<compile_context>
chip_gen: v7x
topology: tpu7x:2x2x1
jax: 0.10.0
libtpu: 0.0.40
codegen_flags: <defaults>
</compile_context>

<pallas_src>
import functools

import jax
import jax.numpy as jnp
from jax.experimental import pallas as pl
from jax.experimental.pallas import tpu as pltpu

NEG_SLOPE = 0.2  # LeakyReLU slope used by the pix2pix Downsampler blocks
_MIB = 1024 * 1024
_VMEM_LIMIT = None


def _vmem_limit_bytes():
    """Generation-aware scoped-VMEM limit (v7x: 64 MiB phys, v5e/v6e: 128 MiB)."""
    global _VMEM_LIMIT
    if _VMEM_LIMIT is None:
        try:
            cap = int(pltpu.get_tpu_info().vmem_capacity_bytes)
        except Exception:
            cap = 64 * _MIB
        _VMEM_LIMIT = int(min(max(cap * 3 // 4, 32 * _MIB), 96 * _MIB))
    return _VMEM_LIMIT


# ---------------------------------------------------------------------------
# Kernel 1: implicit-GEMM VALID stride-1 conv over row-flattened padded slabs.
#   x_ref: (1, R, Cin)  bf16 slab; row r = flattened (h, w) of the padded
#          image, plus kw-1 trailing zero rows.
#   w_ref: (T, Cin, tco) bf16 folded weights, one (Cin, tco) matrix per tap.
#   b_ref: (1, tco)      f32 folded bias.
#   o_ref: (1, L, tco)   L = oh * Wp (full padded width; the last kw-1 columns
#          of each output row are junk and are sliced off by the wrapper).
# Tap t=(di,dj) contributes X[di*Wp+dj : di*Wp+dj+L] @ W[t]  (contiguous slice).
# ---------------------------------------------------------------------------
def _conv_tap_kernel(x_ref, w_ref, b_ref, o_ref, *, taps_off, L, apply_act):
    tco = o_ref.shape[-1]
    # Bias folded into the accumulator init (review micro-opt).
    acc = jnp.broadcast_to(b_ref[...], (L, tco)).astype(jnp.float32)
    for t, off in enumerate(taps_off):
        xs = x_ref[0, pl.ds(off, L), :]                       # (L, Cin) bf16
        acc = acc + jnp.dot(xs, w_ref[t], preferred_element_type=jnp.float32)
    if apply_act:
        acc = jnp.where(acc >= 0, acc, NEG_SLOPE * acc)       # LeakyReLU(0.2)
    o_ref[0] = acc.astype(o_ref.dtype)


def _conv_implicit_gemm(xp, taps, bias, *, kh, kw, apply_act, out_dtype):
    """VALID stride-1 conv of a spatially pre-padded NHWC input via Pallas."""
    N, Hp, Wp, Cin = xp.shape
    T, Cin_w, Cout = taps.shape
    assert T == kh * kw and Cin_w == Cin, (taps.shape, xp.shape)
    oh, ow = Hp - kh + 1, Wp - kw + 1
    L = oh * Wp
    R = Hp * Wp + (kw - 1)
    slab = jnp.pad(xp.reshape(N, Hp * Wp, Cin), ((0, 0), (0, kw - 1), (0, 0)))
    taps_off = tuple(di * Wp + dj for di in range(kh) for dj in range(kw))

    # Split Cout only for the 512-wide layer: keeps the resident weight block
    # ~2 MiB and gives >=2 parallel grid blocks for v7x megacore at batch 1.
    n_co = 2 if Cout >= 512 else 1
    tco = Cout // n_co
    bias2 = bias.reshape(1, Cout).astype(jnp.float32)

    kernel = functools.partial(_conv_tap_kernel, taps_off=taps_off, L=L,
                               apply_act=apply_act)
    out = pl.pallas_call(
        kernel,
        out_shape=jax.ShapeDtypeStruct((N, L, Cout), out_dtype),
        grid_spec=pltpu.PrefetchScalarGridSpec(
            num_scalar_prefetch=0,
            # Cout-block axis OUTER -> weight block index constant across the
            # inner batch loop -> fetched once, VMEM-resident.
            grid=(n_co, N),
            in_specs=[
                pl.BlockSpec((1, R, Cin), lambda j, n: (n, 0, 0)),
                pl.BlockSpec((T, Cin, tco), lambda j, n: (0, 0, j)),
                pl.BlockSpec((1, tco), lambda j, n: (0, j)),
            ],
            out_specs=pl.BlockSpec((1, L, tco), lambda j, n: (n, 0, j)),
        ),
        compiler_params=pltpu.CompilerParams(
            dimension_semantics=("parallel", "parallel"),
            vmem_limit_bytes=_vmem_limit_bytes(),
        ),
    )(slab, taps, bias2)
    # Drop the junk columns (full padded width -> valid width).
    return out.reshape(N, oh, Wp, Cout)[:, :, :ow, :]


# ---------------------------------------------------------------------------
# Kernel 2: final Conv2d(512, 1, 4) as VPU multiply + lane reduction (no MXU,
# no 128x zero-padded filters).  x slab is the padded d4 activation.
# ---------------------------------------------------------------------------
def _final_reduce_kernel(x_ref, w_ref, b_ref, o_ref, *, taps_off, L):
    acc = jnp.broadcast_to(b_ref[...], (L, 1)).astype(jnp.float32)
    for t, off in enumerate(taps_off):
        xs = x_ref[0, pl.ds(off, L), :].astype(jnp.float32)   # (L, 512)
        wt = w_ref[pl.ds(t, 1), :]                            # (1, 512) f32
        acc = acc + jnp.sum(xs * wt, axis=-1, keepdims=True)
    o_ref[0] = acc


def final_conv(x, w_taps, bias):
    xp = jnp.pad(x, ((0, 0), (1, 1), (1, 1), (0, 0)))         # ZeroPad2d(1)
    N, Hp, Wp, Cin = xp.shape
    kh = kw = 4
    oh, ow = Hp - kh + 1, Wp - kw + 1
    L = oh * Wp
    R = Hp * Wp + (kw - 1)
    slab = jnp.pad(xp.reshape(N, Hp * Wp, Cin), ((0, 0), (0, kw - 1), (0, 0)))
    taps_off = tuple(di * Wp + dj for di in range(kh) for dj in range(kw))
    b2 = bias.reshape(1, 1).astype(jnp.float32)
    out = pl.pallas_call(
        functools.partial(_final_reduce_kernel, taps_off=taps_off, L=L),
        out_shape=jax.ShapeDtypeStruct((N, L, 1), jnp.float32),
        grid_spec=pltpu.PrefetchScalarGridSpec(
            num_scalar_prefetch=0,
            grid=(N,),
            in_specs=[
                pl.BlockSpec((1, R, Cin), lambda n: (n, 0, 0)),
                pl.BlockSpec((kh * kw, Cin), lambda n: (0, 0)),
                pl.BlockSpec((1, 1), lambda n: (0, 0)),
            ],
            out_specs=pl.BlockSpec((1, L, 1), lambda n: (n, 0, 0)),
        ),
        compiler_params=pltpu.CompilerParams(
            dimension_semantics=("parallel",),
            vmem_limit_bytes=_vmem_limit_bytes(),
        ),
    )(slab, w_taps, b2)
    return out.reshape(N, oh, Wp, 1)[:, :, :ow, :]


# ---------------------------------------------------------------------------
# Wrapper glue: spatial padding + space-to-depth (stride-2 layers only).
# ---------------------------------------------------------------------------
def _pad_hw(x, p):
    return jnp.pad(x, ((0, 0), (p, p), (p, p), (0, 0)))


def _space_to_depth2(x):
    N, Hp, Wp, C = x.shape
    x = x.reshape(N, Hp // 2, 2, Wp // 2, 2, C).transpose(0, 1, 3, 2, 4, 5)
    return x.reshape(N, Hp // 2, Wp // 2, 4 * C)


def downsample_s2(x, taps, bias):
    """4x4 stride-2 pad-1 conv (+LeakyReLU) as a 2x2 stride-1 conv on s2d(x_pad)."""
    xp = _space_to_depth2(_pad_hw(x, 1))
    return _conv_implicit_gemm(xp, taps, bias, kh=2, kw=2,
                               apply_act=True, out_dtype=jnp.bfloat16)


def downsample_s1(x, taps, bias):
    """ZeroPad2d(1) + 4x4 stride-1 conv (+LeakyReLU)."""
    return _conv_implicit_gemm(_pad_hw(x, 1), taps, bias, kh=4, kw=4,
                               apply_act=True, out_dtype=jnp.bfloat16)


# Weight re-layout: HWIO 4x4 -> tap-major matrices matching the kernels above.
def _s2d_weight(w4):
    kh, kw, C, Co = w4.shape
    assert kh == 4 and kw == 4
    w = w4.reshape(2, 2, 2, 2, C, Co)        # (dI, pi, dJ, pj, c, co)
    w = w.transpose(0, 2, 1, 3, 4, 5)        # (dI, dJ, pi, pj, c, co)
    return w.reshape(4, 4 * C, Co)           # 2x2 taps over s2d channels


def _taps_weight(w4):
    kh, kw, C, Co = w4.shape
    return w4.reshape(kh * kw, C, Co)


# ---------------------------------------------------------------------------
# Deterministic init matching the module's scheme (conv w ~ N(0,0.02),
# BN gamma ~ N(1,0.02), zero biases).  BN folded in eval mode.
# Returns (kernel params, plain-HWIO reference params for the XLA check).
# ---------------------------------------------------------------------------
def init_params(key, inp=13, oup=12, eps=1e-5):
    keys = jax.random.split(key, 9)

    def conv_w(k, cin, cout):
        return 0.02 * jax.random.normal(k, (4, 4, cin, cout), jnp.float32)

    params, ref = {}, {}

    # down1: Conv(25->64, 4, s2, p1), no BN.  Cin padded 25->32 (s2d gives 128
    # channels) and Cout padded 64->128 (lane-dense stores); pad filters are
    # zero so the extra outputs are exactly 0 and are sliced off afterwards.
    cin1 = inp + oup
    w = conv_w(keys[0], cin1, 64)
    ref["down1"] = (w, jnp.zeros((64,), jnp.float32))
    w_p = jnp.pad(w, ((0, 0), (0, 0), (0, 32 - cin1), (0, 64)))
    params["down1"] = (_s2d_weight(w_p).astype(jnp.bfloat16),
                      jnp.zeros((128,), jnp.float32))

    # down2..down4: Conv + BatchNorm (eval-mode fold) + LeakyReLU.
    ki = 1
    for name, ci, co, stride in (("down2", 64, 128, 2),
                                 ("down3", 128, 256, 2),
                                 ("down4", 256, 512, 1)):
        w = conv_w(keys[ki], ci, co); ki += 1
        gamma = 1.0 + 0.02 * jax.random.normal(keys[ki], (co,), jnp.float32); ki += 1
        beta = jnp.zeros((co,), jnp.float32)
        scale = gamma / jnp.sqrt(1.0 + eps)        # running_var = 1
        bias = beta                                # conv bias 0, running_mean 0
        wf = w * scale[None, None, None, :]
        ref[name] = (wf, bias)
        taps = _s2d_weight(wf) if stride == 2 else _taps_weight(wf)
        params[name] = (taps.astype(jnp.bfloat16), bias)

    # Final Conv2d(512, 1, 4): weight ~ N(0, 0.02).
    # TODO(synk): PyTorch's default uniform bias init is not reproduced (zero used).
    w = conv_w(keys[ki], 512, 1)
    ref["conv"] = (w, jnp.zeros((1,), jnp.float32))
    params["conv"] = (w.reshape(16, 512).astype(jnp.float32),
                      jnp.zeros((1,), jnp.float32))
    return params, ref


# ---------------------------------------------------------------------------
# Forward pass: mirrors Discriminator.forward.  NHWC concat == NCHW concat
# after the module's permutes; intermediate activations are bf16.
# ---------------------------------------------------------------------------
def discriminator_forward(params, x, y):
    N, H, W, _ = x.shape
    assert H % 8 == 0 and W % 8 == 0, "spatial dims must be multiples of 8"
    a = jnp.concatenate([x, y], axis=-1).astype(jnp.bfloat16)
    a = jnp.pad(a, ((0, 0), (0, 0), (0, 0), (0, 32 - a.shape[-1])))

    t, b = params["down1"]; a = downsample_s2(a, t, b)[..., :64]  # drop pad Cout
    t, b = params["down2"]; a = downsample_s2(a, t, b)
    t, b = params["down3"]; a = downsample_s2(a, t, b)
    t, b = params["down4"]; a = downsample_s1(a, t, b)
    t, b = params["conv"];  out = final_conv(a, t, b)
    return out                                                    # (N, H/8-2, W/8-2, 1)


# Plain-XLA f32 reference (for a correctness check only).
def _ref_conv(x, w, b, stride, pad, act):
    out = jax.lax.conv_general_dilated(
        x, w, window_strides=(stride, stride),
        padding=((pad, pad), (pad, pad)),
        dimension_numbers=("NHWC", "HWIO", "NHWC"))
    out = out + b.reshape(1, 1, 1, -1)
    return jnp.where(out >= 0, out, NEG_SLOPE * out) if act else out


def discriminator_reference(ref, x, y):
    a = jnp.concatenate([x, y], axis=-1).astype(jnp.float32)
    a = _ref_conv(a, *ref["down1"], 2, 1, True)
    a = _ref_conv(a, *ref["down2"], 2, 1, True)
    a = _ref_conv(a, *ref["down3"], 2, 1, True)
    a = _ref_conv(a, *ref["down4"], 1, 1, True)
    return _ref_conv(a, *ref["conv"], 1, 1, False)


if __name__ == "__main__":
    key = jax.random.PRNGKey(0)
    kx, ky, kp = jax.random.split(key, 3)
    # Small test shape; the kernel design targets real pix2pix sizes (256x256).
    N, H, W = 2, 32, 32
    x = jax.random.normal(kx, (N, H, W, 13), jnp.float32)
    y = jax.random.normal(ky, (N, H, W, 12), jnp.float32)
    params, ref_params = init_params(kp)

    out = jax.jit(discriminator_forward)(params, x, y)
    out = jax.block_until_ready(out)
    assert out.shape == (N, H // 8 - 2, W // 8 - 2, 1), out.shape
    assert bool(jnp.all(jnp.isfinite(out)))

    # Loose tolerance: intermediates/weights are bf16 in the Pallas path.
    ref_out = discriminator_reference(ref_params, x, y)
    err = float(jnp.max(jnp.abs(out - ref_out)))
    assert err < 5e-2, f"max abs diff vs XLA reference: {err}"
    print("KERNEL_OK")
</pallas_src>

<mosaic_0001>
module attributes {stable_mosaic.version = 11 : i64} {
  func.func @_conv_tap_kernel(%arg0: i32, %arg1: i32, %arg2: memref<1x290x128xbf16, #tpu.memory_space<vmem>>, %arg3: memref<4x128x128xbf16, #tpu.memory_space<vmem>>, %arg4: memref<1x128xf32, #tpu.memory_space<vmem>>, %arg5: memref<1x272x128xbf16, #tpu.memory_space<vmem>>) attributes {dimension_semantics = [#tpu.dimension_semantics<parallel>, #tpu.dimension_semantics<parallel>], iteration_bounds = array<i64: 1, 2>, scalar_prefetch = 0 : i64, scratch_operands = 0 : i64, tpu.core_type = #tpu.core_type<tc>, window_params = [{transform_indices = @transform_0, window_bounds = array<i64: 1, 290, 128>}, {transform_indices = @transform_1, window_bounds = array<i64: 4, 128, 128>}, {transform_indices = @transform_2, window_bounds = array<i64: 1, 128>}, {transform_indices = @transform_3, window_bounds = array<i64: 1, 272, 128>}]} {
    %c0 = arith.constant 0 : index
    %c0_0 = arith.constant 0 : index
    %0 = vector.load %arg4[%c0, %c0_0] : memref<1x128xf32, #tpu.memory_space<vmem>>, vector<1x128xf32>
    %1 = vector.shape_cast %0 : vector<1x128xf32> to vector<1x128xf32>
    %2 = vector.broadcast %1 : vector<1x128xf32> to vector<272x128xf32>
    %c0_1 = arith.constant 0 : index
    %c0_2 = arith.constant 0 : index
    %c0_3 = arith.constant 0 : index
    %3 = vector.load %arg2[%c0_1, %c0_2, %c0_3] : memref<1x290x128xbf16, #tpu.memory_space<vmem>>, vector<1x272x128xbf16>
    %4 = vector.shape_cast %3 : vector<1x272x128xbf16> to vector<272x128xbf16>
    %c0_4 = arith.constant 0 : index
    %c0_5 = arith.constant 0 : index
    %c0_6 = arith.constant 0 : index
    %5 = vector.load %arg3[%c0_4, %c0_5, %c0_6] : memref<4x128x128xbf16, #tpu.memory_space<vmem>>, vector<1x128x128xbf16>
    %6 = vector.shape_cast %5 : vector<1x128x128xbf16> to vector<128x128xbf16>
    %cst = arith.constant dense<0.000000e+00> : vector<272x128xf32>
    %7 = tpu.matmul %4, %6, %cst {dimension_numbers = #tpu.dot_dimension_numbers<[1], [0], [0], [1], [0, 0, 1, 1], [], []>} : vector<272x128xbf16>, vector<128x128xbf16>, vector<272x128xf32> -> vector<272x128xf32>
    %8 = arith.addf %2, %7 : vector<272x128xf32>
    %c0_7 = arith.constant 0 : index
    %c1 = arith.constant 1 : index
    %c0_8 = arith.constant 0 : index
    %9 = vector.load %arg2[%c0_7, %c1, %c0_8] : memref<1x290x128xbf16, #tpu.memory_space<vmem>>, vector<1x272x128xbf16>
    %10 = vector.shape_cast %9 : vector<1x272x128xbf16> to vector<272x128xbf16>
    %c1_9 = arith.constant 1 : index
    %c0_10 = arith.constant 0 : index
    %c0_11 = arith.constant 0 : index
    %11 = vector.load %arg3[%c1_9, %c0_10, %c0_11] : memref<4x128x128xbf16, #tpu.memory_space<vmem>>, vector<1x128x128xbf16>
    %12 = vector.shape_cast %11 : vector<1x128x128xbf16> to vector<128x128xbf16>
    %cst_12 = arith.constant dense<0.000000e+00> : vector<272x128xf32>
    %13 = tpu.matmul %10, %12, %cst_12 {dimension_numbers = #tpu.dot_dimension_numbers<[1], [0], [0], [1], [0, 0, 1, 1], [], []>} : vector<272x128xbf16>, vector<128x128xbf16>, vector<272x128xf32> -> vector<272x128xf32>
    %14 = arith.addf %8, %13 : vector<272x128xf32>
    %c0_13 = arith.constant 0 : index
    %c17 = arith.constant 17 : index
    %c0_14 = arith.constant 0 : index
    %15 = vector.load %arg2[%c0_13, %c17, %c0_14] : memref<1x290x128xbf16, #tpu.memory_space<vmem>>, vector<1x272x128xbf16>
    %16 = vector.shape_cast %15 : vector<1x272x128xbf16> to vector<272x128xbf16>
    %c2 = arith.constant 2 : index
    %c0_15 = arith.constant 0 : index
    %c0_16 = arith.constant 0 : index
    %17 = vector.load %arg3[%c2, %c0_15, %c0_16] : memref<4x128x128xbf16, #tpu.memory_space<vmem>>, vector<1x128x128xbf16>
    %18 = vector.shape_cast %17 : vector<1x128x128xbf16> to vector<128x128xbf16>
    %cst_17 = arith.constant dense<0.000000e+00> : vector<272x128xf32>
    %19 = tpu.matmul %16, %18, %cst_17 {dimension_numbers = #tpu.dot_dimension_numbers<[1], [0], [0], [1], [0, 0, 1, 1], [], []>} : vector<272x128xbf16>, vector<128x128xbf16>, vector<272x128xf32> -> vector<272x128xf32>
    %20 = arith.addf %14, %19 : vector<272x128xf32>
    %c0_18 = arith.constant 0 : index
    %c18 = arith.constant 18 : index
    %c0_19 = arith.constant 0 : index
    %21 = vector.load %arg2[%c0_18, %c18, %c0_19] : memref<1x290x128xbf16, #tpu.memory_space<vmem>>, vector<1x272x128xbf16>
    %22 = vector.shape_cast %21 : vector<1x272x128xbf16> to vector<272x128xbf16>
    %c3 = arith.constant 3 : index
    %c0_20 = arith.constant 0 : index
    %c0_21 = arith.constant 0 : index
    %23 = vector.load %arg3[%c3, %c0_20, %c0_21] : memref<4x128x128xbf16, #tpu.memory_space<vmem>>, vector<1x128x128xbf16>
    %24 = vector.shape_cast %23 : vector<1x128x128xbf16> to vector<128x128xbf16>
    %cst_22 = arith.constant dense<0.000000e+00> : vector<272x128xf32>
    %25 = tpu.matmul %22, %24, %cst_22 {dimension_numbers = #tpu.dot_dimension_numbers<[1], [0], [0], [1], [0, 0, 1, 1], [], []>} : vector<272x128xbf16>, vector<128x128xbf16>, vector<272x128xf32> -> vector<272x128xf32>
    %26 = arith.addf %20, %25 : vector<272x128xf32>
    %cst_23 = arith.constant 0.000000e+00 : f32
    %27 = vector.broadcast %cst_23 : f32 to vector<272x128xf32>
    %28 = arith.cmpf oge, %26, %27 : vector<272x128xf32>
    %cst_24 = arith.constant 2.000000e-01 : f32
    %29 = vector.broadcast %cst_24 : f32 to vector<272x128xf32>
    %30 = arith.mulf %29, %26 : vector<272x128xf32>
    %31 = arith.select %28, %26, %30 : vector<272x128xi1>, vector<272x128xf32>
    %32 = arith.truncf %31 : vector<272x128xf32> to vector<272x128xbf16>
    %c0_25 = arith.constant 0 : index
    %c0_26 = arith.constant 0 : index
    %c0_27 = arith.constant 0 : index
    %33 = vector.load %arg5[%c0_25, %c0_26, %c0_27] : memref<1x272x128xbf16, #tpu.memory_space<vmem>>, vector<1x272x128xbf16>
    %34 = vector.shape_cast %33 : vector<1x272x128xbf16> to vector<272x128xbf16>
    %35 = vector.shape_cast %32 : vector<272x128xbf16> to vector<1x272x128xbf16>
    tpu.vector_store %arg5[%c0_25, %c0_26, %c0_27], %35 {strides = array<i32>} : memref<1x272x128xbf16, #tpu.memory_space<vmem>>, vector<1x272x128xbf16>,
    return
  }
  func.func @transform_0(%arg0: i32, %arg1: i32) -> (i32, i32, i32) {
    %c0_i32 = arith.constant 0 : i32
    %c0_i32_0 = arith.constant 0 : i32
    %c0_i32_1 = arith.constant 0 : i32
    return %arg1, %c0_i32, %c0_i32_0 : i32, i32, i32
  }
  func.func @transform_1(%arg0: i32, %arg1: i32) -> (i32, i32, i32) {
    %c0_i32 = arith.constant 0 : i32
    %c0_i32_0 = arith.constant 0 : i32
    %c0_i32_1 = arith.constant 0 : i32
    return %c0_i32, %c0_i32_0, %arg0 : i32, i32, i32
  }
  func.func @transform_2(%arg0: i32, %arg1: i32) -> (i32, i32) {
    %c0_i32 = arith.constant 0 : i32
    %c0_i32_0 = arith.constant 0 : i32
    return %c0_i32, %arg0 : i32, i32
  }
  func.func @transform_3(%arg0: i32, %arg1: i32) -> (i32, i32, i32) {
    %c0_i32 = arith.constant 0 : i32
    %c0_i32_0 = arith.constant 0 : i32
    return %arg1, %c0_i32, %arg0 : i32, i32, i32
  }
}

module attributes {stable_mosaic.version = 11 : i64} {
  func.func @_conv_tap_kernel(%arg0: i32, %arg1: i32, %arg2: memref<1x82x256xbf16, #tpu.memory_space<vmem>>, %arg3: memref<4x256x128xbf16, #tpu.memory_space<vmem>>, %arg4: memref<1x128xf32, #tpu.memory_space<vmem>>, %arg5: memref<1x72x128xbf16, #tpu.memory_space<vmem>>) attributes {dimension_semantics = [#tpu.dimension_semantics<parallel>, #tpu.dimension_semantics<parallel>], iteration_bounds = array<i64: 1, 2>, scalar_prefetch = 0 : i64, scratch_operands = 0 : i64, tpu.core_type = #tpu.core_type<tc>, window_params = [{transform_indices = @transform_0, window_bounds = array<i64: 1, 82, 256>}, {transform_indices = @transform_1, window_bounds = array<i64: 4, 256, 128>}, {transform_indices = @transform_2, window_bounds = array<i64: 1, 128>}, {transform_indices = @transform_3, window_bounds = array<i64: 1, 72, 128>}]} {
    %c0 = arith.constant 0 : index
    %c0_0 = arith.constant 0 : index
    %0 = vector.load %arg4[%c0, %c0_0] : memref<1x128xf32, #tpu.memory_space<vmem>>, vector<1x128xf32>
    %1 = vector.shape_cast %0 : vector<1x128xf32> to vector<1x128xf32>
    %2 = vector.broadcast %1 : vector<1x128xf32> to vector<72x128xf32>
    %c0_1 = arith.constant 0 : index
    %c0_2 = arith.constant 0 : index
    %c0_3 = arith.constant 0 : index
    %3 = vector.load %arg2[%c0_1, %c0_2, %c0_3] : memref<1x82x256xbf16, #tpu.memory_space<vmem>>, vector<1x72x256xbf16>
    %4 = vector.shape_cast %3 : vector<1x72x256xbf16> to vector<72x256xbf16>
    %c0_4 = arith.constant 0 : index
    %c0_5 = arith.constant 0 : index
    %c0_6 = arith.constant 0 : index
    %5 = vector.load %arg3[%c0_4, %c0_5, %c0_6] : memref<4x256x128xbf16, #tpu.memory_space<vmem>>, vector<1x256x128xbf16>
    %6 = vector.shape_cast %5 : vector<1x256x128xbf16> to vector<256x128xbf16>
    %cst = arith.constant dense<0.000000e+00> : vector<72x128xf32>
    %7 = tpu.matmul %4, %6, %cst {dimension_numbers = #tpu.dot_dimension_numbers<[1], [0], [0], [1], [0, 0, 1, 1], [], []>} : vector<72x256xbf16>, vector<256x128xbf16>, vector<72x128xf32> -> vector<72x128xf32>
    %8 = arith.addf %2, %7 : vector<72x128xf32>
    %c0_7 = arith.constant 0 : index
    %c1 = arith.constant 1 : index
    %c0_8 = arith.constant 0 : index
    %9 = vector.load %arg2[%c0_7, %c1, %c0_8] : memref<1x82x256xbf16, #tpu.memory_space<vmem>>, vector<1x72x256xbf16>
    %10 = vector.shape_cast %9 : vector<1x72x256xbf16> to vector<72x256xbf16>
    %c1_9 = arith.constant 1 : index
    %c0_10 = arith.constant 0 : index
    %c0_11 = arith.constant 0 : index
    %11 = vector.load %arg3[%c1_9, %c0_10, %c0_11] : memref<4x256x128xbf16, #tpu.memory_space<vmem>>, vector<1x256x128xbf16>
    %12 = vector.shape_cast %11 : vector<1x256x128xbf16> to vector<256x128xbf16>
    %cst_12 = arith.constant dense<0.000000e+00> : vector<72x128xf32>
    %13 = tpu.matmul %10, %12, %cst_12 {dimension_numbers = #tpu.dot_dimension_numbers<[1], [0], [0], [1], [0, 0, 1, 1], [], []>} : vector<72x256xbf16>, vector<256x128xbf16>, vector<72x128xf32> -> vector<72x128xf32>
    %14 = arith.addf %8, %13 : vector<72x128xf32>
    %c0_13 = arith.constant 0 : index
    %c9 = arith.constant 9 : index
    %c0_14 = arith.constant 0 : index
    %15 = vector.load %arg2[%c0_13, %c9, %c0_14] : memref<1x82x256xbf16, #tpu.memory_space<vmem>>, vector<1x72x256xbf16>
    %16 = vector.shape_cast %15 : vector<1x72x256xbf16> to vector<72x256xbf16>
    %c2 = arith.constant 2 : index
    %c0_15 = arith.constant 0 : index
    %c0_16 = arith.constant 0 : index
    %17 = vector.load %arg3[%c2, %c0_15, %c0_16] : memref<4x256x128xbf16, #tpu.memory_space<vmem>>, vector<1x256x128xbf16>
    %18 = vector.shape_cast %17 : vector<1x256x128xbf16> to vector<256x128xbf16>
    %cst_17 = arith.constant dense<0.000000e+00> : vector<72x128xf32>
    %19 = tpu.matmul %16, %18, %cst_17 {dimension_numbers = #tpu.dot_dimension_numbers<[1], [0], [0], [1], [0, 0, 1, 1], [], []>} : vector<72x256xbf16>, vector<256x128xbf16>, vector<72x128xf32> -> vector<72x128xf32>
    %20 = arith.addf %14, %19 : vector<72x128xf32>
    %c0_18 = arith.constant 0 : index
    %c10 = arith.constant 10 : index
    %c0_19 = arith.constant 0 : index
    %21 = vector.load %arg2[%c0_18, %c10, %c0_19] : memref<1x82x256xbf16, #tpu.memory_space<vmem>>, vector<1x72x256xbf16>
    %22 = vector.shape_cast %21 : vector<1x72x256xbf16> to vector<72x256xbf16>
    %c3 = arith.constant 3 : index
    %c0_20 = arith.constant 0 : index
    %c0_21 = arith.constant 0 : index
    %23 = vector.load %arg3[%c3, %c0_20, %c0_21] : memref<4x256x128xbf16, #tpu.memory_space<vmem>>, vector<1x256x128xbf16>
    %24 = vector.shape_cast %23 : vector<1x256x128xbf16> to vector<256x128xbf16>
    %cst_22 = arith.constant dense<0.000000e+00> : vector<72x128xf32>
    %25 = tpu.matmul %22, %24, %cst_22 {dimension_numbers = #tpu.dot_dimension_numbers<[1], [0], [0], [1], [0, 0, 1, 1], [], []>} : vector<72x256xbf16>, vector<256x128xbf16>, vector<72x128xf32> -> vector<72x128xf32>
    %26 = arith.addf %20, %25 : vector<72x128xf32>
    %cst_23 = arith.constant 0.000000e+00 : f32
    %27 = vector.broadcast %cst_23 : f32 to vector<72x128xf32>
    %28 = arith.cmpf oge, %26, %27 : vector<72x128xf32>
    %cst_24 = arith.constant 2.000000e-01 : f32
    %29 = vector.broadcast %cst_24 : f32 to vector<72x128xf32>
    %30 = arith.mulf %29, %26 : vector<72x128xf32>
    %31 = arith.select %28, %26, %30 : vector<72x128xi1>, vector<72x128xf32>
    %32 = arith.truncf %31 : vector<72x128xf32> to vector<72x128xbf16>
    %c0_25 = arith.constant 0 : index
    %c0_26 = arith.constant 0 : index
    %c0_27 = arith.constant 0 : index
    %33 = vector.load %arg5[%c0_25, %c0_26, %c0_27] : memref<1x72x128xbf16, #tpu.memory_space<vmem>>, vector<1x72x128xbf16>
    %34 = vector.shape_cast %33 : vector<1x72x128xbf16> to vector<72x128xbf16>
    %35 = vector.shape_cast %32 : vector<72x128xbf16> to vector<1x72x128xbf16>
    tpu.vector_store %arg5[%c0_25, %c0_26, %c0_27], %35 {strides = array<i32>} : memref<1x72x128xbf16, #tpu.memory_space<vmem>>, vector<1x72x128xbf16>,
    return
  }
  func.func @transform_0(%arg0: i32, %arg1: i32) -> (i32, i32, i32) {
    %c0_i32 = arith.constant 0 : i32
    %c0_i32_0 = arith.constant 0 : i32
    %c0_i32_1 = arith.constant 0 : i32
    return %arg1, %c0_i32, %c0_i32_0 : i32, i32, i32
  }
  func.func @transform_1(%arg0: i32, %arg1: i32) -> (i32, i32, i32) {
    %c0_i32 = arith.constant 0 : i32
    %c0_i32_0 = arith.constant 0 : i32
    %c0_i32_1 = arith.constant 0 : i32
    return %c0_i32, %c0_i32_0, %arg0 : i32, i32, i32
  }
  func.func @transform_2(%arg0: i32, %arg1: i32) -> (i32, i32) {
    %c0_i32 = arith.constant 0 : i32
    %c0_i32_0 = arith.constant 0 : i32
    return %c0_i32, %arg0 : i32, i32
  }
  func.func @transform_3(%arg0: i32, %arg1: i32) -> (i32, i32, i32) {
    %c0_i32 = arith.constant 0 : i32
    %c0_i32_0 = arith.constant 0 : i32
    return %arg1, %c0_i32, %arg0 : i32, i32, i32
  }
}

module attributes {stable_mosaic.version = 11 : i64} {
  func.func @_conv_tap_kernel(%arg0: i32, %arg1: i32, %arg2: memref<1x26x512xbf16, #tpu.memory_space<vmem>>, %arg3: memref<4x512x256xbf16, #tpu.memory_space<vmem>>, %arg4: memref<1x256xf32, #tpu.memory_space<vmem>>, %arg5: memref<1x20x256xbf16, #tpu.memory_space<vmem>>) attributes {dimension_semantics = [#tpu.dimension_semantics<parallel>, #tpu.dimension_semantics<parallel>], iteration_bounds = array<i64: 1, 2>, scalar_prefetch = 0 : i64, scratch_operands = 0 : i64, tpu.core_type = #tpu.core_type<tc>, window_params = [{transform_indices = @transform_0, window_bounds = array<i64: 1, 26, 512>}, {transform_indices = @transform_1, window_bounds = array<i64: 4, 512, 256>}, {transform_indices = @transform_2, window_bounds = array<i64: 1, 256>}, {transform_indices = @transform_3, window_bounds = array<i64: 1, 20, 256>}]} {
    %c0 = arith.constant 0 : index
    %c0_0 = arith.constant 0 : index
    %0 = vector.load %arg4[%c0, %c0_0] : memref<1x256xf32, #tpu.memory_space<vmem>>, vector<1x256xf32>
    %1 = vector.shape_cast %0 : vector<1x256xf32> to vector<1x256xf32>
    %2 = vector.broadcast %1 : vector<1x256xf32> to vector<20x256xf32>
    %c0_1 = arith.constant 0 : index
    %c0_2 = arith.constant 0 : index
    %c0_3 = arith.constant 0 : index
    %3 = vector.load %arg2[%c0_1, %c0_2, %c0_3] : memref<1x26x512xbf16, #tpu.memory_space<vmem>>, vector<1x20x512xbf16>
    %4 = vector.shape_cast %3 : vector<1x20x512xbf16> to vector<20x512xbf16>
    %c0_4 = arith.constant 0 : index
    %c0_5 = arith.constant 0 : index
    %c0_6 = arith.constant 0 : index
    %5 = vector.load %arg3[%c0_4, %c0_5, %c0_6] : memref<4x512x256xbf16, #tpu.memory_space<vmem>>, vector<1x512x256xbf16>
    %6 = vector.shape_cast %5 : vector<1x512x256xbf16> to vector<512x256xbf16>
    %cst = arith.constant dense<0.000000e+00> : vector<20x256xf32>
    %7 = tpu.matmul %4, %6, %cst {dimension_numbers = #tpu.dot_dimension_numbers<[1], [0], [0], [1], [0, 0, 1, 1], [], []>} : vector<20x512xbf16>, vector<512x256xbf16>, vector<20x256xf32> -> vector<20x256xf32>
    %8 = arith.addf %2, %7 : vector<20x256xf32>
    %c0_7 = arith.constant 0 : index
    %c1 = arith.constant 1 : index
    %c0_8 = arith.constant 0 : index
    %9 = vector.load %arg2[%c0_7, %c1, %c0_8] : memref<1x26x512xbf16, #tpu.memory_space<vmem>>, vector<1x20x512xbf16>
    %10 = vector.shape_cast %9 : vector<1x20x512xbf16> to vector<20x512xbf16>
    %c1_9 = arith.constant 1 : index
    %c0_10 = arith.constant 0 : index
    %c0_11 = arith.constant 0 : index
    %11 = vector.load %arg3[%c1_9, %c0_10, %c0_11] : memref<4x512x256xbf16, #tpu.memory_space<vmem>>, vector<1x512x256xbf16>
    %12 = vector.shape_cast %11 : vector<1x512x256xbf16> to vector<512x256xbf16>
    %cst_12 = arith.constant dense<0.000000e+00> : vector<20x256xf32>
    %13 = tpu.matmul %10, %12, %cst_12 {dimension_numbers = #tpu.dot_dimension_numbers<[1], [0], [0], [1], [0, 0, 1, 1], [], []>} : vector<20x512xbf16>, vector<512x256xbf16>, vector<20x256xf32> -> vector<20x256xf32>
    %14 = arith.addf %8, %13 : vector<20x256xf32>
    %c0_13 = arith.constant 0 : index
    %c5 = arith.constant 5 : index
    %c0_14 = arith.constant 0 : index
    %15 = vector.load %arg2[%c0_13, %c5, %c0_14] : memref<1x26x512xbf16, #tpu.memory_space<vmem>>, vector<1x20x512xbf16>
    %16 = vector.shape_cast %15 : vector<1x20x512xbf16> to vector<20x512xbf16>
    %c2 = arith.constant 2 : index
    %c0_15 = arith.constant 0 : index
    %c0_16 = arith.constant 0 : index
    %17 = vector.load %arg3[%c2, %c0_15, %c0_16] : memref<4x512x256xbf16, #tpu.memory_space<vmem>>, vector<1x512x256xbf16>
    %18 = vector.shape_cast %17 : vector<1x512x256xbf16> to vector<512x256xbf16>
    %cst_17 = arith.constant dense<0.000000e+00> : vector<20x256xf32>
    %19 = tpu.matmul %16, %18, %cst_17 {dimension_numbers = #tpu.dot_dimension_numbers<[1], [0], [0], [1], [0, 0, 1, 1], [], []>} : vector<20x512xbf16>, vector<512x256xbf16>, vector<20x256xf32> -> vector<20x256xf32>
    %20 = arith.addf %14, %19 : vector<20x256xf32>
    %c0_18 = arith.constant 0 : index
    %c6 = arith.constant 6 : index
    %c0_19 = arith.constant 0 : index
    %21 = vector.load %arg2[%c0_18, %c6, %c0_19] : memref<1x26x512xbf16, #tpu.memory_space<vmem>>, vector<1x20x512xbf16>
    %22 = vector.shape_cast %21 : vector<1x20x512xbf16> to vector<20x512xbf16>
    %c3 = arith.constant 3 : index
    %c0_20 = arith.constant 0 : index
    %c0_21 = arith.constant 0 : index
    %23 = vector.load %arg3[%c3, %c0_20, %c0_21] : memref<4x512x256xbf16, #tpu.memory_space<vmem>>, vector<1x512x256xbf16>
    %24 = vector.shape_cast %23 : vector<1x512x256xbf16> to vector<512x256xbf16>
    %cst_22 = arith.constant dense<0.000000e+00> : vector<20x256xf32>
    %25 = tpu.matmul %22, %24, %cst_22 {dimension_numbers = #tpu.dot_dimension_numbers<[1], [0], [0], [1], [0, 0, 1, 1], [], []>} : vector<20x512xbf16>, vector<512x256xbf16>, vector<20x256xf32> -> vector<20x256xf32>
    %26 = arith.addf %20, %25 : vector<20x256xf32>
    %cst_23 = arith.constant 0.000000e+00 : f32
    %27 = vector.broadcast %cst_23 : f32 to vector<20x256xf32>
    %28 = arith.cmpf oge, %26, %27 : vector<20x256xf32>
    %cst_24 = arith.constant 2.000000e-01 : f32
    %29 = vector.broadcast %cst_24 : f32 to vector<20x256xf32>
    %30 = arith.mulf %29, %26 : vector<20x256xf32>
    %31 = arith.select %28, %26, %30 : vector<20x256xi1>, vector<20x256xf32>
    %32 = arith.truncf %31 : vector<20x256xf32> to vector<20x256xbf16>
    %c0_25 = arith.constant 0 : index
    %c0_26 = arith.constant 0 : index
    %c0_27 = arith.constant 0 : index
    %33 = vector.load %arg5[%c0_25, %c0_26, %c0_27] : memref<1x20x256xbf16, #tpu.memory_space<vmem>>, vector<1x20x256xbf16>
    %34 = vector.shape_cast %33 : vector<1x20x256xbf16> to vector<20x256xbf16>
    %35 = vector.shape_cast %32 : vector<20x256xbf16> to vector<1x20x256xbf16>
    tpu.vector_store %arg5[%c0_25, %c0_26, %c0_27], %35 {strides = array<i32>} : memref<1x20x256xbf16, #tpu.memory_space<vmem>>, vector<1x20x256xbf16>,
    return
  }
  func.func @transform_0(%arg0: i32, %arg1: i32) -> (i32, i32, i32) {
    %c0_i32 = arith.constant 0 : i32
    %c0_i32_0 = arith.constant 0 : i32
    %c0_i32_1 = arith.constant 0 : i32
    return %arg1, %c0_i32, %c0_i32_0 : i32, i32, i32
  }
  func.func @transform_1(%arg0: i32, %arg1: i32) -> (i32, i32, i32) {
    %c0_i32 = arith.constant 0 : i32
    %c0_i32_0 = arith.constant 0 : i32
    %c0_i32_1 = arith.constant 0 : i32
    return %c0_i32, %c0_i32_0, %arg0 : i32, i32, i32
  }
  func.func @transform_2(%arg0: i32, %arg1: i32) -> (i32, i32) {
    %c0_i32 = arith.constant 0 : i32
    %c0_i32_0 = arith.constant 0 : i32
    return %c0_i32, %arg0 : i32, i32
  }
  func.func @transform_3(%arg0: i32, %arg1: i32) -> (i32, i32, i32) {
    %c0_i32 = arith.constant 0 : i32
    %c0_i32_0 = arith.constant 0 : i32
    return %arg1, %c0_i32, %arg0 : i32, i32, i32
  }
}

module attributes {stable_mosaic.version = 11 : i64} {
  func.func @_conv_tap_kernel(%arg0: i32, %arg1: i32, %arg2: memref<1x39x256xbf16, #tpu.memory_space<vmem>>, %arg3: memref<16x256x256xbf16, #tpu.memory_space<vmem>>, %arg4: memref<1x256xf32, #tpu.memory_space<vmem>>, %arg5: memref<1x18x256xbf16, #tpu.memory_space<vmem>>) attributes {dimension_semantics = [#tpu.dimension_semantics<parallel>, #tpu.dimension_semantics<parallel>], iteration_bounds = array<i64: 2, 2>, scalar_prefetch = 0 : i64, scratch_operands = 0 : i64, tpu.core_type = #tpu.core_type<tc>, window_params = [{transform_indices = @transform_0, window_bounds = array<i64: 1, 39, 256>}, {transform_indices = @transform_1, window_bounds = array<i64: 16, 256, 256>}, {transform_indices = @transform_2, window_bounds = array<i64: 1, 256>}, {transform_indices = @transform_3, window_bounds = array<i64: 1, 18, 256>}]} {
    %c0 = arith.constant 0 : index
    %c0_0 = arith.constant 0 : index
    %0 = vector.load %arg4[%c0, %c0_0] : memref<1x256xf32, #tpu.memory_space<vmem>>, vector<1x256xf32>
    %1 = vector.shape_cast %0 : vector<1x256xf32> to vector<1x256xf32>
    %2 = vector.broadcast %1 : vector<1x256xf32> to vector<18x256xf32>
    %c0_1 = arith.constant 0 : index
    %c0_2 = arith.constant 0 : index
    %c0_3 = arith.constant 0 : index
    %3 = vector.load %arg2[%c0_1, %c0_2, %c0_3] : memref<1x39x256xbf16, #tpu.memory_space<vmem>>, vector<1x18x256xbf16>
    %4 = vector.shape_cast %3 : vector<1x18x256xbf16> to vector<18x256xbf16>
    %c0_4 = arith.constant 0 : index
    %c0_5 = arith.constant 0 : index
    %c0_6 = arith.constant 0 : index
    %5 = vector.load %arg3[%c0_4, %c0_5, %c0_6] : memref<16x256x256xbf16, #tpu.memory_space<vmem>>, vector<1x256x256xbf16>
    %6 = vector.shape_cast %5 : vector<1x256x256xbf16> to vector<256x256xbf16>
    %cst = arith.constant dense<0.000000e+00> : vector<18x256xf32>
    %7 = tpu.matmul %4, %6, %cst {dimension_numbers = #tpu.dot_dimension_numbers<[1], [0], [0], [1], [0, 0, 1, 1], [], []>} : vector<18x256xbf16>, vector<256x256xbf16>, vector<18x256xf32> -> vector<18x256xf32>
    %8 = arith.addf %2, %7 : vector<18x256xf32>
    %c0_7 = arith.constant 0 : index
    %c1 = arith.constant 1 : index
    %c0_8 = arith.constant 0 : index
    %9 = vector.load %arg2[%c0_7, %c1, %c0_8] : memref<1x39x256xbf16, #tpu.memory_space<vmem>>, vector<1x18x256xbf16>
    %10 = vector.shape_cast %9 : vector<1x18x256xbf16> to vector<18x256xbf16>
    %c1_9 = arith.constant 1 : index
    %c0_10 = arith.constant 0 : index
    %c0_11 = arith.constant 0 : index
    %11 = vector.load %arg3[%c1_9, %c0_10, %c0_11] : memref<16x256x256xbf16, #tpu.memory_space<vmem>>, vector<1x256x256xbf16>
    %12 = vector.shape_cast %11 : vector<1x256x256xbf16> to vector<256x256xbf16>
    %cst_12 = arith.constant dense<0.000000e+00> : vector<18x256xf32>
    %13 = tpu.matmul %10, %12, %cst_12 {dimension_numbers = #tpu.dot_dimension_numbers<[1], [0], [0], [1], [0, 0, 1, 1], [], []>} : vector<18x256xbf16>, vector<256x256xbf16>, vector<18x256xf32> -> vector<18x256xf32>
    %14 = arith.addf %8, %13 : vector<18x256xf32>
    %c0_13 = arith.constant 0 : index
    %c2 = arith.constant 2 : index
    %c0_14 = arith.constant 0 : index
    %15 = vector.load %arg2[%c0_13, %c2, %c0_14] : memref<1x39x256xbf16, #tpu.memory_space<vmem>>, vector<1x18x256xbf16>
    %16 = vector.shape_cast %15 : vector<1x18x256xbf16> to vector<18x256xbf16>
    %c2_15 = arith.constant 2 : index
    %c0_16 = arith.constant 0 : index
    %c0_17 = arith.constant 0 : index
    %17 = vector.load %arg3[%c2_15, %c0_16, %c0_17] : memref<16x256x256xbf16, #tpu.memory_space<vmem>>, vector<1x256x256xbf16>
    %18 = vector.shape_cast %17 : vector<1x256x256xbf16> to vector<256x256xbf16>
    %cst_18 = arith.constant dense<0.000000e+00> : vector<18x256xf32>
    %19 = tpu.matmul %16, %18, %cst_18 {dimension_numbers = #tpu.dot_dimension_numbers<[1], [0], [0], [1], [0, 0, 1, 1], [], []>} : vector<18x256xbf16>, vector<256x256xbf16>, vector<18x256xf32> -> vector<18x256xf32>
    %20 = arith.addf %14, %19 : vector<18x256xf32>
    %c0_19 = arith.constant 0 : index
    %c3 = arith.constant 3 : index
    %c0_20 = arith.constant 0 : index
    %21 = vector.load %arg2[%c0_19, %c3, %c0_20] : memref<1x39x256xbf16, #tpu.memory_space<vmem>>, vector<1x18x256xbf16>
    %22 = vector.shape_cast %21 : vector<1x18x256xbf16> to vector<18x256xbf16>
    %c3_21 = arith.constant 3 : index
    %c0_22 = arith.constant 0 : index
    %c0_23 = arith.constant 0 : index
    %23 = vector.load %arg3[%c3_21, %c0_22, %c0_23] : memref<16x256x256xbf16, #tpu.memory_space<vmem>>, vector<1x256x256xbf16>
    %24 = vector.shape_cast %23 : vector<1x256x256xbf16> to vector<256x256xbf16>
    %cst_24 = arith.constant dense<0.000000e+00> : vector<18x256xf32>
    %25 = tpu.matmul %22, %24, %cst_24 {dimension_numbers = #tpu.dot_dimension_numbers<[1], [0], [0], [1], [0, 0, 1, 1], [], []>} : vector<18x256xbf16>, vector<256x256xbf16>, vector<18x256xf32> -> vector<18x256xf32>
    %26 = arith.addf %20, %25 : vector<18x256xf32>
    %c0_25 = arith.constant 0 : index
    %c6 = arith.constant 6 : index
    %c0_26 = arith.constant 0 : index
    %27 = vector.load %arg2[%c0_25, %c6, %c0_26] : memref<1x39x256xbf16, #tpu.memory_space<vmem>>, vector<1x18x256xbf16>
    %28 = vector.shape_cast %27 : vector<1x18x256xbf16> to vector<18x256xbf16>
    %c4 = arith.constant 4 : index
    %c0_27 = arith.constant 0 : index
    %c0_28 = arith.constant 0 : index
    %29 = vector.load %arg3[%c4, %c0_27, %c0_28] : memref<16x256x256xbf16, #tpu.memory_space<vmem>>, vector<1x256x256xbf16>
    %30 = vector.shape_cast %29 : vector<1x256x256xbf16> to vector<256x256xbf16>
    %cst_29 = arith.constant dense<0.000000e+00> : vector<18x256xf32>
    %31 = tpu.matmul %28, %30, %cst_29 {dimension_numbers = #tpu.dot_dimension_numbers<[1], [0], [0], [1], [0, 0, 1, 1], [], []>} : vector<18x256xbf16>, vector<256x256xbf16>, vector<18x256xf32> -> vector<18x256xf32>
    %32 = arith.addf %26, %31 : vector<18x256xf32>
    %c0_30 = arith.constant 0 : index
    %c7 = arith.constant 7 : index
    %c0_31 = arith.constant 0 : index
    %33 = vector.load %arg2[%c0_30, %c7, %c0_31] : memref<1x39x256xbf16, #tpu.memory_space<vmem>>, vector<1x18x256xbf16>
    %34 = vector.shape_cast %33 : vector<1x18x256xbf16> to vector<18x256xbf16>
    %c5 = arith.constant 5 : index
    %c0_32 = arith.constant 0 : index
    %c0_33 = arith.constant 0 : index
    %35 = vector.load %arg3[%c5, %c0_32, %c0_33] : memref<16x256x256xbf16, #tpu.memory_space<vmem>>, vector<1x256x256xbf16>
    %36 = vector.shape_cast %35 : vector<1x256x256xbf16> to vector<256x256xbf16>
    %cst_34 = arith.constant dense<0.000000e+00> : vector<18x256xf32>
    %37 = tpu.matmul %34, %36, %cst_34 {dimension_numbers = #tpu.dot_dimension_numbers<[1], [0], [0], [1], [0, 0, 1, 1], [], []>} : vector<18x256xbf16>, vector<256x256xbf16>, vector<18x256xf32> -> vector<18x256xf32>
    %38 = arith.addf %32, %37 : vector<18x256xf32>
    %c0_35 = arith.constant 0 : index
    %c8 = arith.constant 8 : index
    %c0_36 = arith.constant 0 : index
    %39 = vector.load %arg2[%c0_35, %c8, %c0_36] : memref<1x39x256xbf16, #tpu.memory_space<vmem>>, vector<1x18x256xbf16>
    %40 = vector.shape_cast %39 : vector<1x18x256xbf16> to vector<18x256xbf16>
    %c6_37 = arith.constant 6 : index
    %c0_38 = arith.constant 0 : index
    %c0_39 = arith.constant 0 : index
    %41 = vector.load %arg3[%c6_37, %c0_38, %c0_39] : memref<16x256x256xbf16, #tpu.memory_space<vmem>>, vector<1x256x256xbf16>
    %42 = vector.shape_cast %41 : vector<1x256x256xbf16> to vector<256x256xbf16>
    %cst_40 = arith.constant dense<0.000000e+00> : vector<18x256xf32>
    %43 = tpu.matmul %40, %42, %cst_40 {dimension_numbers = #tpu.dot_dimension_numbers<[1], [0], [0], [1], [0, 0, 1, 1], [], []>} : vector<18x256xbf16>, vector<256x256xbf16>, vector<18x256xf32> -> vector<18x256xf32>
    %44 = arith.addf %38, %43 : vector<18x256xf32>
    %c0_41 = arith.constant 0 : index
    %c9 = arith.constant 9 : index
    %c0_42 = arith.constant 0 : index
    %45 = vector.load %arg2[%c0_41, %c9, %c0_42] : memref<1x39x256xbf16, #tpu.memory_space<vmem>>, vector<1x18x256xbf16>
    %46 = vector.shape_cast %45 : vector<1x18x256xbf16> to vector<18x256xbf16>
    %c7_43 = arith.constant 7 : index
    %c0_44 = arith.constant 0 : index
    %c0_45 = arith.constant 0 : index
    %47 = vector.load %arg3[%c7_43, %c0_44, %c0_45] : memref<16x256x256xbf16, #tpu.memory_space<vmem>>, vector<1x256x256xbf16>
    %48 = vector.shape_cast %47 : vector<1x256x256xbf16> to vector<256x256xbf16>
    %cst_46 = arith.constant dense<0.000000e+00> : vector<18x256xf32>
    %49 = tpu.matmul %46, %48, %cst_46 {dimension_numbers = #tpu.dot_dimension_numbers<[1], [0], [0], [1], [0, 0, 1, 1], [], []>} : vector<18x256xbf16>, vector<256x256xbf16>, vector<18x256xf32> -> vector<18x256xf32>
    %50 = arith.addf %44, %49 : vector<18x256xf32>
    %c0_47 = arith.constant 0 : index
    %c12 = arith.constant 12 : index
    %c0_48 = arith.constant 0 : index
    %51 = vector.load %arg2[%c0_47, %c12, %c0_48] : memref<1x39x256xbf16, #tpu.memory_space<vmem>>, vector<1x18x256xbf16>
    %52 = vector.shape_cast %51 : vector<1x18x256xbf16> to vector<18x256xbf16>
    %c8_49 = arith.constant 8 : index
    %c0_50 = arith.constant 0 : index
    %c0_51 = arith.constant 0 : index
    %53 = vector.load %arg3[%c8_49, %c0_50, %c0_51] : memref<16x256x256xbf16, #tpu.memory_space<vmem>>, vector<1x256x256xbf16>
    %54 = vector.shape_cast %53 : vector<1x256x256xbf16> to vector<256x256xbf16>
    %cst_52 = arith.constant dense<0.000000e+00> : vector<18x256xf32>
    %55 = tpu.matmul %52, %54, %cst_52 {dimension_numbers = #tpu.dot_dimension_numbers<[1], [0], [0], [1], [0, 0, 1, 1], [], []>} : vector<18x256xbf16>, vector<256x256xbf16>, vector<18x256xf32> -> vector<18x256xf32>
    %56 = arith.addf %50, %55 : vector<18x256xf32>
    %c0_53 = arith.constant 0 : index
    %c13 = arith.constant 13 : index
    %c0_54 = arith.constant 0 : index
    %57 = vector.load %arg2[%c0_53, %c13, %c0_54] : memref<1x39x256xbf16, #tpu.memory_space<vmem>>, vector<1x18x256xbf16>
    %58 = vector.shape_cast %57 : vector<1x18x256xbf16> to vector<18x256xbf16>
    %c9_55 = arith.constant 9 : index
    %c0_56 = arith.constant 0 : index
    %c0_57 = arith.constant 0 : index
    %59 = vector.load %arg3[%c9_55, %c0_56, %c0_57] : memref<16x256x256xbf16, #tpu.memory_space<vmem>>, vector<1x256x256xbf16>
    %60 = vector.shape_cast %59 : vector<1x256x256xbf16> to vector<256x256xbf16>
    %cst_58 = arith.constant dense<0.000000e+00> : vector<18x256xf32>
    %61 = tpu.matmul %58, %60, %cst_58 {dimension_numbers = #tpu.dot_dimension_numbers<[1], [0], [0], [1], [0, 0, 1, 1], [], []>} : vector<18x256xbf16>, vector<256x256xbf16>, vector<18x256xf32> -> vector<18x256xf32>
    %62 = arith.addf %56, %61 : vector<18x256xf32>
    %c0_59 = arith.constant 0 : index
    %c14 = arith.constant 14 : index
    %c0_60 = arith.constant 0 : index
    %63 = vector.load %arg2[%c0_59, %c14, %c0_60] : memref<1x39x256xbf16, #tpu.memory_space<vmem>>, vector<1x18x256xbf16>
    %64 = vector.shape_cast %63 : vector<1x18x256xbf16> to vector<18x256xbf16>
    %c10 = arith.constant 10 : index
    %c0_61 = arith.constant 0 : index
    %c0_62 = arith.constant 0 : index
    %65 = vector.load %arg3[%c10, %c0_61, %c0_62] : memref<16x256x256xbf16, #tpu.memory_space<vmem>>, vector<1x256x256xbf16>
    %66 = vector.shape_cast %65 : vector<1x256x256xbf16> to vector<256x256xbf16>
    %cst_63 = arith.constant dense<0.000000e+00> : vector<18x256xf32>
    %67 = tpu.matmul %64, %66, %cst_63 {dimension_numbers = #tpu.dot_dimension_numbers<[1], [0], [0], [1], [0, 0, 1, 1], [], []>} : vector<18x256xbf16>, vector<256x256xbf16>, vector<18x256xf32> -> vector<18x256xf32>
    %68 = arith.addf %62, %67 : vector<18x256xf32>
    %c0_64 = arith.constant 0 : index
    %c15 = arith.constant 15 : index
    %c0_65 = arith.constant 0 : index
    %69 = vector.load %arg2[%c0_64, %c15, %c0_65] : memref<1x39x256xbf16, #tpu.memory_space<vmem>>, vector<1x18x256xbf16>
    %70 = vector.shape_cast %69 : vector<1x18x256xbf16> to vector<18x256xbf16>
    %c11 = arith.constant 11 : index
    %c0_66 = arith.constant 0 : index
    %c0_67 = arith.constant 0 : index
    %71 = vector.load %arg3[%c11, %c0_66, %c0_67] : memref<16x256x256xbf16, #tpu.memory_space<vmem>>, vector<1x256x256xbf16>
    %72 = vector.shape_cast %71 : vector<1x256x256xbf16> to vector<256x256xbf16>
    %cst_68 = arith.constant dense<0.000000e+00> : vector<18x256xf32>
    %73 = tpu.matmul %70, %72, %cst_68 {dimension_numbers = #tpu.dot_dimension_numbers<[1], [0], [0], [1], [0, 0, 1, 1], [], []>} : vector<18x256xbf16>, vector<256x256xbf16>, vector<18x256xf32> -> vector<18x256xf32>
    %74 = arith.addf %68, %73 : vector<18x256xf32>
    %c0_69 = arith.constant 0 : index
    %c18 = arith.constant 18 : index
    %c0_70 = arith.constant 0 : index
    %75 = vector.load %arg2[%c0_69, %c18, %c0_70] : memref<1x39x256xbf16, #tpu.memory_space<vmem>>, vector<1x18x256xbf16>
    %76 = vector.shape_cast %75 : vector<1x18x256xbf16> to vector<18x256xbf16>
    %c12_71 = arith.constant 12 : index
    %c0_72 = arith.constant 0 : index
    %c0_73 = arith.constant 0 : index
    %77 = vector.load %arg3[%c12_71, %c0_72, %c0_73] : memref<16x256x256xbf16, #tpu.memory_space<vmem>>, vector<1x256x256xbf16>
    %78 = vector.shape_cast %77 : vector<1x256x256xbf16> to vector<256x256xbf16>
    %cst_74 = arith.constant dense<0.000000e+00> : vector<18x256xf32>
    %79 = tpu.matmul %76, %78, %cst_74 {dimension_numbers = #tpu.dot_dimension_numbers<[1], [0], [0], [1], [0, 0, 1, 1], [], []>} : vector<18x256xbf16>, vector<256x256xbf16>, vector<18x256xf32> -> vector<18x256xf32>
    %80 = arith.addf %74, %79 : vector<18x256xf32>
    %c0_75 = arith.constant 0 : index
    %c19 = arith.constant 19 : index
    %c0_76 = arith.constant 0 : index
    %81 = vector.load %arg2[%c0_75, %c19, %c0_76] : memref<1x39x256xbf16, #tpu.memory_space<vmem>>, vector<1x18x256xbf16>
    %82 = vector.shape_cast %81 : vector<1x18x256xbf16> to vector<18x256xbf16>
    %c13_77 = arith.constant 13 : index
    %c0_78 = arith.constant 0 : index
    %c0_79 = arith.constant 0 : index
    %83 = vector.load %arg3[%c13_77, %c0_78, %c0_79] : memref<16x256x256xbf16, #tpu.memory_space<vmem>>, vector<1x256x256xbf16>
    %84 = vector.shape_cast %83 : vector<1x256x256xbf16> to vector<256x256xbf16>
    %cst_80 = arith.constant dense<0.000000e+00> : vector<18x256xf32>
    %85 = tpu.matmul %82, %84, %cst_80 {dimension_numbers = #tpu.dot_dimension_numbers<[1], [0], [0], [1], [0, 0, 1, 1], [], []>} : vector<18x256xbf16>, vector<256x256xbf16>, vector<18x256xf32> -> vector<18x256xf32>
    %86 = arith.addf %80, %85 : vector<18x256xf32>
    %c0_81 = arith.constant 0 : index
    %c20 = arith.constant 20 : index
    %c0_82 = arith.constant 0 : index
    %87 = vector.load %arg2[%c0_81, %c20, %c0_82] : memref<1x39x256xbf16, #tpu.memory_space<vmem>>, vector<1x18x256xbf16>
    %88 = vector.shape_cast %87 : vector<1x18x256xbf16> to vector<18x256xbf16>
    %c14_83 = arith.constant 14 : index
    %c0_84 = arith.constant 0 : index
    %c0_85 = arith.constant 0 : index
    %89 = vector.load %arg3[%c14_83, %c0_84, %c0_85] : memref<16x256x256xbf16, #tpu.memory_space<vmem>>, vector<1x256x256xbf16>
    %90 = vector.shape_cast %89 : vector<1x256x256xbf16> to vector<256x256xbf16>
    %cst_86 = arith.constant dense<0.000000e+00> : vector<18x256xf32>
    %91 = tpu.matmul %88, %90, %cst_86 {dimension_numbers = #tpu.dot_dimension_numbers<[1], [0], [0], [1], [0, 0, 1, 1], [], []>} : vector<18x256xbf16>, vector<256x256xbf16>, vector<18x256xf32> -> vector<18x256xf32>
    %92 = arith.addf %86, %91 : vector<18x256xf32>
    %c0_87 = arith.constant 0 : index
    %c21 = arith.constant 21 : index
    %c0_88 = arith.constant 0 : index
    %93 = vector.load %arg2[%c0_87, %c21, %c0_88] : memref<1x39x256xbf16, #tpu.memory_space<vmem>>, vector<1x18x256xbf16>
    %94 = vector.shape_cast %93 : vector<1x18x256xbf16> to vector<18x256xbf16>
    %c15_89 = arith.constant 15 : index
    %c0_90 = arith.constant 0 : index
    %c0_91 = arith.constant 0 : index
    %95 = vector.load %arg3[%c15_89, %c0_90, %c0_91] : memref<16x256x256xbf16, #tpu.memory_space<vmem>>, vector<1x256x256xbf16>
    %96 = vector.shape_cast %95 : vector<1x256x256xbf16> to vector<256x256xbf16>
    %cst_92 = arith.constant dense<0.000000e+00> : vector<18x256xf32>
    %97 = tpu.matmul %94, %96, %cst_92 {dimension_numbers = #tpu.dot_dimension_numbers<[1], [0], [0], [1], [0, 0, 1, 1], [], []>} : vector<18x256xbf16>, vector<256x256xbf16>, vector<18x256xf32> -> vector<18x256xf32>
    %98 = arith.addf %92, %97 : vector<18x256xf32>
    %cst_93 = arith.constant 0.000000e+00 : f32
    %99 = vector.broadcast %cst_93 : f32 to vector<18x256xf32>
    %100 = arith.cmpf oge, %98, %99 : vector<18x256xf32>
    %cst_94 = arith.constant 2.000000e-01 : f32
    %101 = vector.broadcast %cst_94 : f32 to vector<18x256xf32>
    %102 = arith.mulf %101, %98 : vector<18x256xf32>
    %103 = arith.select %100, %98, %102 : vector<18x256xi1>, vector<18x256xf32>
    %104 = arith.truncf %103 : vector<18x256xf32> to vector<18x256xbf16>
    %c0_95 = arith.constant 0 : index
    %c0_96 = arith.constant 0 : index
    %c0_97 = arith.constant 0 : index
    %105 = vector.load %arg5[%c0_95, %c0_96, %c0_97] : memref<1x18x256xbf16, #tpu.memory_space<vmem>>, vector<1x18x256xbf16>
    %106 = vector.shape_cast %105 : vector<1x18x256xbf16> to vector<18x256xbf16>
    %107 = vector.shape_cast %104 : vector<18x256xbf16> to vector<1x18x256xbf16>
    tpu.vector_store %arg5[%c0_95, %c0_96, %c0_97], %107 {strides = array<i32>} : memref<1x18x256xbf16, #tpu.memory_space<vmem>>, vector<1x18x256xbf16>,
    return
  }
  func.func @transform_0(%arg0: i32, %arg1: i32) -> (i32, i32, i32) {
    %c0_i32 = arith.constant 0 : i32
    %c0_i32_0 = arith.constant 0 : i32
    %c0_i32_1 = arith.constant 0 : i32
    return %arg1, %c0_i32, %c0_i32_0 : i32, i32, i32
  }
  func.func @transform_1(%arg0: i32, %arg1: i32) -> (i32, i32, i32) {
    %c0_i32 = arith.constant 0 : i32
    %c0_i32_0 = arith.constant 0 : i32
    %c0_i32_1 = arith.constant 0 : i32
    return %c0_i32, %c0_i32_0, %arg0 : i32, i32, i32
  }
  func.func @transform_2(%arg0: i32, %arg1: i32) -> (i32, i32) {
    %c0_i32 = arith.constant 0 : i32
    %c0_i32_0 = arith.constant 0 : i32
    return %c0_i32, %arg0 : i32, i32
  }
  func.func @transform_3(%arg0: i32, %arg1: i32) -> (i32, i32, i32) {
    %c0_i32 = arith.constant 0 : i32
    %c0_i32_0 = arith.constant 0 : i32
    return %arg1, %c0_i32, %arg0 : i32, i32, i32
  }
}

module attributes {stable_mosaic.version = 11 : i64} {
  func.func @_final_reduce_kernel(%arg0: i32, %arg1: memref<1x28x512xbf16, #tpu.memory_space<vmem>>, %arg2: memref<16x512xf32, #tpu.memory_space<vmem>>, %arg3: memref<1x1xf32, #tpu.memory_space<vmem>>, %arg4: memref<1x10x1xf32, #tpu.memory_space<vmem>>) attributes {dimension_semantics = [#tpu.dimension_semantics<parallel>], iteration_bounds = array<i64: 2>, scalar_prefetch = 0 : i64, scratch_operands = 0 : i64, tpu.core_type = #tpu.core_type<tc>, window_params = [{transform_indices = @transform_0, window_bounds = array<i64: 1, 28, 512>}, {pipeline_mode = #tpu.pipeline_mode<synchronous>, transform_indices = @transform_1, window_bounds = array<i64: 16, 512>}, {pipeline_mode = #tpu.pipeline_mode<synchronous>, transform_indices = @transform_2, window_bounds = array<i64: 1, 1>}, {transform_indices = @transform_3, window_bounds = array<i64: 1, 10, 1>}]} {
    %c0 = arith.constant 0 : index
    %c0_0 = arith.constant 0 : index
    %0 = vector.load %arg3[%c0, %c0_0] : memref<1x1xf32, #tpu.memory_space<vmem>>, vector<1x1xf32>
    %1 = vector.shape_cast %0 : vector<1x1xf32> to vector<1x1xf32>
    %2 = vector.broadcast %1 : vector<1x1xf32> to vector<10x1xf32>
    %c0_1 = arith.constant 0 : index
    %c0_2 = arith.constant 0 : index
    %c0_3 = arith.constant 0 : index
    %3 = vector.load %arg1[%c0_1, %c0_2, %c0_3] : memref<1x28x512xbf16, #tpu.memory_space<vmem>>, vector<1x10x512xbf16>
    %4 = vector.shape_cast %3 : vector<1x10x512xbf16> to vector<10x512xbf16>
    %5 = arith.extf %4 : vector<10x512xbf16> to vector<10x512xf32>
    %c0_4 = arith.constant 0 : index
    %c0_5 = arith.constant 0 : index
    %6 = vector.load %arg2[%c0_4, %c0_5] : memref<16x512xf32, #tpu.memory_space<vmem>>, vector<1x512xf32>
    %7 = vector.broadcast %6 : vector<1x512xf32> to vector<10x512xf32>
    %8 = arith.mulf %5, %7 : vector<10x512xf32>
    %cst = arith.constant dense<0.000000e+00> : vector<10xf32>
    %9 = vector.multi_reduction <add>, %8, %cst [1] : vector<10x512xf32> to vector<10xf32>
    %10 = vector.shape_cast %9 : vector<10xf32> to vector<10x1xf32>
    %11 = arith.addf %2, %10 : vector<10x1xf32>
    %c0_6 = arith.constant 0 : index
    %c1 = arith.constant 1 : index
    %c0_7 = arith.constant 0 : index
    %12 = vector.load %arg1[%c0_6, %c1, %c0_7] : memref<1x28x512xbf16, #tpu.memory_space<vmem>>, vector<1x10x512xbf16>
    %13 = vector.shape_cast %12 : vector<1x10x512xbf16> to vector<10x512xbf16>
    %14 = arith.extf %13 : vector<10x512xbf16> to vector<10x512xf32>
    %c1_8 = arith.constant 1 : index
    %c0_9 = arith.constant 0 : index
    %15 = vector.load %arg2[%c1_8, %c0_9] : memref<16x512xf32, #tpu.memory_space<vmem>>, vector<1x512xf32>
    %16 = vector.broadcast %15 : vector<1x512xf32> to vector<10x512xf32>
    %17 = arith.mulf %14, %16 : vector<10x512xf32>
    %cst_10 = arith.constant dense<0.000000e+00> : vector<10xf32>
    %18 = vector.multi_reduction <add>, %17, %cst_10 [1] : vector<10x512xf32> to vector<10xf32>
    %19 = vector.shape_cast %18 : vector<10xf32> to vector<10x1xf32>
    %20 = arith.addf %11, %19 : vector<10x1xf32>
    %c0_11 = arith.constant 0 : index
    %c2 = arith.constant 2 : index
    %c0_12 = arith.constant 0 : index
    %21 = vector.load %arg1[%c0_11, %c2, %c0_12] : memref<1x28x512xbf16, #tpu.memory_space<vmem>>, vector<1x10x512xbf16>
    %22 = vector.shape_cast %21 : vector<1x10x512xbf16> to vector<10x512xbf16>
    %23 = arith.extf %22 : vector<10x512xbf16> to vector<10x512xf32>
    %c2_13 = arith.constant 2 : index
    %c0_14 = arith.constant 0 : index
    %24 = vector.load %arg2[%c2_13, %c0_14] : memref<16x512xf32, #tpu.memory_space<vmem>>, vector<1x512xf32>
    %25 = vector.broadcast %24 : vector<1x512xf32> to vector<10x512xf32>
    %26 = arith.mulf %23, %25 : vector<10x512xf32>
    %cst_15 = arith.constant dense<0.000000e+00> : vector<10xf32>
    %27 = vector.multi_reduction <add>, %26, %cst_15 [1] : vector<10x512xf32> to vector<10xf32>
    %28 = vector.shape_cast %27 : vector<10xf32> to vector<10x1xf32>
    %29 = arith.addf %20, %28 : vector<10x1xf32>
    %c0_16 = arith.constant 0 : index
    %c3 = arith.constant 3 : index
    %c0_17 = arith.constant 0 : index
    %30 = vector.load %arg1[%c0_16, %c3, %c0_17] : memref<1x28x512xbf16, #tpu.memory_space<vmem>>, vector<1x10x512xbf16>
    %31 = vector.shape_cast %30 : vector<1x10x512xbf16> to vector<10x512xbf16>
    %32 = arith.extf %31 : vector<10x512xbf16> to vector<10x512xf32>
    %c3_18 = arith.constant 3 : index
    %c0_19 = arith.constant 0 : index
    %33 = vector.load %arg2[%c3_18, %c0_19] : memref<16x512xf32, #tpu.memory_space<vmem>>, vector<1x512xf32>
    %34 = vector.broadcast %33 : vector<1x512xf32> to vector<10x512xf32>
    %35 = arith.mulf %32, %34 : vector<10x512xf32>
    %cst_20 = arith.constant dense<0.000000e+00> : vector<10xf32>
    %36 = vector.multi_reduction <add>, %35, %cst_20 [1] : vector<10x512xf32> to vector<10xf32>
    %37 = vector.shape_cast %36 : vector<10xf32> to vector<10x1xf32>
    %38 = arith.addf %29, %37 : vector<10x1xf32>
    %c0_21 = arith.constant 0 : index
    %c5 = arith.constant 5 : index
    %c0_22 = arith.constant 0 : index
    %39 = vector.load %arg1[%c0_21, %c5, %c0_22] : memref<1x28x512xbf16, #tpu.memory_space<vmem>>, vector<1x10x512xbf16>
    %40 = vector.shape_cast %39 : vector<1x10x512xbf16> to vector<10x512xbf16>
    %41 = arith.extf %40 : vector<10x512xbf16> to vector<10x512xf32>
    %c4 = arith.constant 4 : index
    %c0_23 = arith.constant 0 : index
    %42 = vector.load %arg2[%c4, %c0_23] : memref<16x512xf32, #tpu.memory_space<vmem>>, vector<1x512xf32>
    %43 = vector.broadcast %42 : vector<1x512xf32> to vector<10x512xf32>
    %44 = arith.mulf %41, %43 : vector<10x512xf32>
    %cst_24 = arith.constant dense<0.000000e+00> : vector<10xf32>
    %45 = vector.multi_reduction <add>, %44, %cst_24 [1] : vector<10x512xf32> to vector<10xf32>
    %46 = vector.shape_cast %45 : vector<10xf32> to vector<10x1xf32>
    %47 = arith.addf %38, %46 : vector<10x1xf32>
    %c0_25 = arith.constant 0 : index
    %c6 = arith.constant 6 : index
    %c0_26 = arith.constant 0 : index
    %48 = vector.load %arg1[%c0_25, %c6, %c0_26] : memref<1x28x512xbf16, #tpu.memory_space<vmem>>, vector<1x10x512xbf16>
    %49 = vector.shape_cast %48 : vector<1x10x512xbf16> to vector<10x512xbf16>
    %50 = arith.extf %49 : vector<10x512xbf16> to vector<10x512xf32>
    %c5_27 = arith.constant 5 : index
    %c0_28 = arith.constant 0 : index
    %51 = vector.load %arg2[%c5_27, %c0_28] : memref<16x512xf32, #tpu.memory_space<vmem>>, vector<1x512xf32>
    %52 = vector.broadcast %51 : vector<1x512xf32> to vector<10x512xf32>
    %53 = arith.mulf %50, %52 : vector<10x512xf32>
    %cst_29 = arith.constant dense<0.000000e+00> : vector<10xf32>
    %54 = vector.multi_reduction <add>, %53, %cst_29 [1] : vector<10x512xf32> to vector<10xf32>
    %55 = vector.shape_cast %54 : vector<10xf32> to vector<10x1xf32>
    %56 = arith.addf %47, %55 : vector<10x1xf32>
    %c0_30 = arith.constant 0 : index
    %c7 = arith.constant 7 : index
    %c0_31 = arith.constant 0 : index
    %57 = vector.load %arg1[%c0_30, %c7, %c0_31] : memref<1x28x512xbf16, #tpu.memory_space<vmem>>, vector<1x10x512xbf16>
    %58 = vector.shape_cast %57 : vector<1x10x512xbf16> to vector<10x512xbf16>
    %59 = arith.extf %58 : vector<10x512xbf16> to vector<10x512xf32>
    %c6_32 = arith.constant 6 : index
    %c0_33 = arith.constant 0 : index
    %60 = vector.load %arg2[%c6_32, %c0_33] : memref<16x512xf32, #tpu.memory_space<vmem>>, vector<1x512xf32>
    %61 = vector.broadcast %60 : vector<1x512xf32> to vector<10x512xf32>
    %62 = arith.mulf %59, %61 : vector<10x512xf32>
    %cst_34 = arith.constant dense<0.000000e+00> : vector<10xf32>
    %63 = vector.multi_reduction <add>, %62, %cst_34 [1] : vector<10x512xf32> to vector<10xf32>
    %64 = vector.shape_cast %63 : vector<10xf32> to vector<10x1xf32>
    %65 = arith.addf %56, %64 : vector<10x1xf32>
    %c0_35 = arith.constant 0 : index
    %c8 = arith.constant 8 : index
    %c0_36 = arith.constant 0 : index
    %66 = vector.load %arg1[%c0_35, %c8, %c0_36] : memref<1x28x512xbf16, #tpu.memory_space<vmem>>, vector<1x10x512xbf16>
    %67 = vector.shape_cast %66 : vector<1x10x512xbf16> to vector<10x512xbf16>
    %68 = arith.extf %67 : vector<10x512xbf16> to vector<10x512xf32>
    %c7_37 = arith.constant 7 : index
    %c0_38 = arith.constant 0 : index
    %69 = vector.load %arg2[%c7_37, %c0_38] : memref<16x512xf32, #tpu.memory_space<vmem>>, vector<1x512xf32>
    %70 = vector.broadcast %69 : vector<1x512xf32> to vector<10x512xf32>
    %71 = arith.mulf %68, %70 : vector<10x512xf32>
    %cst_39 = arith.constant dense<0.000000e+00> : vector<10xf32>
    %72 = vector.multi_reduction <add>, %71, %cst_39 [1] : vector<10x512xf32> to vector<10xf32>
    %73 = vector.shape_cast %72 : vector<10xf32> to vector<10x1xf32>
    %74 = arith.addf %65, %73 : vector<10x1xf32>
    %c0_40 = arith.constant 0 : index
    %c10 = arith.constant 10 : index
    %c0_41 = arith.constant 0 : index
    %75 = vector.load %arg1[%c0_40, %c10, %c0_41] : memref<1x28x512xbf16, #tpu.memory_space<vmem>>, vector<1x10x512xbf16>
    %76 = vector.shape_cast %75 : vector<1x10x512xbf16> to vector<10x512xbf16>
    %77 = arith.extf %76 : vector<10x512xbf16> to vector<10x512xf32>
    %c8_42 = arith.constant 8 : index
    %c0_43 = arith.constant 0 : index
    %78 = vector.load %arg2[%c8_42, %c0_43] : memref<16x512xf32, #tpu.memory_space<vmem>>, vector<1x512xf32>
    %79 = vector.broadcast %78 : vector<1x512xf32> to vector<10x512xf32>
    %80 = arith.mulf %77, %79 : vector<10x512xf32>
    %cst_44 = arith.constant dense<0.000000e+00> : vector<10xf32>
    %81 = vector.multi_reduction <add>, %80, %cst_44 [1] : vector<10x512xf32> to vector<10xf32>
    %82 = vector.shape_cast %81 : vector<10xf32> to vector<10x1xf32>
    %83 = arith.addf %74, %82 : vector<10x1xf32>
    %c0_45 = arith.constant 0 : index
    %c11 = arith.constant 11 : index
    %c0_46 = arith.constant 0 : index
    %84 = vector.load %arg1[%c0_45, %c11, %c0_46] : memref<1x28x512xbf16, #tpu.memory_space<vmem>>, vector<1x10x512xbf16>
    %85 = vector.shape_cast %84 : vector<1x10x512xbf16> to vector<10x512xbf16>
    %86 = arith.extf %85 : vector<10x512xbf16> to vector<10x512xf32>
    %c9 = arith.constant 9 : index
    %c0_47 = arith.constant 0 : index
    %87 = vector.load %arg2[%c9, %c0_47] : memref<16x512xf32, #tpu.memory_space<vmem>>, vector<1x512xf32>
    %88 = vector.broadcast %87 : vector<1x512xf32> to vector<10x512xf32>
    %89 = arith.mulf %86, %88 : vector<10x512xf32>
    %cst_48 = arith.constant dense<0.000000e+00> : vector<10xf32>
    %90 = vector.multi_reduction <add>, %89, %cst_48 [1] : vector<10x512xf32> to vector<10xf32>
    %91 = vector.shape_cast %90 : vector<10xf32> to vector<10x1xf32>
    %92 = arith.addf %83, %91 : vector<10x1xf32>
    %c0_49 = arith.constant 0 : index
    %c12 = arith.constant 12 : index
    %c0_50 = arith.constant 0 : index
    %93 = vector.load %arg1[%c0_49, %c12, %c0_50] : memref<1x28x512xbf16, #tpu.memory_space<vmem>>, vector<1x10x512xbf16>
    %94 = vector.shape_cast %93 : vector<1x10x512xbf16> to vector<10x512xbf16>
    %95 = arith.extf %94 : vector<10x512xbf16> to vector<10x512xf32>
    %c10_51 = arith.constant 10 : index
    %c0_52 = arith.constant 0 : index
    %96 = vector.load %arg2[%c10_51, %c0_52] : memref<16x512xf32, #tpu.memory_space<vmem>>, vector<1x512xf32>
    %97 = vector.broadcast %96 : vector<1x512xf32> to vector<10x512xf32>
    %98 = arith.mulf %95, %97 : vector<10x512xf32>
    %cst_53 = arith.constant dense<0.000000e+00> : vector<10xf32>
    %99 = vector.multi_reduction <add>, %98, %cst_53 [1] : vector<10x512xf32> to vector<10xf32>
    %100 = vector.shape_cast %99 : vector<10xf32> to vector<10x1xf32>
    %101 = arith.addf %92, %100 : vector<10x1xf32>
    %c0_54 = arith.constant 0 : index
    %c13 = arith.constant 13 : index
    %c0_55 = arith.constant 0 : index
    %102 = vector.load %arg1[%c0_54, %c13, %c0_55] : memref<1x28x512xbf16, #tpu.memory_space<vmem>>, vector<1x10x512xbf16>
    %103 = vector.shape_cast %102 : vector<1x10x512xbf16> to vector<10x512xbf16>
    %104 = arith.extf %103 : vector<10x512xbf16> to vector<10x512xf32>
    %c11_56 = arith.constant 11 : index
    %c0_57 = arith.constant 0 : index
    %105 = vector.load %arg2[%c11_56, %c0_57] : memref<16x512xf32, #tpu.memory_space<vmem>>, vector<1x512xf32>
    %106 = vector.broadcast %105 : vector<1x512xf32> to vector<10x512xf32>
    %107 = arith.mulf %104, %106 : vector<10x512xf32>
    %cst_58 = arith.constant dense<0.000000e+00> : vector<10xf32>
    %108 = vector.multi_reduction <add>, %107, %cst_58 [1] : vector<10x512xf32> to vector<10xf32>
    %109 = vector.shape_cast %108 : vector<10xf32> to vector<10x1xf32>
    %110 = arith.addf %101, %109 : vector<10x1xf32>
    %c0_59 = arith.constant 0 : index
    %c15 = arith.constant 15 : index
    %c0_60 = arith.constant 0 : index
    %111 = vector.load %arg1[%c0_59, %c15, %c0_60] : memref<1x28x512xbf16, #tpu.memory_space<vmem>>, vector<1x10x512xbf16>
    %112 = vector.shape_cast %111 : vector<1x10x512xbf16> to vector<10x512xbf16>
    %113 = arith.extf %112 : vector<10x512xbf16> to vector<10x512xf32>
    %c12_61 = arith.constant 12 : index
    %c0_62 = arith.constant 0 : index
    %114 = vector.load %arg2[%c12_61, %c0_62] : memref<16x512xf32, #tpu.memory_space<vmem>>, vector<1x512xf32>
    %115 = vector.broadcast %114 : vector<1x512xf32> to vector<10x512xf32>
    %116 = arith.mulf %113, %115 : vector<10x512xf32>
    %cst_63 = arith.constant dense<0.000000e+00> : vector<10xf32>
    %117 = vector.multi_reduction <add>, %116, %cst_63 [1] : vector<10x512xf32> to vector<10xf32>
    %118 = vector.shape_cast %117 : vector<10xf32> to vector<10x1xf32>
    %119 = arith.addf %110, %118 : vector<10x1xf32>
    %c0_64 = arith.constant 0 : index
    %c16 = arith.constant 16 : index
    %c0_65 = arith.constant 0 : index
    %120 = vector.load %arg1[%c0_64, %c16, %c0_65] : memref<1x28x512xbf16, #tpu.memory_space<vmem>>, vector<1x10x512xbf16>
    %121 = vector.shape_cast %120 : vector<1x10x512xbf16> to vector<10x512xbf16>
    %122 = arith.extf %121 : vector<10x512xbf16> to vector<10x512xf32>
    %c13_66 = arith.constant 13 : index
    %c0_67 = arith.constant 0 : index
    %123 = vector.load %arg2[%c13_66, %c0_67] : memref<16x512xf32, #tpu.memory_space<vmem>>, vector<1x512xf32>
    %124 = vector.broadcast %123 : vector<1x512xf32> to vector<10x512xf32>
    %125 = arith.mulf %122, %124 : vector<10x512xf32>
    %cst_68 = arith.constant dense<0.000000e+00> : vector<10xf32>
    %126 = vector.multi_reduction <add>, %125, %cst_68 [1] : vector<10x512xf32> to vector<10xf32>
    %127 = vector.shape_cast %126 : vector<10xf32> to vector<10x1xf32>
    %128 = arith.addf %119, %127 : vector<10x1xf32>
    %c0_69 = arith.constant 0 : index
    %c17 = arith.constant 17 : index
    %c0_70 = arith.constant 0 : index
    %129 = vector.load %arg1[%c0_69, %c17, %c0_70] : memref<1x28x512xbf16, #tpu.memory_space<vmem>>, vector<1x10x512xbf16>
    %130 = vector.shape_cast %129 : vector<1x10x512xbf16> to vector<10x512xbf16>
    %131 = arith.extf %130 : vector<10x512xbf16> to vector<10x512xf32>
    %c14 = arith.constant 14 : index
    %c0_71 = arith.constant 0 : index
    %132 = vector.load %arg2[%c14, %c0_71] : memref<16x512xf32, #tpu.memory_space<vmem>>, vector<1x512xf32>
    %133 = vector.broadcast %132 : vector<1x512xf32> to vector<10x512xf32>
    %134 = arith.mulf %131, %133 : vector<10x512xf32>
    %cst_72 = arith.constant dense<0.000000e+00> : vector<10xf32>
    %135 = vector.multi_reduction <add>, %134, %cst_72 [1] : vector<10x512xf32> to vector<10xf32>
    %136 = vector.shape_cast %135 : vector<10xf32> to vector<10x1xf32>
    %137 = arith.addf %128, %136 : vector<10x1xf32>
    %c0_73 = arith.constant 0 : index
    %c18 = arith.constant 18 : index
    %c0_74 = arith.constant 0 : index
    %138 = vector.load %arg1[%c0_73, %c18, %c0_74] : memref<1x28x512xbf16, #tpu.memory_space<vmem>>, vector<1x10x512xbf16>
    %139 = vector.shape_cast %138 : vector<1x10x512xbf16> to vector<10x512xbf16>
    %140 = arith.extf %139 : vector<10x512xbf16> to vector<10x512xf32>
    %c15_75 = arith.constant 15 : index
    %c0_76 = arith.constant 0 : index
    %141 = vector.load %arg2[%c15_75, %c0_76] : memref<16x512xf32, #tpu.memory_space<vmem>>, vector<1x512xf32>
    %142 = vector.broadcast %141 : vector<1x512xf32> to vector<10x512xf32>
    %143 = arith.mulf %140, %142 : vector<10x512xf32>
    %cst_77 = arith.constant dense<0.000000e+00> : vector<10xf32>
    %144 = vector.multi_reduction <add>, %143, %cst_77 [1] : vector<10x512xf32> to vector<10xf32>
    %145 = vector.shape_cast %144 : vector<10xf32> to vector<10x1xf32>
    %146 = arith.addf %137, %145 : vector<10x1xf32>
    %c0_78 = arith.constant 0 : index
    %c0_79 = arith.constant 0 : index
    %c0_80 = arith.constant 0 : index
    %147 = vector.load %arg4[%c0_78, %c0_79, %c0_80] : memref<1x10x1xf32, #tpu.memory_space<vmem>>, vector<1x10x1xf32>
    %148 = vector.shape_cast %147 : vector<1x10x1xf32> to vector<10x1xf32>
    %149 = vector.shape_cast %146 : vector<10x1xf32> to vector<1x10x1xf32>
    tpu.vector_store %arg4[%c0_78, %c0_79, %c0_80], %149 {strides = array<i32>} : memref<1x10x1xf32, #tpu.memory_space<vmem>>, vector<1x10x1xf32>,
    return
  }
  func.func @transform_0(%arg0: i32) -> (i32, i32, i32) {
    %c0_i32 = arith.constant 0 : i32
    %c0_i32_0 = arith.constant 0 : i32
    %c0_i32_1 = arith.constant 0 : i32
    return %arg0, %c0_i32, %c0_i32_0 : i32, i32, i32
  }
  func.func @transform_1(%arg0: i32) -> (i32, i32) {
    %c0_i32 = arith.constant 0 : i32
    %c0_i32_0 = arith.constant 0 : i32
    %c0_i32_1 = arith.constant 0 : i32
    return %c0_i32, %c0_i32_0 : i32, i32
  }
  func.func @transform_2(%arg0: i32) -> (i32, i32) {
    %c0_i32 = arith.constant 0 : i32
    %c0_i32_0 = arith.constant 0 : i32
    %c0_i32_1 = arith.constant 0 : i32
    return %c0_i32, %c0_i32_0 : i32, i32
  }
  func.func @transform_3(%arg0: i32) -> (i32, i32, i32) {
    %c0_i32 = arith.constant 0 : i32
    %c0_i32_0 = arith.constant 0 : i32
    %c0_i32_1 = arith.constant 0 : i32
    return %arg0, %c0_i32, %c0_i32_0 : i32, i32, i32
  }
}

</mosaic_0001>

<bundles_post_ra>
// kernel: discriminator_forward.5
= control target key start
LH: loop header
LB: loop body
LE: loop exit
PB: predicated region body
PF: predicated region fallthrough
CT: control target
= control target key end

     0   :  { %s3547_s12 = smov 0   ;;  %s3549_s13 = smov 0   ;;  %s4126_s0 = inlined_call_operand.vmem [shape: bf16[2,290,128], index: 0, kind: input, shape index: {}]   ;;  %s4127_s1 = inlined_call_operand.vmem [shape: bf16[4,128,128], index: 1, kind: input, shape index: {}]   ;;  %s4128_s2 = inlined_call_operand.vmem [shape: f32[1,128], index: 2, kind: input, shape index: {}]   ;;  %s4129_s3 = inlined_call_operand.vmem [shape: bf16[2,272,128], index: 3, kind: output, shape index: {}]  }
   0x1   :  { %s3551_s14 = smov 0  }
   0x2 LB: > { %s22_s15 = sadd.s32 1, %s3519_s13  ;;  %p2438_p0 = scmp.ge.s32.totalorder %s3523_s14, 1  ;;  %s3523_s14 = sphi %s3551_s14, %s13_s14   ;;  %s3519_s13 = sphi %s3549_s13, %s4131_s13   ;;  %s3515_s12 = sphi %s3547_s12, %s4130_s12  }
   0x3   : > { %p23_p1 = scmp.ge.s32.totalorder %s22_s15, 2  ;;  %p168_p2 = scmp.lt.s32.totalorder %s3523_s14, 3 }
   0x5   : > { %s4133_s15 = smov (%p23_p1, %s22_s15), 0  ;;  %p169_p3 = pnand %p2438_p0, %p168_p2 }
   0x6   : > { %v3415_v0 = vld [vmem:[%s4127_s1] sm:$0xff] (!%p169_p3)   ;;  %v3525_v1 = vmov (!%p169_p3), 0.0   ;;  %v3417_v3 = vld [vmem:[%s4127_s1 + $0x8] sm:$0xff] (!%p169_p3)   ;;  %vm3526_vm0 = vmmov (!%p169_p3), 0   ;;  %p202_p4 = scmp.lt.s32.totalorder (!%p169_p3), %s3515_s12, 1  ;;  %v3419_v5 = vld [vmem:[%s4127_s1 + $0x10] sm:$0xff] (!%p169_p3)  }
   0x7   : > { %172 = sbr.rel (%p169_p3) target bundleno = 527 (0x20f), region = 32  ;;  %2847 = vmatprep.subr.bf16.mxu1 (!%p169_p3), %v3525_v1  ;;  %3015 = vmatprep.subr.bf16.mxu0 (!%p169_p3), %v3525_v1  ;;  %v3416_v2 = vld [vmem:[%s4127_s1 + $0x80] sm:$0xff] (!%p169_p3)   ;;  %v3418_v4 = vld [vmem:[%s4127_s1 + $0x88] sm:$0xff] (!%p169_p3)   ;;  %v3420_v6 = vld [vmem:[%s4127_s1 + $0x90] sm:$0xff] (!%p169_p3)   ;;  %vm773_vm1 = vsmask.f32 (!%p169_p3), 7424 }
   0x8   : > { %2848 = vmatpush3.bf16.msra.mxu1 (!%p169_p3), %v3415_v0  ;;  %2863 = vmatprep.mubr.msk.bf16.mxu1 (!%p169_p3), %vm3526_vm0, %v3525_v1  ;;  %v3421_v7 = vld [vmem:[%s4127_s1 + $0x18] sm:$0xff] (!%p169_p3)   ;;  %v3423_v9 = vld [vmem:[%s4127_s1 + $0x20] sm:$0xff] (!%p169_p3)   ;;  %v3425_v11 = vld [vmem:[%s4127_s1 + $0x28] sm:$0xff] (!%p169_p3)   ;;  %vm1751_vm2 = vcmask (!%p169_p3), 1046528  }
   0x9   : > { %3016 = vmatpush3.bf16.msra.mxu0 (!%p169_p3), %v3416_v2  ;;  %2849 = vmatprep.subr.bf16.mxu1 (!%p169_p3), %v3525_v1  ;;  %v3422_v8 = vld [vmem:[%s4127_s1 + $0x98] sm:$0xff] (!%p169_p3)   ;;  %v3424_v10 = vld [vmem:[%s4127_s1 + $0xa0] sm:$0xff] (!%p169_p3)   ;;  %v3426_v14 = vld [vmem:[%s4127_s1 + $0xa8] sm:$0xff] (!%p169_p3)  }
   0xa   : > { %3017 = vmatprep.subr.bf16.mxu0 (!%p169_p3), %v3525_v1  ;;  %3031 = vmatprep.mubr.msk.bf16.mxu0 (!%p169_p3), %vm3526_vm0, %v3525_v1  ;;  %v3427_v18 = vld [vmem:[%s4127_s1 + $0x30] sm:$0xff] (!%p169_p3)   ;;  %v3429_v23 = vld [vmem:[%s4127_s1 + $0x38] sm:$0xff] (!%p169_p3)   ;;  %v3434_v29 = vld [vmem:[%s4127_s1 + $0x40] sm:$0xff] (!%p169_p3)  }
   0xb   : > { %v3428_v19 = vld [vmem:[%s4127_s1 + $0xb0] sm:$0xff] (!%p169_p3)   ;;  %v3430_v24 = vld [vmem:[%s4127_s1 + $0xb8] sm:$0xff] (!%p169_p3)   ;;  %v3435_v31 = vld [vmem:[%s4127_s1 + $0xc0] sm:$0xff] (!%p169_p3)  }
   0xc   : > { %2850 = vmatpush3.bf16.msra.mxu1 (!%p169_p3), %v3417_v3  ;;  %v3440_v34 = vld [vmem:[%s4127_s1 + $0x48] sm:$0xff] (!%p169_p3)   ;;  %v3446_v43 = vld [vmem:[%s4127_s1 + $0x50] sm:$0xff] (!%p169_p3)   ;;  %v3452_v48 = vld [vmem:[%s4127_s1 + $0x58] sm:$0xff] (!%p169_p3)  }
   0xd   : > { %3018 = vmatpush3.bf16.msra.mxu0 (!%p169_p3), %v3418_v4  ;;  %2851 = vmatprep.subr.bf16.mxu1 (!%p169_p3), %v3525_v1  ;;  %v3441_v38 = vld [vmem:[%s4127_s1 + $0xc8] sm:$0xff] (!%p169_p3)   ;;  %v3447_v44 = vld [vmem:[%s4127_s1 + $0xd0] sm:$0xff] (!%p169_p3)   ;;  %v3453_v49 = vld [vmem:[%s4127_s1 + $0xd8] sm:$0xff] (!%p169_p3)  }
   0xe   : > { %s4135_s12 = smov (!%p202_p4, %s3515_s12), 1  ;;  %3019 = vmatprep.subr.bf16.mxu0 %v3525_v1  ;;  %v3458_v54 = vld [vmem:[%s4127_s1 + $0x60] sm:$0xff]   ;;  %v3464_v59 = vld [vmem:[%s4127_s1 + $0x68] sm:$0xff]   ;;  %v3470_v2 = vld [vmem:[%s4127_s1 + $0x70] sm:$0xff]  }
   0xf   : > { %s3387_s30 = smul.u32 148, %s4135_s12  ;;  %v3459_v55 = vld [vmem:[%s4127_s1 + $0xe0] sm:$0xff]   ;;  %v3467_v60 = vld [vmem:[%s4127_s1 + $0xe8] sm:$0xff]  }
  0x10   : > { %2852 = vmatpush3.bf16.msra.mxu1 %v3419_v5  ;;  %s3388_s18 = smul.u32 136, %s4135_s12 }
  0x11   : > { %3020 = vmatpush3.bf16.msra.mxu0 %v3420_v6  ;;  %2853 = vmatprep.subr.bf16.mxu1 %v3525_v1  ;;  %s3610_s10 = scalar_lea.vmem %s4126_s0, %s3387_s30  ;;  %v3473_v6 = vld [vmem:[%s4127_s1 + $0xf0] sm:$0xff]  }
  0x12   : > { %3021 = vmatprep.subr.bf16.mxu0 %v3525_v1  ;;  %v1182_v12 = vld [vmem:[%s3610_s10 + $0x8] sm:$0xf]  ;;  %v3622_v13 = vld [vmem:[%s3610_s10 + $0xc] sm:$0xf]  ;;  %v3630_v16 = vld [vmem:[%s3610_s10 + $0x10] sm:$0xff]   ;;  %s4066_s21 = scalar_lea.vmem %s4129_s3, %s3388_s18 }
  0x13   : > { %v2525_v15 = vcombine.low %v1182_v12, %v3622_v13  ;;  %v1330_v22 = vshll.u32 %v3630_v16, 16  ;;  %v3650_v27 = vld [vmem:[%s3610_s10 + $0x18] sm:$0xff]   ;;  %v3431_v28 = vld [vmem:[%s3610_s10] sm:$0xff]   ;;  %v1334_v32 = vshrl.u32 %v3630_v16, 16  ;;  %v3436_v39 = vld [vmem:[%s3610_s10 + $0x8] sm:$0xff]  }
  0x14   : > { %2854 = vmatpush3.bf16.msra.mxu1 %v3421_v7  ;;  %v1338_v33 = vshll.u32 %v3650_v27, 16  ;;  %v3671_v37 = vld [vmem:[%s3610_s10 + $0x20] sm:$0xff]   ;;  %v1342_v41 = vshrl.u32 %v3650_v27, 16  ;;  %v3693_v45 = vld [vmem:[%s3610_s10 + $0x28] sm:$0xff]   ;;  %v3438_v50 = vld [vmem:[%s3610_s10 + $0x10] sm:$0xff]  }
  0x15   : > { %3022 = vmatpush3.bf16.msra.mxu0 %v3422_v8  ;;  %2855 = vmatprep.subr.bf16.mxu1 %v3525_v1  ;;  %v1325_v17 = vshll.u32 %v2525_v15, 16  ;;  %v1323_v20 = vshrl.u32 %v2525_v15, 16  ;;  %v1332_v26 = vrot.slane %v1330_v22, 1  ;;  %v1346_v42 = vshll.u32 %v3671_v37, 16  ;;  %v3724_v58 = vld [vmem:[%s3610_s10 + $0x30] sm:$0xff]   ;;  %v3442_v61 = vld [vmem:[%s3610_s10 + $0x18] sm:$0xff]  }
  0x16   : > { %3023 = vmatprep.subr.bf16.mxu0 %v3525_v1  ;;  %v1340_v36 = vrot.slane %v1338_v33, 1  ;;  %v1350_v52 = vshrl.u32 %v3671_v37, 16  ;;  %v1354_v53 = vshll.u32 %v3693_v45, 16  ;;  %v1358_v63 = vshrl.u32 %v3693_v45, 16  ;;  %v3746_v3 = vld [vmem:[%s3610_s10 + $0x38] sm:$0xff]   ;;  %v3444_v7 = vld [vmem:[%s3610_s10 + $0x20] sm:$0xff]  }
  0x17   : > { %v1327_v21 = vrot.slane %v1325_v17, 1  ;;  %v1336_v35 = vor.u32 %v1334_v32, %v1332_v26  ;;  %v1348_v47 = vrot.slane %v1346_v42, 1  ;;  %v1362_v0 = vshll.u32 %v3724_v58, 16  ;;  %v3479_v12 = vld [vmem:[%s4127_s1 + $0xf8] sm:$0xff]  }
  0x18   : > { %2856 = vmatpush3.bf16.msra.mxu1 %v3423_v9  ;;  %v1344_v46 = vor.u32 %v1342_v41, %v1340_v36  ;;  %v1356_v57 = vrot.slane %v1354_v53, 1  ;;  %v1366_v8 = vshrl.u32 %v3724_v58, 16  ;;  %v1374_v22 = vshrl.u32 %v3746_v3, 16  ;;  %v3826_v53 = vld [vmem:[%s3610_s10 + $0x58] sm:$0xff]  }
  0x19   : > { %3024 = vmatpush3.bf16.msra.mxu0 %v3424_v10  ;;  %2857 = vmatprep.subr.bf16.mxu1 %v3525_v1  ;;  %v1328_v25 = vor.u32 %v1327_v21, %v1323_v20  ;;  %v1341_v40 = vsel %vm773_vm1, %v1336_v35, %v1340_v36  ;;  %v1352_v56 = vor.u32 %v1350_v52, %v1348_v47  ;;  %v1364_v5 = vrot.slane %v1362_v0, 1  ;;  %v1730_v20 = vld [vmem:[%s3610_s10 + $0x8] sm:$0xe] }
  0x1a   : > { %3025 = vmatprep.subr.bf16.mxu0 %v3525_v1  ;;  %v1349_v51 = vsel %vm773_vm1, %v1344_v46, %v1348_v47  ;;  %v1360_v4 = vor.u32 %v1358_v63, %v1356_v57  ;;  %v1370_v10 = vshll.u32 %v3746_v3, 16  ;;  %v1759_v33 = vrot.slane %v3693_v45, 1  ;;  %v3454_v45 = vld [vmem:[%s3610_s10 + $0x38] sm:$0xff]   ;;  %v3460_v63 = vld [vmem:[%s3610_s10 + $0x48] sm:$0xff]  }
  0x1b   : > { %v1333_v30 = vsel %vm773_vm1, %v1328_v25, %v1332_v26  ;;  %v1357_v62 = vsel %vm773_vm1, %v1352_v56, %v1356_v57  ;;  %v1368_v15 = vor.u32 %v1366_v8, %v1364_v5  ;;  %v1755_v25 = vrot.slane %v3650_v27, 1  ;;  %v3853_v8 = vld [vmem:[%s3610_s10 + $0x68] sm:$0xff]  }
  0x1c   : > { %2858 = vmatpush3.bf16.msra.mxu1 %v3425_v11  ;;  %v1365_v9 = vsel %vm773_vm1, %v1360_v4, %v1364_v5  ;;  %v3477_v11 = vld [vmem:[%s4127_s1 + $0x78] sm:$0xff]   ;;  %v1372_v17 = vrot.slane %v1370_v10, 1  ;;  %v1757_v27 = vrot.slane %v3671_v37, 1  ;;  %v1402_v57 = vshll.u32 %v3826_v53, 16 }
  0x1d   : > { %3026 = vmatpush3.bf16.msra.mxu0 %v3426_v14  ;;  %2859 = vmatprep.subr.bf16.mxu1 %v3525_v1  ;;  %v3768_v14 = vld [vmem:[%s3610_s10 + $0x40] sm:$0xff]  }
  0x1e   : > { %3027 = vmatprep.subr.bf16.mxu0 %v3525_v1  ;;  %v1373_v21 = vsel %vm773_vm1, %v1368_v15, %v1372_v17  ;;  %v3794_v32 = vsel %vm1751_vm2, %v1755_v25, %v1757_v27 }
  0x20   : > { %2860 = vmatpush3.bf16.msra.mxu1 %v3427_v18  ;;  %v3448_v18 = vld [vmem:[%s3610_s10 + $0x28] sm:$0xff]  }
  0x21   : > { %3028 = vmatpush3.bf16.msra.mxu0 %v3428_v19  ;;  %2861 = vmatprep.subr.bf16.mxu1 %v3525_v1  ;;  %v1378_v19 = vshll.u32 %v3768_v14, 16 }
  0x22   : > { %3029 = vmatprep.subr.bf16.mxu0 %v3525_v1 }
  0x24   : > { %2862 = vmatpush3.bf16.msra.mxu1 %v3429_v23  ;;  %v2567_v23 = vcombine.low %v1730_v20, %v3622_v13  ;;  %v3455_v13 = vld [vmem:[%s3610_s10 + $0x48] sm:$0xff]   ;;  %v3465_v20 = vld [vmem:[%s3610_s10 + $0x58] sm:$0xff]  }
  0x25   : > { %3030 = vmatpush3.bf16.msra.mxu0 %v3430_v24  ;;  %2931 = vmatprep.subr.bf16.mxu1 %v3525_v1  ;;  %v1753_v24 = vrot.slane %v3630_v16, 1  ;;  %v1386_v36 = vshll.u32 %v3455_v13, 16  ;;  %v1390_v47 = vshrl.u32 %v3455_v13, 16 }
  0x26   : > { %3099 = vmatprep.subr.bf16.mxu0 %v3525_v1  ;;  %v1752_v26 = vrot.slane %v2567_v23, 1 }
  0x27   : > { %2864 = vmatmul.mubr.bf16.vlgmr.msra.gmra.mrb[0].mxu1 %v3431_v28  ;;  %v1380_v28 = vrot.slane %v1378_v19, 1  ;;  %v1388_v42 = vrot.slane %v1386_v36, 1  ;;  %v3870_v19 = vld [vmem:[%s3610_s10 + $0x70] sm:$0xff]  }
  0x28   : > { %3032 = vmatmul.mubr.bf16.vlgmr.msra.gmra.mrb[0].mxu0 %v1333_v30  ;;  %2932 = vmatpush3.bf16.msra.mxu1 %v3434_v29  ;;  %v3783_v29 = vsel %vm1751_vm2, %v1753_v24, %v1755_v25  ;;  %v1376_v30 = vor.u32 %v1374_v22, %v1372_v17  ;;  %v3789_v16 = vsel %vm1751_vm2, %v1752_v26, %v1753_v24  ;;  %v1422_v22 = vshrl.u32 %v3853_v8, 16  ;;  %v3881_v26 = vld [vmem:[%s3610_s10 + $0x78] sm:$0xff]  }
  0x29   : > { %3100 = vmatpush3.bf16.msra.mxu0 %v3435_v31  ;;  %2867 = vmatprep.mubr.msk.bf16.mxu1 %vm3526_vm0, %v3525_v1  ;;  %v3450_v31 = vld [vmem:[%s3610_s10 + $0x30] sm:$0xff]   ;;  %v1426_v23 = vshll.u32 %v3870_v19, 16 }
  0x2a   : > { %3035 = vmatprep.mubr.msk.bf16.mxu0 %vm3526_vm0, %v3525_v1  ;;  %2933 = vmatprep.subr.bf16.mxu1 %v3525_v1  ;;  %v1381_v35 = vsel %vm773_vm1, %v1376_v30, %v1380_v28 }
  0x2b   : > { %3101 = vmatprep.subr.bf16.mxu0 %v3525_v1  ;;  %v1428_v25 = vrot.slane %v1426_v23, 1 }
  0x2c   : > { %2934 = vmatpush3.bf16.msra.mxu1 %v3440_v34  ;;  %v1382_v34 = vshrl.u32 %v3768_v14, 16 }
  0x2d   : > { %3102 = vmatpush3.bf16.msra.mxu0 %v3441_v38  ;;  %2935 = vmatprep.subr.bf16.mxu1 %v3525_v1  ;;  %v3800_v38 = vsel %vm1751_vm2, %v1757_v27, %v1759_v33  ;;  %v1434_v27 = vshll.u32 %v3881_v26, 16 }
  0x2e   : > { %3103 = vmatprep.subr.bf16.mxu0 %v3525_v1  ;;  %v1384_v41 = vor.u32 %v1382_v34, %v1380_v28  ;;  %v3468_v28 = vld [vmem:[%s3610_s10 + $0x60] sm:$0xff]  }
  0x2f   : > { %2868 = vmatmul.mubr.bf16.gmra.mrb[4].mxu1 %v3436_v39  ;;  %v1761_v39 = vrot.slane %v3724_v58, 1  ;;  %v1767_v58 = vrot.slane %v3455_v13, 1  ;;  %v1430_v13 = vshrl.u32 %v3870_v19, 16  ;;  %v3892_v34 = vld [vmem:[%s3610_s10 + $0x80] sm:$0xff]  }
  0x30   : > { %3036 = vmatmul.mubr.bf16.gmra.mrb[4].mxu0 %v1341_v40  ;;  %2871 = vmatprep.mubr.msk.bf16.mxu1 %vm3526_vm0, %v3525_v1  ;;  %v1763_v40 = vrot.slane %v3746_v3, 1  ;;  %v1389_v46 = vsel %vm773_vm1, %v1384_v41, %v1388_v42 }
  0x31   : > { %3039 = vmatprep.mubr.msk.bf16.mxu0 %vm3526_vm0, %v3525_v1  ;;  %2936 = vmatpush3.bf16.msra.mxu1 %v3446_v43  ;;  %v3804_v37 = vsel %vm1751_vm2, %v1759_v33, %v1761_v39  ;;  %v3457_v43 = vld [vmem:[%s3610_s10 + $0x50] sm:$0xff]   ;;  %v1436_v33 = vrot.slane %v1434_v27, 1 }
  0x32   : > { %3104 = vmatpush3.bf16.msra.mxu0 %v3447_v44  ;;  %2937 = vmatprep.subr.bf16.mxu1 %v3525_v1  ;;  %v3813_v44 = vsel %vm1751_vm2, %v1761_v39, %v1763_v40  ;;  %v1398_v56 = vshrl.u32 %v3457_v43, 16  ;;  %v1769_v4 = vrot.slane %v3457_v43, 1  ;;  %v1438_v39 = vshrl.u32 %v3881_v26, 16 }
  0x33   : > { %3105 = vmatprep.subr.bf16.mxu0 %v3525_v1 }
  0x34   : > { %v3846_v5 = vsel %vm1751_vm2, %v1767_v58, %v1769_v4  ;;  %v1440_v41 = vor.u32 %v1438_v39, %v1436_v33 }
  0x35   : > { %2938 = vmatpush3.bf16.msra.mxu1 %v3452_v48  ;;  %v1394_v48 = vshll.u32 %v3457_v43, 16  ;;  %v3903_v43 = vld [vmem:[%s3610_s10 + $0x88] sm:$0xff]  }
  0x36   : > { %3106 = vmatpush3.bf16.msra.mxu0 %v3453_v49  ;;  %2939 = vmatprep.subr.bf16.mxu1 %v3525_v1  ;;  %v1765_v49 = vrot.slane %v3768_v14, 1  ;;  %v1771_v14 = vrot.slane %v3826_v53, 1 }
  0x37   : > { %2872 = vmatmul.mubr.bf16.gmra.mrb[8].mxu1 %v3438_v50  ;;  %3107 = vmatprep.subr.bf16.mxu0 %v3525_v1  ;;  %v1396_v52 = vrot.slane %v1394_v48, 1  ;;  %v1450_v48 = vshll.u32 %v3903_v43, 16 }
  0x38   : > { %3040 = vmatmul.mubr.bf16.gmra.mrb[8].mxu0 %v1349_v51  ;;  %2875 = vmatprep.mubr.msk.bf16.mxu1 %vm3526_vm0, %v3525_v1  ;;  %v3819_v50 = vsel %vm1751_vm2, %v1763_v40, %v1765_v49  ;;  %v1392_v51 = vor.u32 %v1390_v47, %v1388_v42  ;;  %v3863_v15 = vsel %vm1751_vm2, %v1769_v4, %v1771_v14  ;;  %v1442_v40 = vshll.u32 %v3892_v34, 16 }
  0x39   : > { %3043 = vmatprep.mubr.msk.bf16.mxu0 %vm3526_vm0, %v3525_v1  ;;  %2940 = vmatpush3.bf16.msra.mxu1 %v3458_v54  ;;  %v3456_v54 = vld [vmem:[%s3610_s10 + $0x40] sm:$0xff]   ;;  %v1446_v47 = vshrl.u32 %v3892_v34, 16 }
  0x3a   : > { %3108 = vmatpush3.bf16.msra.mxu0 %v3459_v55  ;;  %2941 = vmatprep.subr.bf16.mxu1 %v3525_v1  ;;  %v1397_v55 = vsel %vm773_vm1, %v1392_v51, %v1396_v52  ;;  %v1444_v42 = vrot.slane %v1442_v40, 1  ;;  %v1452_v51 = vrot.slane %v1450_v48, 1 }
  0x3b   : > { %3109 = vmatprep.subr.bf16.mxu0 %v3525_v1 }
  0x3d   : > { %2942 = vmatpush3.bf16.msra.mxu1 %v3464_v59  ;;  %v3832_v59 = vsel %vm1751_vm2, %v1765_v49, %v1767_v58  ;;  %v1448_v49 = vor.u32 %v1446_v47, %v1444_v42 }
  0x3e   : > { %3110 = vmatpush3.bf16.msra.mxu0 %v3467_v60  ;;  %2943 = vmatprep.subr.bf16.mxu1 %v3525_v1  ;;  %v1400_v60 = vor.u32 %v1398_v56, %v1396_v52  ;;  %v3914_v52 = vld [vmem:[%s3610_s10 + $0x90] ss:$0 sps:$4 sm:$0x11]  }
  0x3f   : > { %2876 = vmatmul.mubr.bf16.gmra.mrb[12].mxu1 %v3442_v61  ;;  %3111 = vmatprep.subr.bf16.mxu0 %v3525_v1  ;;  %v1404_v61 = vrot.slane %v1402_v57, 1  ;;  %v1453_v56 = vsel %vm773_vm1, %v1448_v49, %v1452_v51  ;;  %v1454_v57 = vshrl.u32 %v3903_v43, 16  ;;  %v1458_v58 = vshll.u32 %v3914_v52, 16  ;;  %v3490_v49 = vld [vmem:[%s3610_s10 + $0x38] sm:$0xff]  }
  0x40   : > { %3044 = vmatmul.mubr.bf16.gmra.mrb[12].mxu0 %v1357_v62  ;;  %2879 = vmatprep.mubr.msk.bf16.mxu1 %vm3526_vm0, %v3525_v1  ;;  %v3839_v62 = vld [vmem:[%s3610_s10 + $0x60] sm:$0xff]  }
  0x41   : > { %3047 = vmatprep.mubr.msk.bf16.mxu0 %vm3526_vm0, %v3525_v1  ;;  %2944 = vmatpush3.bf16.msra.mxu1 %v3470_v2  ;;  %v1405_v0 = vsel %vm773_vm1, %v1400_v60, %v1404_v61  ;;  %v1406_v2 = vshrl.u32 %v3826_v53, 16  ;;  %v1410_v3 = vshll.u32 %v3839_v62, 16  ;;  %v3483_v60 = vld [vmem:[%s3610_s10 + $0x8] sm:$0xff]  }
  0x42   : > { %2945 = vmatprep.subr.bf16.mxu1 %v3525_v1  ;;  %3112 = vmatpush3.bf16.msra.mxu0 %v3473_v6 }
  0x43   : > { %3113 = vmatprep.subr.bf16.mxu0 %v3525_v1  ;;  %v1408_v6 = vor.u32 %v1406_v2, %v1404_v61  ;;  %v3480_v2 = vld [vmem:[%s3610_s10 + $0x80] sm:$0xff]  }
  0x45   : > { %2946 = vmatpush3.bf16.msra.mxu1 %v3477_v11  ;;  %v1414_v11 = vshrl.u32 %v3839_v62, 16 }
  0x46   : > { %3114 = vmatpush3.bf16.msra.mxu0 %v3479_v12  ;;  %v1418_v12 = vshll.u32 %v3853_v8, 16 }
  0x47   : > { %2880 = vmatmul.mubr.bf16.gmra.mrb[16].mxu1 %v3444_v7  ;;  %v1412_v7 = vrot.slane %v1410_v3, 1 }
  0x48   : > { %3048 = vmatmul.mubr.bf16.gmra.mrb[16].mxu0 %v1365_v9  ;;  %2883 = vmatprep.mubr.msk.bf16.mxu1 %vm3526_vm0, %v3525_v1  ;;  %v3462_v9 = vld [vmem:[%s3610_s10 + $0x50] sm:$0xff]  }
  0x49   : > { %3051 = vmatprep.mubr.msk.bf16.mxu0 %vm3526_vm0, %v3525_v1  ;;  %v1413_v10 = vsel %vm773_vm1, %v1408_v6, %v1412_v7  ;;  %v1416_v17 = vor.u32 %v1414_v11, %v1412_v7  ;;  %v782_v6 = vshll.u32 %v3483_v60, 16  ;;  %v3485_v11 = vld [vmem:[%s3610_s10 + $0x10] sm:$0xff]  }
  0x4f   : > { %2884 = vmatmul.mubr.bf16.gmra.mrb[20].mxu1 %v3448_v18  ;;  %v1420_v18 = vrot.slane %v1418_v12, 1 }
  0x50   : > { %3052 = vmatmul.mubr.bf16.gmra.mrb[20].mxu0 %v1373_v21  ;;  %2887 = vmatprep.mubr.msk.bf16.mxu1 %vm3526_vm0, %v3525_v1 }
  0x51   : > { %3055 = vmatprep.mubr.msk.bf16.mxu0 %vm3526_vm0, %v3525_v1  ;;  %v1421_v21 = vsel %vm773_vm1, %v1416_v17, %v1420_v18  ;;  %v1424_v24 = vor.u32 %v1422_v22, %v1420_v18  ;;  %v786_v17 = vshrl.u32 %v3483_v60, 16  ;;  %v790_v18 = vshll.u32 %v3485_v11, 16  ;;  %v3486_v22 = vld [vmem:[%s3610_s10 + $0x18] sm:$0xff]  }
  0x52   : > { %v802_v27 = vshrl.u32 %v3486_v22, 16  ;;  %v834_v60 = vshrl.u32 %v3490_v49, 16 }
  0x53   : > { %v1429_v30 = vsel %vm773_vm1, %v1424_v24, %v1428_v25  ;;  %v794_v24 = vshrl.u32 %v3485_v11, 16 }
  0x57   : > { %2888 = vmatmul.mubr.bf16.gmra.mrb[24].mxu1 %v3450_v31  ;;  %v1432_v31 = vor.u32 %v1430_v13, %v1428_v25  ;;  %v798_v25 = vshll.u32 %v3486_v22, 16 }
  0x58   : > { %3056 = vmatmul.mubr.bf16.gmra.mrb[24].mxu0 %v1381_v35  ;;  %2891 = vmatprep.mubr.msk.bf16.mxu1 %vm3526_vm0, %v3525_v1  ;;  %v3471_v35 = vld [vmem:[%s3610_s10 + $0x68] sm:$0xff]  }
  0x59   : > { %3059 = vmatprep.mubr.msk.bf16.mxu0 %vm3526_vm0, %v3525_v1  ;;  %v1437_v36 = vsel %vm773_vm1, %v1432_v31, %v1436_v33 }
  0x5f   : > { %2892 = vmatmul.mubr.bf16.gmra.mrb[28].mxu1 %v3454_v45  ;;  %v3474_v45 = vld [vmem:[%s3610_s10 + $0x70] sm:$0xff]  }
  0x60   : > { %3060 = vmatmul.mubr.bf16.gmra.mrb[28].mxu0 %v1389_v46  ;;  %2895 = vmatprep.mubr.msk.bf16.mxu1 %vm3526_vm0, %v3525_v1  ;;  %v1445_v46 = vsel %vm773_vm1, %v1440_v41, %v1444_v42  ;;  %v3489_v42 = vld [vmem:[%s3610_s10 + $0x30] sm:$0xff]  }
  0x61   : > { %3063 = vmatprep.mubr.msk.bf16.mxu0 %vm3526_vm0, %v3525_v1  ;;  %v822_v47 = vshll.u32 %v3489_v42, 16 }
  0x63   : > { %v824_v48 = vrot.slane %v822_v47, 1 }
  0x67   : > { %2896 = vmatmul.mubr.bf16.gmra.mrb[32].mxu1 %v3456_v54  ;;  %v3476_v54 = vld [vmem:[%s3610_s10 + $0x78] sm:$0xff]  }
  0x68   : > { %3064 = vmatmul.mubr.bf16.gmra.mrb[32].mxu0 %v1397_v55  ;;  %2899 = vmatprep.mubr.msk.bf16.mxu1 %vm3526_vm0, %v3525_v1  ;;  %v3482_v55 = vld [vmem:[%s3610_s10] sm:$0xff]  }
  0x69   : > { %3067 = vmatprep.mubr.msk.bf16.mxu0 %vm3526_vm0, %v3525_v1  ;;  %v777_v61 = vshll.u32 %v3482_v55, 16  ;;  %v775_v3 = vshrl.u32 %v3482_v55, 16  ;;  %v830_v55 = vshll.u32 %v3490_v49, 16 }
  0x6b   : > { %v779_v4 = vrot.slane %v777_v61, 1 }
  0x6f   : > { %2900 = vmatmul.mubr.bf16.gmra.mrb[36].mxu1 %v3460_v63  ;;  %v1456_v63 = vor.u32 %v1454_v57, %v1452_v51  ;;  %v3491_v57 = vld [vmem:[%s3610_s10 + $0x40] sm:$0xff]  }
  0x70   : > { %3068 = vmatmul.mubr.bf16.gmra.mrb[36].mxu0 %v1405_v0  ;;  %2903 = vmatprep.mubr.msk.bf16.mxu1 %vm3526_vm0, %v3525_v1  ;;  %v1460_v0 = vrot.slane %v1458_v58, 1  ;;  %v838_v61 = vshll.u32 %v3491_v57, 16 }
  0x71   : > { %3071 = vmatprep.mubr.msk.bf16.mxu0 %vm3526_vm0, %v3525_v1 }
  0x72   : > { %v1461_v7 = vsel %vm773_vm1, %v1456_v63, %v1460_v0  ;;  %v840_v63 = vrot.slane %v838_v61, 1  ;;  %v3492_v0 = vld [vmem:[%s3610_s10 + $0x48] sm:$0xff]  }
  0x77   : > { %2904 = vmatmul.mubr.bf16.gmra.mrb[40].mxu1 %v3462_v9  ;;  %v780_v9 = vor.u32 %v779_v4, %v775_v3  ;;  %v842_v3 = vshrl.u32 %v3491_v57, 16  ;;  %v846_v4 = vshll.u32 %v3492_v0, 16 }
  0x78   : > { %3072 = vmatmul.mubr.bf16.gmra.mrb[40].mxu0 %v1413_v10  ;;  %2907 = vmatprep.mubr.msk.bf16.mxu1 %vm3526_vm0, %v3525_v1  ;;  %v784_v10 = vrot.slane %v782_v6, 1 }
  0x79   : > { %3075 = vmatprep.mubr.msk.bf16.mxu0 %vm3526_vm0, %v3525_v1  ;;  %v848_v6 = vrot.slane %v846_v4, 1 }
  0x7a   : > { %v785_v12 = vsel %vm773_vm1, %v780_v9, %v784_v10 }
  0x7f   : > { %2908 = vmatmul.mubr.bf16.gmra.mrb[44].mxu1 %v3465_v20  ;;  %v788_v20 = vor.u32 %v786_v17, %v784_v10  ;;  %v850_v10 = vshrl.u32 %v3492_v0, 16  ;;  %v3494_v17 = vld [vmem:[%s3610_s10 + $0x58] sm:$0xff]  }
  0x80   : > { %3076 = vmatmul.mubr.bf16.gmra.mrb[44].mxu0 %v1421_v21  ;;  %2911 = vmatprep.mubr.msk.bf16.mxu1 %vm3526_vm0, %v3525_v1  ;;  %v792_v21 = vrot.slane %v790_v18, 1 }
  0x81   : > { %3079 = vmatprep.mubr.msk.bf16.mxu0 %vm3526_vm0, %v3525_v1 }
  0x82   : > { %v793_v23 = vsel %vm773_vm1, %v788_v20, %v792_v21 }
  0x87   : > { %2912 = vmatmul.mubr.bf16.gmra.mrb[48].mxu1 %v3468_v28  ;;  %v800_v28 = vrot.slane %v798_v25, 1 }
  0x88   : > { %3080 = vmatmul.mubr.bf16.gmra.mrb[48].mxu0 %v1429_v30  ;;  %2915 = vmatprep.mubr.msk.bf16.mxu1 %vm3526_vm0, %v3525_v1  ;;  %v3487_v30 = vld [vmem:[%s3610_s10 + $0x20] sm:$0xff]  }
  0x89   : > { %3083 = vmatprep.mubr.msk.bf16.mxu0 %vm3526_vm0, %v3525_v1  ;;  %v806_v31 = vshll.u32 %v3487_v30, 16  ;;  %v810_v39 = vshrl.u32 %v3487_v30, 16 }
  0x8b   : > { %v808_v33 = vrot.slane %v806_v31, 1 }
  0x8f   : > { %2916 = vmatmul.mubr.bf16.gmra.mrb[52].mxu1 %v3471_v35  ;;  %v3488_v35 = vld [vmem:[%s3610_s10 + $0x28] sm:$0xff]  }
  0x90   : > { %3084 = vmatmul.mubr.bf16.gmra.mrb[52].mxu0 %v1437_v36  ;;  %2919 = vmatprep.mubr.msk.bf16.mxu1 %vm3526_vm0, %v3525_v1  ;;  %v814_v40 = vshll.u32 %v3488_v35, 16 }
  0x91   : > { %3087 = vmatprep.mubr.msk.bf16.mxu0 %vm3526_vm0, %v3525_v1 }
  0x92   : > { %v816_v41 = vrot.slane %v814_v40, 1 }
  0x97   : > { %2920 = vmatmul.mubr.bf16.gmra.mrb[56].mxu1 %v3474_v45 }
  0x98   : > { %3088 = vmatmul.mubr.bf16.gmra.mrb[56].mxu0 %v1445_v46  ;;  %2923 = vmatprep.mubr.msk.bf16.mxu1 %vm3526_vm0, %v3525_v1  ;;  %v818_v46 = vshrl.u32 %v3488_v35, 16 }
  0x99   : > { %3091 = vmatprep.mubr.msk.bf16.mxu0 %vm3526_vm0, %v3525_v1 }
  0x9f   : > { %2924 = vmatmul.mubr.bf16.gmra.mrb[60].mxu1 %v3476_v54  ;;  %v826_v54 = vshrl.u32 %v3489_v42, 16 }
  0xa0   : > { %3092 = vmatmul.mubr.bf16.gmra.mrb[60].mxu0 %v1453_v56  ;;  %2927 = vmatprep.mubr.msk.bf16.mxu1 %vm3526_vm0, %v3525_v1  ;;  %v832_v56 = vrot.slane %v830_v55, 1  ;;  %v3499_v55 = vld [vmem:[%s3610_s10 + $0x80] sm:$0xff]  }
  0xa1   : > { %3095 = vmatprep.mubr.msk.bf16.mxu0 %vm3526_vm0, %v3525_v1  ;;  %v902_v57 = vshll.u32 %v3499_v55, 16  ;;  %v906_v0 = vshrl.u32 %v3499_v55, 16 }
  0xa3   : > { %v904_v61 = vrot.slane %v902_v57, 1 }
  0xa5   : > { %v908_v4 = vor.u32 %v906_v0, %v904_v61 }
  0xa7   : > { %2928 = vmatmul.mubr.bf16.gmra.mrb[64].mxu1 %v3480_v2 }
  0xa8   : > { %3096 = vmatmul.mubr.bf16.gmra.mrb[64].mxu0 %v1461_v7  ;;  %2947 = vmatprep.mubr.msk.bf16.mxu1 %vm3526_vm0, %v3525_v1  ;;  %v3493_v7 = vld [vmem:[%s3610_s10 + $0x50] sm:$0xff]  }
  0xa9   : > { %3115 = vmatprep.mubr.msk.bf16.mxu0 %vm3526_vm0, %v3525_v1  ;;  %v854_v11 = vshll.u32 %v3493_v7, 16  ;;  %v858_v20 = vshrl.u32 %v3493_v7, 16 }
  0xaf   : > { %2948 = vmatmul.mubr.bf16.vlgmr.msra.gmra.mrb[0].mxu1 %v785_v12  ;;  %v856_v12 = vrot.slane %v854_v11, 1 }
  0xb0   : > { %3116 = vmatmul.mubr.bf16.vlgmr.msra.gmra.mrb[0].mxu0 %v3789_v16  ;;  %2951 = vmatprep.mubr.msk.bf16.mxu1 %vm3526_vm0, %v3525_v1  ;;  %v796_v16 = vor.u32 %v794_v24, %v792_v21  ;;  %v862_v21 = vshll.u32 %v3494_v17, 16  ;;  %v1773_v24 = vrot.slane %v3839_v62, 1  ;;  %v1775_v62 = vrot.slane %v3853_v8, 1 }
  0xb1   : > { %3119 = vmatprep.mubr.msk.bf16.mxu0 %vm3526_vm0, %v3525_v1  ;;  %v1777_v8 = vrot.slane %v3870_v19, 1  ;;  %v1779_v19 = vrot.slane %v3881_v26, 1  ;;  %v1781_v26 = vrot.slane %v3892_v34, 1 }
  0xb2   : > { %v801_v13 = vsel %vm773_vm1, %v796_v16, %v800_v28  ;;  %v864_v22 = vrot.slane %v862_v21, 1  ;;  %v866_v16 = vshrl.u32 %v3494_v17, 16 }
  0xb3   : > { %v1780_v49 = vsel %vm1751_vm2, %v1777_v8, %v1779_v19 }
  0xb4   : > { %v868_v30 = vor.u32 %v866_v16, %v864_v22 }
  0xb7   : > { %2952 = vmatmul.mubr.bf16.gmra.mrb[4].mxu1 %v793_v23  ;;  %v3495_v23 = vld [vmem:[%s3610_s10 + $0x60] sm:$0xff]  }
  0xb8   : > { %3120 = vmatmul.mubr.bf16.gmra.mrb[4].mxu0 %v3783_v29  ;;  %2955 = vmatprep.mubr.msk.bf16.mxu1 %vm3526_vm0, %v3525_v1  ;;  %v804_v29 = vor.u32 %v802_v27, %v800_v28  ;;  %v870_v28 = vshll.u32 %v3495_v23, 16  ;;  %v3496_v27 = vld [vmem:[%s3610_s10 + $0x68] sm:$0xff]  }
  0xb9   : > { %3123 = vmatprep.mubr.msk.bf16.mxu0 %vm3526_vm0, %v3525_v1  ;;  %v878_v53 = vshll.u32 %v3496_v27, 16  ;;  %v882_v40 = vshrl.u32 %v3496_v27, 16 }
  0xba   : > { %v809_v36 = vsel %vm773_vm1, %v804_v29, %v808_v33  ;;  %v874_v29 = vshrl.u32 %v3495_v23, 16 }
  0xbb   : > { %v880_v35 = vrot.slane %v878_v53, 1 }
  0xbd   : > { %v884_v42 = vor.u32 %v882_v40, %v880_v35 }
  0xbf   : > { %2956 = vmatmul.mubr.bf16.gmra.mrb[8].mxu1 %v801_v13  ;;  %v872_v13 = vrot.slane %v870_v28, 1 }
  0xc0   : > { %3124 = vmatmul.mubr.bf16.gmra.mrb[8].mxu0 %v3794_v32  ;;  %2959 = vmatprep.mubr.msk.bf16.mxu1 %vm3526_vm0, %v3525_v1  ;;  %v812_v32 = vor.u32 %v810_v39, %v808_v33 }
  0xc1   : > { %3127 = vmatprep.mubr.msk.bf16.mxu0 %vm3526_vm0, %v3525_v1  ;;  %v873_v31 = vsel %vm773_vm1, %v868_v30, %v872_v13  ;;  %v876_v33 = vor.u32 %v874_v29, %v872_v13 }
  0xc2   : > { %v817_v45 = vsel %vm773_vm1, %v812_v32, %v816_v41 }
  0xc3   : > { %v881_v39 = vsel %vm773_vm1, %v876_v33, %v880_v35 }
  0xc7   : > { %2960 = vmatmul.mubr.bf16.gmra.mrb[12].mxu1 %v809_v36  ;;  %v3497_v36 = vld [vmem:[%s3610_s10 + $0x70] sm:$0xff]  }
  0xc8   : > { %3128 = vmatmul.mubr.bf16.gmra.mrb[12].mxu0 %v3800_v38  ;;  %2963 = vmatprep.mubr.msk.bf16.mxu1 %vm3526_vm0, %v3525_v1  ;;  %v820_v38 = vor.u32 %v818_v46, %v816_v41  ;;  %v886_v32 = vshll.u32 %v3497_v36, 16  ;;  %v1778_v41 = vsel %vm1751_vm2, %v1775_v62, %v1777_v8  ;;  %v3498_v46 = vld [vmem:[%s3610_s10 + $0x78] sm:$0xff]  }
  0xc9   : > { %3131 = vmatprep.mubr.msk.bf16.mxu0 %vm3526_vm0, %v3525_v1 }
  0xca   : > { %v825_v51 = vsel %vm773_vm1, %v820_v38, %v824_v48  ;;  %v890_v38 = vshrl.u32 %v3497_v36, 16 }
  0xcf   : > { %2964 = vmatmul.mubr.bf16.gmra.mrb[16].mxu1 %v817_v45  ;;  %v888_v45 = vrot.slane %v886_v32, 1 }
  0xd0   : > { %3132 = vmatmul.mubr.bf16.gmra.mrb[16].mxu0 %v3804_v37  ;;  %2967 = vmatprep.mubr.msk.bf16.mxu1 %vm3526_vm0, %v3525_v1  ;;  %v828_v37 = vor.u32 %v826_v54, %v824_v48  ;;  %v894_v48 = vshll.u32 %v3498_v46, 16 }
  0xd1   : > { %3135 = vmatprep.mubr.msk.bf16.mxu0 %vm3526_vm0, %v3525_v1  ;;  %v889_v47 = vsel %vm773_vm1, %v884_v42, %v888_v45 }
  0xd2   : > { %v833_v58 = vsel %vm773_vm1, %v828_v37, %v832_v56  ;;  %v896_v54 = vrot.slane %v894_v48, 1 }
  0xd7   : > { %2968 = vmatmul.mubr.bf16.gmra.mrb[20].mxu1 %v825_v51  ;;  %v892_v51 = vor.u32 %v890_v38, %v888_v45 }
  0xd8   : > { %3136 = vmatmul.mubr.bf16.gmra.mrb[20].mxu0 %v3813_v44  ;;  %2971 = vmatprep.mubr.msk.bf16.mxu1 %vm3526_vm0, %v3525_v1  ;;  %v836_v44 = vor.u32 %v834_v60, %v832_v56  ;;  %v898_v56 = vshrl.u32 %v3498_v46, 16 }
  0xd9   : > { %3139 = vmatprep.mubr.msk.bf16.mxu0 %vm3526_vm0, %v3525_v1  ;;  %v897_v37 = vsel %vm773_vm1, %v892_v51, %v896_v54 }
  0xda   : > { %v841_v2 = vsel %vm773_vm1, %v836_v44, %v840_v63  ;;  %v900_v60 = vor.u32 %v898_v56, %v896_v54  ;;  %v3500_v44 = vld [vmem:[%s3610_s10 + $0x88] ss:$0 sps:$4 sm:$0x11]  }
  0xdc   : > { %v905_v34 = vsel %vm773_vm1, %v900_v60, %v904_v61 }
  0xdf   : > { %2972 = vmatmul.mubr.bf16.gmra.mrb[24].mxu1 %v833_v58  ;;  %v1782_v58 = vsel %vm1751_vm2, %v1779_v19, %v1781_v26 }
  0xe0   : > { %3140 = vmatmul.mubr.bf16.gmra.mrb[24].mxu0 %v3819_v50  ;;  %2975 = vmatprep.mubr.msk.bf16.mxu1 %vm3526_vm0, %v3525_v1  ;;  %v844_v50 = vor.u32 %v842_v3, %v840_v63  ;;  %v1783_v63 = vrot.slane %v3903_v43, 1 }
  0xe1   : > { %3143 = vmatprep.mubr.msk.bf16.mxu0 %vm3526_vm0, %v3525_v1 }
  0xe2   : > { %v849_v9 = vsel %vm773_vm1, %v844_v50, %v848_v6  ;;  %v1784_v3 = vsel %vm1751_vm2, %v1781_v26, %v1783_v63 }
  0xe7   : > { %2976 = vmatmul.mubr.bf16.gmra.mrb[28].mxu1 %v841_v2  ;;  %v910_v2 = vshll.u32 %v3500_v44, 16 }
  0xe8   : > { %3144 = vmatmul.mubr.bf16.gmra.mrb[28].mxu0 %v3832_v59  ;;  %2979 = vmatprep.mubr.msk.bf16.mxu1 %vm3526_vm0, %v3525_v1  ;;  %v852_v59 = vor.u32 %v850_v10, %v848_v6  ;;  %v1785_v6 = vrot.slane %v3914_v52, 1 }
  0xe9   : > { %3147 = vmatprep.mubr.msk.bf16.mxu0 %vm3526_vm0, %v3525_v1  ;;  %v912_v50 = vrot.slane %v910_v2, 1 }
  0xea   : > { %v857_v18 = vsel %vm773_vm1, %v852_v59, %v856_v12  ;;  %v1786_v7 = vsel %vm1751_vm2, %v1783_v63, %v1785_v6 }
  0xeb   : > { %v913_v43 = vsel %vm773_vm1, %v908_v4, %v912_v50 }
  0xef   : > { %2980 = vmatmul.mubr.bf16.gmra.mrb[32].mxu1 %v849_v9  ;;  %v4058_v9 = vld [vmem:[%s4128_s2] ss:$0 sm:$0xff] }
  0xf0   : > { %3148 = vmatmul.mubr.bf16.gmra.mrb[32].mxu0 %v3846_v5  ;;  %2983 = vmatprep.mubr.msk.bf16.mxu1 %vm3526_vm0, %v3525_v1  ;;  %v860_v5 = vor.u32 %v858_v20, %v856_v12 }
  0xf1   : > { %3151 = vmatprep.mubr.msk.bf16.mxu0 %vm3526_vm0, %v3525_v1 }
  0xf2   : > { %v865_v25 = vsel %vm773_vm1, %v860_v5, %v864_v22 }
  0xf7   : > { %2984 = vmatmul.mubr.bf16.gmra.mrb[36].mxu1 %v857_v18 }
  0xf8   : > { %3152 = vmatmul.mubr.bf16.gmra.mrb[36].mxu0 %v3863_v15  ;;  %2987 = vmatprep.mubr.msk.bf16.mxu1 %vm3526_vm0, %v3525_v1  ;;  %v1774_v15 = vsel %vm1751_vm2, %v1771_v14, %v1773_v24  ;;  %v1776_v14 = vsel %vm1751_vm2, %v1773_v24, %v1775_v62 }
  0xf9   : > { %3155 = vmatprep.mubr.msk.bf16.mxu0 %vm3526_vm0, %v3525_v1 }
  0xff   : > { %2988 = vmatmul.mubr.bf16.gmra.mrb[40].mxu1 %v865_v25 }
 0x100   : > { %3156 = vmatmul.mubr.bf16.gmra.mrb[40].mxu0 %v1774_v15  ;;  %2991 = vmatprep.mubr.msk.bf16.mxu1 %vm3526_vm0, %v3525_v1 }
 0x101   : > { %3159 = vmatprep.mubr.msk.bf16.mxu0 %vm3526_vm0, %v3525_v1 }
 0x107   : > { %2992 = vmatmul.mubr.bf16.gmra.mrb[44].mxu1 %v873_v31 }
 0x108   : > { %3160 = vmatmul.mubr.bf16.gmra.mrb[44].mxu0 %v1776_v14  ;;  %2995 = vmatprep.mubr.msk.bf16.mxu1 %vm3526_vm0, %v3525_v1 }
 0x109   : > { %3163 = vmatprep.mubr.msk.bf16.mxu0 %vm3526_vm0, %v3525_v1 }
 0x10f   : > { %2996 = vmatmul.mubr.bf16.gmra.mrb[48].mxu1 %v881_v39 }
 0x110   : > { %3164 = vmatmul.mubr.bf16.gmra.mrb[48].mxu0 %v1778_v41  ;;  %2999 = vmatprep.mubr.msk.bf16.mxu1 %vm3526_vm0, %v3525_v1 }
 0x111   : > { %3167 = vmatprep.mubr.msk.bf16.mxu0 %vm3526_vm0, %v3525_v1 }
 0x117   : > { %3000 = vmatmul.mubr.bf16.gmra.mrb[52].mxu1 %v889_v47 }
 0x118   : > { %3168 = vmatmul.mubr.bf16.gmra.mrb[52].mxu0 %v1780_v49  ;;  %3003 = vmatprep.mubr.msk.bf16.mxu1 %vm3526_vm0, %v3525_v1 }
 0x119   : > { %3171 = vmatprep.mubr.msk.bf16.mxu0 %vm3526_vm0, %v3525_v1 }
 0x11f   : > { %3004 = vmatmul.mubr.bf16.gmra.mrb[56].mxu1 %v897_v37 }
 0x120   : > { %3172 = vmatmul.mubr.bf16.gmra.mrb[56].mxu0 %v1782_v58  ;;  %3007 = vmatprep.mubr.msk.bf16.mxu1 %vm3526_vm0, %v3525_v1 }
 0x121   : > { %3175 = vmatprep.mubr.msk.bf16.mxu0 %vm3526_vm0, %v3525_v1 }
 0x127   : > { %3008 = vmatmul.mubr.bf16.gmra.mrb[60].mxu1 %v905_v34 }
 0x128   : > { %3176 = vmatmul.mubr.bf16.gmra.mrb[60].mxu0 %v1784_v3  ;;  %3011 = vmatprep.mubr.msk.bf16.mxu1 %vm3526_vm0, %v3525_v1 }
 0x129   : > { %3179 = vmatprep.mubr.msk.bf16.mxu0 %vm3526_vm0, %v3525_v1 }
 0x12f   : > { %3012 = vmatmul.mubr.bf16.gmra.mrb[64].mxu1 %v913_v43 }
 0x130   : > { %3180 = vmatmul.mubr.bf16.gmra.mrb[64].mxu0 %v1786_v7 }
 0x182   : > { %v1013_v10 = vpop.f32.mrb[0].mxu1 }
 0x183   : > { %v3183_v11 = vadd.f32 %v4058_v9, %v1013_v10  ;;  %v1886_v59 = vpop.f32.mrb[0].mxu0  ;;  %v2949_v12 = vpop.f32.mrb[1].mxu1 }
 0x184   : > { %v3117_v1 = vpop.f32.mrb[1].mxu0  ;;  %v1016_v17 = vpop.f32.mrb[2].mxu1 }
 0x185   : > { %v3184_v52 = vadd.f32 %v3183_v11, %v1886_v59  ;;  %v3185_v18 = vadd.f32 %v4058_v9, %v1016_v17  ;;  %v1889_v20 = vpop.f32.mrb[2].mxu0  ;;  %v2950_v21 = vpop.f32.mrb[3].mxu1 }
 0x186   : > { %v3118_v5 = vpop.f32.mrb[3].mxu0 }
 0x187   : > { %v2089_v22 = vmul.f32 0.2, %v3184_v52  ;;  %v3186_v23 = vadd.f32 %v3185_v18, %v1889_v20  ;;  %vm2055_vm3 = vcmp.ge.f32.partialorder %v3184_v52, 0.0 }
 0x189   : > { %vm2056_vm4 = vcmp.ge.f32.partialorder %v3186_v23, 0.0  ;;  %v2090_v24 = vmul.f32 0.2, %v3186_v23  ;;  %v2123_v16 = vsel %vm2055_vm3, %v3184_v52, %v2089_v22 }
 0x18a   : > { %v1021_v25 = vpop.f32.mrb[4].mxu1 }
 0x18b   : > { %v2124_v28 = vsel %vm2056_vm4, %v3186_v23, %v2090_v24  ;;  %v3187_v15 = vadd.f32 %v4058_v9, %v1021_v25  ;;  %v1894_v30 = vpop.f32.mrb[4].mxu0  ;;  %v2953_v13 = vpop.f32.mrb[5].mxu1 }
 0x18c   : > { %v2649_v27 = vpack.c.bf16 %v2124_v28, %v2123_v16  ;;  %v3121_v62 = vpop.f32.mrb[5].mxu0  ;;  %v1024_v31 = vpop.f32.mrb[6].mxu1 }
 0x18d   : > { %v3188_v29 = vadd.f32 %v3187_v15, %v1894_v30  ;;  %v3189_v53 = vadd.f32 %v4058_v9, %v1024_v31  ;;  %v1897_v14 = vpop.f32.mrb[6].mxu0  ;;  %v2954_v33 = vpop.f32.mrb[7].mxu1 }
 0x18e   : > { %2650 = vst [vmem:[%s4066_s21] sm:$0xff] %v2649_v27   ;;  %v3122_v35 = vpop.f32.mrb[7].mxu0 }
 0x18f   : > { %v2091_v36 = vmul.f32 0.2, %v3188_v29  ;;  %v3190_v8 = vadd.f32 %v3189_v53, %v1897_v14  ;;  %vm2057_vm5 = vcmp.ge.f32.partialorder %v3188_v29, 0.0 }
 0x191   : > { %vm2058_vm6 = vcmp.ge.f32.partialorder %v3190_v8, 0.0  ;;  %v2092_v39 = vmul.f32 0.2, %v3190_v8  ;;  %v2125_v32 = vsel %vm2057_vm5, %v3188_v29, %v2091_v36 }
 0x192   : > { %v1029_v40 = vpop.f32.mrb[8].mxu1 }
 0x193   : > { %v2126_v41 = vsel %vm2058_vm6, %v3190_v8, %v2092_v39  ;;  %v3191_v42 = vadd.f32 %v4058_v9, %v1029_v40  ;;  %v1902_v45 = vpop.f32.mrb[8].mxu0  ;;  %v2957_v46 = vpop.f32.mrb[9].mxu1 }
 0x194   : > { %v2654_v19 = vpack.c.bf16 %v2126_v41, %v2125_v32  ;;  %v3125_v47 = vpop.f32.mrb[9].mxu0  ;;  %v1032_v38 = vpop.f32.mrb[10].mxu1 }
 0x195   : > { %v3192_v48 = vadd.f32 %v3191_v42, %v1902_v45  ;;  %v3193_v49 = vadd.f32 %v4058_v9, %v1032_v38  ;;  %v1905_v51 = vpop.f32.mrb[10].mxu0  ;;  %v2958_v54 = vpop.f32.mrb[11].mxu1 }
 0x196   : > { %2731 = vst [vmem:[%s4066_s21 + $0x8] sm:$0xff] %v2654_v19   ;;  %v3126_v55 = vpop.f32.mrb[11].mxu0 }
 0x197   : > { %v2093_v26 = vmul.f32 0.2, %v3192_v48  ;;  %v3194_v37 = vadd.f32 %v3193_v49, %v1905_v51  ;;  %vm2059_vm7 = vcmp.ge.f32.partialorder %v3192_v48, 0.0 }
 0x199   : > { %vm2060_vm8 = vcmp.ge.f32.partialorder %v3194_v37, 0.0  ;;  %v2094_v56 = vmul.f32 0.2, %v3194_v37  ;;  %v2127_v58 = vsel %vm2059_vm7, %v3192_v48, %v2093_v26 }
 0x19a   : > { %v1037_v57 = vpop.f32.mrb[12].mxu1 }
 0x19b   : > { %v2128_v60 = vsel %vm2060_vm8, %v3194_v37, %v2094_v56  ;;  %v3195_v61 = vadd.f32 %v4058_v9, %v1037_v57  ;;  %v1910_v44 = vpop.f32.mrb[12].mxu0  ;;  %v2961_v63 = vpop.f32.mrb[13].mxu1 }
 0x19c   : > { %v2659_v34 = vpack.c.bf16 %v2128_v60, %v2127_v58  ;;  %v3129_v0 = vpop.f32.mrb[13].mxu0  ;;  %v1040_v2 = vpop.f32.mrb[14].mxu1 }
 0x19d   : > { %v3196_v3 = vadd.f32 %v3195_v61, %v1910_v44  ;;  %v3197_v4 = vadd.f32 %v4058_v9, %v1040_v2  ;;  %v1913_v50 = vpop.f32.mrb[14].mxu0  ;;  %v2962_v6 = vpop.f32.mrb[15].mxu1 }
 0x19e   : > { %2732 = vst [vmem:[%s4066_s21 + $0x10] sm:$0xff] %v2659_v34   ;;  %v3130_v43 = vpop.f32.mrb[15].mxu0 }
 0x19f   : > { %v2095_v7 = vmul.f32 0.2, %v3196_v3  ;;  %v3198_v10 = vadd.f32 %v3197_v4, %v1913_v50  ;;  %vm2061_vm9 = vcmp.ge.f32.partialorder %v3196_v3, 0.0 }
 0x1a1   : > { %vm2062_vm10 = vcmp.ge.f32.partialorder %v3198_v10, 0.0  ;;  %v2096_v11 = vmul.f32 0.2, %v3198_v10  ;;  %v2129_v12 = vsel %vm2061_vm9, %v3196_v3, %v2095_v7 }
 0x1a2   : > { %v1045_v59 = vpop.f32.mrb[16].mxu1 }
 0x1a3   : > { %v2130_v1 = vsel %vm2062_vm10, %v3198_v10, %v2096_v11  ;;  %v3199_v17 = vadd.f32 %v4058_v9, %v1045_v59  ;;  %v1918_v52 = vpop.f32.mrb[16].mxu0  ;;  %v2965_v18 = vpop.f32.mrb[17].mxu1 }
 0x1a4   : > { %v2664_v20 = vpack.c.bf16 %v2130_v1, %v2129_v12  ;;  %v3133_v21 = vpop.f32.mrb[17].mxu0  ;;  %v1048_v5 = vpop.f32.mrb[18].mxu1 }
 0x1a5   : > { %v3200_v22 = vadd.f32 %v3199_v17, %v1918_v52  ;;  %v3201_v23 = vadd.f32 %v4058_v9, %v1048_v5  ;;  %v1921_v24 = vpop.f32.mrb[18].mxu0  ;;  %v2966_v25 = vpop.f32.mrb[19].mxu1 }
 0x1a6   : > { %2733 = vst [vmem:[%s4066_s21 + $0x18] sm:$0xff] %v2664_v20   ;;  %v3134_v16 = vpop.f32.mrb[19].mxu0 }
 0x1a7   : > { %v2097_v28 = vmul.f32 0.2, %v3200_v22  ;;  %v3202_v15 = vadd.f32 %v3201_v23, %v1921_v24  ;;  %vm2063_vm11 = vcmp.ge.f32.partialorder %v3200_v22, 0.0 }
 0x1a9   : > { %vm2064_vm12 = vcmp.ge.f32.partialorder %v3202_v15, 0.0  ;;  %v2098_v30 = vmul.f32 0.2, %v3202_v15  ;;  %v2131_v27 = vsel %vm2063_vm11, %v3200_v22, %v2097_v28 }
 0x1aa   : > { %v1053_v13 = vpop.f32.mrb[20].mxu1 }
 0x1ab   : > { %v2132_v62 = vsel %vm2064_vm12, %v3202_v15, %v2098_v30  ;;  %v3203_v31 = vadd.f32 %v4058_v9, %v1053_v13  ;;  %v1926_v29 = vpop.f32.mrb[20].mxu0  ;;  %v2969_v53 = vpop.f32.mrb[21].mxu1 }
 0x1ac   : > { %v2669_v14 = vpack.c.bf16 %v2132_v62, %v2131_v27  ;;  %v3137_v33 = vpop.f32.mrb[21].mxu0  ;;  %v1056_v35 = vpop.f32.mrb[22].mxu1 }
 0x1ad   : > { %v3204_v36 = vadd.f32 %v3203_v31, %v1926_v29  ;;  %v3205_v8 = vadd.f32 %v4058_v9, %v1056_v35  ;;  %v1929_v39 = vpop.f32.mrb[22].mxu0  ;;  %v2970_v40 = vpop.f32.mrb[23].mxu1 }
 0x1ae   : > { %2734 = vst [vmem:[%s4066_s21 + $0x20] sm:$0xff] %v2669_v14   ;;  %v3138_v32 = vpop.f32.mrb[23].mxu0 }
 0x1af   : > { %v2099_v41 = vmul.f32 0.2, %v3204_v36  ;;  %v3206_v42 = vadd.f32 %v3205_v8, %v1929_v39  ;;  %vm2065_vm13 = vcmp.ge.f32.partialorder %v3204_v36, 0.0 }
 0x1b1   : > { %vm2066_vm14 = vcmp.ge.f32.partialorder %v3206_v42, 0.0  ;;  %v2100_v45 = vmul.f32 0.2, %v3206_v42  ;;  %v2133_v19 = vsel %vm2065_vm13, %v3204_v36, %v2099_v41 }
 0x1b2   : > { %v1061_v46 = vpop.f32.mrb[24].mxu1 }
 0x1b3   : > { %v2134_v47 = vsel %vm2066_vm14, %v3206_v42, %v2100_v45  ;;  %v3207_v38 = vadd.f32 %v4058_v9, %v1061_v46  ;;  %v1934_v48 = vpop.f32.mrb[24].mxu0  ;;  %v2973_v49 = vpop.f32.mrb[25].mxu1 }
 0x1b4   : > { %v2674_v51 = vpack.c.bf16 %v2134_v47, %v2133_v19  ;;  %v3141_v54 = vpop.f32.mrb[25].mxu0  ;;  %v1064_v55 = vpop.f32.mrb[26].mxu1 }
 0x1b5   : > { %v3208_v26 = vadd.f32 %v3207_v38, %v1934_v48  ;;  %v3209_v37 = vadd.f32 %v4058_v9, %v1064_v55  ;;  %v1937_v56 = vpop.f32.mrb[26].mxu0  ;;  %v2974_v57 = vpop.f32.mrb[27].mxu1 }
 0x1b6   : > { %2735 = vst [vmem:[%s4066_s21 + $0x28] sm:$0xff] %v2674_v51   ;;  %v3142_v58 = vpop.f32.mrb[27].mxu0 }
 0x1b7   : > { %v2101_v60 = vmul.f32 0.2, %v3208_v26  ;;  %v3210_v61 = vadd.f32 %v3209_v37, %v1937_v56  ;;  %vm2067_vm15 = vcmp.ge.f32.partialorder %v3208_v26, 0.0 }
 0x1b9   : > { %vm2068_vm0 = vcmp.ge.f32.partialorder %v3210_v61, 0.0  ;;  %v2102_v44 = vmul.f32 0.2, %v3210_v61  ;;  %v2135_v34 = vsel %vm2067_vm15, %v3208_v26, %v2101_v60 }
 0x1ba   : > { %v1069_v63 = vpop.f32.mrb[28].mxu1 }
 0x1bb   : > { %v2136_v0 = vsel %vm2068_vm0, %v3210_v61, %v2102_v44  ;;  %v3211_v2 = vadd.f32 %v4058_v9, %v1069_v63  ;;  %v1942_v3 = vpop.f32.mrb[28].mxu0  ;;  %v2977_v4 = vpop.f32.mrb[29].mxu1 }
 0x1bc   : > { %v2679_v50 = vpack.c.bf16 %v2136_v0, %v2135_v34  ;;  %v3145_v6 = vpop.f32.mrb[29].mxu0  ;;  %v1072_v43 = vpop.f32.mrb[30].mxu1 }
 0x1bd   : > { %v3212_v7 = vadd.f32 %v3211_v2, %v1942_v3  ;;  %v3213_v10 = vadd.f32 %v4058_v9, %v1072_v43  ;;  %v1945_v11 = vpop.f32.mrb[30].mxu0  ;;  %v2978_v59 = vpop.f32.mrb[31].mxu1 }
 0x1be   : > { %2736 = vst [vmem:[%s4066_s21 + $0x30] sm:$0xff] %v2679_v50   ;;  %v3146_v12 = vpop.f32.mrb[31].mxu0 }
 0x1bf   : > { %v2103_v1 = vmul.f32 0.2, %v3212_v7  ;;  %v3214_v17 = vadd.f32 %v3213_v10, %v1945_v11  ;;  %vm2069_vm1 = vcmp.ge.f32.partialorder %v3212_v7, 0.0 }
 0x1c1   : > { %vm2070_vm2 = vcmp.ge.f32.partialorder %v3214_v17, 0.0  ;;  %v2104_v52 = vmul.f32 0.2, %v3214_v17  ;;  %v2137_v20 = vsel %vm2069_vm1, %v3212_v7, %v2103_v1 }
 0x1c2   : > { %v1077_v18 = vpop.f32.mrb[32].mxu1 }
 0x1c3   : > { %v2138_v21 = vsel %vm2070_vm2, %v3214_v17, %v2104_v52  ;;  %v3215_v5 = vadd.f32 %v4058_v9, %v1077_v18  ;;  %v1950_v22 = vpop.f32.mrb[32].mxu0  ;;  %v2981_v23 = vpop.f32.mrb[33].mxu1 }
 0x1c4   : > { %v2684_v24 = vpack.c.bf16 %v2138_v21, %v2137_v20  ;;  %v3149_v25 = vpop.f32.mrb[33].mxu0  ;;  %v1080_v16 = vpop.f32.mrb[34].mxu1 }
 0x1c5   : > { %v3216_v28 = vadd.f32 %v3215_v5, %v1950_v22  ;;  %v3217_v15 = vadd.f32 %v4058_v9, %v1080_v16  ;;  %v1953_v30 = vpop.f32.mrb[34].mxu0  ;;  %v2982_v13 = vpop.f32.mrb[35].mxu1 }
 0x1c6   : > { %2737 = vst [vmem:[%s4066_s21 + $0x38] sm:$0xff] %v2684_v24   ;;  %v3150_v27 = vpop.f32.mrb[35].mxu0 }
 0x1c7   : > { %v2105_v62 = vmul.f32 0.2, %v3216_v28  ;;  %v3218_v31 = vadd.f32 %v3217_v15, %v1953_v30  ;;  %vm2071_vm3 = vcmp.ge.f32.partialorder %v3216_v28, 0.0 }
 0x1c9   : > { %vm2072_vm4 = vcmp.ge.f32.partialorder %v3218_v31, 0.0  ;;  %v2106_v29 = vmul.f32 0.2, %v3218_v31  ;;  %v2139_v14 = vsel %vm2071_vm3, %v3216_v28, %v2105_v62 }
 0x1ca   : > { %v1085_v53 = vpop.f32.mrb[36].mxu1 }
 0x1cb   : > { %v2140_v33 = vsel %vm2072_vm4, %v3218_v31, %v2106_v29  ;;  %v3219_v35 = vadd.f32 %v4058_v9, %v1085_v53  ;;  %v1958_v36 = vpop.f32.mrb[36].mxu0  ;;  %v2985_v8 = vpop.f32.mrb[37].mxu1 }
 0x1cc   : > { %v2689_v39 = vpack.c.bf16 %v2140_v33, %v2139_v14  ;;  %v3153_v40 = vpop.f32.mrb[37].mxu0  ;;  %v1088_v32 = vpop.f32.mrb[38].mxu1 }
 0x1cd   : > { %v3220_v41 = vadd.f32 %v3219_v35, %v1958_v36  ;;  %v3221_v42 = vadd.f32 %v4058_v9, %v1088_v32  ;;  %v1961_v45 = vpop.f32.mrb[38].mxu0  ;;  %v2986_v46 = vpop.f32.mrb[39].mxu1 }
 0x1ce   : > { %2738 = vst [vmem:[%s4066_s21 + $0x40] sm:$0xff] %v2689_v39   ;;  %v3154_v19 = vpop.f32.mrb[39].mxu0 }
 0x1cf   : > { %v2107_v47 = vmul.f32 0.2, %v3220_v41  ;;  %v3222_v38 = vadd.f32 %v3221_v42, %v1961_v45  ;;  %vm2073_vm5 = vcmp.ge.f32.partialorder %v3220_v41, 0.0 }
 0x1d1   : > { %vm2074_vm6 = vcmp.ge.f32.partialorder %v3222_v38, 0.0  ;;  %v2108_v48 = vmul.f32 0.2, %v3222_v38  ;;  %v2141_v51 = vsel %vm2073_vm5, %v3220_v41, %v2107_v47 }
 0x1d2   : > { %v1093_v49 = vpop.f32.mrb[40].mxu1 }
 0x1d3   : > { %v2142_v54 = vsel %vm2074_vm6, %v3222_v38, %v2108_v48  ;;  %v3223_v55 = vadd.f32 %v4058_v9, %v1093_v49  ;;  %v1966_v26 = vpop.f32.mrb[40].mxu0  ;;  %v2989_v37 = vpop.f32.mrb[41].mxu1 }
 0x1d4   : > { %v2694_v56 = vpack.c.bf16 %v2142_v54, %v2141_v51  ;;  %v3157_v57 = vpop.f32.mrb[41].mxu0  ;;  %v1096_v58 = vpop.f32.mrb[42].mxu1 }
 0x1d5   : > { %v3224_v60 = vadd.f32 %v3223_v55, %v1966_v26  ;;  %v3225_v61 = vadd.f32 %v4058_v9, %v1096_v58  ;;  %v1969_v44 = vpop.f32.mrb[42].mxu0  ;;  %v2990_v63 = vpop.f32.mrb[43].mxu1 }
 0x1d6   : > { %2739 = vst [vmem:[%s4066_s21 + $0x48] sm:$0xff] %v2694_v56   ;;  %v3158_v34 = vpop.f32.mrb[43].mxu0 }
 0x1d7   : > { %v2109_v0 = vmul.f32 0.2, %v3224_v60  ;;  %v3226_v2 = vadd.f32 %v3225_v61, %v1969_v44  ;;  %vm2075_vm7 = vcmp.ge.f32.partialorder %v3224_v60, 0.0 }
 0x1d9   : > { %vm2076_vm8 = vcmp.ge.f32.partialorder %v3226_v2, 0.0  ;;  %v2110_v3 = vmul.f32 0.2, %v3226_v2  ;;  %v2143_v50 = vsel %vm2075_vm7, %v3224_v60, %v2109_v0 }
 0x1da   : > { %v1101_v4 = vpop.f32.mrb[44].mxu1 }
 0x1db   : > { %v2144_v6 = vsel %vm2076_vm8, %v3226_v2, %v2110_v3  ;;  %v3227_v43 = vadd.f32 %v4058_v9, %v1101_v4  ;;  %v1974_v7 = vpop.f32.mrb[44].mxu0  ;;  %v2993_v10 = vpop.f32.mrb[45].mxu1 }
 0x1dc   : > { %v2699_v11 = vpack.c.bf16 %v2144_v6, %v2143_v50  ;;  %v3161_v59 = vpop.f32.mrb[45].mxu0  ;;  %v1104_v12 = vpop.f32.mrb[46].mxu1 }
 0x1dd   : > { %v3228_v1 = vadd.f32 %v3227_v43, %v1974_v7  ;;  %v3229_v17 = vadd.f32 %v4058_v9, %v1104_v12  ;;  %v1977_v52 = vpop.f32.mrb[46].mxu0  ;;  %v2994_v18 = vpop.f32.mrb[47].mxu1 }
 0x1de   : > { %2740 = vst [vmem:[%s4066_s21 + $0x50] sm:$0xff] %v2699_v11   ;;  %v3162_v20 = vpop.f32.mrb[47].mxu0 }
 0x1df   : > { %v2111_v21 = vmul.f32 0.2, %v3228_v1  ;;  %v3230_v5 = vadd.f32 %v3229_v17, %v1977_v52  ;;  %vm2077_vm9 = vcmp.ge.f32.partialorder %v3228_v1, 0.0 }
 0x1e1   : > { %vm2078_vm10 = vcmp.ge.f32.partialorder %v3230_v5, 0.0  ;;  %v2112_v22 = vmul.f32 0.2, %v3230_v5  ;;  %v2145_v24 = vsel %vm2077_vm9, %v3228_v1, %v2111_v21 }
 0x1e2   : > { %v1109_v23 = vpop.f32.mrb[48].mxu1 }
 0x1e3   : > { %v2146_v25 = vsel %vm2078_vm10, %v3230_v5, %v2112_v22  ;;  %v3231_v16 = vadd.f32 %v4058_v9, %v1109_v23  ;;  %v1982_v28 = vpop.f32.mrb[48].mxu0  ;;  %v2997_v15 = vpop.f32.mrb[49].mxu1 }
 0x1e4   : > { %v2704_v30 = vpack.c.bf16 %v2146_v25, %v2145_v24  ;;  %v3165_v13 = vpop.f32.mrb[49].mxu0  ;;  %v1112_v27 = vpop.f32.mrb[50].mxu1 }
 0x1e5   : > { %v3232_v62 = vadd.f32 %v3231_v16, %v1982_v28  ;;  %v3233_v31 = vadd.f32 %v4058_v9, %v1112_v27  ;;  %v1985_v29 = vpop.f32.mrb[50].mxu0  ;;  %v2998_v53 = vpop.f32.mrb[51].mxu1 }
 0x1e6   : > { %2741 = vst [vmem:[%s4066_s21 + $0x58] sm:$0xff] %v2704_v30   ;;  %v3166_v14 = vpop.f32.mrb[51].mxu0 }
 0x1e7   : > { %v2113_v33 = vmul.f32 0.2, %v3232_v62  ;;  %v3234_v35 = vadd.f32 %v3233_v31, %v1985_v29  ;;  %vm2079_vm11 = vcmp.ge.f32.partialorder %v3232_v62, 0.0 }
 0x1e9   : > { %vm2080_vm12 = vcmp.ge.f32.partialorder %v3234_v35, 0.0  ;;  %v2114_v36 = vmul.f32 0.2, %v3234_v35  ;;  %v2147_v39 = vsel %vm2079_vm11, %v3232_v62, %v2113_v33 }
 0x1ea   : > { %v1117_v8 = vpop.f32.mrb[52].mxu1 }
 0x1eb   : > { %v2148_v40 = vsel %vm2080_vm12, %v3234_v35, %v2114_v36  ;;  %v3235_v32 = vadd.f32 %v4058_v9, %v1117_v8  ;;  %v1990_v41 = vpop.f32.mrb[52].mxu0  ;;  %v3001_v42 = vpop.f32.mrb[53].mxu1 }
 0x1ec   : > { %v2709_v45 = vpack.c.bf16 %v2148_v40, %v2147_v39  ;;  %v3169_v46 = vpop.f32.mrb[53].mxu0  ;;  %v1120_v19 = vpop.f32.mrb[54].mxu1 }
 0x1ed   : > { %v3236_v47 = vadd.f32 %v3235_v32, %v1990_v41  ;;  %v3237_v38 = vadd.f32 %v4058_v9, %v1120_v19  ;;  %v1993_v48 = vpop.f32.mrb[54].mxu0  ;;  %v3002_v49 = vpop.f32.mrb[55].mxu1 }
 0x1ee   : > { %2742 = vst [vmem:[%s4066_s21 + $0x60] sm:$0xff] %v2709_v45   ;;  %v3170_v51 = vpop.f32.mrb[55].mxu0 }
 0x1ef   : > { %v2115_v54 = vmul.f32 0.2, %v3236_v47  ;;  %v3238_v55 = vadd.f32 %v3237_v38, %v1993_v48  ;;  %vm2081_vm13 = vcmp.ge.f32.partialorder %v3236_v47, 0.0 }
 0x1f1   : > { %vm2082_vm14 = vcmp.ge.f32.partialorder %v3238_v55, 0.0  ;;  %v2116_v26 = vmul.f32 0.2, %v3238_v55  ;;  %v2149_v56 = vsel %vm2081_vm13, %v3236_v47, %v2115_v54 }
 0x1f2   : > { %v1125_v37 = vpop.f32.mrb[56].mxu1 }
 0x1f3   : > { %v2150_v57 = vsel %vm2082_vm14, %v3238_v55, %v2116_v26  ;;  %v3239_v58 = vadd.f32 %v4058_v9, %v1125_v37  ;;  %v1998_v60 = vpop.f32.mrb[56].mxu0  ;;  %v3005_v61 = vpop.f32.mrb[57].mxu1 }
 0x1f4   : > { %v2714_v44 = vpack.c.bf16 %v2150_v57, %v2149_v56  ;;  %v3173_v63 = vpop.f32.mrb[57].mxu0  ;;  %v1128_v34 = vpop.f32.mrb[58].mxu1 }
 0x1f5   : > { %v3240_v0 = vadd.f32 %v3239_v58, %v1998_v60  ;;  %v3241_v2 = vadd.f32 %v4058_v9, %v1128_v34  ;;  %v2001_v3 = vpop.f32.mrb[58].mxu0  ;;  %v3006_v4 = vpop.f32.mrb[59].mxu1 }
 0x1f6   : > { %2743 = vst [vmem:[%s4066_s21 + $0x68] sm:$0xff] %v2714_v44   ;;  %v3174_v50 = vpop.f32.mrb[59].mxu0 }
 0x1f7   : > { %v2117_v6 = vmul.f32 0.2, %v3240_v0  ;;  %v3242_v43 = vadd.f32 %v3241_v2, %v2001_v3  ;;  %vm2083_vm15 = vcmp.ge.f32.partialorder %v3240_v0, 0.0 }
 0x1f9   : > { %vm2084_vm0 = vcmp.ge.f32.partialorder %v3242_v43, 0.0  ;;  %v2118_v7 = vmul.f32 0.2, %v3242_v43  ;;  %v2151_v11 = vsel %vm2083_vm15, %v3240_v0, %v2117_v6 }
 0x1fa   : > { %v1133_v10 = vpop.f32.mrb[60].mxu1 }
 0x1fb   : > { %v2152_v59 = vsel %vm2084_vm0, %v3242_v43, %v2118_v7  ;;  %v3243_v12 = vadd.f32 %v4058_v9, %v1133_v10  ;;  %v2006_v1 = vpop.f32.mrb[60].mxu0  ;;  %v3009_v17 = vpop.f32.mrb[61].mxu1 }
 0x1fc   : > { %v2719_v52 = vpack.c.bf16 %v2152_v59, %v2151_v11  ;;  %v3177_v18 = vpop.f32.mrb[61].mxu0  ;;  %v1136_v20 = vpop.f32.mrb[62].mxu1 }
 0x1fd   : > { %v3244_v21 = vadd.f32 %v3243_v12, %v2006_v1  ;;  %v3245_v5 = vadd.f32 %v4058_v9, %v1136_v20  ;;  %v2009_v22 = vpop.f32.mrb[62].mxu0  ;;  %v3010_v23 = vpop.f32.mrb[63].mxu1 }
 0x1fe   : > { %2744 = vst [vmem:[%s4066_s21 + $0x70] sm:$0xff] %v2719_v52   ;;  %v3178_v24 = vpop.f32.mrb[63].mxu0 }
 0x1ff   : > { %v2119_v25 = vmul.f32 0.2, %v3244_v21  ;;  %v3246_v16 = vadd.f32 %v3245_v5, %v2009_v22  ;;  %vm2085_vm1 = vcmp.ge.f32.partialorder %v3244_v21, 0.0 }
 0x201   : > { %vm2086_vm2 = vcmp.ge.f32.partialorder %v3246_v16, 0.0  ;;  %v2120_v28 = vmul.f32 0.2, %v3246_v16  ;;  %v2153_v30 = vsel %vm2085_vm1, %v3244_v21, %v2119_v25 }
 0x202   : > { %v1141_v15 = vpop.f32.mrb[64].mxu1 }
 0x203   : > { %v2154_v13 = vsel %vm2086_vm2, %v3246_v16, %v2120_v28  ;;  %v3247_v27 = vadd.f32 %v4058_v9, %v1141_v15  ;;  %v2014_v62 = vpop.f32.mrb[64].mxu0  ;;  %v3013_v31 = vpop.f32.mrb[65].mxu1 }
 0x204   : > { %v2724_v29 = vpack.c.bf16 %v2154_v13, %v2153_v30  ;;  %v3181_v53 = vpop.f32.mrb[65].mxu0  ;;  %v1144_v14 = vpop.f32.mrb[66].mxu1 }
 0x205   : > { %v3248_v33 = vadd.f32 %v3247_v27, %v2014_v62  ;;  %v3249_v35 = vadd.f32 %v4058_v9, %v1144_v14  ;;  %v2017_v36 = vpop.f32.mrb[66].mxu0  ;;  %v3014_v8 = vpop.f32.mrb[67].mxu1 }
 0x206   : > { %2745 = vst [vmem:[%s4066_s21 + $0x78] sm:$0xff] %v2724_v29   ;;  %v3182_v39 = vpop.f32.mrb[67].mxu0 }
 0x207   : > { %v2121_v40 = vmul.f32 0.2, %v3248_v33  ;;  %v3250_v32 = vadd.f32 %v3249_v35, %v2017_v36  ;;  %vm2087_vm3 = vcmp.ge.f32.partialorder %v3248_v33, 0.0 }
 0x209   : > { %vm2088_vm4 = vcmp.ge.f32.partialorder %v3250_v32, 0.0  ;;  %v2122_v41 = vmul.f32 0.2, %v3250_v32  ;;  %v2155_v42 = vsel %vm2087_vm3, %v3248_v33, %v2121_v40 }
 0x20b   : > { %v2156_v45 = vsel %vm2088_vm4, %v3250_v32, %v2122_v41 }
 0x20c   : > { %v2729_v46 = vpack.c.bf16 %v2156_v45, %v2155_v42 }
 0x20e   : > { %2746 = vst [vmem:[%s4066_s21 + $0x80] sm:$0xff] %v2729_v46  }
 0x20f PF: > { %s13_s14 = sadd.s32 1, %s3523_s14   ;;  %s4130_s12 = smov %s3519_s13 }
 0x210   : > { %p10_p5 = scmp.ge.s32.totalorder %s13_s14, 4   ;;  %s4131_s13 = smov %s4133_s15 }
 0x212   :  { %12 = sbr.rel (!%p10_p5) target bundleno = 2 (0x2), region = 71 }

// kernel: discriminator_forward.6
= control target key start
LH: loop header
LB: loop body
LE: loop exit
PB: predicated region body
PF: predicated region fallthrough
CT: control target
= control target key end

     0   :  { %s2203_s12 = smov 0   ;;  %s2205_s13 = smov 0   ;;  %s2613_s0 = inlined_call_operand.vmem [shape: bf16[2,82,256], index: 0, kind: input, shape index: {}]   ;;  %s2614_s1 = inlined_call_operand.vmem [shape: bf16[4,256,128], index: 1, kind: input, shape index: {}]   ;;  %s2615_s2 = inlined_call_operand.vmem [shape: f32[1,128], index: 2, kind: input, shape index: {}]   ;;  %s2616_s3 = inlined_call_operand.vmem [shape: bf16[2,72,128], index: 3, kind: output, shape index: {}]  }
   0x1   :  { %s2207_s14 = smov 0  }
   0x2 LB: > { %s22_s15 = sadd.s32 1, %s2177_s13  ;;  %p1621_p0 = scmp.ge.s32.totalorder %s2181_s14, 1  ;;  %s2181_s14 = sphi %s2207_s14, %s13_s14   ;;  %s2177_s13 = sphi %s2205_s13, %s2618_s13   ;;  %s2173_s12 = sphi %s2203_s12, %s2617_s12  }
   0x3   : > { %p23_p1 = scmp.ge.s32.totalorder %s22_s15, 2  ;;  %p168_p2 = scmp.lt.s32.totalorder %s2181_s14, 3 }
   0x5   : > { %s2620_s15 = smov (%p23_p1, %s22_s15), 0  ;;  %p169_p3 = pnand %p1621_p0, %p168_p2 }
   0x6   : > { %v2070_v0 = vld [vmem:[%s2614_s1 + $0x40] sm:$0xff] (!%p169_p3)   ;;  %v2074_v4 = vld [vmem:[%s2614_s1 + $0x48] sm:$0xff] (!%p169_p3)   ;;  %v2078_v8 = vld [vmem:[%s2614_s1 + $0x50] sm:$0xff] (!%p169_p3)   ;;  %p202_p4 = scmp.lt.s32.totalorder (!%p169_p3), %s2173_s12, 1  ;;  %vm578_vm0 = vsmask.f32 (!%p169_p3), 7424 }
   0x7   : > { %172 = sbr.rel (%p169_p3) target bundleno = 337 (0x151), region = 32  ;;  %v2071_v1 = vld [vmem:[%s2614_s1 + $0xc0] sm:$0xff] (!%p169_p3)   ;;  %1860 = vmatprep.subr.bf16.mxu0 (!%p169_p3), %v2070_v0  ;;  %v2075_v5 = vld [vmem:[%s2614_s1 + $0xc8] sm:$0xff] (!%p169_p3)   ;;  %v2079_v9 = vld [vmem:[%s2614_s1 + $0xd0] sm:$0xff] (!%p169_p3)   ;;  %vm1231_vm1 = vcmask (!%p169_p3), 1046528  }
   0x8   : > { %v2072_v2 = vld [vmem:[%s2614_s1] sm:$0xff] (!%p169_p3)   ;;  %1906 = vmatprep.subr.bf16.mxu1 (!%p169_p3), %v2071_v1  ;;  %v2076_v6 = vld [vmem:[%s2614_s1 + $0x8] sm:$0xff] (!%p169_p3)   ;;  %v2080_v10 = vld [vmem:[%s2614_s1 + $0x10] sm:$0xff] (!%p169_p3)  }
   0x9   : > { %v2073_v3 = vld [vmem:[%s2614_s1 + $0x80] sm:$0xff] (!%p169_p3)   ;;  %1861 = vmatpush3.bf16.msra.mxu0 (!%p169_p3), %v2072_v2  ;;  %v2077_v7 = vld [vmem:[%s2614_s1 + $0x88] sm:$0xff] (!%p169_p3)   ;;  %v2081_v11 = vld [vmem:[%s2614_s1 + $0x90] sm:$0xff] (!%p169_p3)  }
   0xa   : > { %1907 = vmatpush3.bf16.msra.mxu1 (!%p169_p3), %v2073_v3  ;;  %1862 = vmatprep.subr.bf16.mxu0 (!%p169_p3), %v2074_v4  ;;  %v2082_v12 = vld [vmem:[%s2614_s1 + $0x58] sm:$0xff] (!%p169_p3)   ;;  %v2086_v16 = vld [vmem:[%s2614_s1 + $0x60] sm:$0xff] (!%p169_p3)   ;;  %v2090_v20 = vld [vmem:[%s2614_s1 + $0x68] sm:$0xff] (!%p169_p3)  }
   0xb   : > { %1908 = vmatprep.subr.bf16.mxu1 (!%p169_p3), %v2075_v5  ;;  %v2083_v13 = vld [vmem:[%s2614_s1 + $0xd8] sm:$0xff] (!%p169_p3)   ;;  %v2087_v17 = vld [vmem:[%s2614_s1 + $0xe0] sm:$0xff] (!%p169_p3)   ;;  %v2091_v21 = vld [vmem:[%s2614_s1 + $0xe8] sm:$0xff] (!%p169_p3)  }
   0xc   : > { %v2084_v14 = vld [vmem:[%s2614_s1 + $0x18] sm:$0xff] (!%p169_p3)   ;;  %v2088_v18 = vld [vmem:[%s2614_s1 + $0x20] sm:$0xff] (!%p169_p3)   ;;  %v2092_v22 = vld [vmem:[%s2614_s1 + $0x28] sm:$0xff] (!%p169_p3)  }
   0xd   : > { %1863 = vmatpush3.bf16.msra.mxu0 (!%p169_p3), %v2076_v6  ;;  %v2085_v15 = vld [vmem:[%s2614_s1 + $0x98] sm:$0xff] (!%p169_p3)   ;;  %v2089_v19 = vld [vmem:[%s2614_s1 + $0xa0] sm:$0xff] (!%p169_p3)   ;;  %v2093_v23 = vld [vmem:[%s2614_s1 + $0xa8] sm:$0xff] (!%p169_p3)  }
   0xe   : > { %1909 = vmatpush3.bf16.msra.mxu1 %v2077_v7  ;;  %1864 = vmatprep.subr.bf16.mxu0 %v2078_v8  ;;  %s2622_s12 = smov (!%p202_p4, %s2173_s12), 1  ;;  %v2094_v24 = vld [vmem:[%s2614_s1 + $0x70] sm:$0xff]   ;;  %v2098_v28 = vld [vmem:[%s2614_s1 + $0x78] sm:$0xff]   ;;  %v2106_v40 = vld [vmem:[%s2614_s1 + $0x140] sm:$0xff]  }
   0xf   : > { %1910 = vmatprep.subr.bf16.mxu1 %v2079_v9  ;;  %v2095_v25 = vld [vmem:[%s2614_s1 + $0xf0] sm:$0xff]   ;;  %s2044_s22 = smul.u32 88, %s2622_s12  ;;  %v2099_v29 = vld [vmem:[%s2614_s1 + $0xf8] sm:$0xff]   ;;  %v2107_v45 = vld [vmem:[%s2614_s1 + $0x100] sm:$0xff]  }
  0x10   : > { %v2096_v26 = vld [vmem:[%s2614_s1 + $0x30] sm:$0xff]   ;;  %v2100_v30 = vld [vmem:[%s2614_s1 + $0x38] sm:$0xff]   ;;  %v2108_v46 = vld [vmem:[%s2614_s1 + $0x1c0] sm:$0xff]   ;;  %s2045_s10 = smul.u32 36, %s2622_s12 }
  0x11   : > { %1865 = vmatpush3.bf16.msra.mxu0 %v2080_v10  ;;  %v2097_v27 = vld [vmem:[%s2614_s1 + $0xb0] sm:$0xff]   ;;  %s2321_s6 = scalar_lea.vmem %s2613_s0, %s2044_s22  ;;  %v2101_v31 = vld [vmem:[%s2614_s1 + $0xb8] sm:$0xff]   ;;  %v2109_v53 = vld [vmem:[%s2614_s1 + $0x180] sm:$0xff]  }
  0x12   : > { %1911 = vmatpush3.bf16.msra.mxu1 %v2081_v11  ;;  %1866 = vmatprep.subr.bf16.mxu0 %v2082_v12  ;;  %v230_v32 = vld [vmem:[%s2321_s6] sm:$0xff]  ;;  %v2331_v33 = vld [vmem:[%s2321_s6 + $0x8] sm:$0xff]  ;;  %v2334_v34 = vld [vmem:[%s2321_s6 + $0x10] sm:$0xff]  ;;  %s2592_s17 = scalar_lea.vmem %s2616_s3, %s2045_s10 }
  0x13   : > { %1912 = vmatprep.subr.bf16.mxu1 %v2083_v13  ;;  %v1625_v35 = vcombine.low %v230_v32, %v2331_v33  ;;  %v1626_v36 = vcombine.high %v230_v32, %v2331_v33  ;;  %v2339_v37 = vld [vmem:[%s2321_s6 + $0x18] sm:$0xff]  ;;  %v2110_v54 = vld [vmem:[%s2614_s1 + $0x148] sm:$0xff]   ;;  %v2364_v58 = vld [vmem:[%s2321_s6 + $0x20] sm:$0xff] }
  0x14   : > { %v1686_v38 = vcombine.high %v2334_v34, %v2339_v37  ;;  %v1685_v39 = vcombine.low %v2334_v34, %v2339_v37  ;;  %v2111_v57 = vld [vmem:[%s2614_s1 + $0x108] sm:$0xff]   ;;  %v2116_v8 = vld [vmem:[%s2614_s1 + $0x150] sm:$0xff]  }
  0x15   : > { %1867 = vmatpush3.bf16.msra.mxu0 %v2084_v14  ;;  %446 = vmatprep.mubr.bf16.mxu0 %v1626_v36  ;;  %v592_v41 = vshrl.u32 %v1626_v36, 16  ;;  %v594_v42 = vshll.u32 %v1626_v36, 16  ;;  %v580_v43 = vshrl.u32 %v1625_v35, 16  ;;  %v582_v44 = vshll.u32 %v1625_v35, 16  ;;  %v2367_v59 = vld [vmem:[%s2321_s6 + $0x28] sm:$0xff]  ;;  %v2117_v12 = vld [vmem:[%s2614_s1 + $0x110] sm:$0xff]  }
  0x16   : > { %1913 = vmatpush3.bf16.msra.mxu1 %v2085_v15  ;;  %1868 = vmatprep.subr.bf16.mxu0 %v2086_v16  ;;  %v599_v47 = vshll.u32 %v1686_v38, 16  ;;  %v587_v48 = vshll.u32 %v1685_v39, 16  ;;  %v611_v60 = vshrl.u32 %v1686_v38, 16  ;;  %v603_v61 = vshrl.u32 %v1685_v39, 16  ;;  %v2113_v1 = vld [vmem:[%s2614_s1 + $0x1c8] sm:$0xff]   ;;  %v2118_v13 = vld [vmem:[%s2614_s1 + $0x1d0] sm:$0xff]  }
  0x17   : > { %1914 = vmatprep.subr.bf16.mxu1 %v2087_v17  ;;  %v596_v49 = vrot.slane %v594_v42, 1  ;;  %v584_v50 = vrot.slane %v582_v44, 1  ;;  %v1688_v0 = vcombine.high %v2364_v58, %v2367_v59  ;;  %v1687_v2 = vcombine.low %v2364_v58, %v2367_v59  ;;  %v2115_v3 = vld [vmem:[%s2614_s1 + $0x188] sm:$0xff]   ;;  %v2119_v15 = vld [vmem:[%s2614_s1 + $0x190] sm:$0xff]   ;;  %v2398_v17 = vld [vmem:[%s2321_s6 + $0x38] sm:$0xff] }
  0x18   : > { %v601_v51 = vrot.slane %v599_v47, 1  ;;  %v589_v52 = vrot.slane %v587_v48, 1  ;;  %v2395_v16 = vld [vmem:[%s2321_s6 + $0x30] sm:$0xff]  ;;  %v2127_v42 = vld [vmem:[%s2614_s1 + $0x120] sm:$0xff]  }
  0x19   : > { %1869 = vmatpush3.bf16.msra.mxu0 %v2088_v18  ;;  %v597_v55 = vor.u32 %v596_v49, %v592_v41  ;;  %v585_v56 = vor.u32 %v584_v50, %v580_v43  ;;  %v615_v5 = vshll.u32 %v1688_v0, 16  ;;  %v607_v6 = vshll.u32 %v1687_v2, 16  ;;  %v2128_v44 = vld [vmem:[%s2614_s1 + $0x1e0] sm:$0xff]  }
  0x1a   : > { %1915 = vmatpush3.bf16.msra.mxu1 %v2089_v19  ;;  %1870 = vmatprep.subr.bf16.mxu0 %v2090_v20  ;;  %v613_v4 = vor.u32 %v611_v60, %v601_v51  ;;  %v605_v7 = vor.u32 %v603_v61, %v589_v52  ;;  %v627_v9 = vshrl.u32 %v1688_v0, 16  ;;  %v2402_v18 = vcombine.high %v2331_v33, %v2334_v34  ;;  %v2130_v50 = vld [vmem:[%s2614_s1 + $0x1a0] sm:$0xff]   ;;  %v2133_v61 = vld [vmem:[%s2614_s1 + $0x128] sm:$0xff]  }
  0x1b   : > { %1916 = vmatprep.subr.bf16.mxu1 %v2091_v21  ;;  %v602_v62 = vsel %vm578_vm0, %v597_v55, %v601_v51  ;;  %v590_v63 = vsel %vm578_vm0, %v585_v56, %v589_v52  ;;  %v617_v10 = vrot.slane %v615_v5, 1  ;;  %v609_v11 = vrot.slane %v607_v6, 1  ;;  %v2121_v21 = vld [vmem:[%s2614_s1 + $0x158] sm:$0xff]   ;;  %v2136_v6 = vld [vmem:[%s2614_s1 + $0x170] sm:$0xff]  }
  0x1c   : > { %795 = vmatprep.mubr.bf16.mxu1 %v602_v62  ;;  %v1690_v20 = vcombine.high %v2395_v16, %v2398_v17 }
  0x1d   : > { %1871 = vmatpush3.bf16.msra.mxu0 %v2092_v22  ;;  %v618_v14 = vsel %vm578_vm0, %v613_v4, %v617_v10  ;;  %v610_v19 = vsel %vm578_vm0, %v605_v7, %v609_v11  ;;  %v1689_v22 = vcombine.low %v2395_v16, %v2398_v17  ;;  %v2472_v4 = vcombine.low %v2339_v37, %v2364_v58 }
  0x1e   : > { %1917 = vmatpush3.bf16.msra.mxu1 %v2093_v23  ;;  %1872 = vmatprep.subr.bf16.mxu0 %v2094_v24  ;;  %v619_v23 = vshrl.u32 %v1687_v2, 16  ;;  %v2123_v24 = vld [vmem:[%s2614_s1 + $0x118] sm:$0xff]   ;;  %v643_v43 = vshrl.u32 %v1690_v20, 16 }
  0x1f   : > { %1918 = vmatprep.subr.bf16.mxu1 %v2095_v25  ;;  %v940_v25 = vshrl.u32 %v2402_v18, 16  ;;  %v635_v52 = vshrl.u32 %v1689_v22, 16 }
  0x21   : > { %1873 = vmatpush3.bf16.msra.mxu0 %v2096_v26  ;;  %v629_v26 = vor.u32 %v627_v9, %v617_v10 }
  0x22   : > { %1919 = vmatpush3.bf16.msra.mxu1 %v2097_v27  ;;  %1874 = vmatprep.subr.bf16.mxu0 %v2098_v28  ;;  %v631_v27 = vshll.u32 %v1690_v20, 16  ;;  %v623_v28 = vshll.u32 %v1689_v22, 16 }
  0x23   : > { %1920 = vmatprep.subr.bf16.mxu1 %v2099_v29  ;;  %v2124_v29 = vld [vmem:[%s2614_s1 + $0x1d8] sm:$0xff]  }
  0x24   : > { %v633_v32 = vrot.slane %v631_v27, 1  ;;  %v625_v36 = vrot.slane %v623_v28, 1  ;;  %v1192_v27 = vld [vmem:[%s2321_s6 + $0x8] sm:$0xee] }
  0x25   : > { %1875 = vmatpush3.bf16.msra.mxu0 %v2100_v30  ;;  %v2421_v30 = vcombine.high %v2339_v37, %v2364_v58  ;;  %v2486_v37 = vcombine.high %v2367_v59, %v2395_v16 }
  0x26   : > { %1921 = vmatpush3.bf16.msra.mxu1 %v2101_v31  ;;  %1952 = vmatprep.subr.bf16.mxu0 %v2106_v40  ;;  %v942_v31 = vshll.u32 %v2402_v18, 16  ;;  %v2432_v40 = vcombine.low %v2331_v33, %v2334_v34  ;;  %v634_v41 = vsel %vm578_vm0, %v629_v26, %v633_v32  ;;  %v645_v56 = vor.u32 %v643_v43, %v633_v32  ;;  %v2145_v26 = vld [vmem:[%s2614_s1 + $0x1b8] sm:$0xff]  }
  0x27   : > { %1998 = vmatprep.subr.bf16.mxu1 %v2108_v46  ;;  %v504_v46 = vld [vmem:[%s2321_s6 + $0x48] sm:$0x11]  ;;  %v947_v33 = vshll.u32 %v2421_v30, 16  ;;  %v935_v18 = vshll.u32 %v2472_v4, 16  ;;  %v1236_v28 = vrot.slane %v2421_v30, 1  ;;  %v2518_v32 = vcombine.low %v2367_v59, %v2395_v16 }
  0x28   : > { %447 = vmatmul.mubr.bf16.vlgmr.msra.gmra.mrb[0].mxu0 %v1625_v35  ;;  %v621_v35 = vor.u32 %v619_v23, %v609_v11  ;;  %v944_v47 = vrot.slane %v942_v31, 1  ;;  %v930_v55 = vshll.u32 %v2432_v40, 16  ;;  %v928_v10 = vshrl.u32 %v2432_v40, 16  ;;  %v2144_v23 = vld [vmem:[%s2614_s1 + $0x1f8] sm:$0xff]  }
  0x29   : > { %1953 = vmatpush3.bf16.msra.mxu0 %v2107_v45  ;;  %454 = vmatprep.mubr.bf16.mxu0 %v1686_v38  ;;  %v2125_v38 = vld [vmem:[%s2614_s1 + $0x198] sm:$0xff]   ;;  %v2442_v45 = vld [vmem:[%s2321_s6 + $0x40] sm:$0xff]  ;;  %v949_v7 = vrot.slane %v947_v33, 1  ;;  %v937_v31 = vrot.slane %v935_v18, 1  ;;  %v951_v16 = vshrl.u32 %v2472_v4, 16 }
  0x2a   : > { %1954 = vmatprep.subr.bf16.mxu0 %v2110_v54  ;;  %796 = vmatmul.mubr.bf16.vlgmr.msra.gmra.mrb[0].mxu1 %v590_v63  ;;  %v626_v48 = vsel %vm578_vm0, %v621_v35, %v625_v36  ;;  %v1692_v49 = vcombine.high %v2442_v45, %v504_v46  ;;  %v2452_v51 = vcombine.low %v2442_v45, %v504_v46  ;;  %v975_v46 = vshrl.u32 %v2486_v37, 16 }
  0x2b   : > { %1999 = vmatpush3.bf16.msra.mxu1 %v2109_v53  ;;  %803 = vmatprep.mubr.bf16.mxu1 %v618_v14  ;;  %v2132_v53 = vld [vmem:[%s2614_s1 + $0x168] sm:$0xff]   ;;  %v1634_v54 = vcombine.high %v2442_v45, %v2442_v45  ;;  %v945_v9 = vor.u32 %v944_v47, %v940_v25  ;;  %v932_v14 = vrot.slane %v930_v55, 1  ;;  %v963_v25 = vshll.u32 %v2486_v37, 16 }
  0x2c   : > { %2000 = vmatprep.subr.bf16.mxu1 %v2113_v1  ;;  %v639_v60 = vshll.u32 %v2452_v51, 16  ;;  %v654_v62 = vshrl.u32 %v1692_v49, 16  ;;  %v1800_v35 = vcombine.high %v1192_v27, %v2334_v34 }
  0x2d   : > { %1955 = vmatpush3.bf16.msra.mxu0 %v2111_v57  ;;  %v647_v57 = vshll.u32 %v1692_v49, 16  ;;  %v953_v49 = vor.u32 %v951_v16, %v937_v31 }
  0x2e   : > { %1956 = vmatprep.subr.bf16.mxu0 %v2116_v8  ;;  %v641_v1 = vrot.slane %v639_v60, 1  ;;  %v2138_v8 = vld [vmem:[%s2614_s1 + $0x130] sm:$0xff]   ;;  %v967_v60 = vshrl.u32 %v2518_v32, 16 }
  0x2f   : > { %2001 = vmatpush3.bf16.msra.mxu1 %v2115_v3  ;;  %v649_v63 = vrot.slane %v647_v57, 1  ;;  %v2135_v3 = vld [vmem:[%s2614_s1 + $0x1a8] sm:$0xff]  }
  0x30   : > { %455 = vmatmul.mubr.bf16.gmra.mrb[4].mxu0 %v1685_v39  ;;  %2002 = vmatprep.subr.bf16.mxu1 %v2118_v13  ;;  %v2126_v39 = vld [vmem:[%s2614_s1 + $0x160] sm:$0xff]   ;;  %v2140_v13 = vld [vmem:[%s2614_s1 + $0x1f0] sm:$0xff]  }
  0x31   : > { %462 = vmatprep.mubr.bf16.mxu0 %v1688_v0  ;;  %1957 = vmatpush3.bf16.msra.mxu0 %v2117_v12  ;;  %v637_v0 = vor.u32 %v635_v52, %v625_v36  ;;  %v650_v5 = vsel %vm578_vm0, %v645_v56, %v649_v63  ;;  %v656_v11 = vor.u32 %v654_v62, %v649_v63 }
  0x32   : > { %1958 = vmatprep.subr.bf16.mxu0 %v2121_v21  ;;  %804 = vmatmul.mubr.bf16.gmra.mrb[4].mxu1 %v610_v19  ;;  %v1633_v12 = vcombine.low %v2442_v45, %v2442_v45  ;;  %v651_v19 = vshrl.u32 %v2452_v51, 16  ;;  %v2143_v21 = vld [vmem:[%s2614_s1 + $0x138] sm:$0xff]   ;;  %v1747_v51 = vcombine.low %v2398_v17, %v2442_v45 }
  0x33   : > { %2003 = vmatpush3.bf16.msra.mxu1 %v2119_v15  ;;  %811 = vmatprep.mubr.bf16.mxu1 %v634_v41  ;;  %v642_v58 = vsel %vm578_vm0, %v637_v0, %v641_v1  ;;  %v2141_v15 = vld [vmem:[%s2614_s1 + $0x1b0] sm:$0xff]   ;;  %v1235_v41 = vrot.slane %v1800_v35, 1 }
  0x34   : > { %2004 = vmatprep.subr.bf16.mxu1 %v2124_v29  ;;  %v933_v29 = vor.u32 %v932_v14, %v928_v10  ;;  %v653_v40 = vor.u32 %v651_v19, %v641_v1 }
  0x35   : > { %1959 = vmatpush3.bf16.msra.mxu0 %v2123_v24  ;;  %v950_v24 = vsel %vm578_vm0, %v945_v9, %v949_v7  ;;  %v1237_v43 = vsel %vm1231_vm1, %v1235_v41, %v1236_v28  ;;  %v983_v9 = vshrl.u32 %v1747_v51, 16 }
  0x36   : > { %1960 = vmatprep.subr.bf16.mxu0 %v2126_v39  ;;  %v2523_v39 = vcombine.high %v2398_v17, %v2442_v45  ;;  %v938_v59 = vsel %vm578_vm0, %v933_v29, %v937_v31  ;;  %v1238_v17 = vrot.slane %v2518_v32, 1  ;;  %v2558_v31 = vld [vmem:[%s2615_s2] ss:$0 sm:$0xff] }
  0x37   : > { %2005 = vmatpush3.bf16.msra.mxu1 %v2125_v38  ;;  %v965_v38 = vrot.slane %v963_v25, 1 }
  0x38   : > { %463 = vmatmul.mubr.bf16.gmra.mrb[8].mxu0 %v1687_v2  ;;  %2006 = vmatprep.subr.bf16.mxu1 %v2128_v44  ;;  %v2134_v2 = vld [vmem:[%s2614_s1 + $0x1e8] sm:$0xff]   ;;  %v979_v47 = vshll.u32 %v2523_v39, 16  ;;  %v991_v63 = vshrl.u32 %v2523_v39, 16  ;;  %v1244_v45 = vrot.slane %v2523_v39, 1 }
  0x39   : > { %470 = vmatprep.mubr.bf16.mxu0 %v1690_v20  ;;  %1961 = vmatpush3.bf16.msra.mxu0 %v2127_v42  ;;  %v2142_v20 = vld [vmem:[%s2614_s1 + $0x178] sm:$0xff]   ;;  %v955_v42 = vshll.u32 %v2518_v32, 16  ;;  %v977_v52 = vor.u32 %v975_v46, %v965_v38 }
  0x3a   : > { %812 = vmatmul.mubr.bf16.gmra.mrb[8].mxu1 %v626_v48  ;;  %1962 = vmatprep.subr.bf16.mxu0 %v2132_v53  ;;  %v1240_v48 = vrot.slane %v2486_v37, 1  ;;  %v981_v53 = vrot.slane %v979_v47, 1 }
  0x3b   : > { %2007 = vmatpush3.bf16.msra.mxu1 %v2130_v50  ;;  %819 = vmatprep.mubr.bf16.mxu1 %v650_v5  ;;  %v957_v50 = vrot.slane %v955_v42, 1 }
  0x3c   : > { %2008 = vmatprep.subr.bf16.mxu1 %v2134_v2  ;;  %v1241_v56 = vsel %vm1231_vm1, %v1236_v28, %v1240_v48  ;;  %v982_v62 = vsel %vm578_vm0, %v977_v52, %v981_v53 }
  0x3d   : > { %1963 = vmatpush3.bf16.msra.mxu0 %v2133_v61  ;;  %v958_v57 = vsel %vm578_vm0, %v953_v49, %v957_v50  ;;  %v971_v61 = vshll.u32 %v1747_v51, 16  ;;  %v969_v1 = vor.u32 %v967_v60, %v957_v50 }
  0x3e   : > { %1964 = vmatprep.subr.bf16.mxu0 %v2136_v6 }
  0x3f   : > { %2009 = vmatpush3.bf16.msra.mxu1 %v2135_v3  ;;  %v973_v2 = vrot.slane %v971_v61, 1  ;;  %v2158_v3 = vld [vmem:[%s2321_s6 + $0x48] ss:$8 sps:$4 sm:$0x1f]  }
  0x40   : > { %471 = vmatmul.mubr.bf16.gmra.mrb[12].mxu0 %v1689_v22  ;;  %2010 = vmatprep.subr.bf16.mxu1 %v2140_v13  ;;  %v959_v22 = vshrl.u32 %v2421_v30, 16  ;;  %v1799_v30 = vcombine.low %v1192_v27, %v2334_v34  ;;  %v1233_v34 = vrot.slane %v2472_v4, 1  ;;  %v993_v4 = vor.u32 %v991_v63, %v981_v53 }
  0x41   : > { %478 = vmatprep.mubr.bf16.mxu0 %v1634_v54  ;;  %1965 = vmatpush3.bf16.msra.mxu0 %v2138_v8  ;;  %v2156_v54 = vld [vmem:[%s2321_s6 + $0x4c] ss:$8 sps:$4 sm:$0x1f]   ;;  %v974_v8 = vsel %vm578_vm0, %v969_v1, %v973_v2  ;;  %v987_v10 = vshll.u32 %v2158_v3, 16 }
  0x42   : > { %820 = vmatmul.mubr.bf16.gmra.mrb[12].mxu1 %v642_v58  ;;  %1966 = vmatprep.subr.bf16.mxu0 %v2142_v20  ;;  %v961_v36 = vor.u32 %v959_v22, %v949_v7  ;;  %v1232_v33 = vrot.slane %v1799_v30, 1  ;;  %v995_v0 = vshll.u32 %v2156_v54, 16  ;;  %v1239_v6 = vsel %vm1231_vm1, %v1233_v34, %v1238_v17 }
  0x43   : > { %827 = vmatprep.mubr.bf16.mxu1 %v656_v11  ;;  %2011 = vmatpush3.bf16.msra.mxu1 %v2141_v15  ;;  %v1245_v7 = vsel %vm1231_vm1, %v1240_v48, %v1244_v45  ;;  %v1242_v58 = vrot.slane %v1747_v51, 1  ;;  %v1248_v11 = vrot.slane %v2156_v54, 1  ;;  %v989_v13 = vrot.slane %v987_v10, 1 }
  0x44   : > { %2012 = vmatprep.subr.bf16.mxu1 %v2144_v23  ;;  %v966_v44 = vsel %vm578_vm0, %v961_v36, %v965_v38  ;;  %v1234_v55 = vsel %vm1231_vm1, %v1232_v33, %v1233_v34  ;;  %v997_v5 = vrot.slane %v995_v0, 1  ;;  %v1002_v14 = vshrl.u32 %v2156_v54, 16 }
  0x45   : > { %1967 = vmatpush3.bf16.msra.mxu0 %v2143_v21  ;;  %v1243_v15 = vsel %vm1231_vm1, %v1238_v17, %v1242_v58  ;;  %v1249_v18 = vsel %vm1231_vm1, %v1244_v45, %v1248_v11  ;;  %v1246_v21 = vrot.slane %v2158_v3, 1  ;;  %v999_v22 = vshrl.u32 %v2158_v3, 16 }
  0x46   : > { %v998_v37 = vsel %vm578_vm0, %v993_v4, %v997_v5  ;;  %v1004_v20 = vor.u32 %v1002_v14, %v997_v5 }
  0x47   : > { %2013 = vmatpush3.bf16.msra.mxu1 %v2145_v26  ;;  %v1247_v23 = vsel %vm1231_vm1, %v1242_v58, %v1246_v21 }
  0x48   : > { %479 = vmatmul.mubr.bf16.gmra.mrb[16].mxu0 %v1633_v12  ;;  %v985_v12 = vor.u32 %v983_v9, %v973_v2 }
  0x49   : > { %1143 = vmatprep.mubr.bf16.mxu0 %v950_v24  ;;  %v1001_v24 = vor.u32 %v999_v22, %v989_v13 }
  0x4a   : > { %828 = vmatmul.mubr.bf16.gmra.mrb[16].mxu1 %v653_v40  ;;  %v990_v19 = vsel %vm578_vm0, %v985_v12, %v989_v13 }
  0x4b   : > { %1388 = vmatprep.mubr.bf16.mxu1 %v1237_v43 }
  0x50   : > { %1144 = vmatmul.mubr.bf16.vlgmr.msra.gmra.mrb[20].mxu0 %v938_v59 }
  0x51   : > { %1151 = vmatprep.mubr.bf16.mxu0 %v966_v44 }
  0x52   : > { %1389 = vmatmul.mubr.bf16.vlgmr.msra.gmra.mrb[20].mxu1 %v1234_v55 }
  0x53   : > { %1396 = vmatprep.mubr.bf16.mxu1 %v1241_v56 }
  0x58   : > { %1152 = vmatmul.mubr.bf16.gmra.mrb[24].mxu0 %v958_v57 }
  0x59   : > { %1159 = vmatprep.mubr.bf16.mxu0 %v982_v62 }
  0x5a   : > { %1397 = vmatmul.mubr.bf16.gmra.mrb[24].mxu1 %v1239_v6 }
  0x5b   : > { %1404 = vmatprep.mubr.bf16.mxu1 %v1245_v7 }
  0x60   : > { %1160 = vmatmul.mubr.bf16.gmra.mrb[28].mxu0 %v974_v8 }
  0x61   : > { %1167 = vmatprep.mubr.bf16.mxu0 %v998_v37 }
  0x62   : > { %1405 = vmatmul.mubr.bf16.gmra.mrb[28].mxu1 %v1243_v15 }
  0x63   : > { %1412 = vmatprep.mubr.bf16.mxu1 %v1249_v18 }
  0x68   : > { %1168 = vmatmul.mubr.bf16.gmra.mrb[32].mxu0 %v990_v19 }
  0x69   : > { %1175 = vmatprep.mubr.bf16.mxu0 %v1004_v20 }
  0x6a   : > { %1413 = vmatmul.mubr.bf16.gmra.mrb[32].mxu1 %v1247_v23 }
  0x6b   : > { %1420 = vmatprep.mubr.bf16.mxu1 %v1248_v11 }
  0x70   : > { %1176 = vmatmul.mubr.bf16.gmra.mrb[36].mxu0 %v1001_v24 }
  0x72   : > { %1421 = vmatmul.mubr.bf16.gmra.mrb[36].mxu1 %v1246_v21 }
  0xfb   : > { %v1876_v25 = vpop.f32.mrb[0].mxu0 }
  0xfc   : > { %v1877_v26 = vpop.f32.mrb[1].mxu0 }
  0xfd   : > { %v1878_v27 = vadd.f32 %v1877_v26, %v1876_v25  ;;  %v1879_v28 = vpop.f32.mrb[2].mxu0  ;;  %v1922_v35 = vpop.f32.mrb[0].mxu1 }
  0xfe   : > { %v1880_v29 = vpop.f32.mrb[3].mxu0  ;;  %v1923_v38 = vpop.f32.mrb[1].mxu1 }
  0xff   : > { %v1881_v32 = vadd.f32 %v1880_v29, %v1879_v28  ;;  %v486_v36 = vadd.f32 %v1878_v27, %v2558_v31  ;;  %v1924_v40 = vadd.f32 %v1923_v38, %v1922_v35  ;;  %v1925_v30 = vpop.f32.mrb[2].mxu1 }
 0x100   : > { %v1926_v16 = vpop.f32.mrb[3].mxu1 }
 0x101   : > { %v487_v41 = vadd.f32 %v1881_v32, %v2558_v31  ;;  %v2562_v44 = vadd.f32 %v1924_v40, %v486_v36  ;;  %v1927_v46 = vadd.f32 %v1926_v16, %v1925_v30 }
 0x103   : > { %v1882_v39 = vpop.f32.mrb[4].mxu0  ;;  %v836_v34 = vadd.f32 %v1927_v46, %v487_v41 }
 0x104   : > { %v1883_v59 = vpop.f32.mrb[5].mxu0 }
 0x105   : > { %v1884_v42 = vadd.f32 %v1883_v59, %v1882_v39  ;;  %v1885_v43 = vpop.f32.mrb[6].mxu0  ;;  %v1928_v48 = vpop.f32.mrb[4].mxu1 }
 0x106   : > { %v1886_v47 = vpop.f32.mrb[7].mxu0  ;;  %v1929_v50 = vpop.f32.mrb[5].mxu1 }
 0x107   : > { %v1887_v33 = vadd.f32 %v1886_v47, %v1885_v43  ;;  %v488_v49 = vadd.f32 %v1884_v42, %v2558_v31  ;;  %v1930_v52 = vadd.f32 %v1929_v50, %v1928_v48  ;;  %v1931_v53 = vpop.f32.mrb[6].mxu1 }
 0x108   : > { %v1932_v56 = vpop.f32.mrb[7].mxu1 }
 0x109   : > { %v489_v54 = vadd.f32 %v1887_v33, %v2558_v31  ;;  %v2566_v61 = vadd.f32 %v1930_v52, %v488_v49  ;;  %v1933_v62 = vadd.f32 %v1932_v56, %v1931_v53 }
 0x10b   : > { %v1888_v51 = vpop.f32.mrb[8].mxu0  ;;  %v2568_v17 = vadd.f32 %v1933_v62, %v489_v54 }
 0x10c   : > { %v1889_v55 = vpop.f32.mrb[9].mxu0 }
 0x10d   : > { %v1890_v57 = vadd.f32 %v1889_v55, %v1888_v51  ;;  %v1891_v60 = vpop.f32.mrb[10].mxu0  ;;  %v1934_v45 = vpop.f32.mrb[8].mxu1 }
 0x10e   : > { %v1892_v63 = vpop.f32.mrb[11].mxu0  ;;  %v1935_v2 = vpop.f32.mrb[9].mxu1 }
 0x10f   : > { %v1893_v0 = vadd.f32 %v1892_v63, %v1891_v60  ;;  %v490_v1 = vadd.f32 %v1890_v57, %v2558_v31  ;;  %v1936_v4 = vadd.f32 %v1935_v2, %v1934_v45  ;;  %v1937_v5 = vpop.f32.mrb[10].mxu1 }
 0x110   : > { %v1938_v8 = vpop.f32.mrb[11].mxu1 }
 0x111   : > { %v491_v6 = vadd.f32 %v1893_v0, %v2558_v31  ;;  %v2572_v37 = vadd.f32 %v1936_v4, %v490_v1  ;;  %v1939_v58 = vadd.f32 %v1938_v8, %v1937_v5 }
 0x113   : > { %v1894_v3 = vpop.f32.mrb[12].mxu0  ;;  %v2574_v13 = vadd.f32 %v1939_v58, %v491_v6 }
 0x114   : > { %v1895_v7 = vpop.f32.mrb[13].mxu0 }
 0x115   : > { %v1896_v9 = vadd.f32 %v1895_v7, %v1894_v3  ;;  %v1897_v10 = vpop.f32.mrb[14].mxu0  ;;  %v1940_v14 = vpop.f32.mrb[12].mxu1 }
 0x116   : > { %v1898_v11 = vpop.f32.mrb[15].mxu0  ;;  %v1941_v18 = vpop.f32.mrb[13].mxu1 }
 0x117   : > { %v1899_v12 = vadd.f32 %v1898_v11, %v1897_v10  ;;  %v492_v15 = vadd.f32 %v1896_v9, %v2558_v31  ;;  %v1942_v20 = vadd.f32 %v1941_v18, %v1940_v14  ;;  %v1943_v21 = vpop.f32.mrb[14].mxu1 }
 0x118   : > { %v1944_v24 = vpop.f32.mrb[15].mxu1 }
 0x119   : > { %v493_v22 = vadd.f32 %v1899_v12, %v2558_v31  ;;  %v2578_v27 = vadd.f32 %v1942_v20, %v492_v15  ;;  %v1945_v28 = vadd.f32 %v1944_v24, %v1943_v21 }
 0x11b   : > { %v1900_v19 = vpop.f32.mrb[16].mxu0  ;;  %v2580_v32 = vadd.f32 %v1945_v28, %v493_v22 }
 0x11c   : > { %v1901_v23 = vpop.f32.mrb[17].mxu0 }
 0x11d   : > { %v1902_v25 = vadd.f32 %v1901_v23, %v1900_v19  ;;  %v1903_v26 = vpop.f32.mrb[18].mxu0  ;;  %v1946_v35 = vpop.f32.mrb[16].mxu1 }
 0x11e   : > { %v1904_v29 = vpop.f32.mrb[19].mxu0  ;;  %v1947_v38 = vpop.f32.mrb[17].mxu1 }
 0x11f   : > { %v494_v36 = vadd.f32 %v1902_v25, %v2558_v31  ;;  %v1948_v40 = vadd.f32 %v1947_v38, %v1946_v35  ;;  %v1949_v30 = vpop.f32.mrb[18].mxu1 }
 0x120   : > { %v1950_v59 = vpop.f32.mrb[19].mxu1 }
 0x121   : > { %v2583_v43 = vadd.f32 %v1948_v40, %v494_v36 }
 0x123   : > { %v1968_v39 = vpop.f32.mrb[20].mxu0 }
 0x124   : > { %v1969_v41 = vpop.f32.mrb[21].mxu0 }
 0x125   : > { %v1970_v16 = vadd.f32 %v1969_v41, %v1968_v39  ;;  %v1971_v42 = vpop.f32.mrb[22].mxu0  ;;  %v2014_v49 = vpop.f32.mrb[20].mxu1 }
 0x126   : > { %v1972_v46 = vpop.f32.mrb[23].mxu0  ;;  %v2015_v50 = vpop.f32.mrb[21].mxu1 }
 0x127   : > { %v1183_v47 = vadd.f32 %v1970_v16, %v2562_v44  ;;  %v1973_v33 = vadd.f32 %v1972_v46, %v1971_v42  ;;  %v2016_v31 = vadd.f32 %v2015_v50, %v2014_v49  ;;  %v2017_v52 = vpop.f32.mrb[22].mxu1 }
 0x128   : > { %v2018_v54 = vpop.f32.mrb[23].mxu1 }
 0x129   : > { %v1184_v48 = vadd.f32 %v1973_v33, %v836_v34  ;;  %v1428_v57 = vadd.f32 %v2016_v31, %v1183_v47  ;;  %v2019_v60 = vadd.f32 %v2018_v54, %v2017_v52 }
 0x12b   : > { %v1974_v51 = vpop.f32.mrb[24].mxu0  ;;  %v1446_v45 = vmul.f32 0.2, %v1428_v57  ;;  %v1429_v44 = vadd.f32 %v2019_v60, %v1184_v48  ;;  %vm1437_vm2 = vcmp.ge.f32.partialorder %v1428_v57, 0.0 }
 0x12c   : > { %v1975_v53 = vpop.f32.mrb[25].mxu0 }
 0x12d   : > { %v1976_v55 = vadd.f32 %v1975_v53, %v1974_v51  ;;  %v1977_v56 = vpop.f32.mrb[26].mxu0  ;;  %vm1438_vm3 = vcmp.ge.f32.partialorder %v1429_v44, 0.0  ;;  %v1447_v1 = vmul.f32 0.2, %v1429_v44  ;;  %v2020_v2 = vpop.f32.mrb[24].mxu1  ;;  %v1455_v5 = vsel %vm1437_vm2, %v1428_v57, %v1446_v45 }
 0x12e   : > { %v1978_v62 = vpop.f32.mrb[27].mxu0  ;;  %v2021_v3 = vpop.f32.mrb[25].mxu1 }
 0x12f   : > { %v1185_v63 = vadd.f32 %v1976_v55, %v2566_v61  ;;  %v1979_v0 = vadd.f32 %v1978_v62, %v1977_v56  ;;  %v1456_v61 = vsel %vm1438_vm3, %v1429_v44, %v1447_v1  ;;  %v2022_v6 = vadd.f32 %v2021_v3, %v2020_v2  ;;  %v2023_v7 = vpop.f32.mrb[26].mxu1 }
 0x130   : > { %v1840_v9 = vpack.c.bf16 %v1456_v61, %v1455_v5  ;;  %v2024_v10 = vpop.f32.mrb[27].mxu1 }
 0x131   : > { %v1186_v34 = vadd.f32 %v1979_v0, %v2568_v17  ;;  %v1430_v11 = vadd.f32 %v2022_v6, %v1185_v63  ;;  %v2025_v12 = vadd.f32 %v2024_v10, %v2023_v7 }
 0x132   : > { %1841 = vst [vmem:[%s2592_s17] sm:$0xff] %v1840_v9  }
 0x133   : > { %v1980_v4 = vpop.f32.mrb[28].mxu0  ;;  %v1448_v19 = vmul.f32 0.2, %v1430_v11  ;;  %v1431_v20 = vadd.f32 %v2025_v12, %v1186_v34  ;;  %vm1439_vm4 = vcmp.ge.f32.partialorder %v1430_v11, 0.0 }
 0x134   : > { %v1981_v8 = vpop.f32.mrb[29].mxu0 }
 0x135   : > { %v1982_v58 = vadd.f32 %v1981_v8, %v1980_v4  ;;  %v1983_v17 = vpop.f32.mrb[30].mxu0  ;;  %vm1440_vm5 = vcmp.ge.f32.partialorder %v1431_v20, 0.0  ;;  %v1449_v22 = vmul.f32 0.2, %v1431_v20  ;;  %v2026_v23 = vpop.f32.mrb[28].mxu1  ;;  %v1457_v26 = vsel %vm1439_vm4, %v1430_v11, %v1448_v19 }
 0x136   : > { %v1984_v14 = vpop.f32.mrb[31].mxu0  ;;  %v2027_v24 = vpop.f32.mrb[29].mxu1 }
 0x137   : > { %v1187_v15 = vadd.f32 %v1982_v58, %v2572_v37  ;;  %v1985_v18 = vadd.f32 %v1984_v14, %v1983_v17  ;;  %v1458_v28 = vsel %vm1440_vm5, %v1431_v20, %v1449_v22  ;;  %v2028_v29 = vadd.f32 %v2027_v24, %v2026_v23  ;;  %v2029_v35 = vpop.f32.mrb[30].mxu1 }
 0x138   : > { %v1845_v38 = vpack.c.bf16 %v1458_v28, %v1457_v26  ;;  %v2030_v39 = vpop.f32.mrb[31].mxu1 }
 0x139   : > { %v1188_v21 = vadd.f32 %v1985_v18, %v2574_v13  ;;  %v1432_v30 = vadd.f32 %v2028_v29, %v1187_v15  ;;  %v2031_v41 = vadd.f32 %v2030_v39, %v2029_v35 }
 0x13a   : > { %1857 = vst [vmem:[%s2592_s17 + $0x8] sm:$0xff] %v1845_v38  }
 0x13b   : > { %v1986_v25 = vpop.f32.mrb[32].mxu0  ;;  %v1450_v42 = vmul.f32 0.2, %v1432_v30  ;;  %v1433_v46 = vadd.f32 %v2031_v41, %v1188_v21  ;;  %vm1441_vm6 = vcmp.ge.f32.partialorder %v1432_v30, 0.0 }
 0x13c   : > { %v1987_v36 = vpop.f32.mrb[33].mxu0 }
 0x13d   : > { %v1988_v37 = vadd.f32 %v1987_v36, %v1986_v25  ;;  %v1989_v40 = vpop.f32.mrb[34].mxu0  ;;  %vm1442_vm7 = vcmp.ge.f32.partialorder %v1433_v46, 0.0  ;;  %v1451_v33 = vmul.f32 0.2, %v1433_v46  ;;  %v2032_v48 = vpop.f32.mrb[32].mxu1  ;;  %v1459_v51 = vsel %vm1441_vm6, %v1432_v30, %v1450_v42 }
 0x13e   : > { %v1990_v59 = vpop.f32.mrb[35].mxu0  ;;  %v2033_v49 = vpop.f32.mrb[33].mxu1 }
 0x13f   : > { %v1189_v13 = vadd.f32 %v1988_v37, %v2578_v27  ;;  %v1991_v16 = vadd.f32 %v1990_v59, %v1989_v40  ;;  %v1460_v31 = vsel %vm1442_vm7, %v1433_v46, %v1451_v33  ;;  %v2034_v52 = vadd.f32 %v2033_v49, %v2032_v48  ;;  %v2035_v53 = vpop.f32.mrb[34].mxu1 }
 0x140   : > { %v1850_v55 = vpack.c.bf16 %v1460_v31, %v1459_v51  ;;  %v2036_v56 = vpop.f32.mrb[35].mxu1 }
 0x141   : > { %v1190_v47 = vadd.f32 %v1991_v16, %v2580_v32  ;;  %v1434_v60 = vadd.f32 %v2034_v52, %v1189_v13  ;;  %v2037_v62 = vadd.f32 %v2036_v56, %v2035_v53 }
 0x142   : > { %1858 = vst [vmem:[%s2592_s17 + $0x10] sm:$0xff] %v1850_v55  }
 0x143   : > { %v1992_v50 = vpop.f32.mrb[36].mxu0  ;;  %v1452_v0 = vmul.f32 0.2, %v1434_v60  ;;  %v1435_v45 = vadd.f32 %v2037_v62, %v1190_v47  ;;  %vm1443_vm8 = vcmp.ge.f32.partialorder %v1434_v60, 0.0 }
 0x144   : > { %v1993_v54 = vpop.f32.mrb[37].mxu0 }
 0x145   : > { %v1994_v27 = vadd.f32 %v1993_v54, %v1992_v50  ;;  %v1995_v57 = vpop.f32.mrb[38].mxu0  ;;  %vm1444_vm9 = vcmp.ge.f32.partialorder %v1435_v45, 0.0  ;;  %v1453_v44 = vmul.f32 0.2, %v1435_v45  ;;  %v2038_v34 = vpop.f32.mrb[36].mxu1  ;;  %v1461_v2 = vsel %vm1443_vm8, %v1434_v60, %v1452_v0 }
 0x146   : > { %v1996_v63 = vpop.f32.mrb[39].mxu0  ;;  %v2039_v1 = vpop.f32.mrb[37].mxu1 }
 0x147   : > { %v1191_v32 = vadd.f32 %v1994_v27, %v2583_v43  ;;  %v1462_v3 = vsel %vm1444_vm9, %v1435_v45, %v1453_v44  ;;  %v2040_v4 = vadd.f32 %v2039_v1, %v2038_v34  ;;  %v2041_v5 = vpop.f32.mrb[38].mxu1 }
 0x148   : > { %v1855_v61 = vpack.c.bf16 %v1462_v3, %v1461_v2  ;;  %v2042_v6 = vpop.f32.mrb[39].mxu1 }
 0x149   : > { %v1436_v7 = vadd.f32 %v2040_v4, %v1191_v32 }
 0x14a   : > { %1859 = vst [vmem:[%s2592_s17 + $0x18] sm:$0xff] %v1855_v61  }
 0x14b   : > { %vm1445_vm10 = vcmp.ge.f32.partialorder %v1436_v7, 0.0  ;;  %v1454_v8 = vmul.f32 0.2, %v1436_v7 }
 0x14d   : > { %v1463_v9 = vsel %vm1445_vm10, %v1436_v7, %v1454_v8 }
 0x14e   : > { %v1836_v43 = vpack.c.bf16 %v1463_v9, %v1463_v9 }
 0x150   : > { %1509 = vst [vmem:[%s2592_s17 + $0x20] sm:$0xf] %v1836_v43 }
 0x151 PF: > { %s13_s14 = sadd.s32 1, %s2181_s14   ;;  %s2617_s12 = smov %s2177_s13 }
 0x152   : > { %p10_p5 = scmp.ge.s32.totalorder %s13_s14, 4   ;;  %s2618_s13 = smov %s2620_s15 }
 0x154   :  { %12 = sbr.rel (!%p10_p5) target bundleno = 2 (0x2), region = 71 }

// kernel: discriminator_forward.7
= control target key start
LH: loop header
LB: loop body
LE: loop exit
PB: predicated region body
PF: predicated region fallthrough
CT: control target
= control target key end

     0   :  { %s3670_s12 = smov 0   ;;  %s3672_s13 = smov 0   ;;  %s4636_s0 = inlined_call_operand.vmem [shape: bf16[2,26,512], index: 0, kind: input, shape index: {}]   ;;  %s4637_s1 = inlined_call_operand.vmem [shape: bf16[4,512,256], index: 1, kind: input, shape index: {}]   ;;  %s4638_s2 = inlined_call_operand.vmem [shape: f32[1,256], index: 2, kind: input, shape index: {}]   ;;  %s4639_s3 = inlined_call_operand.vmem [shape: bf16[2,20,256], index: 3, kind: output, shape index: {}]  }
   0x1   :  { %s3674_s14 = smov 0  }
   0x2 LB: > { %s22_s15 = sadd.s32 1, %s3644_s13  ;;  %p2644_p0 = scmp.ge.s32.totalorder %s3648_s14, 1  ;;  %s3648_s14 = sphi %s3674_s14, %s13_s14   ;;  %s3644_s13 = sphi %s3672_s13, %s4641_s13   ;;  %s3640_s12 = sphi %s3670_s12, %s4640_s12  }
   0x3   : > { %p23_p1 = scmp.ge.s32.totalorder %s22_s15, 2  ;;  %p172_p2 = scmp.lt.s32.totalorder %s3648_s14, 3 }
   0x5   : > { %s4643_s15 = smov (%p23_p1, %s22_s15), 0  ;;  %p173_p3 = pnand %p2644_p0, %p172_p2 }
   0x6   : > { %v3214_v0 = vld [vmem:[%s4637_s1 + $0x4] ss:$8 sps:$4 sm:$0xff] (!%p173_p3)   ;;  %v3218_v2 = vld [vmem:[%s4637_s1] ss:$8 sps:$4 sm:$0xff] (!%p173_p3)   ;;  %v3220_v4 = vld [vmem:[%s4637_s1 + $0x14] ss:$8 sps:$4 sm:$0xff] (!%p173_p3)  }
   0x7   : > { %176 = sbr.rel (%p173_p3) target bundleno = 494 (0x1ee), region = 32  ;;  %v3216_v1 = vld [vmem:[%s4637_s1 + $0x404] ss:$8 sps:$4 sm:$0xff] (!%p173_p3)   ;;  %671 = vmatprep.subr.bf16.mxu1 (!%p173_p3), %v3214_v0  ;;  %v3219_v3 = vld [vmem:[%s4637_s1 + $0x400] ss:$8 sps:$4 sm:$0xff] (!%p173_p3)   ;;  %p209_p4 = scmp.lt.s32.totalorder (!%p173_p3), %s3640_s12, 1 }
   0x8   : > { %1855 = vmatprep.subr.bf16.mxu0 (!%p173_p3), %v3216_v1  ;;  %672 = vmatpush1.bf16.msra.mxu1 (!%p173_p3), %v3218_v2  ;;  %v3222_v5 = vld [vmem:[%s4637_s1 + $0x414] ss:$8 sps:$4 sm:$0xff] (!%p173_p3)   ;;  %v3224_v6 = vld [vmem:[%s4637_s1 + $0x10] ss:$8 sps:$4 sm:$0xff] (!%p173_p3)   ;;  %v3226_v8 = vld [vmem:[%s4637_s1 + $0x24] ss:$8 sps:$4 sm:$0xff] (!%p173_p3)  }
   0x9   : > { %1856 = vmatpush1.bf16.msra.mxu0 (!%p173_p3), %v3219_v3  ;;  %673 = vmatprep.subr.bf16.mxu1 (!%p173_p3), %v3220_v4  ;;  %v3225_v7 = vld [vmem:[%s4637_s1 + $0x410] ss:$8 sps:$4 sm:$0xff] (!%p173_p3)   ;;  %v3228_v9 = vld [vmem:[%s4637_s1 + $0x424] ss:$8 sps:$4 sm:$0xff] (!%p173_p3)   ;;  %v3230_v10 = vld [vmem:[%s4637_s1 + $0x20] ss:$8 sps:$4 sm:$0xff] (!%p173_p3)  }
   0xa   : > { %1857 = vmatprep.subr.bf16.mxu0 (!%p173_p3), %v3222_v5  ;;  %v3231_v11 = vld [vmem:[%s4637_s1 + $0x420] ss:$8 sps:$4 sm:$0xff] (!%p173_p3)   ;;  %v3232_v12 = vld [vmem:[%s4637_s1 + $0x34] ss:$8 sps:$4 sm:$0xff] (!%p173_p3)   ;;  %v3236_v14 = vld [vmem:[%s4637_s1 + $0x30] ss:$8 sps:$4 sm:$0xff] (!%p173_p3)  }
   0xb   : > { %v3234_v13 = vld [vmem:[%s4637_s1 + $0x434] ss:$8 sps:$4 sm:$0xff] (!%p173_p3)   ;;  %v3237_v15 = vld [vmem:[%s4637_s1 + $0x430] ss:$8 sps:$4 sm:$0xff] (!%p173_p3)   ;;  %v3238_v16 = vld [vmem:[%s4637_s1 + $0x44] ss:$8 sps:$4 sm:$0xff] (!%p173_p3)  }
   0xc   : > { %674 = vmatpush1.bf16.msra.mxu1 (!%p173_p3), %v3224_v6  ;;  %v3240_v17 = vld [vmem:[%s4637_s1 + $0x444] ss:$8 sps:$4 sm:$0xff] (!%p173_p3)   ;;  %v3242_v18 = vld [vmem:[%s4637_s1 + $0x40] ss:$8 sps:$4 sm:$0xff] (!%p173_p3)   ;;  %v3244_v20 = vld [vmem:[%s4637_s1 + $0x54] ss:$8 sps:$4 sm:$0xff] (!%p173_p3)  }
   0xd   : > { %1858 = vmatpush1.bf16.msra.mxu0 (!%p173_p3), %v3225_v7  ;;  %675 = vmatprep.subr.bf16.mxu1 (!%p173_p3), %v3226_v8  ;;  %v3243_v19 = vld [vmem:[%s4637_s1 + $0x440] ss:$8 sps:$4 sm:$0xff] (!%p173_p3)   ;;  %v3246_v21 = vld [vmem:[%s4637_s1 + $0x454] ss:$8 sps:$4 sm:$0xff] (!%p173_p3)   ;;  %v3248_v22 = vld [vmem:[%s4637_s1 + $0x50] ss:$8 sps:$4 sm:$0xff] (!%p173_p3)  }
   0xe   : > { %1859 = vmatprep.subr.bf16.mxu0 %v3228_v9  ;;  %v3249_v23 = vld [vmem:[%s4637_s1 + $0x450] ss:$8 sps:$4 sm:$0xff]   ;;  %v3250_v24 = vld [vmem:[%s4637_s1 + $0x64] ss:$8 sps:$4 sm:$0xff]   ;;  %v3254_v26 = vld [vmem:[%s4637_s1 + $0x60] ss:$8 sps:$4 sm:$0xff]  }
   0xf   : > { %v3252_v25 = vld [vmem:[%s4637_s1 + $0x464] ss:$8 sps:$4 sm:$0xff]   ;;  %v3255_v27 = vld [vmem:[%s4637_s1 + $0x460] ss:$8 sps:$4 sm:$0xff]   ;;  %v3256_v28 = vld [vmem:[%s4637_s1 + $0x74] ss:$8 sps:$4 sm:$0xff]  }
  0x10   : > { %676 = vmatpush1.bf16.msra.mxu1 %v3230_v10  ;;  %v3258_v29 = vld [vmem:[%s4637_s1 + $0x474] ss:$8 sps:$4 sm:$0xff]   ;;  %v3260_v30 = vld [vmem:[%s4637_s1 + $0x70] ss:$8 sps:$4 sm:$0xff]   ;;  %v3262_v32 = vld [vmem:[%s4637_s1 + $0x84] ss:$8 sps:$4 sm:$0xff]  }
  0x11   : > { %1860 = vmatpush1.bf16.msra.mxu0 %v3231_v11  ;;  %677 = vmatprep.subr.bf16.mxu1 %v3232_v12  ;;  %v3261_v31 = vld [vmem:[%s4637_s1 + $0x470] ss:$8 sps:$4 sm:$0xff]   ;;  %v3264_v33 = vld [vmem:[%s4637_s1 + $0x484] ss:$8 sps:$4 sm:$0xff]   ;;  %v3266_v34 = vld [vmem:[%s4637_s1 + $0x80] ss:$8 sps:$4 sm:$0xff]  }
  0x12   : > { %1861 = vmatprep.subr.bf16.mxu0 %v3234_v13  ;;  %v3267_v35 = vld [vmem:[%s4637_s1 + $0x480] ss:$8 sps:$4 sm:$0xff]   ;;  %v3268_v36 = vld [vmem:[%s4637_s1 + $0x94] ss:$8 sps:$4 sm:$0xff]   ;;  %s4645_s12 = smov (!%p209_p4, %s3640_s12), 1  ;;  %vm2040_vm2 = vcmask 1044480  }
  0x13   : > { %v3270_v37 = vld [vmem:[%s4637_s1 + $0x494] ss:$8 sps:$4 sm:$0xff]   ;;  %v3272_v38 = vld [vmem:[%s4637_s1 + $0x90] ss:$8 sps:$4 sm:$0xff]   ;;  %v3274_v40 = vld [vmem:[%s4637_s1 + $0xa4] ss:$8 sps:$4 sm:$0xff]  }
  0x14   : > { %678 = vmatpush1.bf16.msra.mxu1 %v3236_v14  ;;  %v3273_v39 = vld [vmem:[%s4637_s1 + $0x490] ss:$8 sps:$4 sm:$0xff]   ;;  %v3276_v41 = vld [vmem:[%s4637_s1 + $0x4a4] ss:$8 sps:$4 sm:$0xff]   ;;  %s3125_s4 = sshll.u32 %s4645_s12, 6  ;;  %s3189_s18 = smul.u32 24, %s4645_s12 }
  0x15   : > { %1862 = vmatpush1.bf16.msra.mxu0 %v3237_v15  ;;  %679 = vmatprep.subr.bf16.mxu1 %v3238_v16  ;;  %v3278_v42 = vld [vmem:[%s4637_s1 + $0xa0] ss:$8 sps:$4 sm:$0xff]   ;;  %v3280_v44 = vld [vmem:[%s4637_s1 + $0xb4] ss:$8 sps:$4 sm:$0xff]   ;;  %s3833_s17 = scalar_lea.vmem %s4636_s0, %s3125_s4  ;;  %v3284_v46 = vld [vmem:[%s4637_s1 + $0xb0] ss:$8 sps:$4 sm:$0xff]  }
  0x16   : > { %1863 = vmatprep.subr.bf16.mxu0 %v3240_v17  ;;  %v3279_v43 = vld [vmem:[%s4637_s1 + $0x4a0] ss:$8 sps:$4 sm:$0xff]   ;;  %v3282_v45 = vld [vmem:[%s4637_s1 + $0x4b4] ss:$8 sps:$4 sm:$0xff]   ;;  %v3285_v47 = vld [vmem:[%s4637_s1 + $0x4b0] ss:$8 sps:$4 sm:$0xff]   ;;  %s233_s21 = scalar_lea.vmem %s4639_s3, %s3189_s18 }
  0x17   : > { %v3845_v48 = vld [vmem:[%s3833_s17] sm:$0xff]  ;;  %v3848_v49 = vld [vmem:[%s3833_s17 + $0x10] sm:$0xff]  ;;  %vm1458_vm0 = vsmask.f32 5376  ;;  %vm856_vm1 = vsmask.f32 7424 }
  0x18   : > { %680 = vmatpush1.bf16.msra.mxu1 %v3242_v18  ;;  %v3286_v50 = vld [vmem:[%s4637_s1 + $0xc4] ss:$8 sps:$4 sm:$0xff]   ;;  %v3858_v52 = vcombine.high %v3845_v48, %v3848_v49  ;;  %v3290_v56 = vld [vmem:[%s4637_s1 + $0xc0] ss:$8 sps:$4 sm:$0xff]   ;;  %v3292_v58 = vld [vmem:[%s4637_s1 + $0xd4] ss:$8 sps:$4 sm:$0xff]  }
  0x19   : > { %1864 = vmatpush1.bf16.msra.mxu0 %v3243_v19  ;;  %681 = vmatprep.subr.bf16.mxu1 %v3244_v20  ;;  %v3288_v51 = vld [vmem:[%s4637_s1 + $0x4c4] ss:$8 sps:$4 sm:$0xff]   ;;  %v3291_v57 = vld [vmem:[%s4637_s1 + $0x4c0] ss:$8 sps:$4 sm:$0xff]   ;;  %v3294_v63 = vld [vmem:[%s4637_s1 + $0x4d4] ss:$8 sps:$4 sm:$0xff]  }
  0x1a   : > { %1865 = vmatprep.subr.bf16.mxu0 %v3246_v21  ;;  %v1353_v53 = vld [vmem:[%s3833_s17] sm:$0xcc]  ;;  %703 = vmatprep.mubr.bf16.mxu1 %v3858_v52  ;;  %v3296_v6 = vld [vmem:[%s4637_s1 + $0xd0] ss:$8 sps:$4 sm:$0xff]  }
  0x1b   : > { %v2917_v54 = vcombine.high %v1353_v53, %v3848_v49  ;;  %v3863_v55 = vld [vmem:[%s3833_s17 + $0x24] ss:$16 sps:$4 sm:$0x1f]   ;;  %v2916_v0 = vcombine.low %v1353_v53, %v3848_v49  ;;  %v3322_v1 = vld [vmem:[%s3833_s17 + $0x20] ss:$16 sps:$4 sm:$0x1f]  }
  0x1c   : > { %682 = vmatpush1.bf16.msra.mxu1 %v3248_v22  ;;  %v1485_v61 = vshrl.u32 %v3863_v55, 16  ;;  %v1488_v62 = vshll.u32 %v3863_v55, 16  ;;  %v3297_v7 = vld [vmem:[%s4637_s1 + $0x4d0] ss:$8 sps:$4 sm:$0xff]   ;;  %v1468_v12 = vshrl.u32 %v3322_v1, 16  ;;  %v1471_v13 = vshll.u32 %v3322_v1, 16 }
  0x1d   : > { %1866 = vmatpush1.bf16.msra.mxu0 %v3249_v23  ;;  %683 = vmatprep.subr.bf16.mxu1 %v3250_v24  ;;  %v1477_v59 = vshrl.u32 %v2917_v54, 16  ;;  %v1480_v60 = vshll.u32 %v2917_v54, 16  ;;  %v1460_v10 = vshrl.u32 %v2916_v0, 16  ;;  %v1463_v11 = vshll.u32 %v2916_v0, 16  ;;  %v3298_v14 = vld [vmem:[%s4637_s1 + $0xe4] ss:$8 sps:$4 sm:$0xff]  }
  0x1e   : > { %1867 = vmatprep.subr.bf16.mxu0 %v3252_v25  ;;  %v1487_v4 = vrot.slane %v1485_v61, 2  ;;  %v1490_v5 = vrot.slane %v1488_v62, 3  ;;  %v3300_v15 = vld [vmem:[%s4637_s1 + $0x4e4] ss:$8 sps:$4 sm:$0xff]   ;;  %v3302_v17 = vld [vmem:[%s4637_s1 + $0xe0] ss:$8 sps:$4 sm:$0xff]  }
  0x1f   : > { %v1479_v2 = vrot.slane %v1477_v59, 2  ;;  %v1482_v3 = vrot.slane %v1480_v60, 3  ;;  %v3303_v18 = vld [vmem:[%s4637_s1 + $0x4e0] ss:$8 sps:$4 sm:$0xff]   ;;  %v1462_v19 = vrot.slane %v1460_v10, 2  ;;  %v1465_v20 = vrot.slane %v1463_v11, 3 }
  0x20   : > { %684 = vmatpush1.bf16.msra.mxu1 %v3254_v26  ;;  %v1491_v9 = vor.u32 %v1490_v5, %v1487_v4  ;;  %v1470_v21 = vrot.slane %v1468_v12, 2  ;;  %v1473_v22 = vrot.slane %v1471_v13, 3  ;;  %v3304_v23 = vld [vmem:[%s4637_s1 + $0xf4] ss:$8 sps:$4 sm:$0xff]   ;;  %v3308_v25 = vld [vmem:[%s4637_s1 + $0xf0] ss:$8 sps:$4 sm:$0xff]  }
  0x21   : > { %1868 = vmatpush1.bf16.msra.mxu0 %v3255_v27  ;;  %685 = vmatprep.subr.bf16.mxu1 %v3256_v28  ;;  %v1483_v8 = vor.u32 %v1482_v3, %v1479_v2  ;;  %v3306_v24 = vld [vmem:[%s4637_s1 + $0x4f4] ss:$8 sps:$4 sm:$0xff]   ;;  %v3309_v26 = vld [vmem:[%s4637_s1 + $0x4f0] ss:$8 sps:$4 sm:$0xff]   ;;  %v1466_v27 = vor.u32 %v1465_v20, %v1462_v19  ;;  %v251_v59 = vld [vmem:[%s3833_s17 + $0x20] sm:$0x33] }
  0x22   : > { %1869 = vmatprep.subr.bf16.mxu0 %v3258_v29  ;;  %v1474_v28 = vor.u32 %v1473_v22, %v1470_v21  ;;  %v3313_v29 = vld [vmem:[%s4637_s1 + $0x104] ss:$8 sps:$4 sm:$0xff]   ;;  %v3349_v53 = vld [vmem:[%s4637_s1 + $0x154] ss:$8 sps:$4 sm:$0xff]   ;;  %v2653_v61 = vcombine.high %v251_v59, %v251_v59  ;;  %v2652_v62 = vcombine.low %v251_v59, %v251_v59  ;;  %v3356_v0 = vld [vmem:[%s4637_s1 + $0x560] ss:$8 sps:$4 sm:$0xff]  }
  0x23   : > { %v1492_v16 = vsel %vm1458_vm0, %v1483_v8, %v1491_v9  ;;  %v3352_v54 = vld [vmem:[%s4637_s1 + $0x554] ss:$8 sps:$4 sm:$0xff]   ;;  %v3358_v60 = vld [vmem:[%s4637_s1 + $0x564] ss:$8 sps:$4 sm:$0xff]   ;;  %v3359_v3 = vld [vmem:[%s4637_s1 + $0x170] ss:$8 sps:$4 sm:$0xff]  }
  0x24   : > { %686 = vmatpush1.bf16.msra.mxu1 %v3260_v30  ;;  %1887 = vmatprep.mubr.bf16.mxu0 %v1492_v16  ;;  %v3319_v30 = vld [vmem:[%s4637_s1 + $0x504] ss:$8 sps:$4 sm:$0xff]   ;;  %v3361_v1 = vld [vmem:[%s4637_s1 + $0x174] ss:$8 sps:$4 sm:$0xff]   ;;  %v3365_v13 = vld [vmem:[%s4637_s1 + $0x180] ss:$8 sps:$4 sm:$0xff]  }
  0x25   : > { %1870 = vmatpush1.bf16.msra.mxu0 %v3261_v31  ;;  %687 = vmatprep.subr.bf16.mxu1 %v3262_v32  ;;  %v3921_v31 = vcombine.low %v3845_v48, %v3848_v49  ;;  %v3311_v32 = vld [vmem:[%s4637_s1 + $0x100] ss:$8 sps:$4 sm:$0xff]   ;;  %v3346_v48 = vld [vmem:[%s4637_s1 + $0x544] ss:$8 sps:$4 sm:$0xff]   ;;  %v3364_v2 = vld [vmem:[%s4637_s1 + $0x574] ss:$8 sps:$4 sm:$0xff]  }
  0x26   : > { %1871 = vmatprep.subr.bf16.mxu0 %v3264_v33  ;;  %v3317_v33 = vld [vmem:[%s4637_s1 + $0x500] ss:$8 sps:$4 sm:$0xff]   ;;  %v4017_v5 = vld [vmem:[%s3833_s17 + $0x18] sm:$0xff]  ;;  %v3367_v8 = vld [vmem:[%s4637_s1 + $0x184] ss:$8 sps:$4 sm:$0xff]  }
  0x27   : > { %v4014_v4 = vld [vmem:[%s3833_s17 + $0x8] sm:$0xff]  ;;  %v3373_v19 = vld [vmem:[%s4637_s1 + $0x194] ss:$8 sps:$4 sm:$0xff]  }
  0x28   : > { %688 = vmatpush1.bf16.msra.mxu1 %v3266_v34  ;;  %v1475_v34 = vsel %vm1458_vm0, %v1466_v27, %v1474_v28  ;;  %v3370_v10 = vld [vmem:[%s4637_s1 + $0x584] ss:$8 sps:$4 sm:$0xff]   ;;  %v3376_v20 = vld [vmem:[%s4637_s1 + $0x594] ss:$8 sps:$4 sm:$0xff]   ;;  %v3405_v59 = vld [vmem:[%s4637_s1 + $0x5e0] ss:$8 sps:$4 sm:$0xff]  }
  0x29   : > { %1872 = vmatpush1.bf16.msra.mxu0 %v3267_v35  ;;  %689 = vmatprep.subr.bf16.mxu1 %v3268_v36  ;;  %v3325_v35 = vld [vmem:[%s4637_s1 + $0x114] ss:$8 sps:$4 sm:$0xff]  }
  0x2a   : > { %1873 = vmatprep.subr.bf16.mxu0 %v3270_v37  ;;  %v3328_v36 = vld [vmem:[%s4637_s1 + $0x514] ss:$8 sps:$4 sm:$0xff]   ;;  %v3323_v37 = vld [vmem:[%s4637_s1 + $0x110] ss:$8 sps:$4 sm:$0xff]  }
  0x2b   : > { %v4036_v12 = vld [vmem:[%s3833_s17 + $0x2c] ss:$16 sps:$4 sm:$0x1f]  }
  0x2c   : > { %690 = vmatpush1.bf16.msra.mxu1 %v3272_v38  ;;  %v3326_v38 = vld [vmem:[%s4637_s1 + $0x510] ss:$8 sps:$4 sm:$0xff]  }
  0x2d   : > { %1874 = vmatpush1.bf16.msra.mxu0 %v3273_v39  ;;  %691 = vmatprep.subr.bf16.mxu1 %v3274_v40  ;;  %v3331_v39 = vld [vmem:[%s4637_s1 + $0x124] ss:$8 sps:$4 sm:$0xff]  }
  0x2e   : > { %1875 = vmatprep.subr.bf16.mxu0 %v3276_v41  ;;  %v3334_v40 = vld [vmem:[%s4637_s1 + $0x524] ss:$8 sps:$4 sm:$0xff]   ;;  %v3329_v41 = vld [vmem:[%s4637_s1 + $0x120] ss:$8 sps:$4 sm:$0xff]  }
  0x30   : > { %692 = vmatpush1.bf16.msra.mxu1 %v3278_v42  ;;  %v3332_v42 = vld [vmem:[%s4637_s1 + $0x520] ss:$8 sps:$4 sm:$0xff]  }
  0x31   : > { %1876 = vmatpush1.bf16.msra.mxu0 %v3279_v43  ;;  %693 = vmatprep.subr.bf16.mxu1 %v3280_v44  ;;  %v3337_v43 = vld [vmem:[%s4637_s1 + $0x134] ss:$8 sps:$4 sm:$0xff]  }
  0x32   : > { %1877 = vmatprep.subr.bf16.mxu0 %v3282_v45  ;;  %v3340_v44 = vld [vmem:[%s4637_s1 + $0x534] ss:$8 sps:$4 sm:$0xff]   ;;  %v3335_v45 = vld [vmem:[%s4637_s1 + $0x130] ss:$8 sps:$4 sm:$0xff]  }
  0x34   : > { %694 = vmatpush1.bf16.msra.mxu1 %v3284_v46  ;;  %v3338_v46 = vld [vmem:[%s4637_s1 + $0x530] ss:$8 sps:$4 sm:$0xff]  }
  0x35   : > { %1878 = vmatpush1.bf16.msra.mxu0 %v3285_v47  ;;  %695 = vmatprep.subr.bf16.mxu1 %v3286_v50  ;;  %v3343_v47 = vld [vmem:[%s4637_s1 + $0x144] ss:$8 sps:$4 sm:$0xff]   ;;  %v3341_v50 = vld [vmem:[%s4637_s1 + $0x140] ss:$8 sps:$4 sm:$0xff]  }
  0x36   : > { %1879 = vmatprep.subr.bf16.mxu0 %v3288_v51  ;;  %v3344_v51 = vld [vmem:[%s4637_s1 + $0x540] ss:$8 sps:$4 sm:$0xff]  }
  0x38   : > { %696 = vmatpush1.bf16.msra.mxu1 %v3290_v56  ;;  %v3347_v56 = vld [vmem:[%s4637_s1 + $0x150] ss:$8 sps:$4 sm:$0xff]  }
  0x39   : > { %1880 = vmatpush1.bf16.msra.mxu0 %v3291_v57  ;;  %697 = vmatprep.subr.bf16.mxu1 %v3292_v58  ;;  %v3350_v57 = vld [vmem:[%s4637_s1 + $0x550] ss:$8 sps:$4 sm:$0xff]   ;;  %v3355_v58 = vld [vmem:[%s4637_s1 + $0x164] ss:$8 sps:$4 sm:$0xff]  }
  0x3a   : > { %1881 = vmatprep.subr.bf16.mxu0 %v3294_v63  ;;  %v3353_v63 = vld [vmem:[%s4637_s1 + $0x160] ss:$8 sps:$4 sm:$0xff]  }
  0x3c   : > { %698 = vmatpush1.bf16.msra.mxu1 %v3296_v6  ;;  %v3362_v6 = vld [vmem:[%s4637_s1 + $0x570] ss:$8 sps:$4 sm:$0xff]  }
  0x3d   : > { %1882 = vmatpush1.bf16.msra.mxu0 %v3297_v7  ;;  %699 = vmatprep.subr.bf16.mxu1 %v3298_v14  ;;  %v4024_v7 = vcombine.high %v4014_v4, %v4017_v5  ;;  %v3368_v14 = vld [vmem:[%s4637_s1 + $0x580] ss:$8 sps:$4 sm:$0xff]  }
  0x3e   : > { %1883 = vmatprep.subr.bf16.mxu0 %v3300_v15 }
  0x40   : > { %700 = vmatpush1.bf16.msra.mxu1 %v3302_v17  ;;  %v1519_v17 = vshrl.u32 %v4036_v12, 16 }
  0x41   : > { %1884 = vmatpush1.bf16.msra.mxu0 %v3303_v18  ;;  %701 = vmatprep.subr.bf16.mxu1 %v3304_v23  ;;  %v1522_v18 = vshll.u32 %v4036_v12, 16 }
  0x42   : > { %1885 = vmatprep.subr.bf16.mxu0 %v3306_v24  ;;  %v1521_v23 = vrot.slane %v1519_v17, 2  ;;  %v3428_v17 = vld [vmem:[%s4637_s1 + $0x210] ss:$8 sps:$4 sm:$0xff]  }
  0x43   : > { %v1524_v24 = vrot.slane %v1522_v18, 3  ;;  %v3431_v18 = vld [vmem:[%s4637_s1 + $0x610] ss:$8 sps:$4 sm:$0xff]  }
  0x44   : > { %702 = vmatpush1.bf16.msra.mxu1 %v3308_v25  ;;  %v3371_v25 = vld [vmem:[%s4637_s1 + $0x190] ss:$8 sps:$4 sm:$0xff]  }
  0x45   : > { %1886 = vmatpush1.bf16.msra.mxu0 %v3309_v26  ;;  %722 = vmatprep.subr.bf16.mxu1 %v3313_v29  ;;  %v3374_v26 = vld [vmem:[%s4637_s1 + $0x590] ss:$8 sps:$4 sm:$0xff]   ;;  %v3379_v29 = vld [vmem:[%s4637_s1 + $0x1a4] ss:$8 sps:$4 sm:$0xff]  }
  0x46   : > { %1906 = vmatprep.subr.bf16.mxu0 %v3319_v30  ;;  %v3382_v30 = vld [vmem:[%s4637_s1 + $0x5a4] ss:$8 sps:$4 sm:$0xff]  }
  0x47   : > { %704 = vmatmul.mubr.bf16.vlgmr.msra.gmra.mrb[0].mxu1 %v3921_v31 }
  0x48   : > { %1888 = vmatmul.mubr.bf16.vlgmr.msra.gmra.mrb[0].mxu0 %v1475_v34  ;;  %723 = vmatpush1.bf16.msra.mxu1 %v3311_v32  ;;  %v3380_v34 = vld [vmem:[%s4637_s1 + $0x5a0] ss:$8 sps:$4 sm:$0xff]  }
  0x49   : > { %1907 = vmatpush1.bf16.msra.mxu0 %v3317_v33  ;;  %724 = vmatprep.subr.bf16.mxu1 %v3325_v35  ;;  %v3377_v33 = vld [vmem:[%s4637_s1 + $0x1a0] ss:$8 sps:$4 sm:$0xff]   ;;  %v3385_v35 = vld [vmem:[%s4637_s1 + $0x1b4] ss:$8 sps:$4 sm:$0xff]  }
  0x4a   : > { %1908 = vmatprep.subr.bf16.mxu0 %v3328_v36  ;;  %1897 = vmatprep.mubr.bf16.mxu0 %v1491_v9  ;;  %v1354_v9 = vld [vmem:[%s3833_s17 + $0x8] sm:$0xcc]  ;;  %v3388_v36 = vld [vmem:[%s4637_s1 + $0x5b4] ss:$8 sps:$4 sm:$0xff]  }
  0x4b   : > { %713 = vmatprep.mubr.bf16.mxu1 %v2653_v61  ;;  %v2919_v11 = vcombine.high %v1354_v9, %v4017_v5 }
  0x4c   : > { %725 = vmatpush1.bf16.msra.mxu1 %v3323_v37  ;;  %v3383_v37 = vld [vmem:[%s4637_s1 + $0x1b0] ss:$8 sps:$4 sm:$0xff]  }
  0x4d   : > { %1909 = vmatpush1.bf16.msra.mxu0 %v3326_v38  ;;  %726 = vmatprep.subr.bf16.mxu1 %v3331_v39  ;;  %v1511_v15 = vshrl.u32 %v2919_v11, 16  ;;  %v1514_v16 = vshll.u32 %v2919_v11, 16  ;;  %v3386_v38 = vld [vmem:[%s4637_s1 + $0x5b0] ss:$8 sps:$4 sm:$0xff]   ;;  %v3391_v39 = vld [vmem:[%s4637_s1 + $0x1c4] ss:$8 sps:$4 sm:$0xff]   ;;  %v4148_v11 = vcombine.low %v4014_v4, %v4017_v5 }
  0x4e   : > { %1910 = vmatprep.subr.bf16.mxu0 %v3334_v40  ;;  %v3394_v40 = vld [vmem:[%s4637_s1 + $0x5c4] ss:$8 sps:$4 sm:$0xff]   ;;  %v3430_v4 = vld [vmem:[%s4637_s1 + $0x214] ss:$8 sps:$4 sm:$0xff]  }
  0x4f   : > { %714 = vmatmul.mubr.bf16.gmra.mrb[4].mxu1 %v2652_v62  ;;  %v1513_v21 = vrot.slane %v1511_v15, 2  ;;  %v1516_v22 = vrot.slane %v1514_v16, 3  ;;  %v3433_v16 = vld [vmem:[%s4637_s1 + $0x614] ss:$8 sps:$4 sm:$0xff]  }
  0x50   : > { %1898 = vmatmul.mubr.bf16.gmra.mrb[4].mxu0 %v1474_v28  ;;  %727 = vmatpush1.bf16.msra.mxu1 %v3329_v41  ;;  %v4058_v28 = vor.u32 %v1524_v24, %v1521_v23  ;;  %v3389_v41 = vld [vmem:[%s4637_s1 + $0x1c0] ss:$8 sps:$4 sm:$0xff]  }
  0x51   : > { %1911 = vmatpush1.bf16.msra.mxu0 %v3332_v42  ;;  %728 = vmatprep.subr.bf16.mxu1 %v3337_v43  ;;  %v1517_v27 = vor.u32 %v1516_v22, %v1513_v21  ;;  %v3392_v42 = vld [vmem:[%s4637_s1 + $0x5c0] ss:$8 sps:$4 sm:$0xff]   ;;  %v2918_v43 = vcombine.low %v1354_v9, %v4017_v5  ;;  %v3419_v9 = vld [vmem:[%s4637_s1 + $0x204] ss:$8 sps:$4 sm:$0xff]   ;;  %v872_v21 = vshll.u32 %v3858_v52, 16 }
  0x52   : > { %1912 = vmatprep.subr.bf16.mxu0 %v3340_v44  ;;  %754 = vmatprep.mubr.bf16.mxu1 %v4024_v7  ;;  %v4100_v44 = vld [vmem:[%s3833_s17 + $0x28] ss:$16 sps:$4 sm:$0x1f]   ;;  %v3439_v22 = vld [vmem:[%s4637_s1 + $0x624] ss:$8 sps:$4 sm:$0xff]  }
  0x53   : > { %v1526_v32 = vsel %vm1458_vm0, %v1517_v27, %v4058_v28  ;;  %v3434_v24 = vld [vmem:[%s4637_s1 + $0x220] ss:$8 sps:$4 sm:$0xff]   ;;  %v3442_v27 = vld [vmem:[%s4637_s1 + $0x234] ss:$8 sps:$4 sm:$0xff]  }
  0x54   : > { %729 = vmatpush1.bf16.msra.mxu1 %v3335_v45  ;;  %1938 = vmatprep.mubr.bf16.mxu0 %v1526_v32  ;;  %v3397_v45 = vld [vmem:[%s4637_s1 + $0x1d4] ss:$8 sps:$4 sm:$0xff]   ;;  %v4193_v32 = vld [vmem:[%s3833_s17 + $0x20] sm:$0x77] }
  0x55   : > { %1913 = vmatpush1.bf16.msra.mxu0 %v3338_v46  ;;  %730 = vmatprep.subr.bf16.mxu1 %v3343_v47  ;;  %v3400_v46 = vld [vmem:[%s4637_s1 + $0x5d4] ss:$8 sps:$4 sm:$0xff]   ;;  %v3395_v47 = vld [vmem:[%s4637_s1 + $0x1d0] ss:$8 sps:$4 sm:$0xff]  }
  0x56   : > { %1914 = vmatprep.subr.bf16.mxu0 %v3346_v48  ;;  %v3398_v48 = vld [vmem:[%s4637_s1 + $0x5d0] ss:$8 sps:$4 sm:$0xff]  }
  0x58   : > { %731 = vmatpush1.bf16.msra.mxu1 %v3341_v50  ;;  %v1494_v50 = vshrl.u32 %v2918_v43, 16 }
  0x59   : > { %1915 = vmatpush1.bf16.msra.mxu0 %v3344_v51  ;;  %732 = vmatprep.subr.bf16.mxu1 %v3349_v53  ;;  %v1497_v51 = vshll.u32 %v2918_v43, 16  ;;  %v1502_v53 = vshrl.u32 %v4100_v44, 16  ;;  %v3449_v43 = vld [vmem:[%s4637_s1 + $0x640] ss:$8 sps:$4 sm:$0xff]  }
  0x5a   : > { %1916 = vmatprep.subr.bf16.mxu0 %v3352_v54  ;;  %v1505_v54 = vshll.u32 %v4100_v44, 16 }
  0x5b   : > { %v1499_v61 = vrot.slane %v1497_v51, 3  ;;  %v1504_v62 = vrot.slane %v1502_v53, 2  ;;  %v3452_v51 = vld [vmem:[%s4637_s1 + $0x250] ss:$8 sps:$4 sm:$0xff]  }
  0x5c   : > { %733 = vmatpush1.bf16.msra.mxu1 %v3347_v56  ;;  %v3404_v56 = vld [vmem:[%s4637_s1 + $0x1e4] ss:$8 sps:$4 sm:$0xff]   ;;  %v3455_v53 = vld [vmem:[%s4637_s1 + $0x650] ss:$8 sps:$4 sm:$0xff]  }
  0x5d   : > { %1917 = vmatpush1.bf16.msra.mxu0 %v3350_v57  ;;  %734 = vmatprep.subr.bf16.mxu1 %v3355_v58  ;;  %v3407_v57 = vld [vmem:[%s4637_s1 + $0x5e4] ss:$8 sps:$4 sm:$0xff]   ;;  %v3402_v58 = vld [vmem:[%s4637_s1 + $0x1e0] ss:$8 sps:$4 sm:$0xff]  }
  0x5e   : > { %1918 = vmatprep.subr.bf16.mxu0 %v3358_v60  ;;  %v1496_v60 = vrot.slane %v1494_v50, 2 }
  0x60   : > { %735 = vmatpush1.bf16.msra.mxu1 %v3353_v63  ;;  %v1507_v63 = vrot.slane %v1505_v54, 3  ;;  %v3460_v54 = vld [vmem:[%s4637_s1 + $0x264] ss:$8 sps:$4 sm:$0xff]  }
  0x61   : > { %1919 = vmatpush1.bf16.msra.mxu0 %v3356_v0  ;;  %736 = vmatprep.subr.bf16.mxu1 %v3361_v1  ;;  %v3411_v0 = vld [vmem:[%s4637_s1 + $0x1f4] ss:$8 sps:$4 sm:$0xff]  }
  0x62   : > { %1920 = vmatprep.subr.bf16.mxu0 %v3364_v2  ;;  %v3414_v1 = vld [vmem:[%s4637_s1 + $0x5f4] ss:$8 sps:$4 sm:$0xff]   ;;  %v3409_v2 = vld [vmem:[%s4637_s1 + $0x1f0] ss:$8 sps:$4 sm:$0xff]  }
  0x64   : > { %737 = vmatpush1.bf16.msra.mxu1 %v3359_v3  ;;  %v3412_v3 = vld [vmem:[%s4637_s1 + $0x5f0] ss:$8 sps:$4 sm:$0xff]  }
  0x65   : > { %1921 = vmatpush1.bf16.msra.mxu0 %v3362_v6  ;;  %738 = vmatprep.subr.bf16.mxu1 %v3367_v8  ;;  %v1500_v6 = vor.u32 %v1499_v61, %v1496_v60  ;;  %v1508_v8 = vor.u32 %v1507_v63, %v1504_v62  ;;  %v3469_v60 = vld [vmem:[%s4637_s1 + $0x674] ss:$8 sps:$4 sm:$0xff]   ;;  %v3464_v61 = vld [vmem:[%s4637_s1 + $0x270] ss:$8 sps:$4 sm:$0xff]   ;;  %v3472_v63 = vld [vmem:[%s4637_s1 + $0x284] ss:$8 sps:$4 sm:$0xff]  }
  0x66   : > { %1922 = vmatprep.subr.bf16.mxu0 %v3370_v10  ;;  %v3427_v10 = vld [vmem:[%s4637_s1 + $0x604] ss:$8 sps:$4 sm:$0xff]   ;;  %v3467_v62 = vld [vmem:[%s4637_s1 + $0x670] ss:$8 sps:$4 sm:$0xff]  }
  0x67   : > { %v1509_v15 = vsel %vm1458_vm0, %v1500_v6, %v1508_v8  ;;  %v3481_v6 = vld [vmem:[%s4637_s1 + $0x694] ss:$8 sps:$4 sm:$0xff]  }
  0x68   : > { %739 = vmatpush1.bf16.msra.mxu1 %v3365_v13  ;;  %v3417_v13 = vld [vmem:[%s4637_s1 + $0x200] ss:$8 sps:$4 sm:$0xff]  }
  0x69   : > { %1923 = vmatpush1.bf16.msra.mxu0 %v3368_v14  ;;  %740 = vmatprep.subr.bf16.mxu1 %v3373_v19  ;;  %v3425_v14 = vld [vmem:[%s4637_s1 + $0x600] ss:$8 sps:$4 sm:$0xff]   ;;  %v3436_v19 = vld [vmem:[%s4637_s1 + $0x224] ss:$8 sps:$4 sm:$0xff]  }
  0x6a   : > { %1924 = vmatprep.subr.bf16.mxu0 %v3376_v20  ;;  %v252_v20 = vld [vmem:[%s3833_s17 + $0x28] sm:$0x33] }
  0x6b   : > { %v2655_v23 = vcombine.high %v252_v20, %v252_v20 }
  0x6c   : > { %741 = vmatpush1.bf16.msra.mxu1 %v3371_v25  ;;  %v2654_v25 = vcombine.low %v252_v20, %v252_v20  ;;  %v3499_v20 = vld [vmem:[%s4637_s1 + $0x6c4] ss:$8 sps:$4 sm:$0xff]  }
  0x6d   : > { %1925 = vmatpush1.bf16.msra.mxu0 %v3374_v26  ;;  %742 = vmatprep.subr.bf16.mxu1 %v3379_v29  ;;  %v3437_v26 = vld [vmem:[%s4637_s1 + $0x620] ss:$8 sps:$4 sm:$0xff]   ;;  %v870_v29 = vshrl.u32 %v3858_v52, 16 }
  0x6e   : > { %1926 = vmatprep.subr.bf16.mxu0 %v3382_v30  ;;  %v874_v30 = vrot.slane %v872_v21, 1  ;;  %v4206_v52 = vld [vmem:[%s3833_s17] sm:$0x88] }
  0x6f   : > { %v3494_v21 = vld [vmem:[%s4637_s1 + $0x2c0] ss:$8 sps:$4 sm:$0xff]  }
  0x70   : > { %743 = vmatpush1.bf16.msra.mxu1 %v3377_v33  ;;  %v3440_v33 = vld [vmem:[%s4637_s1 + $0x230] ss:$8 sps:$4 sm:$0xff]  }
  0x71   : > { %1927 = vmatpush1.bf16.msra.mxu0 %v3380_v34  ;;  %744 = vmatprep.subr.bf16.mxu1 %v3385_v35  ;;  %v3443_v34 = vld [vmem:[%s4637_s1 + $0x630] ss:$8 sps:$4 sm:$0xff]   ;;  %v4203_v35 = vcombine.high %v4193_v32, %v4193_v32 }
  0x72   : > { %1928 = vmatprep.subr.bf16.mxu0 %v3388_v36  ;;  %v3448_v36 = vld [vmem:[%s4637_s1 + $0x244] ss:$8 sps:$4 sm:$0xff]  }
  0x74   : > { %745 = vmatpush1.bf16.msra.mxu1 %v3383_v37  ;;  %v3451_v37 = vld [vmem:[%s4637_s1 + $0x644] ss:$8 sps:$4 sm:$0xff]  }
  0x75   : > { %1929 = vmatpush1.bf16.msra.mxu0 %v3386_v38  ;;  %746 = vmatprep.subr.bf16.mxu1 %v3391_v39  ;;  %v875_v38 = vor.u32 %v874_v30, %v870_v29  ;;  %v877_v39 = vshll.u32 %v4203_v35, 16  ;;  %v3509_v29 = vld [vmem:[%s4637_s1 + $0x2e4] ss:$8 sps:$4 sm:$0xff]   ;;  %v4346_v30 = vcombine.low %v4193_v32, %v4193_v32  ;;  %v3510_v32 = vld [vmem:[%s4637_s1 + $0x6e0] ss:$8 sps:$4 sm:$0xff]  }
  0x76   : > { %1930 = vmatprep.subr.bf16.mxu0 %v3394_v40  ;;  %v3053_v40 = vcombine.high %v4206_v52, %v3848_v49  ;;  %v3454_v49 = vld [vmem:[%s4637_s1 + $0x254] ss:$8 sps:$4 sm:$0xff]  }
  0x78   : > { %747 = vmatpush1.bf16.msra.mxu1 %v3389_v41  ;;  %v2045_v41 = vrot.slane %v3863_v55, 3  ;;  %v3544_v55 = vld [vmem:[%s4637_s1 + $0x334] ss:$8 sps:$4 sm:$0xff]  }
  0x79   : > { %1931 = vmatpush1.bf16.msra.mxu0 %v3392_v42  ;;  %748 = vmatprep.subr.bf16.mxu1 %v3397_v45  ;;  %v3446_v42 = vld [vmem:[%s4637_s1 + $0x240] ss:$8 sps:$4 sm:$0xff]   ;;  %v4224_v45 = vrot.slane %v877_v39, 1 }
  0x7a   : > { %1932 = vmatprep.subr.bf16.mxu0 %v3400_v46  ;;  %v2044_v46 = vrot.slane %v3053_v40, 3 }
  0x7c   : > { %749 = vmatpush1.bf16.msra.mxu1 %v3395_v47  ;;  %v3457_v47 = vld [vmem:[%s4637_s1 + $0x654] ss:$8 sps:$4 sm:$0xff]   ;;  %v2046_v50 = vsel %vm2040_vm2, %v2044_v46, %v2045_v41 }
  0x7d   : > { %1933 = vmatpush1.bf16.msra.mxu0 %v3398_v48  ;;  %750 = vmatprep.subr.bf16.mxu1 %v3404_v56  ;;  %v880_v48 = vsel %vm856_vm1, %v875_v38, %v4224_v45  ;;  %v3463_v56 = vld [vmem:[%s4637_s1 + $0x664] ss:$8 sps:$4 sm:$0xff]   ;;  %v858_v38 = vshrl.u32 %v3921_v31, 16 }
  0x7e   : > { %1934 = vmatprep.subr.bf16.mxu0 %v3407_v57  ;;  %v3458_v57 = vld [vmem:[%s4637_s1 + $0x260] ss:$8 sps:$4 sm:$0xff]  }
  0x80   : > { %751 = vmatpush1.bf16.msra.mxu1 %v3402_v58  ;;  %v3461_v58 = vld [vmem:[%s4637_s1 + $0x660] ss:$8 sps:$4 sm:$0xff]  }
  0x81   : > { %1935 = vmatpush1.bf16.msra.mxu0 %v3405_v59  ;;  %752 = vmatprep.subr.bf16.mxu1 %v3411_v0  ;;  %v3466_v59 = vld [vmem:[%s4637_s1 + $0x274] ss:$8 sps:$4 sm:$0xff]   ;;  %v3475_v0 = vld [vmem:[%s4637_s1 + $0x684] ss:$8 sps:$4 sm:$0xff]  }
  0x82   : > { %1936 = vmatprep.subr.bf16.mxu0 %v3414_v1  ;;  %v3470_v1 = vld [vmem:[%s4637_s1 + $0x280] ss:$8 sps:$4 sm:$0xff]  }
  0x84   : > { %753 = vmatpush1.bf16.msra.mxu1 %v3409_v2  ;;  %v3473_v2 = vld [vmem:[%s4637_s1 + $0x680] ss:$8 sps:$4 sm:$0xff]  }
  0x85   : > { %1937 = vmatpush1.bf16.msra.mxu0 %v3412_v3  ;;  %1245 = vmatprep.subr.bf16.mxu1 %v3419_v9  ;;  %v3478_v3 = vld [vmem:[%s4637_s1 + $0x294] ss:$8 sps:$4 sm:$0xff]   ;;  %v3479_v9 = vld [vmem:[%s4637_s1 + $0x690] ss:$8 sps:$4 sm:$0xff]  }
  0x86   : > { %2381 = vmatprep.subr.bf16.mxu0 %v3427_v10  ;;  %v3484_v10 = vld [vmem:[%s4637_s1 + $0x2a4] ss:$8 sps:$4 sm:$0xff]  }
  0x87   : > { %755 = vmatmul.mubr.bf16.vlgmr.msra.gmra.mrb[0].mxu1 %v4148_v11 }
  0x88   : > { %1939 = vmatmul.mubr.bf16.vlgmr.msra.gmra.mrb[0].mxu0 %v1509_v15  ;;  %1246 = vmatpush1.bf16.msra.mxu1 %v3417_v13  ;;  %v3487_v13 = vld [vmem:[%s4637_s1 + $0x6a4] ss:$8 sps:$4 sm:$0xff]   ;;  %v3485_v15 = vld [vmem:[%s4637_s1 + $0x6a0] ss:$8 sps:$4 sm:$0xff]  }
  0x89   : > { %2382 = vmatpush1.bf16.msra.mxu0 %v3425_v14  ;;  %1247 = vmatprep.subr.bf16.mxu1 %v3430_v4  ;;  %v3482_v14 = vld [vmem:[%s4637_s1 + $0x2a0] ss:$8 sps:$4 sm:$0xff]   ;;  %v3490_v4 = vld [vmem:[%s4637_s1 + $0x2b4] ss:$8 sps:$4 sm:$0xff]  }
  0x8a   : > { %2383 = vmatprep.subr.bf16.mxu0 %v3433_v16  ;;  %1948 = vmatprep.mubr.bf16.mxu0 %v4058_v28  ;;  %v3445_v28 = vld [vmem:[%s4637_s1 + $0x634] ss:$8 sps:$4 sm:$0xff]  }
  0x8b   : > { %764 = vmatprep.mubr.bf16.mxu1 %v2655_v23  ;;  %v3493_v16 = vld [vmem:[%s4637_s1 + $0x6b4] ss:$8 sps:$4 sm:$0xff]  }
  0x8c   : > { %1248 = vmatpush1.bf16.msra.mxu1 %v3428_v17  ;;  %v3488_v17 = vld [vmem:[%s4637_s1 + $0x2b0] ss:$8 sps:$4 sm:$0xff]   ;;  %v3502_v23 = vld [vmem:[%s4637_s1 + $0x2d4] ss:$8 sps:$4 sm:$0xff]  }
  0x8d   : > { %2384 = vmatpush1.bf16.msra.mxu0 %v3431_v18  ;;  %1249 = vmatprep.subr.bf16.mxu1 %v3436_v19  ;;  %v3491_v18 = vld [vmem:[%s4637_s1 + $0x6b0] ss:$8 sps:$4 sm:$0xff]   ;;  %v3496_v19 = vld [vmem:[%s4637_s1 + $0x2c4] ss:$8 sps:$4 sm:$0xff]  }
  0x8e   : > { %2385 = vmatprep.subr.bf16.mxu0 %v3439_v22  ;;  %v3497_v22 = vld [vmem:[%s4637_s1 + $0x6c0] ss:$8 sps:$4 sm:$0xff]  }
  0x8f   : > { %765 = vmatmul.mubr.bf16.gmra.mrb[4].mxu1 %v2654_v25  ;;  %v3505_v25 = vld [vmem:[%s4637_s1 + $0x6d4] ss:$8 sps:$4 sm:$0xff]  }
  0x90   : > { %1949 = vmatmul.mubr.bf16.gmra.mrb[4].mxu0 %v1508_v8  ;;  %1250 = vmatpush1.bf16.msra.mxu1 %v3434_v24  ;;  %v3476_v8 = vld [vmem:[%s4637_s1 + $0x290] ss:$8 sps:$4 sm:$0xff]   ;;  %v884_v24 = vshll.u32 %v4148_v11, 16 }
  0x91   : > { %2386 = vmatpush1.bf16.msra.mxu0 %v3437_v26  ;;  %1251 = vmatprep.subr.bf16.mxu1 %v3442_v27  ;;  %v860_v26 = vshll.u32 %v3921_v31, 16  ;;  %v3500_v27 = vld [vmem:[%s4637_s1 + $0x2d0] ss:$8 sps:$4 sm:$0xff]   ;;  %v865_v31 = vshll.u32 %v4346_v30, 16 }
  0x92   : > { %2387 = vmatprep.subr.bf16.mxu0 %v3445_v28  ;;  %1277 = vmatprep.mubr.bf16.mxu1 %v880_v48  ;;  %v3503_v28 = vld [vmem:[%s4637_s1 + $0x6d0] ss:$8 sps:$4 sm:$0xff]   ;;  %v3516_v48 = vld [vmem:[%s4637_s1 + $0x2f4] ss:$8 sps:$4 sm:$0xff]  }
  0x93   : > { %2413 = vmatprep.mubr.bf16.mxu0 %v2046_v50  ;;  %v862_v39 = vrot.slane %v860_v26, 1  ;;  %v3519_v50 = vld [vmem:[%s4637_s1 + $0x6f4] ss:$8 sps:$4 sm:$0xff]  }
  0x94   : > { %1252 = vmatpush1.bf16.msra.mxu1 %v3440_v33  ;;  %v882_v33 = vshrl.u32 %v4148_v11, 16  ;;  %v3507_v11 = vld [vmem:[%s4637_s1 + $0x2e0] ss:$8 sps:$4 sm:$0xff]  }
  0x95   : > { %2388 = vmatpush1.bf16.msra.mxu0 %v3443_v34  ;;  %1253 = vmatprep.subr.bf16.mxu1 %v3448_v36  ;;  %v886_v34 = vrot.slane %v884_v24, 1  ;;  %v3512_v36 = vld [vmem:[%s4637_s1 + $0x6e4] ss:$8 sps:$4 sm:$0xff]  }
  0x96   : > { %2389 = vmatprep.subr.bf16.mxu0 %v3451_v37  ;;  %v780_v37 = vld [vmem:[%s3833_s17 + $0x28] sm:$0x77] }
  0x97   : > { %v4354_v40 = vcombine.low %v780_v37, %v780_v37 }
  0x98   : > { %1254 = vmatpush1.bf16.msra.mxu1 %v3446_v42  ;;  %v4357_v42 = vld [vmem:[%s3833_s17 + $0x8] sm:$0x88] }
  0x99   : > { %2390 = vmatpush1.bf16.msra.mxu0 %v3449_v43  ;;  %1255 = vmatprep.subr.bf16.mxu1 %v3454_v49  ;;  %v3624_v43 = vld [vmem:[%s3833_s17 + $0x10] sm:$0xff]  ;;  %v3054_v49 = vcombine.low %v4357_v42, %v4017_v5 }
  0x9a   : > { %2391 = vmatprep.subr.bf16.mxu0 %v3457_v47  ;;  %v3052_v46 = vcombine.low %v4206_v52, %v3624_v43  ;;  %v2048_v47 = vrot.slane %v4100_v44, 3  ;;  %v889_v52 = vshll.u32 %v4354_v40, 16  ;;  %v3557_v43 = vld [vmem:[%s4637_s1 + $0x750] ss:$8 sps:$4 sm:$0xff]  }
  0x9c   : > { %1256 = vmatpush1.bf16.msra.mxu1 %v3452_v51  ;;  %v887_v51 = vor.u32 %v886_v34, %v882_v33  ;;  %v3542_v33 = vld [vmem:[%s4637_s1 + $0x330] ss:$8 sps:$4 sm:$0xff]  }
  0x9d   : > { %2392 = vmatpush1.bf16.msra.mxu0 %v3455_v53  ;;  %1257 = vmatprep.subr.bf16.mxu1 %v3460_v54  ;;  %v2047_v53 = vrot.slane %v3054_v49, 3  ;;  %v3625_v54 = vld [vmem:[%s3833_s17 + $0x20] ss:$16 sps:$4 sm:$0x1f]  }
  0x9e   : > { %2393 = vmatprep.subr.bf16.mxu0 %v3463_v56  ;;  %v2042_v56 = vrot.slane %v3625_v54, 3  ;;  %v3545_v34 = vld [vmem:[%s4637_s1 + $0x730] ss:$8 sps:$4 sm:$0xff]   ;;  %v3560_v49 = vld [vmem:[%s4637_s1 + $0x360] ss:$8 sps:$4 sm:$0xff]  }
  0x9f   : > { %v3574_v54 = vld [vmem:[%s4637_s1 + $0x384] ss:$8 sps:$4 sm:$0xff]  }
  0xa0   : > { %1258 = vmatpush1.bf16.msra.mxu1 %v3458_v57  ;;  %v4379_v57 = vrot.slane %v889_v52, 1  ;;  %v3566_v52 = vld [vmem:[%s4637_s1 + $0x370] ss:$8 sps:$4 sm:$0xff]  }
  0xa1   : > { %2394 = vmatpush1.bf16.msra.mxu0 %v3461_v58  ;;  %1259 = vmatprep.subr.bf16.mxu1 %v3466_v59  ;;  %v3514_v58 = vld [vmem:[%s4637_s1 + $0x2f0] ss:$8 sps:$4 sm:$0xff]  }
  0xa2   : > { %2395 = vmatprep.subr.bf16.mxu0 %v3469_v60  ;;  %v3517_v59 = vld [vmem:[%s4637_s1 + $0x6f0] ss:$8 sps:$4 sm:$0xff]   ;;  %v2041_v60 = vrot.slane %v3052_v46, 3  ;;  %v3562_v46 = vld [vmem:[%s4637_s1 + $0x364] ss:$8 sps:$4 sm:$0xff]  }
  0xa4   : > { %1260 = vmatpush1.bf16.msra.mxu1 %v3464_v61  ;;  %v863_v61 = vor.u32 %v862_v39, %v858_v38  ;;  %v3548_v38 = vld [vmem:[%s4637_s1 + $0x340] ss:$8 sps:$4 sm:$0xff]  }
  0xa5   : > { %2396 = vmatpush1.bf16.msra.mxu0 %v3467_v62  ;;  %1261 = vmatprep.subr.bf16.mxu1 %v3472_v63  ;;  %v867_v62 = vrot.slane %v865_v31, 1  ;;  %v4390_v63 = vsel %vm2040_vm2, %v2047_v53, %v2048_v47  ;;  %v3551_v39 = vld [vmem:[%s4637_s1 + $0x740] ss:$8 sps:$4 sm:$0xff]   ;;  %v3565_v31 = vld [vmem:[%s4637_s1 + $0x764] ss:$8 sps:$4 sm:$0xff]  }
  0xa6   : > { %2397 = vmatprep.subr.bf16.mxu0 %v3475_v0  ;;  %v3524_v0 = vld [vmem:[%s4637_s1 + $0x304] ss:$8 sps:$4 sm:$0xff]   ;;  %v3569_v53 = vld [vmem:[%s4637_s1 + $0x770] ss:$8 sps:$4 sm:$0xff]  }
  0xa8   : > { %1262 = vmatpush1.bf16.msra.mxu1 %v3470_v1  ;;  %v3529_v1 = vld [vmem:[%s4637_s1 + $0x704] ss:$8 sps:$4 sm:$0xff]  }
  0xa9   : > { %2398 = vmatpush1.bf16.msra.mxu0 %v3473_v2  ;;  %1263 = vmatprep.subr.bf16.mxu1 %v3478_v3  ;;  %v4400_v2 = vsel %vm856_vm1, %v887_v51, %v4379_v57  ;;  %v908_v3 = vshrl.u32 %v4203_v35, 16  ;;  %v3532_v35 = vld [vmem:[%s4637_s1 + $0x314] ss:$8 sps:$4 sm:$0xff]  }
  0xaa   : > { %2399 = vmatprep.subr.bf16.mxu0 %v3481_v6  ;;  %v896_v6 = vshll.u32 %v4024_v7, 16  ;;  %v3571_v51 = vld [vmem:[%s4637_s1 + $0x774] ss:$8 sps:$4 sm:$0xff]  }
  0xac   : > { %1264 = vmatpush1.bf16.msra.mxu1 %v3476_v8  ;;  %v4404_v8 = vcombine.high %v780_v37, %v780_v37  ;;  %v3553_v37 = vld [vmem:[%s4637_s1 + $0x744] ss:$8 sps:$4 sm:$0xff]  }
  0xad   : > { %2400 = vmatpush1.bf16.msra.mxu0 %v3479_v9  ;;  %1265 = vmatprep.subr.bf16.mxu1 %v3484_v10  ;;  %v3522_v9 = vld [vmem:[%s4637_s1 + $0x300] ss:$8 sps:$4 sm:$0xff]  }
  0xae   : > { %2401 = vmatprep.subr.bf16.mxu0 %v3487_v13  ;;  %v3527_v10 = vld [vmem:[%s4637_s1 + $0x700] ss:$8 sps:$4 sm:$0xff]   ;;  %v868_v13 = vsel %vm856_vm1, %v863_v61, %v867_v62  ;;  %v3583_v61 = vld [vmem:[%s4637_s1 + $0x794] ss:$8 sps:$4 sm:$0xff]  }
  0xb0   : > { %1266 = vmatpush1.bf16.msra.mxu1 %v3482_v14  ;;  %v2043_v14 = vsel %vm2040_vm2, %v2041_v60, %v2042_v56  ;;  %v3580_v60 = vld [vmem:[%s4637_s1 + $0x394] ss:$8 sps:$4 sm:$0xff]  }
  0xb1   : > { %2402 = vmatpush1.bf16.msra.mxu0 %v3485_v15  ;;  %1267 = vmatprep.subr.bf16.mxu1 %v3490_v4  ;;  %v3535_v15 = vld [vmem:[%s4637_s1 + $0x714] ss:$8 sps:$4 sm:$0xff]   ;;  %v910_v4 = vor.u32 %v908_v3, %v4224_v45  ;;  %v3538_v45 = vld [vmem:[%s4637_s1 + $0x324] ss:$8 sps:$4 sm:$0xff]  }
  0xb2   : > { %2403 = vmatprep.subr.bf16.mxu0 %v3493_v16  ;;  %v894_v16 = vshrl.u32 %v4024_v7, 16  ;;  %v3533_v7 = vld [vmem:[%s4637_s1 + $0x710] ss:$8 sps:$4 sm:$0xff]   ;;  %v3589_v3 = vld [vmem:[%s4637_s1 + $0x7a4] ss:$8 sps:$4 sm:$0xff]  }
  0xb4   : > { %1268 = vmatpush1.bf16.msra.mxu1 %v3488_v17  ;;  %v905_v17 = vshrl.u32 %v4346_v30, 16 }
  0xb5   : > { %2404 = vmatpush1.bf16.msra.mxu0 %v3491_v18  ;;  %1269 = vmatprep.subr.bf16.mxu1 %v3496_v19  ;;  %v898_v18 = vrot.slane %v896_v6, 1  ;;  %v901_v19 = vshll.u32 %v4404_v8, 16  ;;  %v3584_v6 = vld [vmem:[%s4637_s1 + $0x3a0] ss:$8 sps:$4 sm:$0xff]  }
  0xb6   : > { %2405 = vmatprep.subr.bf16.mxu0 %v3499_v20  ;;  %v3055_v20 = vcombine.high %v4357_v42, %v4017_v5  ;;  %v3541_v5 = vld [vmem:[%s4637_s1 + $0x724] ss:$8 sps:$4 sm:$0xff]   ;;  %v3556_v42 = vld [vmem:[%s4637_s1 + $0x354] ss:$8 sps:$4 sm:$0xff]  }
  0xb7   : > { %v899_v24 = vor.u32 %v898_v18, %v894_v16  ;;  %v3596_v16 = vld [vmem:[%s4637_s1 + $0x3c0] ss:$8 sps:$4 sm:$0xff]   ;;  %v3604_v18 = vld [vmem:[%s4637_s1 + $0x3d4] ss:$8 sps:$4 sm:$0xff]  }
  0xb8   : > { %1270 = vmatpush1.bf16.msra.mxu1 %v3494_v21  ;;  %v3530_v21 = vld [vmem:[%s4637_s1 + $0x310] ss:$8 sps:$4 sm:$0xff]   ;;  %v2050_v26 = vrot.slane %v3055_v20, 3 }
  0xb9   : > { %2406 = vmatpush1.bf16.msra.mxu0 %v3497_v22  ;;  %1271 = vmatprep.subr.bf16.mxu1 %v3502_v23  ;;  %v2051_v22 = vrot.slane %v4036_v12, 3  ;;  %v907_v23 = vor.u32 %v905_v17, %v867_v62  ;;  %v3578_v62 = vld [vmem:[%s4637_s1 + $0x390] ss:$8 sps:$4 sm:$0xff]   ;;  %v3599_v17 = vld [vmem:[%s4637_s1 + $0x7c0] ss:$8 sps:$4 sm:$0xff]  }
  0xba   : > { %2407 = vmatprep.subr.bf16.mxu0 %v3505_v25  ;;  %v4441_v25 = vrot.slane %v901_v19, 1  ;;  %v3607_v19 = vld [vmem:[%s4637_s1 + $0x7d4] ss:$8 sps:$4 sm:$0xff]   ;;  %v3602_v20 = vld [vmem:[%s4637_s1 + $0x3d0] ss:$8 sps:$4 sm:$0xff]  }
  0xbb   : > { %v2052_v30 = vsel %vm2040_vm2, %v2050_v26, %v2051_v22  ;;  %v3619_v26 = vld [vmem:[%s4637_s1 + $0x7f4] ss:$8 sps:$4 sm:$0xff]  }
  0xbc   : > { %1272 = vmatpush1.bf16.msra.mxu1 %v3500_v27  ;;  %v3536_v27 = vld [vmem:[%s4637_s1 + $0x320] ss:$8 sps:$4 sm:$0xff]  }
  0xbd   : > { %2408 = vmatpush1.bf16.msra.mxu0 %v3503_v28  ;;  %1273 = vmatprep.subr.bf16.mxu1 %v3509_v29  ;;  %v3539_v28 = vld [vmem:[%s4637_s1 + $0x720] ss:$8 sps:$4 sm:$0xff]   ;;  %v904_v29 = vsel %vm856_vm1, %v899_v24, %v4441_v25  ;;  %v3616_v24 = vld [vmem:[%s4637_s1 + $0x3f4] ss:$8 sps:$4 sm:$0xff]  }
  0xbe   : > { %2409 = vmatprep.subr.bf16.mxu0 %v3512_v36  ;;  %v3550_v36 = vld [vmem:[%s4637_s1 + $0x344] ss:$8 sps:$4 sm:$0xff]  }
  0xc0   : > { %1274 = vmatpush1.bf16.msra.mxu1 %v3507_v11  ;;  %v3559_v11 = vld [vmem:[%s4637_s1 + $0x754] ss:$8 sps:$4 sm:$0xff]  }
  0xc1   : > { %2410 = vmatpush1.bf16.msra.mxu0 %v3510_v32  ;;  %1275 = vmatprep.subr.bf16.mxu1 %v3516_v48  ;;  %v3554_v32 = vld [vmem:[%s4637_s1 + $0x350] ss:$8 sps:$4 sm:$0xff]   ;;  %v3563_v48 = vld [vmem:[%s4637_s1 + $0x760] ss:$8 sps:$4 sm:$0xff]  }
  0xc2   : > { %2411 = vmatprep.subr.bf16.mxu0 %v3519_v50  ;;  %v3568_v50 = vld [vmem:[%s4637_s1 + $0x374] ss:$8 sps:$4 sm:$0xff]  }
  0xc4   : > { %1276 = vmatpush1.bf16.msra.mxu1 %v3514_v58  ;;  %v3572_v58 = vld [vmem:[%s4637_s1 + $0x380] ss:$8 sps:$4 sm:$0xff]  }
  0xc5   : > { %2412 = vmatpush1.bf16.msra.mxu0 %v3517_v59  ;;  %1296 = vmatprep.subr.bf16.mxu1 %v3524_v0  ;;  %v3575_v59 = vld [vmem:[%s4637_s1 + $0x780] ss:$8 sps:$4 sm:$0xff]   ;;  %v3581_v0 = vld [vmem:[%s4637_s1 + $0x790] ss:$8 sps:$4 sm:$0xff]  }
  0xc6   : > { %2432 = vmatprep.subr.bf16.mxu0 %v3529_v1  ;;  %v3586_v1 = vld [vmem:[%s4637_s1 + $0x3a4] ss:$8 sps:$4 sm:$0xff]  }
  0xc7   : > { %1278 = vmatmul.mubr.bf16.vlgmr.msra.gmra.mrb[0].mxu1 %v868_v13  ;;  %v3595_v13 = vld [vmem:[%s4637_s1 + $0x7b4] ss:$8 sps:$4 sm:$0xff]  }
  0xc8   : > { %2414 = vmatmul.mubr.bf16.vlgmr.msra.gmra.mrb[0].mxu0 %v2043_v14  ;;  %1297 = vmatpush1.bf16.msra.mxu1 %v3522_v9  ;;  %v3587_v9 = vld [vmem:[%s4637_s1 + $0x7a0] ss:$8 sps:$4 sm:$0xff]   ;;  %v3590_v14 = vld [vmem:[%s4637_s1 + $0x3b0] ss:$8 sps:$4 sm:$0xff]  }
  0xc9   : > { %2433 = vmatpush1.bf16.msra.mxu0 %v3527_v10  ;;  %1298 = vmatprep.subr.bf16.mxu1 %v3532_v35  ;;  %v3592_v10 = vld [vmem:[%s4637_s1 + $0x3b4] ss:$8 sps:$4 sm:$0xff]   ;;  %v3593_v35 = vld [vmem:[%s4637_s1 + $0x7b0] ss:$8 sps:$4 sm:$0xff]  }
  0xca   : > { %2434 = vmatprep.subr.bf16.mxu0 %v3535_v15  ;;  %1287 = vmatprep.mubr.bf16.mxu1 %v910_v4  ;;  %v3598_v15 = vld [vmem:[%s4637_s1 + $0x3c4] ss:$8 sps:$4 sm:$0xff]  }
  0xcb   : > { %2423 = vmatprep.mubr.bf16.mxu0 %v2045_v41  ;;  %v3547_v41 = vld [vmem:[%s4637_s1 + $0x734] ss:$8 sps:$4 sm:$0xff]   ;;  %v3601_v4 = vld [vmem:[%s4637_s1 + $0x7c4] ss:$8 sps:$4 sm:$0xff]  }
  0xcc   : > { %1299 = vmatpush1.bf16.msra.mxu1 %v3530_v21  ;;  %v3605_v21 = vld [vmem:[%s4637_s1 + $0x7d0] ss:$8 sps:$4 sm:$0xff]  }
  0xcd   : > { %2435 = vmatpush1.bf16.msra.mxu0 %v3533_v7  ;;  %1300 = vmatprep.subr.bf16.mxu1 %v3538_v45  ;;  %v3610_v7 = vld [vmem:[%s4637_s1 + $0x3e4] ss:$8 sps:$4 sm:$0xff]  }
  0xce   : > { %2436 = vmatprep.subr.bf16.mxu0 %v3541_v5  ;;  %v3613_v45 = vld [vmem:[%s4637_s1 + $0x7e4] ss:$8 sps:$4 sm:$0xff]   ;;  %v3608_v5 = vld [vmem:[%s4637_s1 + $0x3e0] ss:$8 sps:$4 sm:$0xff]  }
  0xcf   : > { %1288 = vmatmul.mubr.bf16.gmra.mrb[4].mxu1 %v907_v23  ;;  %v3611_v23 = vld [vmem:[%s4637_s1 + $0x7e0] ss:$8 sps:$4 sm:$0xff]  }
  0xd0   : > { %2424 = vmatmul.mubr.bf16.gmra.mrb[4].mxu0 %v2042_v56  ;;  %1301 = vmatpush1.bf16.msra.mxu1 %v3536_v27  ;;  %v3577_v56 = vld [vmem:[%s4637_s1 + $0x784] ss:$8 sps:$4 sm:$0xff]   ;;  %v3614_v27 = vld [vmem:[%s4637_s1 + $0x3f0] ss:$8 sps:$4 sm:$0xff]  }
  0xd1   : > { %2437 = vmatpush1.bf16.msra.mxu0 %v3539_v28  ;;  %1302 = vmatprep.subr.bf16.mxu1 %v3544_v55  ;;  %v3617_v28 = vld [vmem:[%s4637_s1 + $0x7f0] ss:$8 sps:$4 sm:$0xff]   ;;  %v914_v55 = vshrl.u32 %v4404_v8, 16  ;;  %v237_v8 = vlaneseq }
  0xd2   : > { %2438 = vmatprep.subr.bf16.mxu0 %v3547_v41  ;;  %1328 = vmatprep.mubr.bf16.mxu1 %v904_v29  ;;  %v911_v29 = vshrl.u32 %v4354_v40, 16 }
  0xd3   : > { %2464 = vmatprep.mubr.bf16.mxu0 %v2052_v30  ;;  %v916_v41 = vor.u32 %v914_v55, %v4441_v25 }
  0xd4   : > { %1303 = vmatpush1.bf16.msra.mxu1 %v3542_v33  ;;  %v913_v30 = vor.u32 %v911_v29, %v4379_v57  ;;  %v238_v33 = vshrl.u32 %v237_v8, 7 }
  0xd5   : > { %2439 = vmatpush1.bf16.msra.mxu0 %v3545_v34  ;;  %1304 = vmatprep.subr.bf16.mxu1 %v3550_v36 }
  0xd6   : > { %2440 = vmatprep.subr.bf16.mxu0 %v3553_v37  ;;  %v239_v34 = vsub.s32 0, %v238_v33 }
  0xd8   : > { %1305 = vmatpush1.bf16.msra.mxu1 %v3548_v38 }
  0xd9   : > { %2441 = vmatpush1.bf16.msra.mxu0 %v3551_v39  ;;  %1306 = vmatprep.subr.bf16.mxu1 %v3556_v42 }
  0xda   : > { %2442 = vmatprep.subr.bf16.mxu0 %v3559_v11 }
  0xdc   : > { %1307 = vmatpush1.bf16.msra.mxu1 %v3554_v32 }
  0xdd   : > { %2443 = vmatpush1.bf16.msra.mxu0 %v3557_v43  ;;  %1308 = vmatprep.subr.bf16.mxu1 %v3562_v46 }
  0xde   : > { %2444 = vmatprep.subr.bf16.mxu0 %v3565_v31 }
  0xe0   : > { %1309 = vmatpush1.bf16.msra.mxu1 %v3560_v49 }
  0xe1   : > { %2445 = vmatpush1.bf16.msra.mxu0 %v3563_v48  ;;  %1310 = vmatprep.subr.bf16.mxu1 %v3568_v50 }
  0xe2   : > { %2446 = vmatprep.subr.bf16.mxu0 %v3571_v51 }
  0xe4   : > { %1311 = vmatpush1.bf16.msra.mxu1 %v3566_v52 }
  0xe5   : > { %2447 = vmatpush1.bf16.msra.mxu0 %v3569_v53  ;;  %1312 = vmatprep.subr.bf16.mxu1 %v3574_v54 }
  0xe6   : > { %2448 = vmatprep.subr.bf16.mxu0 %v3577_v56 }
  0xe8   : > { %1313 = vmatpush1.bf16.msra.mxu1 %v3572_v58 }
  0xe9   : > { %2449 = vmatpush1.bf16.msra.mxu0 %v3575_v59  ;;  %1314 = vmatprep.subr.bf16.mxu1 %v3580_v60 }
  0xea   : > { %2450 = vmatprep.subr.bf16.mxu0 %v3583_v61 }
  0xec   : > { %1315 = vmatpush1.bf16.msra.mxu1 %v3578_v62 }
  0xed   : > { %2451 = vmatpush1.bf16.msra.mxu0 %v3581_v0  ;;  %1316 = vmatprep.subr.bf16.mxu1 %v3586_v1 }
  0xee   : > { %2452 = vmatprep.subr.bf16.mxu0 %v3589_v3 }
  0xf0   : > { %1317 = vmatpush1.bf16.msra.mxu1 %v3584_v6 }
  0xf1   : > { %2453 = vmatpush1.bf16.msra.mxu0 %v3587_v9  ;;  %1318 = vmatprep.subr.bf16.mxu1 %v3592_v10 }
  0xf2   : > { %2454 = vmatprep.subr.bf16.mxu0 %v3595_v13 }
  0xf4   : > { %1319 = vmatpush1.bf16.msra.mxu1 %v3590_v14 }
  0xf5   : > { %2455 = vmatpush1.bf16.msra.mxu0 %v3593_v35  ;;  %1320 = vmatprep.subr.bf16.mxu1 %v3598_v15 }
  0xf6   : > { %2456 = vmatprep.subr.bf16.mxu0 %v3601_v4 }
  0xf8   : > { %1321 = vmatpush1.bf16.msra.mxu1 %v3596_v16 }
  0xf9   : > { %2457 = vmatpush1.bf16.msra.mxu0 %v3599_v17  ;;  %1322 = vmatprep.subr.bf16.mxu1 %v3604_v18 }
  0xfa   : > { %2458 = vmatprep.subr.bf16.mxu0 %v3607_v19 }
  0xfc   : > { %1323 = vmatpush1.bf16.msra.mxu1 %v3602_v20 }
  0xfd   : > { %2459 = vmatpush1.bf16.msra.mxu0 %v3605_v21  ;;  %1324 = vmatprep.subr.bf16.mxu1 %v3610_v7 }
  0xfe   : > { %2460 = vmatprep.subr.bf16.mxu0 %v3613_v45 }
 0x100   : > { %1325 = vmatpush1.bf16.msra.mxu1 %v3608_v5 }
 0x101   : > { %2461 = vmatpush1.bf16.msra.mxu0 %v3611_v23  ;;  %1326 = vmatprep.subr.bf16.mxu1 %v3616_v24 }
 0x102   : > { %2462 = vmatprep.subr.bf16.mxu0 %v3619_v26 }
 0x104   : > { %1327 = vmatpush1.bf16.msra.mxu1 %v3614_v27 }
 0x105   : > { %2463 = vmatpush1.bf16.msra.mxu0 %v3617_v28 }
 0x107   : > { %1329 = vmatmul.mubr.bf16.vlgmr.msra.gmra.mrb[0].mxu1 %v4400_v2  ;;  %v235_v2 = vld [vmem:[%s4638_s2] sm:$0x3] }
 0x108   : > { %2465 = vmatmul.mubr.bf16.vlgmr.msra.gmra.mrb[0].mxu0 %v4390_v63  ;;  %1338 = vmatprep.mubr.bf16.mxu1 %v916_v41  ;;  %v243_v63 = vsub.s32 1, %v238_v33  ;;  %v240_v40 = vrot.slane %v235_v2, %v239_v34 }
 0x109   : > { %2474 = vmatprep.mubr.bf16.mxu0 %v2051_v22 }
 0x10a   : > { %v244_v25 = vrot.slane %v235_v2, %v243_v63 }
 0x10f   : > { %1339 = vmatmul.mubr.bf16.gmra.mrb[4].mxu1 %v913_v30 }
 0x110   : > { %2475 = vmatmul.mubr.bf16.gmra.mrb[4].mxu0 %v2048_v47 }
 0x1da   : > { %v1330_v36 = vpop.f32.mrb[0].mxu1 }
 0x1db   : > { %v2466_v12 = vpop.f32.mrb[0].mxu0  ;;  %v3129_v22 = vadd.f32 %v1330_v36, %v240_v40  ;;  %v1332_v37 = vpop.f32.mrb[1].mxu1 }
 0x1dc   : > { %v2468_v57 = vpop.f32.mrb[1].mxu0  ;;  %v3131_v38 = vadd.f32 %v1332_v37, %v244_v25  ;;  %v1334_v39 = vpop.f32.mrb[2].mxu1 }
 0x1dd   : > { %v2470_v44 = vpop.f32.mrb[2].mxu0  ;;  %v3130_v47 = vadd.f32 %v3129_v22, %v2466_v12  ;;  %v3133_v42 = vadd.f32 %v1334_v39, %v240_v40  ;;  %v1336_v11 = vpop.f32.mrb[3].mxu1 }
 0x1de   : > { %v2472_v32 = vpop.f32.mrb[3].mxu0  ;;  %v3132_v43 = vadd.f32 %v3131_v38, %v2468_v57  ;;  %v3135_v46 = vadd.f32 %v1336_v11, %v244_v25 }
 0x1df   : > { %vm2489_vm3 = vcmp.ge.f32.partialorder %v3130_v47, 0.0  ;;  %v2495_v31 = vmul.f32 0.2, %v3130_v47  ;;  %v3134_v49 = vadd.f32 %v3133_v42, %v2470_v44 }
 0x1e0   : > { %vm2490_vm4 = vcmp.ge.f32.partialorder %v3132_v43, 0.0  ;;  %v2496_v48 = vmul.f32 0.2, %v3132_v43  ;;  %v3136_v50 = vadd.f32 %v3135_v46, %v2472_v32 }
 0x1e1   : > { %v2501_v51 = vsel %vm2489_vm3, %v3130_v47, %v2495_v31  ;;  %vm2491_vm5 = vcmp.ge.f32.partialorder %v3134_v49, 0.0  ;;  %v2497_v52 = vmul.f32 0.2, %v3134_v49 }
 0x1e2   : > { %v2502_v53 = vsel %vm2490_vm4, %v3132_v43, %v2496_v48  ;;  %vm2492_vm6 = vcmp.ge.f32.partialorder %v3136_v50, 0.0  ;;  %v2498_v54 = vmul.f32 0.2, %v3136_v50  ;;  %v1340_v56 = vpop.f32.mrb[4].mxu1 }
 0x1e3   : > { %v2476_v58 = vpop.f32.mrb[4].mxu0  ;;  %v3126_v59 = vpack.c.bf16 %v2502_v53, %v2501_v51  ;;  %v2503_v60 = vsel %vm2491_vm5, %v3134_v49, %v2497_v52  ;;  %v3137_v61 = vadd.f32 %v1340_v56, %v240_v40  ;;  %v1342_v62 = vpop.f32.mrb[5].mxu1 }
 0x1e4   : > { %v2478_v0 = vpop.f32.mrb[5].mxu0  ;;  %v2504_v1 = vsel %vm2492_vm6, %v3136_v50, %v2498_v54  ;;  %v3139_v3 = vadd.f32 %v1342_v62, %v244_v25  ;;  %v1344_v6 = vpop.f32.mrb[6].mxu1 }
 0x1e5   : > { %v2480_v9 = vpop.f32.mrb[6].mxu0  ;;  %2527 = vst [vmem:[%s233_s21] sm:$0xff] %v3126_v59  ;;  %v3127_v10 = vpack.c.bf16 %v2504_v1, %v2503_v60  ;;  %v3138_v13 = vadd.f32 %v3137_v61, %v2476_v58  ;;  %v1345_v14 = vpop.f32.mrb[7].mxu1 }
 0x1e6   : > { %v2481_v35 = vpop.f32.mrb[7].mxu0  ;;  %v3140_v15 = vadd.f32 %v3139_v3, %v2478_v0 }
 0x1e7   : > { %2528 = vst [vmem:[%s233_s21 + $0x8] sm:$0xff] %v3127_v10  ;;  %vm2493_vm7 = vcmp.ge.f32.partialorder %v3138_v13, 0.0  ;;  %v2499_v4 = vmul.f32 0.2, %v3138_v13 }
 0x1e8   : > { %vm2494_vm8 = vcmp.ge.f32.partialorder %v3140_v15, 0.0  ;;  %v2500_v16 = vmul.f32 0.2, %v3140_v15 }
 0x1e9   : > { %v2505_v17 = vsel %vm2493_vm7, %v3138_v13, %v2499_v4 }
 0x1ea   : > { %v2506_v18 = vsel %vm2494_vm8, %v3140_v15, %v2500_v16 }
 0x1eb   : > { %v3128_v19 = vpack.c.bf16 %v2506_v18, %v2505_v17 }
 0x1ed   : > { %2529 = vst [vmem:[%s233_s21 + $0x10] sm:$0x33] %v3128_v19 }
 0x1ee PF: > { %s13_s14 = sadd.s32 1, %s3648_s14   ;;  %s4640_s12 = smov %s3644_s13 }
 0x1ef   : > { %p10_p5 = scmp.ge.s32.totalorder %s13_s14, 4   ;;  %s4641_s13 = smov %s4643_s15 }
 0x1f1   :  { %12 = sbr.rel (!%p10_p5) target bundleno = 2 (0x2), region = 71 }

// kernel: discriminator_forward.9
= control target key start
LH: loop header
LB: loop body
LE: loop exit
PB: predicated region body
PF: predicated region fallthrough
CT: control target
= control target key end

     0   :  { %s1343_s14 = smov 0   ;;  %s1835_s0 = inlined_call_operand.vmem [shape: bf16[2,28,512], index: 0, kind: input, shape index: {}]   ;;  %s1836_s1 = inlined_call_operand.vmem [shape: f32[16,512], index: 1, kind: input, shape index: {}]   ;;  %s1837_s2 = inlined_call_operand.<no memory space> [shape: f32[1,1], index: 2, kind: input, shape index: {}]   ;;  %s1838_s3 = inlined_call_operand.vmem [shape: f32[2,10,1], index: 3, kind: output, shape index: {}]  }
   0x1   :  { %v8_v0 = vstv %s1837_s2 }
   0x2   :  { %9 = vst [vmem:[#allocation2] sm:$0x1] %v8_v0 }
   0x3 LB: > { %s1275_s15 = sadd.s32 4294967295, %s1318_s14   ;;  %p1279_p0 = scmp.ge.s32.totalorder %s1318_s14, 1  ;;  %s1318_s14 = sphi %s1343_s14, %s15_s14  }
   0x4   : > { %p139_p1 = scmp.lt.s32.totalorder %s1318_s14, 3 }
   0x6   : > { %p140_p2 = pnand %p1279_p0, %p139_p1 }
   0x7   : > { %p163_p3 = scmp.lt.s32.totalorder (!%p140_p2), %s1275_s15, 1  ;;  %v194_v1 = vlaneseq (!%p140_p2)  ;;  %v192_v3 = vld [vmem:[%s1836_s1] ss:$8 sm:$0xf] (!%p140_p2)  ;;  %vm276_vm0 = vcmask (!%p140_p2), 1047553   ;;  %vm227_vm1 = vcmask (!%p140_p2), 1041408  }
   0x8   : > { %143 = sbr.rel (%p140_p2) target bundleno = 291 (0x123), region = 32  ;;  %v1285_v8 = vld [vmem:[%s1836_s1 + $0x1] ss:$8 sm:$0xf] (!%p140_p2)  ;;  %vm286_vm2 = vcmask (!%p140_p2), 1042432   ;;  %vm353_vm3 = vcmask (!%p140_p2), 1043456  }
   0x9   : > { %v195_v2 = vshrl.u32 (!%p140_p2), %v194_v1, 7  ;;  %v1286_v55 = vld [vmem:[%s1836_s1 + $0x2] ss:$8 sm:$0xf] (!%p140_p2)  ;;  %vm343_vm4 = vcmask (!%p140_p2), 1047554   ;;  %vm420_vm5 = vcmask (!%p140_p2), 1044480  }
   0xa   : > { %vm410_vm6 = vcmask (!%p140_p2), 1047555   ;;  %vm298_vm7 = vcmask (!%p140_p2), 1046528   ;;  %vm482_vm8 = vcmask (!%p140_p2), 1047557   ;;  %vm547_vm9 = vcmask (!%p140_p2), 1047558  }
   0xb   : > { %v1357_v4 = vsub.s32 (!%p140_p2), 0, %v195_v2  ;;  %v1359_v5 = vsub.s32 (!%p140_p2), 1, %v195_v2  ;;  %v1361_v6 = vsub.s32 (!%p140_p2), 2, %v195_v2  ;;  %v1363_v7 = vsub.s32 (!%p140_p2), 3, %v195_v2 }
   0xc   : > { %vm612_vm10 = vcmask (!%p140_p2), 1047559   ;;  %vm627_vm11 = vcmask (!%p140_p2), 1040384   ;;  %vm867_vm12 = vcmask (!%p140_p2), 1047556   ;;  %vm365_vm13 = vcmask (!%p140_p2), 1045504  }
   0xd   : > { %v197_v11 = vrot.slane (!%p140_p2), %v192_v3, %v1357_v4  ;;  %v201_v12 = vrot.slane (!%p140_p2), %v192_v3, %v1359_v5  ;;  %v205_v13 = vrot.slane (!%p140_p2), %v192_v3, %v1361_v6  ;;  %v209_v14 = vrot.slane (!%p140_p2), %v192_v3, %v1363_v7 }
   0xe   : > { %v251_v19 = vrot.slane (!%p140_p2), %v1285_v8, %v1357_v4  ;;  %v255_v20 = vrot.slane (!%p140_p2), %v1285_v8, %v1359_v5  ;;  %v259_v21 = vrot.slane (!%p140_p2), %v1285_v8, %v1361_v6  ;;  %v263_v22 = vrot.slane (!%p140_p2), %v1285_v8, %v1363_v7 }
   0xf   : > { %s1840_s15 = smov (!%p163_p3, %s1275_s15), 1  ;;  %v318_v3 = vrot.slane %v1286_v55, %v1357_v4  ;;  %vm1218_vm14 = vcmask 1024   ;;  %vm1216_vm15 = vcmask 7168  }
  0x10   : > { %s1302_s17 = sshll.u32 %s1840_s15, 6 }
  0x11   : > { %s1368_s20 = scalar_lea.vmem %s1835_s0, %s1302_s17 }
  0x12   : > { %v180_v9 = vld [vmem:[%s1368_s20] sm:$0xff]  ;;  %v181_v10 = vld [vmem:[%s1368_s20 + $0x8] sm:$0xff]  ;;  %v182_v23 = vld [vmem:[%s1368_s20 + $0x10] sm:$0x11] }
  0x13   : > { %v184_v15 = vunpack.c.l.bf16 %v180_v9  ;;  %v185_v16 = vunpack.c.h.bf16 %v180_v9  ;;  %v186_v17 = vunpack.c.l.bf16 %v181_v10  ;;  %v187_v18 = vunpack.c.h.bf16 %v181_v10  ;;  %v183_v24 = vld [vmem:[%s1368_s20 + $0x18] sm:$0x11]  ;;  %v239_v37 = vld [vmem:[%s1368_s20 + $0x10] sm:$0x33] }
  0x14   : > { %v188_v34 = vunpack.c.l.bf16 %v182_v23  ;;  %v189_v35 = vunpack.c.h.bf16 %v182_v23  ;;  %v190_v36 = vunpack.c.l.bf16 %v183_v24  ;;  %v191_v44 = vunpack.c.h.bf16 %v183_v24  ;;  %v240_v46 = vld [vmem:[%s1368_s20 + $0x18] sm:$0x33] }
  0x15   : > { %v214_v25 = vmul.f32 %v197_v11, %v184_v15  ;;  %v215_v26 = vmul.f32 %v201_v12, %v185_v16  ;;  %v216_v27 = vmul.f32 %v205_v13, %v186_v17  ;;  %v217_v28 = vmul.f32 %v209_v14, %v187_v18 }
  0x16   : > { %v268_v29 = vmul.f32 %v251_v19, %v184_v15  ;;  %v269_v30 = vmul.f32 %v255_v20, %v185_v16  ;;  %v270_v31 = vmul.f32 %v259_v21, %v186_v17  ;;  %v271_v32 = vmul.f32 %v263_v22, %v187_v18  ;;  %v1410_v17 = vld [vmem:[%s1368_s20 + $0x8] sm:$0xee] }
  0x17   : > { %v222_v33 = vadd.f32 %v215_v26, %v214_v25  ;;  %v218_v45 = vmul.f32 %v197_v11, %v188_v34  ;;  %v219_v47 = vmul.f32 %v201_v12, %v189_v35  ;;  %v220_v48 = vmul.f32 %v205_v13, %v190_v36  ;;  %v1403_v12 = vld [vmem:[%s1368_s20] sm:$0xee]  ;;  %v374_v35 = vld [vmem:[%s1368_s20 + $0x18] sm:$0x77] }
  0x18   : > { %v277_v38 = vsel %vm276_vm0, %v268_v29, 0.0  ;;  %v278_v39 = vsel %vm276_vm0, %v269_v30, 0.0  ;;  %v280_v40 = vsel %vm276_vm0, %v270_v31, 0.0  ;;  %v282_v41 = vsel %vm276_vm0, %v271_v32, 0.0  ;;  %v373_v30 = vld [vmem:[%s1368_s20 + $0x10] sm:$0x77] }
  0x19   : > { %v223_v42 = vadd.f32 %v222_v33, %v216_v27  ;;  %v279_v43 = vadd.f32 %v278_v39, %v277_v38  ;;  %v241_v49 = vunpack.c.l.bf16 %v239_v37  ;;  %v242_v50 = vunpack.c.h.bf16 %v239_v37 }
  0x1a   : > { %v221_v53 = vmul.f32 %v209_v14, %v191_v44  ;;  %v228_v54 = vsel %vm227_vm1, %v218_v45, 0.0  ;;  %v229_v56 = vsel %vm227_vm1, %v219_v47, 0.0  ;;  %v231_v57 = vsel %vm227_vm1, %v220_v48, 0.0  ;;  %v1287_v44 = vld [vmem:[%s1836_s1 + $0x3] ss:$8 sm:$0xf] }
  0x1b   : > { %v224_v51 = vadd.f32 %v223_v42, %v217_v28  ;;  %v281_v52 = vadd.f32 %v280_v40, %v279_v43  ;;  %v243_v58 = vunpack.c.l.bf16 %v240_v46  ;;  %v244_v59 = vunpack.c.h.bf16 %v240_v46 }
  0x1c   : > { %v230_v61 = vadd.f32 %v229_v56, %v228_v54  ;;  %v233_v62 = vsel %vm227_vm1, %v221_v53, 0.0  ;;  %v272_v63 = vmul.f32 %v251_v19, %v241_v49  ;;  %v273_v0 = vmul.f32 %v255_v20, %v242_v50 }
  0x1d   : > { %225 = vadd.xlane.f32.xlu1 %v224_v51  ;;  %v283_v60 = vadd.f32 %v282_v41, %v281_v52  ;;  %v274_v1 = vmul.f32 %v259_v21, %v243_v58  ;;  %v275_v2 = vmul.f32 %v263_v22, %v244_v59  ;;  %v322_v10 = vrot.slane %v1286_v55, %v1359_v5 }
  0x1e   : > { %v232_v8 = vadd.f32 %v231_v57, %v230_v61  ;;  %v287_v9 = vsel %vm286_vm2, %v272_v63, 0.0  ;;  %v326_v11 = vrot.slane %v1286_v55, %v1361_v6  ;;  %v288_v13 = vsel %vm286_vm2, %v273_v0, 0.0 }
  0x1f   : > { %284 = vadd.xlane.f32.xlu0 %v283_v60  ;;  %v290_v14 = vsel %vm286_vm2, %v274_v1, 0.0  ;;  %v292_v15 = vsel %vm286_vm2, %v275_v2, 0.0  ;;  %v330_v16 = vrot.slane %v1286_v55, %v1363_v7  ;;  %v289_v19 = vadd.f32 %v288_v13, %v287_v9 }
  0x20   : > { %v234_v18 = vadd.f32 %v233_v62, %v232_v8  ;;  %v339_v20 = vmul.f32 %v318_v3, %v241_v49  ;;  %v340_v21 = vmul.f32 %v322_v10, %v242_v50  ;;  %v341_v22 = vmul.f32 %v326_v11, %v243_v58  ;;  %v441_v49 = vld [vmem:[%s1368_s20 + $0x10] sm:$0xff]  ;;  %v442_v50 = vld [vmem:[%s1368_s20 + $0x18] sm:$0xff] }
  0x21   : > { %v342_v23 = vmul.f32 %v330_v16, %v244_v59  ;;  %v308_v24 = vunpack.c.l.bf16 %v1403_v12  ;;  %v309_v25 = vunpack.c.h.bf16 %v1403_v12  ;;  %v291_v26 = vadd.f32 %v290_v14, %v289_v19 }
  0x22   : > { %235 = vadd.xlane.f32.xlu1 %v234_v18  ;;  %v354_v27 = vsel %vm353_vm3, %v339_v20, 0.0  ;;  %v355_v28 = vsel %vm353_vm3, %v340_v21, 0.0  ;;  %v310_v29 = vunpack.c.l.bf16 %v1410_v17  ;;  %v357_v32 = vsel %vm353_vm3, %v341_v22, 0.0  ;;  %v439_v20 = vld [vmem:[%s1368_s20] sm:$0xcc] }
  0x23   : > { %v356_v31 = vadd.f32 %v355_v28, %v354_v27  ;;  %v359_v33 = vsel %vm353_vm3, %v342_v23, 0.0  ;;  %v311_v34 = vunpack.c.h.bf16 %v1410_v17  ;;  %v293_v36 = vadd.f32 %v292_v15, %v291_v26 }
  0x24   : > { %v335_v37 = vmul.f32 %v318_v3, %v308_v24  ;;  %v336_v38 = vmul.f32 %v322_v10, %v309_v25  ;;  %v337_v39 = vmul.f32 %v326_v11, %v310_v29  ;;  %v375_v42 = vunpack.c.l.bf16 %v373_v30  ;;  %v1288_v11 = vld [vmem:[%s1836_s1 + $0x4] ss:$8 sm:$0xf] }
  0x25   : > { %v358_v40 = vadd.f32 %v357_v32, %v356_v31  ;;  %v338_v41 = vmul.f32 %v330_v16, %v311_v34  ;;  %v376_v43 = vunpack.c.h.bf16 %v373_v30  ;;  %294 = vadd.xlane.f32.xlu0 %v293_v36  ;;  %v377_v48 = vunpack.c.l.bf16 %v374_v35 }
  0x26   : > { %v344_v45 = vsel %vm343_vm4, %v335_v37, 0.0  ;;  %v345_v46 = vsel %vm343_vm4, %v336_v38, 0.0  ;;  %v347_v47 = vsel %vm343_vm4, %v337_v39, 0.0  ;;  %v378_v54 = vunpack.c.h.bf16 %v374_v35 }
  0x27   : > { %v360_v51 = vadd.f32 %v359_v33, %v358_v40  ;;  %v346_v52 = vadd.f32 %v345_v46, %v344_v45  ;;  %v349_v53 = vsel %vm343_vm4, %v338_v41, 0.0  ;;  %v385_v55 = vrot.slane %v1287_v44, %v1357_v4 }
  0x28   : > { %v389_v56 = vrot.slane %v1287_v44, %v1359_v5  ;;  %v393_v57 = vrot.slane %v1287_v44, %v1361_v6  ;;  %v397_v58 = vrot.slane %v1287_v44, %v1363_v7  ;;  %v1435_v60 = vunpack.c.l.bf16 %v441_v49 }
  0x29   : > { %361 = vadd.xlane.f32.xlu1 %v360_v51  ;;  %v348_v59 = vadd.f32 %v347_v47, %v346_v52  ;;  %v1437_v61 = vunpack.c.h.bf16 %v441_v49  ;;  %v1439_v62 = vunpack.c.l.bf16 %v442_v50  ;;  %v406_v63 = vmul.f32 %v385_v55, %v375_v42  ;;  %v1289_v42 = vld [vmem:[%s1836_s1 + $0x5] ss:$8 sm:$0xf] }
  0x2a   : > { %v407_v0 = vmul.f32 %v389_v56, %v376_v43  ;;  %v408_v1 = vmul.f32 %v393_v57, %v377_v48  ;;  %v409_v2 = vmul.f32 %v397_v58, %v378_v54  ;;  %v402_v8 = vmul.f32 %v385_v55, %v308_v24  ;;  %v510_v55 = vld [vmem:[%s1368_s20] sm:$0x88] }
  0x2b   : > { %v350_v3 = vadd.f32 %v349_v53, %v348_v59  ;;  %v403_v9 = vmul.f32 %v389_v56, %v309_v25  ;;  %v404_v10 = vmul.f32 %v393_v57, %v310_v29  ;;  %v421_v12 = vsel %vm420_vm5, %v406_v63, 0.0  ;;  %v440_v29 = vld [vmem:[%s1368_s20 + $0x8] sm:$0xcc] }
  0x2c   : > { %v422_v13 = vsel %vm420_vm5, %v407_v0, 0.0  ;;  %v424_v14 = vsel %vm420_vm5, %v408_v1, 0.0  ;;  %v426_v15 = vsel %vm420_vm5, %v409_v2, 0.0  ;;  %v405_v17 = vmul.f32 %v397_v58, %v311_v34  ;;  %v511_v63 = vld [vmem:[%s1368_s20 + $0x8] sm:$0x88] }
  0x2d   : > { %351 = vadd.xlane.f32.xlu0 %v350_v3  ;;  %v423_v16 = vadd.f32 %v422_v13, %v421_v12  ;;  %v411_v18 = vsel %vm410_vm6, %v402_v8, 0.0  ;;  %v412_v19 = vsel %vm410_vm6, %v403_v9, 0.0  ;;  %v414_v22 = vsel %vm410_vm6, %v404_v10, 0.0  ;;  %v1290_v12 = vld [vmem:[%s1836_s1 + $0x6] ss:$8 sm:$0xf] }
  0x2e   : > { %v413_v21 = vadd.f32 %v412_v19, %v411_v18  ;;  %v1452_v23 = vunpack.c.h.bf16 %v442_v50  ;;  %v457_v24 = vrot.slane %v1288_v11, %v1357_v4  ;;  %v416_v26 = vsel %vm410_vm6, %v405_v17, 0.0 }
  0x2f   : > { %v425_v25 = vadd.f32 %v424_v14, %v423_v16  ;;  %v461_v27 = vrot.slane %v1288_v11, %v1359_v5  ;;  %v465_v28 = vrot.slane %v1288_v11, %v1361_v6  ;;  %v469_v31 = vrot.slane %v1288_v11, %v1363_v7 }
  0x30   : > { %v415_v30 = vadd.f32 %v414_v22, %v413_v21  ;;  %v478_v32 = vmul.f32 %v457_v24, %v1435_v60  ;;  %v443_v33 = vunpack.c.l.bf16 %v439_v20  ;;  %v444_v37 = vunpack.c.h.bf16 %v439_v20 }
  0x31   : > { %v427_v34 = vadd.f32 %v426_v15, %v425_v25  ;;  %v479_v35 = vmul.f32 %v461_v27, %v1437_v61  ;;  %v480_v36 = vmul.f32 %v465_v28, %v1439_v62  ;;  %v481_v39 = vmul.f32 %v469_v31, %v1452_v23 }
  0x32   : > { %v417_v38 = vadd.f32 %v416_v26, %v415_v30  ;;  %v492_v40 = vsel %vm298_vm7, %v478_v32, 0.0  ;;  %v445_v41 = vunpack.c.l.bf16 %v440_v29  ;;  %v446_v45 = vunpack.c.h.bf16 %v440_v29 }
  0x33   : > { %428 = vadd.xlane.f32.xlu1 %v427_v34  ;;  %v493_v43 = vsel %vm298_vm7, %v479_v35, 0.0  ;;  %v495_v44 = vsel %vm298_vm7, %v480_v36, 0.0  ;;  %v474_v46 = vmul.f32 %v457_v24, %v443_v33  ;;  %v497_v48 = vsel %vm298_vm7, %v481_v39, 0.0 }
  0x34   : > { %418 = vadd.xlane.f32.xlu0 %v417_v38  ;;  %v494_v47 = vadd.f32 %v493_v43, %v492_v40  ;;  %v475_v49 = vmul.f32 %v461_v27, %v444_v37  ;;  %v476_v50 = vmul.f32 %v465_v28, %v445_v41  ;;  %v477_v51 = vmul.f32 %v469_v31, %v446_v45  ;;  %v1498_v37 = vld [vmem:[%s1368_s20 + $0x10] sm:$0xee] }
  0x35   : > { %v483_v52 = vsel %vm482_vm8, %v474_v46, 0.0  ;;  %v522_v53 = vrot.slane %v1289_v42, %v1357_v4  ;;  %v526_v54 = vrot.slane %v1289_v42, %v1359_v5  ;;  %v530_v59 = vrot.slane %v1289_v42, %v1361_v6  ;;  %v1504_v46 = vld [vmem:[%s1368_s20 + $0x18] sm:$0xee] }
  0x36   : > { %v496_v56 = vadd.f32 %v495_v44, %v494_v47  ;;  %v484_v57 = vsel %vm482_vm8, %v475_v49, 0.0  ;;  %v486_v58 = vsel %vm482_vm8, %v476_v50, 0.0  ;;  %v488_v1 = vsel %vm482_vm8, %v477_v51, 0.0  ;;  %v1292_v50 = vld [vmem:[%s1836_s1 + $0x20] ss:$8 sm:$0xf] }
  0x37   : > { %v485_v0 = vadd.f32 %v484_v57, %v483_v52  ;;  %v534_v2 = vrot.slane %v1289_v42, %v1363_v7  ;;  %v543_v3 = vmul.f32 %v522_v53, %v1435_v60  ;;  %v544_v9 = vmul.f32 %v526_v54, %v1437_v61 }
  0x38   : > { %v498_v8 = vadd.f32 %v497_v48, %v496_v56  ;;  %v545_v10 = vmul.f32 %v530_v59, %v1439_v62  ;;  %v512_v11 = vunpack.c.l.bf16 %v510_v55  ;;  %v513_v15 = vunpack.c.h.bf16 %v510_v55  ;;  %v1515_v55 = vld [vmem:[%s1368_s20 + $0x20] sm:$0x11] }
  0x39   : > { %v487_v13 = vadd.f32 %v486_v58, %v485_v0  ;;  %v546_v14 = vmul.f32 %v534_v2, %v1452_v23  ;;  %v514_v16 = vunpack.c.l.bf16 %v511_v63  ;;  %v557_v17 = vadd.f32 %v544_v9, %v543_v3  ;;  %v1524_v3 = vld [vmem:[%s1368_s20 + $0x28] sm:$0x11] }
  0x3a   : > { %499 = vadd.xlane.f32.xlu1 %v498_v8  ;;  %v515_v18 = vunpack.c.h.bf16 %v511_v63  ;;  %v539_v19 = vmul.f32 %v522_v53, %v512_v11  ;;  %v540_v21 = vmul.f32 %v526_v54, %v513_v15  ;;  %v583_v24 = vrot.slane %v1290_v12, %v1357_v4 }
  0x3b   : > { %v489_v20 = vadd.f32 %v488_v1, %v487_v13  ;;  %v541_v22 = vmul.f32 %v530_v59, %v514_v16  ;;  %v558_v25 = vadd.f32 %v557_v17, %v545_v10  ;;  %v587_v28 = vrot.slane %v1290_v12, %v1359_v5 }
  0x3c   : > { %v542_v26 = vmul.f32 %v534_v2, %v515_v18  ;;  %v548_v27 = vsel %vm547_vm9, %v539_v19, 0.0  ;;  %v549_v29 = vsel %vm547_vm9, %v540_v21, 0.0  ;;  %v591_v31 = vrot.slane %v1290_v12, %v1361_v6 }
  0x3d   : > { %490 = vadd.xlane.f32.xlu0 %v489_v20  ;;  %v551_v30 = vsel %vm547_vm9, %v541_v22, 0.0  ;;  %v595_v32 = vrot.slane %v1290_v12, %v1363_v7  ;;  %v559_v33 = vadd.f32 %v558_v25, %v546_v14  ;;  %v550_v34 = vadd.f32 %v549_v29, %v548_v27  ;;  %v1291_v20 = vld [vmem:[%s1836_s1 + $0x7] ss:$8 sm:$0xf] }
  0x3e   : > { %v553_v35 = vsel %vm547_vm9, %v542_v26, 0.0  ;;  %v604_v36 = vmul.f32 %v583_v24, %v1435_v60  ;;  %v605_v38 = vmul.f32 %v587_v28, %v1437_v61  ;;  %v606_v39 = vmul.f32 %v591_v31, %v1439_v62 }
  0x3f   : > { %v607_v40 = vmul.f32 %v595_v32, %v1452_v23  ;;  %v600_v41 = vmul.f32 %v583_v24, %v512_v11  ;;  %560 = vadd.xlane.f32.xlu1 %v559_v33  ;;  %v552_v42 = vadd.f32 %v551_v30, %v550_v34  ;;  %v601_v43 = vmul.f32 %v587_v28, %v513_v15 }
  0x40   : > { %v602_v44 = vmul.f32 %v591_v31, %v514_v16  ;;  %v603_v45 = vmul.f32 %v595_v32, %v515_v18  ;;  %v622_v47 = vadd.f32 %v605_v38, %v604_v36  ;;  %v700_v48 = vunpack.c.l.bf16 %v1498_v37 }
  0x41   : > { %v701_v49 = vunpack.c.h.bf16 %v1498_v37  ;;  %v554_v51 = vadd.f32 %v553_v35, %v552_v42  ;;  %v613_v52 = vsel %vm612_vm10, %v600_v41, 0.0  ;;  %v614_v53 = vsel %vm612_vm10, %v601_v43, 0.0  ;;  %v699_v43 = vld [vmem:[%s1368_s20 + $0x28] sm:$0x33] }
  0x42   : > { %v616_v54 = vsel %vm612_vm10, %v602_v44, 0.0  ;;  %v623_v56 = vadd.f32 %v622_v47, %v606_v39  ;;  %v615_v57 = vadd.f32 %v614_v53, %v613_v52  ;;  %v618_v58 = vsel %vm612_vm10, %v603_v45, 0.0 }
  0x43   : > { %v702_v59 = vunpack.c.l.bf16 %v1504_v46  ;;  %555 = vadd.xlane.f32.xlu0 %v554_v51  ;;  %v703_v63 = vunpack.c.h.bf16 %v1504_v46  ;;  %v714_v0 = vrot.slane %v1292_v50, %v1357_v4  ;;  %v718_v1 = vrot.slane %v1292_v50, %v1359_v5  ;;  %v1293_v51 = vld [vmem:[%s1836_s1 + $0x21] ss:$8 sm:$0xf] }
  0x44   : > { %v722_v2 = vrot.slane %v1292_v50, %v1361_v6  ;;  %v624_v8 = vadd.f32 %v623_v56, %v607_v40  ;;  %v617_v9 = vadd.f32 %v616_v54, %v615_v57  ;;  %v726_v10 = vrot.slane %v1292_v50, %v1363_v7 }
  0x45   : > { %v573_v11 = vunpack.c.l.bf16 %v1515_v55  ;;  %v731_v12 = vmul.f32 %v714_v0, %v700_v48  ;;  %v732_v13 = vmul.f32 %v718_v1, %v701_v49  ;;  %v574_v15 = vunpack.c.h.bf16 %v1515_v55 }
  0x46   : > { %v733_v14 = vmul.f32 %v722_v2, %v702_v59  ;;  %625 = vadd.xlane.f32.xlu1 %v624_v8  ;;  %v619_v16 = vadd.f32 %v618_v58, %v617_v9  ;;  %v734_v17 = vmul.f32 %v726_v10, %v703_v63  ;;  %v575_v18 = vunpack.c.l.bf16 %v1524_v3 }
  0x47   : > { %v576_v19 = vunpack.c.h.bf16 %v1524_v3  ;;  %v739_v21 = vsel %vm343_vm4, %v731_v12, 0.0  ;;  %v740_v22 = vsel %vm343_vm4, %v732_v13, 0.0  ;;  %v608_v26 = vmul.f32 %v583_v24, %v573_v11  ;;  %v698_v24 = vld [vmem:[%s1368_s20 + $0x20] sm:$0x33] }
  0x48   : > { %v742_v25 = vsel %vm343_vm4, %v733_v14, 0.0  ;;  %620 = vadd.xlane.f32.xlu0 %v619_v16  ;;  %v741_v27 = vadd.f32 %v740_v22, %v739_v21  ;;  %v744_v29 = vsel %vm343_vm4, %v734_v17, 0.0  ;;  %v609_v30 = vmul.f32 %v587_v28, %v574_v15 }
  0x49   : > { %v610_v33 = vmul.f32 %v591_v31, %v575_v18  ;;  %v611_v34 = vmul.f32 %v595_v32, %v576_v19  ;;  %v655_v35 = vrot.slane %v1291_v20, %v1357_v4  ;;  %v659_v36 = vrot.slane %v1291_v20, %v1359_v5 }
  0x4a   : > { %v743_v38 = vadd.f32 %v742_v25, %v741_v27  ;;  %v628_v39 = vsel %vm627_vm11, %v608_v26, 0.0  ;;  %v629_v40 = vsel %vm627_vm11, %v609_v30, 0.0  ;;  %v663_v31 = vrot.slane %v1291_v20, %v1361_v6 }
  0x4b   : > { %v631_v41 = vsel %vm627_vm11, %v610_v33, 0.0  ;;  %v630_v28 = vadd.f32 %v629_v40, %v628_v39  ;;  %v633_v42 = vsel %vm627_vm11, %v611_v34, 0.0  ;;  %v667_v32 = vrot.slane %v1291_v20, %v1363_v7  ;;  %v1607_v33 = vld [vmem:[%s1368_s20 + $0x10] sm:$0xcc] }
  0x4c   : > { %v745_v44 = vadd.f32 %v744_v29, %v743_v38  ;;  %v672_v45 = vmul.f32 %v655_v35, %v1435_v60  ;;  %v673_v47 = vmul.f32 %v659_v36, %v1437_v61  ;;  %v704_v50 = vunpack.c.l.bf16 %v698_v24 }
  0x4d   : > { %v632_v52 = vadd.f32 %v631_v41, %v630_v28  ;;  %v674_v53 = vmul.f32 %v663_v31, %v1439_v62  ;;  %v675_v54 = vmul.f32 %v667_v32, %v1452_v23  ;;  %v705_v56 = vunpack.c.h.bf16 %v698_v24  ;;  %v831_v24 = vld [vmem:[%s1368_s20 + $0x18] sm:$0xcc] }
  0x4e   : > { %746 = vadd.xlane.f32.xlu1 %v745_v44  ;;  %v680_v57 = vadd.f32 %v673_v47, %v672_v45  ;;  %v706_v58 = vunpack.c.l.bf16 %v699_v43  ;;  %v707_v8 = vunpack.c.h.bf16 %v699_v43  ;;  %v735_v9 = vmul.f32 %v714_v0, %v704_v50  ;;  %v767_v45 = vld [vmem:[%s1368_s20 + $0x28] sm:$0x77] }
  0x4f   : > { %v634_v12 = vadd.f32 %v633_v42, %v632_v52  ;;  %v736_v60 = vmul.f32 %v718_v1, %v705_v56  ;;  %v1572_v61 = vrot.slane %v1293_v51, %v1357_v4  ;;  %v1575_v13 = vrot.slane %v1293_v51, %v1359_v5 }
  0x50   : > { %v681_v14 = vadd.f32 %v680_v57, %v674_v53  ;;  %v737_v16 = vmul.f32 %v722_v2, %v706_v58  ;;  %v738_v17 = vmul.f32 %v726_v10, %v707_v8  ;;  %v748_v62 = vsel %vm353_vm3, %v735_v9, 0.0 }
  0x51   : > { %635 = vadd.xlane.f32.xlu0 %v634_v12  ;;  %v749_v23 = vsel %vm353_vm3, %v736_v60, 0.0  ;;  %v1580_v20 = vrot.slane %v1293_v51, %v1361_v6  ;;  %v1583_v0 = vrot.slane %v1293_v51, %v1363_v7  ;;  %v795_v1 = vmul.f32 %v1572_v61, %v700_v48  ;;  %v1295_v12 = vld [vmem:[%s1836_s1 + $0x23] ss:$8 sm:$0xf] }
  0x52   : > { %v682_v21 = vadd.f32 %v681_v14, %v675_v54  ;;  %v750_v22 = vadd.f32 %v749_v23, %v748_v62  ;;  %v751_v2 = vsel %vm353_vm3, %v737_v16, 0.0  ;;  %v753_v10 = vsel %vm353_vm3, %v738_v17, 0.0 }
  0x53   : > { %v796_v25 = vmul.f32 %v1575_v13, %v701_v49  ;;  %v797_v26 = vmul.f32 %v1580_v20, %v702_v59  ;;  %v798_v27 = vmul.f32 %v1583_v0, %v703_v63  ;;  %v803_v48 = vsel %vm410_vm6, %v795_v1, 0.0 }
  0x54   : > { %683 = vadd.xlane.f32.xlu1 %v682_v21  ;;  %v752_v29 = vadd.f32 %v751_v2, %v750_v22  ;;  %v676_v30 = vmul.f32 %v655_v35, %v573_v11  ;;  %v677_v37 = vmul.f32 %v659_v36, %v574_v15  ;;  %v678_v49 = vmul.f32 %v663_v31, %v575_v18  ;;  %v1294_v18 = vld [vmem:[%s1836_s1 + $0x22] ss:$8 sm:$0xf] }
  0x55   : > { %v804_v46 = vsel %vm410_vm6, %v796_v25, 0.0  ;;  %v806_v59 = vsel %vm410_vm6, %v797_v26, 0.0  ;;  %v808_v63 = vsel %vm410_vm6, %v798_v27, 0.0  ;;  %v679_v34 = vmul.f32 %v667_v32, %v576_v19  ;;  %v766_v19 = vld [vmem:[%s1368_s20 + $0x20] sm:$0x77] }
  0x56   : > { %v754_v11 = vadd.f32 %v753_v10, %v752_v29  ;;  %v805_v35 = vadd.f32 %v804_v46, %v803_v48  ;;  %v685_v55 = vsel %vm227_vm1, %v676_v30, 0.0  ;;  %v686_v15 = vsel %vm227_vm1, %v677_v37, 0.0 }
  0x57   : > { %v687_v36 = vadd.f32 %v686_v15, %v685_v55  ;;  %v688_v38 = vsel %vm227_vm1, %v678_v49, 0.0  ;;  %v690_v39 = vsel %vm227_vm1, %v679_v34, 0.0  ;;  %v832_v3 = vunpack.c.l.bf16 %v1607_v33  ;;  %v959_v34 = vld [vmem:[%s1368_s20 + $0x10] sm:$0x88] }
  0x58   : > { %755 = vadd.xlane.f32.xlu0 %v754_v11  ;;  %v807_v40 = vadd.f32 %v806_v59, %v805_v35  ;;  %v833_v41 = vunpack.c.h.bf16 %v1607_v33  ;;  %v834_v28 = vunpack.c.l.bf16 %v831_v24  ;;  %v835_v42 = vunpack.c.h.bf16 %v831_v24 }
  0x59   : > { %v689_v31 = vadd.f32 %v688_v38, %v687_v36  ;;  %v842_v32 = vrot.slane %v1294_v18, %v1357_v4  ;;  %v846_v43 = vrot.slane %v1294_v18, %v1359_v5  ;;  %v850_v44 = vrot.slane %v1294_v18, %v1361_v6 }
  0x5a   : > { %v809_v47 = vadd.f32 %v808_v63, %v807_v40  ;;  %v854_v50 = vrot.slane %v1294_v18, %v1363_v7  ;;  %v768_v51 = vunpack.c.l.bf16 %v766_v19  ;;  %v769_v58 = vunpack.c.h.bf16 %v766_v19 }
  0x5b   : > { %v691_v52 = vadd.f32 %v690_v39, %v689_v31  ;;  %v859_v53 = vmul.f32 %v842_v32, %v832_v3  ;;  %v860_v54 = vmul.f32 %v846_v43, %v833_v41  ;;  %v861_v56 = vmul.f32 %v850_v44, %v834_v28  ;;  %v960_v39 = vld [vmem:[%s1368_s20 + $0x18] sm:$0x88] }
  0x5c   : > { %810 = vadd.xlane.f32.xlu1 %v809_v47  ;;  %v862_v57 = vmul.f32 %v854_v50, %v835_v42  ;;  %v770_v8 = vunpack.c.l.bf16 %v767_v45  ;;  %v771_v9 = vunpack.c.h.bf16 %v767_v45  ;;  %v799_v17 = vmul.f32 %v1572_v61, %v768_v51 }
  0x5d   : > { %692 = vadd.xlane.f32.xlu0 %v691_v52  ;;  %v868_v60 = vsel %vm867_vm12, %v859_v53, 0.0  ;;  %v869_v14 = vsel %vm867_vm12, %v860_v54, 0.0  ;;  %v871_v16 = vsel %vm867_vm12, %v861_v56, 0.0  ;;  %v800_v1 = vmul.f32 %v1575_v13, %v769_v58  ;;  %v896_v52 = vld [vmem:[%s1368_s20 + $0x28] sm:$0xff] }
  0x5e   : > { %v870_v62 = vadd.f32 %v869_v14, %v868_v60  ;;  %v873_v23 = vsel %vm867_vm12, %v862_v57, 0.0  ;;  %v801_v21 = vmul.f32 %v1580_v20, %v770_v8  ;;  %v802_v22 = vmul.f32 %v1583_v0, %v771_v9 }
  0x5f   : > { %v812_v2 = vsel %vm420_vm5, %v799_v17, 0.0  ;;  %v907_v10 = vrot.slane %v1295_v12, %v1357_v4  ;;  %v1644_v25 = vrot.slane %v1295_v12, %v1359_v5  ;;  %v813_v61 = vsel %vm420_vm5, %v800_v1, 0.0 }
  0x60   : > { %v872_v26 = vadd.f32 %v871_v16, %v870_v62  ;;  %v815_v27 = vsel %vm420_vm5, %v801_v21, 0.0  ;;  %v1649_v48 = vrot.slane %v1295_v12, %v1361_v6  ;;  %v814_v13 = vadd.f32 %v813_v61, %v812_v2  ;;  %v1681_v62 = vld [vmem:[%s1368_s20 + $0x30] sm:$0x11]  ;;  %v1689_v2 = vld [vmem:[%s1368_s20 + $0x38] sm:$0x11] }
  0x61   : > { %v817_v20 = vsel %vm420_vm5, %v802_v22, 0.0  ;;  %v919_v0 = vrot.slane %v1295_v12, %v1363_v7  ;;  %v924_v29 = vmul.f32 %v907_v10, %v832_v3  ;;  %v925_v37 = vmul.f32 %v1644_v25, %v833_v41  ;;  %v1296_v3 = vld [vmem:[%s1836_s1 + $0x24] ss:$8 sm:$0xf] }
  0x62   : > { %v874_v30 = vadd.f32 %v873_v23, %v872_v26  ;;  %v926_v49 = vmul.f32 %v1649_v48, %v834_v28  ;;  %v816_v33 = vadd.f32 %v815_v27, %v814_v13  ;;  %v863_v63 = vmul.f32 %v842_v32, %v768_v51 }
  0x63   : > { %v927_v46 = vmul.f32 %v919_v0, %v835_v42  ;;  %v932_v59 = vsel %vm482_vm8, %v924_v29, 0.0  ;;  %v933_v24 = vsel %vm482_vm8, %v925_v37, 0.0  ;;  %v864_v35 = vmul.f32 %v846_v43, %v769_v58 }
  0x64   : > { %875 = vadd.xlane.f32.xlu1 %v874_v30  ;;  %v935_v11 = vsel %vm482_vm8, %v926_v49, 0.0  ;;  %v865_v55 = vmul.f32 %v850_v44, %v770_v8  ;;  %v818_v15 = vadd.f32 %v817_v20, %v816_v33  ;;  %v934_v18 = vadd.f32 %v933_v24, %v932_v59  ;;  %v895_v44 = vld [vmem:[%s1368_s20 + $0x20] sm:$0xff] }
  0x65   : > { %v937_v36 = vsel %vm482_vm8, %v927_v46, 0.0  ;;  %v866_v38 = vmul.f32 %v854_v50, %v771_v9  ;;  %v877_v19 = vsel %vm365_vm13, %v863_v63, 0.0  ;;  %v878_v40 = vsel %vm365_vm13, %v864_v35, 0.0 }
  0x66   : > { %v880_v41 = vsel %vm365_vm13, %v865_v55, 0.0  ;;  %v963_v28 = vunpack.c.l.bf16 %v959_v34  ;;  %819 = vadd.xlane.f32.xlu0 %v818_v15  ;;  %v936_v42 = vadd.f32 %v935_v11, %v934_v18  ;;  %v879_v31 = vadd.f32 %v878_v40, %v877_v19 }
  0x67   : > { %v882_v32 = vsel %vm365_vm13, %v866_v38, 0.0  ;;  %v964_v43 = vunpack.c.h.bf16 %v959_v34  ;;  %v965_v45 = vunpack.c.l.bf16 %v960_v39  ;;  %v966_v47 = vunpack.c.h.bf16 %v960_v39  ;;  %v1720_v38 = vld [vmem:[%s1368_s20 + $0x38] sm:$0x33] }
  0x68   : > { %v977_v50 = vrot.slane %v1296_v3, %v1357_v4  ;;  %v981_v51 = vrot.slane %v1296_v3, %v1359_v5  ;;  %v938_v53 = vadd.f32 %v937_v36, %v936_v42  ;;  %v881_v54 = vadd.f32 %v880_v41, %v879_v31  ;;  %v1717_v36 = vld [vmem:[%s1368_s20 + $0x30] sm:$0x33]  ;;  %v1298_v41 = vld [vmem:[%s1836_s1 + $0x26] ss:$8 sm:$0xf] }
  0x69   : > { %v985_v56 = vrot.slane %v1296_v3, %v1361_v6  ;;  %v989_v57 = vrot.slane %v1296_v3, %v1363_v7  ;;  %v1674_v9 = vunpack.c.l.bf16 %v895_v44  ;;  %v1676_v12 = vunpack.c.h.bf16 %v895_v44 }
  0x6a   : > { %v994_v58 = vmul.f32 %v977_v50, %v963_v28  ;;  %v995_v8 = vmul.f32 %v981_v51, %v964_v43  ;;  %939 = vadd.xlane.f32.xlu1 %v938_v53  ;;  %v883_v60 = vadd.f32 %v882_v32, %v881_v54  ;;  %v1678_v17 = vunpack.c.l.bf16 %v896_v52  ;;  %v1297_v43 = vld [vmem:[%s1836_s1 + $0x25] ss:$8 sm:$0xf] }
  0x6b   : > { %v996_v14 = vmul.f32 %v985_v56, %v965_v45  ;;  %v997_v16 = vmul.f32 %v989_v57, %v966_v47  ;;  %v1685_v21 = vunpack.c.h.bf16 %v896_v52  ;;  %v928_v22 = vmul.f32 %v907_v10, %v1674_v9 }
  0x6c   : > { %v1006_v23 = vsel %vm612_vm10, %v994_v58, 0.0  ;;  %v1007_v1 = vsel %vm612_vm10, %v995_v8, 0.0  ;;  %884 = vadd.xlane.f32.xlu0 %v883_v60  ;;  %v929_v13 = vmul.f32 %v1644_v25, %v1676_v12  ;;  %v930_v20 = vmul.f32 %v1649_v48, %v1678_v17 }
  0x6d   : > { %v1008_v26 = vadd.f32 %v1007_v1, %v1006_v23  ;;  %v1009_v61 = vsel %vm612_vm10, %v996_v14, 0.0  ;;  %v1011_v27 = vsel %vm612_vm10, %v997_v16, 0.0  ;;  %v931_v29 = vmul.f32 %v919_v0, %v1685_v21 }
  0x6e   : > { %v941_v30 = vsel %vm298_vm7, %v928_v22, 0.0  ;;  %v967_v10 = vunpack.c.l.bf16 %v1681_v62  ;;  %v942_v49 = vsel %vm298_vm7, %v929_v13, 0.0  ;;  %v968_v33 = vunpack.c.h.bf16 %v1681_v62 }
  0x6f   : > { %v1010_v37 = vadd.f32 %v1009_v61, %v1008_v26  ;;  %v969_v46 = vunpack.c.l.bf16 %v1689_v2  ;;  %v943_v59 = vadd.f32 %v942_v49, %v941_v30  ;;  %v944_v25 = vsel %vm298_vm7, %v930_v20, 0.0 }
  0x70   : > { %v946_v48 = vsel %vm298_vm7, %v931_v29, 0.0  ;;  %v970_v0 = vunpack.c.h.bf16 %v1689_v2  ;;  %v1002_v34 = vmul.f32 %v977_v50, %v967_v10  ;;  %v1003_v24 = vmul.f32 %v981_v51, %v968_v33 }
  0x71   : > { %v1012_v63 = vadd.f32 %v1011_v27, %v1010_v37  ;;  %v1004_v11 = vmul.f32 %v985_v56, %v969_v46  ;;  %v945_v35 = vadd.f32 %v944_v25, %v943_v59  ;;  %v998_v15 = vmul.f32 %v977_v50, %v1674_v9 }
  0x72   : > { %v1005_v55 = vmul.f32 %v989_v57, %v970_v0  ;;  %v999_v18 = vmul.f32 %v981_v51, %v1676_v12  ;;  %v1020_v39 = vsel %vm627_vm11, %v1002_v34, 0.0  ;;  %v1021_v3 = vsel %vm627_vm11, %v1003_v24, 0.0 }
  0x73   : > { %1013 = vadd.xlane.f32.xlu1 %v1012_v63  ;;  %v1023_v19 = vsel %vm627_vm11, %v1004_v11, 0.0  ;;  %v1000_v40 = vmul.f32 %v985_v56, %v1678_v17  ;;  %v947_v28 = vadd.f32 %v946_v48, %v945_v35  ;;  %v1022_v42 = vadd.f32 %v1021_v3, %v1020_v39 }
  0x74   : > { %v1025_v31 = vsel %vm627_vm11, %v1005_v55, 0.0  ;;  %v1001_v32 = vmul.f32 %v989_v57, %v1685_v21  ;;  %v1015_v44 = vadd.f32 %v999_v18, %v998_v15  ;;  %v1090_v45 = vunpack.c.l.bf16 %v1717_v36 }
  0x75   : > { %v1091_v47 = vunpack.c.h.bf16 %v1717_v36  ;;  %v1092_v50 = vunpack.c.l.bf16 %v1720_v38  ;;  %948 = vadd.xlane.f32.xlu0 %v947_v28  ;;  %v1024_v51 = vadd.f32 %v1023_v19, %v1022_v42  ;;  %v1093_v52 = vunpack.c.h.bf16 %v1720_v38  ;;  %v1152_v42 = vld [vmem:[%s1368_s20 + $0x20] sm:$0xee] }
  0x76   : > { %v1100_v53 = vrot.slane %v1298_v41, %v1357_v4  ;;  %v1104_v54 = vrot.slane %v1298_v41, %v1359_v5  ;;  %v1016_v56 = vadd.f32 %v1015_v44, %v1000_v40  ;;  %v1108_v57 = vrot.slane %v1298_v41, %v1361_v6 }
  0x77   : > { %v1112_v58 = vrot.slane %v1298_v41, %v1363_v7  ;;  %v1047_v8 = vrot.slane %v1297_v43, %v1357_v4  ;;  %v1026_v60 = vadd.f32 %v1025_v31, %v1024_v51  ;;  %v1051_v34 = vrot.slane %v1297_v43, %v1359_v5 }
  0x78   : > { %v1121_v14 = vmul.f32 %v1100_v53, %v1090_v45  ;;  %v1122_v16 = vmul.f32 %v1104_v54, %v1091_v47  ;;  %v1117_v23 = vmul.f32 %v1100_v53, %v1674_v9  ;;  %v1017_v1 = vadd.f32 %v1016_v56, %v1001_v32  ;;  %v1153_v53 = vld [vmem:[%s1368_s20 + $0x28] sm:$0xee]  ;;  %s1303_s20 = sshll.u32 %s1840_s15, 4 }
  0x79   : > { %v1123_v22 = vmul.f32 %v1108_v57, %v1092_v50  ;;  %v1124_v26 = vmul.f32 %v1112_v58, %v1093_v52  ;;  %v1118_v61 = vmul.f32 %v1104_v54, %v1676_v12  ;;  %1027 = vadd.xlane.f32.xlu1 %v1026_v60  ;;  %v1119_v20 = vmul.f32 %v1108_v57, %v1678_v17  ;;  %s172_s28 = scalar_lea.vmem %s1838_s3, %s1303_s20 }
  0x7a   : > { %v1134_v27 = vsel %vm286_vm2, %v1121_v14, 0.0  ;;  %v1135_v13 = vsel %vm286_vm2, %v1122_v16, 0.0  ;;  %v1120_v29 = vmul.f32 %v1112_v58, %v1685_v21  ;;  %1018 = vadd.xlane.f32.xlu0 %v1017_v1  ;;  %v1125_v59 = vsel %vm276_vm0, %v1117_v23, 0.0 }
  0x7b   : > { %v1136_v30 = vadd.f32 %v1135_v13, %v1134_v27  ;;  %v1137_v37 = vsel %vm286_vm2, %v1123_v22, 0.0  ;;  %v1139_v49 = vsel %vm286_vm2, %v1124_v26, 0.0  ;;  %v1126_v25 = vsel %vm276_vm0, %v1118_v61, 0.0 }
  0x7c   : > { %v1128_v48 = vsel %vm276_vm0, %v1119_v20, 0.0  ;;  %v1130_v63 = vsel %vm276_vm0, %v1120_v29, 0.0  ;;  %v1127_v11 = vadd.f32 %v1126_v25, %v1125_v59  ;;  %v1055_v35 = vrot.slane %v1297_v43, %v1361_v6 }
  0x7d   : > { %v1138_v24 = vadd.f32 %v1137_v37, %v1136_v30  ;;  %v1059_v55 = vrot.slane %v1297_v43, %v1363_v7  ;;  %v1068_v15 = vmul.f32 %v1047_v8, %v967_v10  ;;  %v1069_v18 = vmul.f32 %v1051_v34, %v968_v33  ;;  %v1299_v10 = vld [vmem:[%s1836_s1 + $0x27] ss:$8 sm:$0xf] }
  0x7e   : > { %v1064_v39 = vmul.f32 %v1047_v8, %v1674_v9  ;;  %v1065_v3 = vmul.f32 %v1051_v34, %v1676_v12  ;;  %v1129_v40 = vadd.f32 %v1128_v48, %v1127_v11  ;;  %v1070_v41 = vmul.f32 %v1055_v35, %v969_v46 }
  0x7f   : > { %v1140_v19 = vadd.f32 %v1139_v49, %v1138_v24  ;;  %v1071_v28 = vmul.f32 %v1059_v55, %v970_v0  ;;  %v1077_v62 = vsel %vm227_vm1, %v1068_v15, 0.0  ;;  %v1078_v33 = vsel %vm227_vm1, %v1069_v18, 0.0 }
  0x80   : > { %v1066_v9 = vmul.f32 %v1055_v35, %v1678_v17  ;;  %v1067_v12 = vmul.f32 %v1059_v55, %v1685_v21  ;;  %v1131_v31 = vadd.f32 %v1130_v63, %v1129_v40  ;;  %v1079_v46 = vadd.f32 %v1078_v33, %v1077_v62  ;;  %v1284_v33 = vld [vmem:[#allocation2] ss:$0 sm:$0xff] }
  0x81   : > { %1141 = vadd.xlane.f32.xlu1 %v1140_v19  ;;  %v1080_v2 = vsel %vm227_vm1, %v1070_v41, 0.0  ;;  %v1082_v0 = vsel %vm227_vm1, %v1071_v28, 0.0  ;;  %v1072_v32 = vadd.f32 %v1065_v3, %v1064_v39  ;;  %v1164_v43 = vrot.slane %v1299_v10, %v1357_v4 }
  0x82   : > { %v1168_v44 = vrot.slane %v1299_v10, %v1359_v5  ;;  %v1172_v51 = vrot.slane %v1299_v10, %v1361_v6  ;;  %1132 = vadd.xlane.f32.xlu0 %v1131_v31  ;;  %v1081_v17 = vadd.f32 %v1080_v2, %v1079_v46  ;;  %v1176_v21 = vrot.slane %v1299_v10, %v1363_v7 }
  0x83   : > { %v1154_v54 = vunpack.c.l.bf16 %v1152_v42  ;;  %v1155_v56 = vunpack.c.h.bf16 %v1152_v42  ;;  %v1073_v57 = vadd.f32 %v1072_v32, %v1066_v9  ;;  %v1185_v58 = vmul.f32 %v1164_v43, %v1090_v45 }
  0x84   : > { %v1186_v8 = vmul.f32 %v1168_v44, %v1091_v47  ;;  %v1187_v4 = vmul.f32 %v1172_v51, %v1092_v50  ;;  %v1083_v5 = vadd.f32 %v1082_v0, %v1081_v17  ;;  %v1188_v6 = vmul.f32 %v1176_v21, %v1093_v52 }
  0x85   : > { %v1156_v60 = vunpack.c.l.bf16 %v1153_v53  ;;  %v1157_v14 = vunpack.c.h.bf16 %v1153_v53  ;;  %v1074_v16 = vadd.f32 %v1073_v57, %v1067_v12  ;;  %v1198_v7 = vsel %vm353_vm3, %v1185_v58, 0.0 }
  0x86   : > { %v1199_v23 = vsel %vm353_vm3, %v1186_v8, 0.0  ;;  %v1201_v1 = vsel %vm353_vm3, %v1187_v4, 0.0  ;;  %1084 = vadd.xlane.f32.xlu1 %v1083_v5  ;;  %v1181_v36 = vmul.f32 %v1164_v43, %v1154_v54  ;;  %v1182_v47 = vmul.f32 %v1168_v44, %v1155_v56 }
  0x87   : > { %v1200_v45 = vadd.f32 %v1199_v23, %v1198_v7  ;;  %1075 = vadd.xlane.f32.xlu0 %v1074_v16  ;;  %v1203_v50 = vsel %vm353_vm3, %v1188_v6, 0.0  ;;  %v1183_v22 = vmul.f32 %v1172_v51, %v1156_v60  ;;  %v1184_v26 = vmul.f32 %v1176_v21, %v1157_v14 }
  0x88   : > { %v1189_v52 = vsel %vm343_vm4, %v1181_v36, 0.0  ;;  %v1190_v61 = vsel %vm343_vm4, %v1182_v47, 0.0 }
  0x89   : > { %v1202_v38 = vadd.f32 %v1201_v1, %v1200_v45  ;;  %v1191_v27 = vadd.f32 %v1190_v61, %v1189_v52  ;;  %v1192_v13 = vsel %vm343_vm4, %v1183_v22, 0.0  ;;  %v1194_v29 = vsel %vm343_vm4, %v1184_v26, 0.0 }
  0x8b   : > { %v1204_v20 = vadd.f32 %v1203_v50, %v1202_v38  ;;  %v1193_v30 = vadd.f32 %v1192_v13, %v1191_v27 }
  0x8d   : > { %1205 = vadd.xlane.f32.xlu1 %v1204_v20  ;;  %v1195_v37 = vadd.f32 %v1194_v29, %v1193_v30 }
  0x8f   : > { %1196 = vadd.xlane.f32.xlu0 %v1195_v37 }
  0xaa   : > { %v226_v49 = vpop.xlane.xlu1 %225 }
  0xab   : > { %v237_v57 = vadd.f32 %v1284_v33, %v226_v49 }
  0xac   : > { %v285_v59 = vpop.xlane.xlu0 %284 }
  0xad   : > { %v299_v43 = vrot.slane %v285_v59, 1 }
  0xaf   : > { %v236_v25 = vpop.xlane.xlu1 %235 }
  0xb0   : > { %v238_v12 = vadd.f32 %v1284_v33, %v236_v25 }
  0xb2   : > { %v295_v48 = vpop.xlane.xlu0 %294 }
  0xb3   : > { %v300_v42 = vrot.slane %v295_v48, 1 }
  0xb5   : > { %v305_v46 = vadd.f32 %v300_v42, %v238_v12  ;;  %v301_v21 = vsel %vm298_vm7, %v299_v43, %v300_v42 }
  0xb6   : > { %v362_v63 = vpop.xlane.xlu1 %361  ;;  %v304_v14 = vadd.f32 %v301_v21, %v237_v57 }
  0xb7   : > { %v367_v2 = vrot.slane %v362_v63, 2 }
  0xb9   : > { %v372_v51 = vadd.f32 %v367_v2, %v305_v46 }
  0xba   : > { %v352_v34 = vpop.xlane.xlu0 %351 }
  0xbb   : > { %v366_v44 = vrot.slane %v352_v34, 2 }
  0xbd   : > { %v368_v4 = vsel %vm365_vm13, %v366_v44, %v367_v2 }
  0xbe   : > { %v371_v45 = vadd.f32 %v368_v4, %v304_v14 }
  0xc0   : > { %v429_v24 = vpop.xlane.xlu1 %428 }
  0xc1   : > { %v419_v11 = vpop.xlane.xlu0 %418  ;;  %v433_v32 = vrot.slane %v429_v24, 3 }
  0xc2   : > { %v432_v54 = vrot.slane %v419_v11, 3 }
  0xc3   : > { %v438_v58 = vadd.f32 %v433_v32, %v372_v51 }
  0xc4   : > { %v434_v7 = vsel %vm420_vm5, %v432_v54, %v433_v32 }
  0xc5   : > { %v437_v26 = vadd.f32 %v434_v7, %v371_v45 }
  0xc7   : > { %v500_v35 = vpop.xlane.xlu1 %499 }
  0xc8   : > { %v504_v53 = vrot.slane %v500_v35, 5 }
  0xca   : > { %v491_v55 = vpop.xlane.xlu0 %490  ;;  %v509_v16 = vadd.f32 %v504_v53, %v438_v58 }
  0xcb   : > { %v503_v5 = vrot.slane %v491_v55, 5 }
  0xcc   : > { %v561_v15 = vpop.xlane.xlu1 %560 }
  0xcd   : > { %v565_v8 = vrot.slane %v561_v15, 6  ;;  %v505_v50 = vsel %vm286_vm2, %v503_v5, %v504_v53 }
  0xce   : > { %v508_v27 = vadd.f32 %v505_v50, %v437_v26 }
  0xcf   : > { %v570_v36 = vadd.f32 %v565_v8, %v509_v16 }
  0xd0   : > { %v556_v18 = vpop.xlane.xlu0 %555 }
  0xd1   : > { %v564_v23 = vrot.slane %v556_v18, 6 }
  0xd3   : > { %v626_v39 = vpop.xlane.xlu1 %625  ;;  %v566_v52 = vsel %vm227_vm1, %v564_v23, %v565_v8 }
  0xd4   : > { %v641_v6 = vrot.slane %v626_v39, 7  ;;  %v569_v30 = vadd.f32 %v566_v52, %v508_v27 }
  0xd5   : > { %v621_v3 = vpop.xlane.xlu0 %620 }
  0xd6   : > { %v640_v22 = vrot.slane %v621_v3, 7 }
  0xd8   : > { %v642_v20 = vsel %vm627_vm11, %v640_v22, %v641_v6 }
  0xd9   : > { %v647_v25 = vadd.f32 %v642_v20, %v569_v30 }
  0xdb   : > { %v747_v19 = vpop.xlane.xlu1 %746 }
  0xdc   : > { %v759_v59 = vrot.slane %v747_v19, 2 }
  0xde   : > { %v636_v40 = vpop.xlane.xlu0 %635 }
  0xdf   : > { %v643_v56 = vrot.slane %v636_v40, 7 }
  0xe1   : > { %v684_v41 = vpop.xlane.xlu1 %683  ;;  %v644_v1 = vsel %vm627_vm11, %v641_v6, %v643_v56 }
  0xe2   : > { %v648_v38 = vadd.f32 %v644_v1, %v570_v36  ;;  %v694_v15 = vadd.f32 %v684_v41, %v647_v25 }
  0xe5   : > { %v756_v28 = vpop.xlane.xlu0 %755 }
  0xe6   : > { %v760_v29 = vrot.slane %v756_v28, 2 }
  0xe8   : > { %v761_v34 = vsel %vm365_vm13, %v759_v59, %v760_v29 }
  0xe9   : > { %v811_v10 = vpop.xlane.xlu1 %810  ;;  %v764_v28 = vadd.f32 %v761_v34, %v694_v15 }
  0xea   : > { %v693_v62 = vpop.xlane.xlu0 %692  ;;  %v823_v24 = vrot.slane %v811_v10, 3 }
  0xeb   : > { %v695_v13 = vadd.f32 %v693_v62, %v648_v38 }
  0xed   : > { %v765_v48 = vadd.f32 %v760_v29, %v695_v13 }
  0xf1   : > { %v1807_v9 = vpop.xlane.xlu1 %875 }
  0xf2   : > { %v888_v3 = vrot.slane %v1807_v9, 4 }
  0xf3   : > { %v820_v31 = vpop.xlane.xlu0 %819 }
  0xf4   : > { %v824_v37 = vrot.slane %v820_v31, 3 }
  0xf6   : > { %v829_v18 = vadd.f32 %v824_v37, %v765_v48  ;;  %v825_v40 = vsel %vm420_vm5, %v823_v24, %v824_v37 }
  0xf7   : > { %v1809_v0 = vpop.xlane.xlu1 %939  ;;  %v828_v42 = vadd.f32 %v825_v40, %v764_v28 }
  0xf8   : > { %v952_v19 = vrot.slane %v1809_v0, 5 }
  0xf9   : > { %v885_v17 = vpop.xlane.xlu0 %884 }
  0xfa   : > { %v889_v63 = vrot.slane %v885_v17, 4 }
  0xfc   : > { %v894_v62 = vadd.f32 %v889_v63, %v829_v18  ;;  %v890_v12 = vsel %vm353_vm3, %v888_v3, %v889_v63 }
  0xfd   : > { %v893_v32 = vadd.f32 %v890_v12, %v828_v42 }
 0x100   : > { %v1014_v60 = vpop.xlane.xlu1 %1013 }
 0x101   : > { %v1032_v46 = vrot.slane %v1014_v60, 7 }
 0x102   : > { %v949_v47 = vpop.xlane.xlu0 %948 }
 0x103   : > { %v953_v39 = vrot.slane %v949_v47, 5 }
 0x105   : > { %v958_v31 = vadd.f32 %v953_v39, %v894_v62  ;;  %v954_v41 = vsel %vm286_vm2, %v952_v19, %v953_v39 }
 0x106   : > { %v1028_v61 = vpop.xlane.xlu1 %1027  ;;  %v957_v53 = vadd.f32 %v954_v41, %v893_v32 }
 0x107   : > { %v1019_v49 = vpop.xlane.xlu0 %1018  ;;  %v1035_v11 = vrot.slane %v1028_v61, 7 }
 0x108   : > { %v1033_v35 = vrot.slane %v1019_v49, 7 }
 0x10a   : > { %v1036_v10 = vsel %vm627_vm11, %v1033_v35, %v1035_v11  ;;  %v1034_v43 = vsel %vm627_vm11, %v1032_v46, %v1033_v35 }
 0x10b   : > { %v1040_v9 = vadd.f32 %v1036_v10, %v958_v31  ;;  %v1039_v0 = vadd.f32 %v1034_v43, %v957_v53 }
 0x10e   : > { %v1142_v55 = vpop.xlane.xlu1 %1141 }
 0x10f   : > { %v1133_v33 = vpop.xlane.xlu0 %1132  ;;  %v1146_v17 = vrot.slane %v1142_v55, 1 }
 0x110   : > { %v1145_v21 = vrot.slane %v1133_v33, 1 }
 0x112   : > { %v1147_v5 = vsel %vm298_vm7, %v1145_v21, %v1146_v17 }
 0x113   : > { %v1085_v2 = vpop.xlane.xlu1 %1084 }
 0x114   : > { %v1087_v44 = vadd.f32 %v1085_v2, %v1040_v9  ;;  %v1076_v51 = vpop.xlane.xlu0 %1075 }
 0x115   : > { %v1086_v57 = vadd.f32 %v1076_v51, %v1039_v0 }
 0x116   : > { %v1151_v56 = vadd.f32 %v1146_v17, %v1087_v44 }
 0x117   : > { %v1150_v60 = vadd.f32 %v1147_v5, %v1086_v57 }
 0x11a   : > { %v1206_v54 = vpop.xlane.xlu1 %1205 }
 0x11b   : > { %v1210_v58 = vrot.slane %v1206_v54, 2 }
 0x11c   : > { %v1197_v4 = vpop.xlane.xlu0 %1196 }
 0x11d   : > { %v1215_v8 = vadd.f32 %v1210_v58, %v1151_v56  ;;  %v1209_v6 = vrot.slane %v1197_v4, 2 }
 0x11f   : > { %1219 = vst.msk [vmem:[%s172_s28 + $0x8] sm:$0x3] %vm1218_vm14, %v1215_v8  ;;  %v1211_v14 = vsel %vm365_vm13, %v1209_v6, %v1210_v58 }
 0x120   : > { %v1214_v16 = vadd.f32 %v1211_v14, %v1150_v60 }
 0x122   : > { %1217 = vst.msk [vmem:[%s172_s28] sm:$0xff] %vm1216_vm15, %v1214_v16 }
 0x123 PF: > { %s15_s14 = sadd.s32 1, %s1318_s14  }
 0x124   : > { %p12_p4 = scmp.ge.s32.totalorder %s15_s14, 4  }
 0x126   :  { %14 = sbr.rel (!%p12_p4) target bundleno = 3 (0x3), region = 77 }

// kernel: discriminator_forward.8
= control target key start
LH: loop header
LB: loop body
LE: loop exit
PB: predicated region body
PF: predicated region fallthrough
CT: control target
= control target key end

     0   :  { %s11284_s12 = smov 0   ;;  %s11286_s13 = smov 0   ;;  %s13298_s0 = inlined_call_operand.vmem [shape: bf16[2,39,256], index: 0, kind: input, shape index: {}]   ;;  %s13299_s1 = inlined_call_operand.vmem [shape: bf16[16,256,512], index: 1, kind: input, shape index: {}]   ;;  %s13300_s2 = inlined_call_operand.vmem [shape: f32[1,512], index: 2, kind: input, shape index: {}]   ;;  %s13301_s3 = inlined_call_operand.vmem [shape: bf16[2,18,512], index: 3, kind: output, shape index: {}]  }
   0x1   :  { %s11288_s14 = smov 0   ;;  %s11290_s15 = smov 0  }
   0x2   :  { %s11292_s16 = smov 0   ;;  %s11294_s17 = smov 0  }
   0x3   :  { %s11296_s18 = smov 0   ;;  %s11298_s19 = smov 0  }
   0x4   :  { %s11300_s20 = smov 0  }
   0x5 LB: > { %s22_s21 = sadd.s32 1, %s11254_s18  ;;  %s25_s22 = sadd.s32 1, %s11258_s19  ;;  %s11262_s20 = sphi %s11300_s20, %s13_s20   ;;  %s11258_s19 = sphi %s11298_s19, %s13311_s19   ;;  %s11254_s18 = sphi %s11296_s18, %s13310_s18   ;;  %s11250_s17 = sphi %s11294_s17, %s13309_s17   ;;  %s11246_s16 = sphi %s11292_s16, %s13308_s16   ;;  %s11242_s15 = sphi %s11290_s15, %s13307_s15   ;;  %s11238_s14 = sphi %s11288_s14, %s13306_s14   ;;  %s11234_s13 = sphi %s11286_s13, %s13305_s13   ;;  %s11230_s12 = sphi %s11284_s12, %s13304_s12  }
   0x6   : > { %p23_p0 = scmp.ge.s32.totalorder %s22_s21, 2  ;;  %p65_p1 = scmp.ne.s32.totalorder %s11242_s15, %s11238_s14 }
   0x7   : > { %s9112_s23 = sadd.s32 4294967295, %s11262_s20   ;;  %p66_p2 = scmp.eq.s32.totalorder %s11262_s20, 0 }
   0x8   : > { %s13313_s21 = smov (%p23_p0, %s22_s21), 0  ;;  %s13315_s22 = smov (!%p23_p0, %s25_s22), %s11258_s19 }
   0x9   : > { %p27_p3 = scmp.ge.s32.totalorder %s13315_s22, 2  ;;  %s107_s24 = ssub.s32 %s11254_s18, %s13313_s21 }
   0xa   : > { %p11340_p4 = por %p66_p2, %p65_p1  ;;  %p122_p5 = scmp.ne.s32.totalorder %s11234_s13, %s11230_s12 }
   0xb   : > { %s13317_s22 = smov (%p27_p3, %s13315_s22), 0  ;;  %s58_s26 = sadd.s32 1, %s11242_s15 }
   0xc   : > { %p123_p6 = scmp.eq.s32.totalorder %s9112_s23, 3  ;;  %s55_s27 = ssub.s32 %s11258_s19, %s13317_s22 }
   0xd   : > { %s112_s28 = sadd.s32 1, %s11234_s13  ;;  %p56_p7 = scmp.eq.s32.totalorder %s55_s27, 0 }
   0xe   : > { %s109_s29 = sor.u32 %s107_s24, %s55_s27  ;;  %p11352_p9 = por %p123_p6, %p122_p5 }
   0xf   : > { %p110_p8 = scmp.eq.s32.totalorder %s109_s29, 0  ;;  %p9115_p10 = scmp.ge.s32.totalorder %s11262_s20, 4 }
  0x10   : > { %s11357_s4 = scalar_select %p56_p7, %s11242_s15, %s58_s26  }
  0x11   : > { %s11360_s5 = scalar_select %p110_p8, %s11234_s13, %s112_s28  }
  0x12   : > { %145 = sbr.rel (%p9115_p10) target bundleno = 285 (0x11d), region = 16 }
  0x19   : > { %156 = sbr.rel (!%p11340_p4) target bundleno = 285 (0x11d), region = 24  ;;  %s158_s6 = sand.u32 (%p11340_p4), 1, %s11242_s15  }
  0x1a   : > { %s10168_s7 = sshll.u32 (%p11340_p4), %s11258_s19, 3  ;;  %s9116_s8 = sshll.u32 (%p11340_p4), %s158_s6, 12 }
  0x1b   : > { %s11370_s11 = scalar_lea.vmem (%p11340_p4), %s13299_s1, %s10168_s7  ;;  %s11375_s23 = scalar_lea.vmem (%p11340_p4), [#allocation2], %s9116_s8 }
  0x1c   : > { %v1216_v0 = vld [vmem:[%s11370_s11] sm:$0xff] (%p11340_p4)  ;;  %v1218_v1 = vld [vmem:[%s11370_s11 + $0x10] sm:$0xff] (%p11340_p4) }
  0x1d   : > { %v1220_v2 = vld [vmem:[%s11370_s11 + $0x20] sm:$0xff] (%p11340_p4)  ;;  %1217 = vst [vmem:[%s11375_s23] sm:$0xff] (%p11340_p4), %v1216_v0  ;;  %1219 = vst [vmem:[%s11375_s23 + $0x8] sm:$0xff] (%p11340_p4), %v1218_v1  ;;  %v1222_v3 = vld [vmem:[%s11370_s11 + $0x30] sm:$0xff] (%p11340_p4) }
  0x1e   : > { %1221 = vst [vmem:[%s11375_s23 + $0x10] sm:$0xff] (%p11340_p4), %v1220_v2  ;;  %v1224_v4 = vld [vmem:[%s11370_s11 + $0x40] sm:$0xff] (%p11340_p4)  ;;  %v1226_v5 = vld [vmem:[%s11370_s11 + $0x50] sm:$0xff] (%p11340_p4)  ;;  %1223 = vst [vmem:[%s11375_s23 + $0x18] sm:$0xff] (%p11340_p4), %v1222_v3 }
  0x1f   : > { %1225 = vst [vmem:[%s11375_s23 + $0x20] sm:$0xff] (%p11340_p4), %v1224_v4  ;;  %1227 = vst [vmem:[%s11375_s23 + $0x28] sm:$0xff] (%p11340_p4), %v1226_v5  ;;  %v1228_v6 = vld [vmem:[%s11370_s11 + $0x60] sm:$0xff] (%p11340_p4)  ;;  %v1230_v7 = vld [vmem:[%s11370_s11 + $0x70] sm:$0xff] (%p11340_p4) }
  0x20   : > { %v1232_v8 = vld [vmem:[%s11370_s11 + $0x80] sm:$0xff]  ;;  %1229 = vst [vmem:[%s11375_s23 + $0x30] sm:$0xff] %v1228_v6  ;;  %1231 = vst [vmem:[%s11375_s23 + $0x38] sm:$0xff] %v1230_v7  ;;  %v1234_v9 = vld [vmem:[%s11370_s11 + $0x90] sm:$0xff] }
  0x21   : > { %1233 = vst [vmem:[%s11375_s23 + $0x40] sm:$0xff] %v1232_v8  ;;  %v1236_v10 = vld [vmem:[%s11370_s11 + $0xa0] sm:$0xff]  ;;  %v1238_v11 = vld [vmem:[%s11370_s11 + $0xb0] sm:$0xff]  ;;  %1235 = vst [vmem:[%s11375_s23 + $0x48] sm:$0xff] %v1234_v9 }
  0x22   : > { %1237 = vst [vmem:[%s11375_s23 + $0x50] sm:$0xff] %v1236_v10  ;;  %1239 = vst [vmem:[%s11375_s23 + $0x58] sm:$0xff] %v1238_v11  ;;  %v1240_v12 = vld [vmem:[%s11370_s11 + $0xc0] sm:$0xff]  ;;  %v1242_v13 = vld [vmem:[%s11370_s11 + $0xd0] sm:$0xff] }
  0x23   : > { %v1244_v14 = vld [vmem:[%s11370_s11 + $0xe0] sm:$0xff]  ;;  %1241 = vst [vmem:[%s11375_s23 + $0x60] sm:$0xff] %v1240_v12  ;;  %1243 = vst [vmem:[%s11375_s23 + $0x68] sm:$0xff] %v1242_v13  ;;  %v1246_v15 = vld [vmem:[%s11370_s11 + $0xf0] sm:$0xff] }
  0x24   : > { %1245 = vst [vmem:[%s11375_s23 + $0x70] sm:$0xff] %v1244_v14  ;;  %v1248_v16 = vld [vmem:[%s11370_s11 + $0x100] sm:$0xff]  ;;  %v1250_v17 = vld [vmem:[%s11370_s11 + $0x110] sm:$0xff]  ;;  %1247 = vst [vmem:[%s11375_s23 + $0x78] sm:$0xff] %v1246_v15 }
  0x25   : > { %1249 = vst [vmem:[%s11375_s23 + $0x80] sm:$0xff] %v1248_v16  ;;  %1251 = vst [vmem:[%s11375_s23 + $0x88] sm:$0xff] %v1250_v17  ;;  %v1252_v18 = vld [vmem:[%s11370_s11 + $0x120] sm:$0xff]  ;;  %v1254_v19 = vld [vmem:[%s11370_s11 + $0x130] sm:$0xff] }
  0x26   : > { %v1256_v20 = vld [vmem:[%s11370_s11 + $0x140] sm:$0xff]  ;;  %1253 = vst [vmem:[%s11375_s23 + $0x90] sm:$0xff] %v1252_v18  ;;  %1255 = vst [vmem:[%s11375_s23 + $0x98] sm:$0xff] %v1254_v19  ;;  %v1258_v21 = vld [vmem:[%s11370_s11 + $0x150] sm:$0xff] }
  0x27   : > { %1257 = vst [vmem:[%s11375_s23 + $0xa0] sm:$0xff] %v1256_v20  ;;  %v1260_v22 = vld [vmem:[%s11370_s11 + $0x160] sm:$0xff]  ;;  %v1262_v23 = vld [vmem:[%s11370_s11 + $0x170] sm:$0xff]  ;;  %1259 = vst [vmem:[%s11375_s23 + $0xa8] sm:$0xff] %v1258_v21 }
  0x28   : > { %1261 = vst [vmem:[%s11375_s23 + $0xb0] sm:$0xff] %v1260_v22  ;;  %1263 = vst [vmem:[%s11375_s23 + $0xb8] sm:$0xff] %v1262_v23  ;;  %v1264_v24 = vld [vmem:[%s11370_s11 + $0x180] sm:$0xff]  ;;  %v1266_v25 = vld [vmem:[%s11370_s11 + $0x190] sm:$0xff] }
  0x29   : > { %v1268_v26 = vld [vmem:[%s11370_s11 + $0x1a0] sm:$0xff]  ;;  %1265 = vst [vmem:[%s11375_s23 + $0xc0] sm:$0xff] %v1264_v24  ;;  %1267 = vst [vmem:[%s11375_s23 + $0xc8] sm:$0xff] %v1266_v25  ;;  %v1270_v27 = vld [vmem:[%s11370_s11 + $0x1b0] sm:$0xff] }
  0x2a   : > { %1269 = vst [vmem:[%s11375_s23 + $0xd0] sm:$0xff] %v1268_v26  ;;  %v1272_v28 = vld [vmem:[%s11370_s11 + $0x1c0] sm:$0xff]  ;;  %v1274_v29 = vld [vmem:[%s11370_s11 + $0x1d0] sm:$0xff]  ;;  %1271 = vst [vmem:[%s11375_s23 + $0xd8] sm:$0xff] %v1270_v27 }
  0x2b   : > { %1273 = vst [vmem:[%s11375_s23 + $0xe0] sm:$0xff] %v1272_v28  ;;  %1275 = vst [vmem:[%s11375_s23 + $0xe8] sm:$0xff] %v1274_v29  ;;  %v1276_v30 = vld [vmem:[%s11370_s11 + $0x1e0] sm:$0xff]  ;;  %v1278_v31 = vld [vmem:[%s11370_s11 + $0x1f0] sm:$0xff] }
  0x2c   : > { %v1280_v32 = vld [vmem:[%s11370_s11 + $0x200] sm:$0xff]  ;;  %1277 = vst [vmem:[%s11375_s23 + $0xf0] sm:$0xff] %v1276_v30  ;;  %1279 = vst [vmem:[%s11375_s23 + $0xf8] sm:$0xff] %v1278_v31  ;;  %v1282_v33 = vld [vmem:[%s11370_s11 + $0x210] sm:$0xff] }
  0x2d   : > { %1281 = vst [vmem:[%s11375_s23 + $0x100] sm:$0xff] %v1280_v32  ;;  %v1284_v34 = vld [vmem:[%s11370_s11 + $0x220] sm:$0xff]  ;;  %v1286_v35 = vld [vmem:[%s11370_s11 + $0x230] sm:$0xff]  ;;  %1283 = vst [vmem:[%s11375_s23 + $0x108] sm:$0xff] %v1282_v33 }
  0x2e   : > { %1285 = vst [vmem:[%s11375_s23 + $0x110] sm:$0xff] %v1284_v34  ;;  %1287 = vst [vmem:[%s11375_s23 + $0x118] sm:$0xff] %v1286_v35  ;;  %v1288_v36 = vld [vmem:[%s11370_s11 + $0x240] sm:$0xff]  ;;  %v1290_v37 = vld [vmem:[%s11370_s11 + $0x250] sm:$0xff] }
  0x2f   : > { %v1292_v38 = vld [vmem:[%s11370_s11 + $0x260] sm:$0xff]  ;;  %1289 = vst [vmem:[%s11375_s23 + $0x120] sm:$0xff] %v1288_v36  ;;  %1291 = vst [vmem:[%s11375_s23 + $0x128] sm:$0xff] %v1290_v37  ;;  %v1294_v39 = vld [vmem:[%s11370_s11 + $0x270] sm:$0xff] }
  0x30   : > { %1293 = vst [vmem:[%s11375_s23 + $0x130] sm:$0xff] %v1292_v38  ;;  %v1296_v40 = vld [vmem:[%s11370_s11 + $0x280] sm:$0xff]  ;;  %v1298_v41 = vld [vmem:[%s11370_s11 + $0x290] sm:$0xff]  ;;  %1295 = vst [vmem:[%s11375_s23 + $0x138] sm:$0xff] %v1294_v39 }
  0x31   : > { %1297 = vst [vmem:[%s11375_s23 + $0x140] sm:$0xff] %v1296_v40  ;;  %1299 = vst [vmem:[%s11375_s23 + $0x148] sm:$0xff] %v1298_v41  ;;  %v1300_v42 = vld [vmem:[%s11370_s11 + $0x2a0] sm:$0xff]  ;;  %v1302_v43 = vld [vmem:[%s11370_s11 + $0x2b0] sm:$0xff] }
  0x32   : > { %v1304_v44 = vld [vmem:[%s11370_s11 + $0x2c0] sm:$0xff]  ;;  %1301 = vst [vmem:[%s11375_s23 + $0x150] sm:$0xff] %v1300_v42  ;;  %1303 = vst [vmem:[%s11375_s23 + $0x158] sm:$0xff] %v1302_v43  ;;  %v1306_v45 = vld [vmem:[%s11370_s11 + $0x2d0] sm:$0xff] }
  0x33   : > { %1305 = vst [vmem:[%s11375_s23 + $0x160] sm:$0xff] %v1304_v44  ;;  %v1308_v46 = vld [vmem:[%s11370_s11 + $0x2e0] sm:$0xff]  ;;  %v1310_v47 = vld [vmem:[%s11370_s11 + $0x2f0] sm:$0xff]  ;;  %1307 = vst [vmem:[%s11375_s23 + $0x168] sm:$0xff] %v1306_v45 }
  0x34   : > { %1309 = vst [vmem:[%s11375_s23 + $0x170] sm:$0xff] %v1308_v46  ;;  %1311 = vst [vmem:[%s11375_s23 + $0x178] sm:$0xff] %v1310_v47  ;;  %v1312_v48 = vld [vmem:[%s11370_s11 + $0x300] sm:$0xff]  ;;  %v1314_v49 = vld [vmem:[%s11370_s11 + $0x310] sm:$0xff] }
  0x35   : > { %v1316_v50 = vld [vmem:[%s11370_s11 + $0x320] sm:$0xff]  ;;  %1313 = vst [vmem:[%s11375_s23 + $0x180] sm:$0xff] %v1312_v48  ;;  %1315 = vst [vmem:[%s11375_s23 + $0x188] sm:$0xff] %v1314_v49  ;;  %v1318_v51 = vld [vmem:[%s11370_s11 + $0x330] sm:$0xff] }
  0x36   : > { %1317 = vst [vmem:[%s11375_s23 + $0x190] sm:$0xff] %v1316_v50  ;;  %v1320_v52 = vld [vmem:[%s11370_s11 + $0x340] sm:$0xff]  ;;  %v1322_v53 = vld [vmem:[%s11370_s11 + $0x350] sm:$0xff]  ;;  %1319 = vst [vmem:[%s11375_s23 + $0x198] sm:$0xff] %v1318_v51 }
  0x37   : > { %1321 = vst [vmem:[%s11375_s23 + $0x1a0] sm:$0xff] %v1320_v52  ;;  %1323 = vst [vmem:[%s11375_s23 + $0x1a8] sm:$0xff] %v1322_v53  ;;  %v1324_v54 = vld [vmem:[%s11370_s11 + $0x360] sm:$0xff]  ;;  %v1326_v55 = vld [vmem:[%s11370_s11 + $0x370] sm:$0xff] }
  0x38   : > { %v1328_v56 = vld [vmem:[%s11370_s11 + $0x380] sm:$0xff]  ;;  %1325 = vst [vmem:[%s11375_s23 + $0x1b0] sm:$0xff] %v1324_v54  ;;  %1327 = vst [vmem:[%s11375_s23 + $0x1b8] sm:$0xff] %v1326_v55  ;;  %v1330_v57 = vld [vmem:[%s11370_s11 + $0x390] sm:$0xff] }
  0x39   : > { %1329 = vst [vmem:[%s11375_s23 + $0x1c0] sm:$0xff] %v1328_v56  ;;  %v1332_v58 = vld [vmem:[%s11370_s11 + $0x3a0] sm:$0xff]  ;;  %v1334_v59 = vld [vmem:[%s11370_s11 + $0x3b0] sm:$0xff]  ;;  %1331 = vst [vmem:[%s11375_s23 + $0x1c8] sm:$0xff] %v1330_v57 }
  0x3a   : > { %1333 = vst [vmem:[%s11375_s23 + $0x1d0] sm:$0xff] %v1332_v58  ;;  %1335 = vst [vmem:[%s11375_s23 + $0x1d8] sm:$0xff] %v1334_v59  ;;  %v1336_v60 = vld [vmem:[%s11370_s11 + $0x3c0] sm:$0xff]  ;;  %v1338_v61 = vld [vmem:[%s11370_s11 + $0x3d0] sm:$0xff] }
  0x3b   : > { %v1340_v62 = vld [vmem:[%s11370_s11 + $0x3e0] sm:$0xff]  ;;  %1337 = vst [vmem:[%s11375_s23 + $0x1e0] sm:$0xff] %v1336_v60  ;;  %1339 = vst [vmem:[%s11375_s23 + $0x1e8] sm:$0xff] %v1338_v61  ;;  %v1342_v63 = vld [vmem:[%s11370_s11 + $0x3f0] sm:$0xff] }
  0x3c   : > { %1341 = vst [vmem:[%s11375_s23 + $0x1f0] sm:$0xff] %v1340_v62  ;;  %v1344_v0 = vld [vmem:[%s11370_s11 + $0x400] sm:$0xff]  ;;  %v1346_v1 = vld [vmem:[%s11370_s11 + $0x410] sm:$0xff]  ;;  %1343 = vst [vmem:[%s11375_s23 + $0x1f8] sm:$0xff] %v1342_v63 }
  0x3d   : > { %1345 = vst [vmem:[%s11375_s23 + $0x200] sm:$0xff] %v1344_v0  ;;  %1347 = vst [vmem:[%s11375_s23 + $0x208] sm:$0xff] %v1346_v1  ;;  %v1348_v2 = vld [vmem:[%s11370_s11 + $0x420] sm:$0xff]  ;;  %v1350_v3 = vld [vmem:[%s11370_s11 + $0x430] sm:$0xff] }
  0x3e   : > { %v1352_v4 = vld [vmem:[%s11370_s11 + $0x440] sm:$0xff]  ;;  %1349 = vst [vmem:[%s11375_s23 + $0x210] sm:$0xff] %v1348_v2  ;;  %1351 = vst [vmem:[%s11375_s23 + $0x218] sm:$0xff] %v1350_v3  ;;  %v1354_v5 = vld [vmem:[%s11370_s11 + $0x450] sm:$0xff] }
  0x3f   : > { %1353 = vst [vmem:[%s11375_s23 + $0x220] sm:$0xff] %v1352_v4  ;;  %v1356_v6 = vld [vmem:[%s11370_s11 + $0x460] sm:$0xff]  ;;  %v1358_v7 = vld [vmem:[%s11370_s11 + $0x470] sm:$0xff]  ;;  %1355 = vst [vmem:[%s11375_s23 + $0x228] sm:$0xff] %v1354_v5 }
  0x40   : > { %1357 = vst [vmem:[%s11375_s23 + $0x230] sm:$0xff] %v1356_v6  ;;  %1359 = vst [vmem:[%s11375_s23 + $0x238] sm:$0xff] %v1358_v7  ;;  %v1360_v8 = vld [vmem:[%s11370_s11 + $0x480] sm:$0xff]  ;;  %v1362_v9 = vld [vmem:[%s11370_s11 + $0x490] sm:$0xff] }
  0x41   : > { %v1364_v10 = vld [vmem:[%s11370_s11 + $0x4a0] sm:$0xff]  ;;  %1361 = vst [vmem:[%s11375_s23 + $0x240] sm:$0xff] %v1360_v8  ;;  %1363 = vst [vmem:[%s11375_s23 + $0x248] sm:$0xff] %v1362_v9  ;;  %v1366_v11 = vld [vmem:[%s11370_s11 + $0x4b0] sm:$0xff] }
  0x42   : > { %1365 = vst [vmem:[%s11375_s23 + $0x250] sm:$0xff] %v1364_v10  ;;  %v1368_v12 = vld [vmem:[%s11370_s11 + $0x4c0] sm:$0xff]  ;;  %v1370_v13 = vld [vmem:[%s11370_s11 + $0x4d0] sm:$0xff]  ;;  %1367 = vst [vmem:[%s11375_s23 + $0x258] sm:$0xff] %v1366_v11 }
  0x43   : > { %1369 = vst [vmem:[%s11375_s23 + $0x260] sm:$0xff] %v1368_v12  ;;  %1371 = vst [vmem:[%s11375_s23 + $0x268] sm:$0xff] %v1370_v13  ;;  %v1372_v14 = vld [vmem:[%s11370_s11 + $0x4e0] sm:$0xff]  ;;  %v1374_v15 = vld [vmem:[%s11370_s11 + $0x4f0] sm:$0xff] }
  0x44   : > { %v1376_v16 = vld [vmem:[%s11370_s11 + $0x500] sm:$0xff]  ;;  %1373 = vst [vmem:[%s11375_s23 + $0x270] sm:$0xff] %v1372_v14  ;;  %1375 = vst [vmem:[%s11375_s23 + $0x278] sm:$0xff] %v1374_v15  ;;  %v1378_v17 = vld [vmem:[%s11370_s11 + $0x510] sm:$0xff] }
  0x45   : > { %1377 = vst [vmem:[%s11375_s23 + $0x280] sm:$0xff] %v1376_v16  ;;  %v1380_v18 = vld [vmem:[%s11370_s11 + $0x520] sm:$0xff]  ;;  %v1382_v19 = vld [vmem:[%s11370_s11 + $0x530] sm:$0xff]  ;;  %1379 = vst [vmem:[%s11375_s23 + $0x288] sm:$0xff] %v1378_v17 }
  0x46   : > { %1381 = vst [vmem:[%s11375_s23 + $0x290] sm:$0xff] %v1380_v18  ;;  %1383 = vst [vmem:[%s11375_s23 + $0x298] sm:$0xff] %v1382_v19  ;;  %v1384_v20 = vld [vmem:[%s11370_s11 + $0x540] sm:$0xff]  ;;  %v1386_v21 = vld [vmem:[%s11370_s11 + $0x550] sm:$0xff] }
  0x47   : > { %v1388_v22 = vld [vmem:[%s11370_s11 + $0x560] sm:$0xff]  ;;  %1385 = vst [vmem:[%s11375_s23 + $0x2a0] sm:$0xff] %v1384_v20  ;;  %1387 = vst [vmem:[%s11375_s23 + $0x2a8] sm:$0xff] %v1386_v21  ;;  %v1390_v23 = vld [vmem:[%s11370_s11 + $0x570] sm:$0xff] }
  0x48   : > { %1389 = vst [vmem:[%s11375_s23 + $0x2b0] sm:$0xff] %v1388_v22  ;;  %v1392_v24 = vld [vmem:[%s11370_s11 + $0x580] sm:$0xff]  ;;  %v1394_v25 = vld [vmem:[%s11370_s11 + $0x590] sm:$0xff]  ;;  %1391 = vst [vmem:[%s11375_s23 + $0x2b8] sm:$0xff] %v1390_v23 }
  0x49   : > { %1393 = vst [vmem:[%s11375_s23 + $0x2c0] sm:$0xff] %v1392_v24  ;;  %1395 = vst [vmem:[%s11375_s23 + $0x2c8] sm:$0xff] %v1394_v25  ;;  %v1396_v26 = vld [vmem:[%s11370_s11 + $0x5a0] sm:$0xff]  ;;  %v1398_v27 = vld [vmem:[%s11370_s11 + $0x5b0] sm:$0xff] }
  0x4a   : > { %v1400_v28 = vld [vmem:[%s11370_s11 + $0x5c0] sm:$0xff]  ;;  %1397 = vst [vmem:[%s11375_s23 + $0x2d0] sm:$0xff] %v1396_v26  ;;  %1399 = vst [vmem:[%s11375_s23 + $0x2d8] sm:$0xff] %v1398_v27  ;;  %v1402_v29 = vld [vmem:[%s11370_s11 + $0x5d0] sm:$0xff] }
  0x4b   : > { %1401 = vst [vmem:[%s11375_s23 + $0x2e0] sm:$0xff] %v1400_v28  ;;  %v1404_v30 = vld [vmem:[%s11370_s11 + $0x5e0] sm:$0xff]  ;;  %v1406_v31 = vld [vmem:[%s11370_s11 + $0x5f0] sm:$0xff]  ;;  %1403 = vst [vmem:[%s11375_s23 + $0x2e8] sm:$0xff] %v1402_v29 }
  0x4c   : > { %1405 = vst [vmem:[%s11375_s23 + $0x2f0] sm:$0xff] %v1404_v30  ;;  %1407 = vst [vmem:[%s11375_s23 + $0x2f8] sm:$0xff] %v1406_v31  ;;  %v1408_v32 = vld [vmem:[%s11370_s11 + $0x600] sm:$0xff]  ;;  %v1410_v33 = vld [vmem:[%s11370_s11 + $0x610] sm:$0xff] }
  0x4d   : > { %v1412_v34 = vld [vmem:[%s11370_s11 + $0x620] sm:$0xff]  ;;  %1409 = vst [vmem:[%s11375_s23 + $0x300] sm:$0xff] %v1408_v32  ;;  %1411 = vst [vmem:[%s11375_s23 + $0x308] sm:$0xff] %v1410_v33  ;;  %v1414_v35 = vld [vmem:[%s11370_s11 + $0x630] sm:$0xff] }
  0x4e   : > { %1413 = vst [vmem:[%s11375_s23 + $0x310] sm:$0xff] %v1412_v34  ;;  %v1416_v36 = vld [vmem:[%s11370_s11 + $0x640] sm:$0xff]  ;;  %v1418_v37 = vld [vmem:[%s11370_s11 + $0x650] sm:$0xff]  ;;  %1415 = vst [vmem:[%s11375_s23 + $0x318] sm:$0xff] %v1414_v35 }
  0x4f   : > { %1417 = vst [vmem:[%s11375_s23 + $0x320] sm:$0xff] %v1416_v36  ;;  %1419 = vst [vmem:[%s11375_s23 + $0x328] sm:$0xff] %v1418_v37  ;;  %v1420_v38 = vld [vmem:[%s11370_s11 + $0x660] sm:$0xff]  ;;  %v1422_v39 = vld [vmem:[%s11370_s11 + $0x670] sm:$0xff] }
  0x50   : > { %v1424_v40 = vld [vmem:[%s11370_s11 + $0x680] sm:$0xff]  ;;  %1421 = vst [vmem:[%s11375_s23 + $0x330] sm:$0xff] %v1420_v38  ;;  %1423 = vst [vmem:[%s11375_s23 + $0x338] sm:$0xff] %v1422_v39  ;;  %v1426_v41 = vld [vmem:[%s11370_s11 + $0x690] sm:$0xff] }
  0x51   : > { %1425 = vst [vmem:[%s11375_s23 + $0x340] sm:$0xff] %v1424_v40  ;;  %v1428_v42 = vld [vmem:[%s11370_s11 + $0x6a0] sm:$0xff]  ;;  %v1430_v43 = vld [vmem:[%s11370_s11 + $0x6b0] sm:$0xff]  ;;  %1427 = vst [vmem:[%s11375_s23 + $0x348] sm:$0xff] %v1426_v41 }
  0x52   : > { %1429 = vst [vmem:[%s11375_s23 + $0x350] sm:$0xff] %v1428_v42  ;;  %1431 = vst [vmem:[%s11375_s23 + $0x358] sm:$0xff] %v1430_v43  ;;  %v1432_v44 = vld [vmem:[%s11370_s11 + $0x6c0] sm:$0xff]  ;;  %v1434_v45 = vld [vmem:[%s11370_s11 + $0x6d0] sm:$0xff] }
  0x53   : > { %v1436_v46 = vld [vmem:[%s11370_s11 + $0x6e0] sm:$0xff]  ;;  %1433 = vst [vmem:[%s11375_s23 + $0x360] sm:$0xff] %v1432_v44  ;;  %1435 = vst [vmem:[%s11375_s23 + $0x368] sm:$0xff] %v1434_v45  ;;  %v1438_v47 = vld [vmem:[%s11370_s11 + $0x6f0] sm:$0xff] }
  0x54   : > { %1437 = vst [vmem:[%s11375_s23 + $0x370] sm:$0xff] %v1436_v46  ;;  %v1440_v48 = vld [vmem:[%s11370_s11 + $0x700] sm:$0xff]  ;;  %v1442_v49 = vld [vmem:[%s11370_s11 + $0x710] sm:$0xff]  ;;  %1439 = vst [vmem:[%s11375_s23 + $0x378] sm:$0xff] %v1438_v47 }
  0x55   : > { %1441 = vst [vmem:[%s11375_s23 + $0x380] sm:$0xff] %v1440_v48  ;;  %1443 = vst [vmem:[%s11375_s23 + $0x388] sm:$0xff] %v1442_v49  ;;  %v1444_v50 = vld [vmem:[%s11370_s11 + $0x720] sm:$0xff]  ;;  %v1446_v51 = vld [vmem:[%s11370_s11 + $0x730] sm:$0xff] }
  0x56   : > { %v1448_v52 = vld [vmem:[%s11370_s11 + $0x740] sm:$0xff]  ;;  %1445 = vst [vmem:[%s11375_s23 + $0x390] sm:$0xff] %v1444_v50  ;;  %1447 = vst [vmem:[%s11375_s23 + $0x398] sm:$0xff] %v1446_v51  ;;  %v1450_v53 = vld [vmem:[%s11370_s11 + $0x750] sm:$0xff] }
  0x57   : > { %1449 = vst [vmem:[%s11375_s23 + $0x3a0] sm:$0xff] %v1448_v52  ;;  %v1452_v54 = vld [vmem:[%s11370_s11 + $0x760] sm:$0xff]  ;;  %v1454_v55 = vld [vmem:[%s11370_s11 + $0x770] sm:$0xff]  ;;  %1451 = vst [vmem:[%s11375_s23 + $0x3a8] sm:$0xff] %v1450_v53 }
  0x58   : > { %1453 = vst [vmem:[%s11375_s23 + $0x3b0] sm:$0xff] %v1452_v54  ;;  %1455 = vst [vmem:[%s11375_s23 + $0x3b8] sm:$0xff] %v1454_v55  ;;  %v1456_v56 = vld [vmem:[%s11370_s11 + $0x780] sm:$0xff]  ;;  %v1458_v57 = vld [vmem:[%s11370_s11 + $0x790] sm:$0xff] }
  0x59   : > { %v1460_v58 = vld [vmem:[%s11370_s11 + $0x7a0] sm:$0xff]  ;;  %1457 = vst [vmem:[%s11375_s23 + $0x3c0] sm:$0xff] %v1456_v56  ;;  %1459 = vst [vmem:[%s11375_s23 + $0x3c8] sm:$0xff] %v1458_v57  ;;  %v1462_v59 = vld [vmem:[%s11370_s11 + $0x7b0] sm:$0xff] }
  0x5a   : > { %1461 = vst [vmem:[%s11375_s23 + $0x3d0] sm:$0xff] %v1460_v58  ;;  %v1464_v60 = vld [vmem:[%s11370_s11 + $0x7c0] sm:$0xff]  ;;  %v1466_v61 = vld [vmem:[%s11370_s11 + $0x7d0] sm:$0xff]  ;;  %1463 = vst [vmem:[%s11375_s23 + $0x3d8] sm:$0xff] %v1462_v59 }
  0x5b   : > { %1465 = vst [vmem:[%s11375_s23 + $0x3e0] sm:$0xff] %v1464_v60  ;;  %1467 = vst [vmem:[%s11375_s23 + $0x3e8] sm:$0xff] %v1466_v61  ;;  %v1468_v62 = vld [vmem:[%s11370_s11 + $0x7e0] sm:$0xff]  ;;  %v1470_v63 = vld [vmem:[%s11370_s11 + $0x7f0] sm:$0xff] }
  0x5c   : > { %v1472_v0 = vld [vmem:[%s11370_s11 + $0x800] sm:$0xff]  ;;  %1469 = vst [vmem:[%s11375_s23 + $0x3f0] sm:$0xff] %v1468_v62  ;;  %1471 = vst [vmem:[%s11375_s23 + $0x3f8] sm:$0xff] %v1470_v63  ;;  %v1474_v1 = vld [vmem:[%s11370_s11 + $0x810] sm:$0xff] }
  0x5d   : > { %1473 = vst [vmem:[%s11375_s23 + $0x400] sm:$0xff] %v1472_v0  ;;  %v1476_v2 = vld [vmem:[%s11370_s11 + $0x820] sm:$0xff]  ;;  %v1478_v3 = vld [vmem:[%s11370_s11 + $0x830] sm:$0xff]  ;;  %1475 = vst [vmem:[%s11375_s23 + $0x408] sm:$0xff] %v1474_v1 }
  0x5e   : > { %1477 = vst [vmem:[%s11375_s23 + $0x410] sm:$0xff] %v1476_v2  ;;  %1479 = vst [vmem:[%s11375_s23 + $0x418] sm:$0xff] %v1478_v3  ;;  %v1480_v4 = vld [vmem:[%s11370_s11 + $0x840] sm:$0xff]  ;;  %v1482_v5 = vld [vmem:[%s11370_s11 + $0x850] sm:$0xff] }
  0x5f   : > { %v1484_v6 = vld [vmem:[%s11370_s11 + $0x860] sm:$0xff]  ;;  %1481 = vst [vmem:[%s11375_s23 + $0x420] sm:$0xff] %v1480_v4  ;;  %1483 = vst [vmem:[%s11375_s23 + $0x428] sm:$0xff] %v1482_v5  ;;  %v1486_v7 = vld [vmem:[%s11370_s11 + $0x870] sm:$0xff] }
  0x60   : > { %1485 = vst [vmem:[%s11375_s23 + $0x430] sm:$0xff] %v1484_v6  ;;  %v1488_v8 = vld [vmem:[%s11370_s11 + $0x880] sm:$0xff]  ;;  %v1490_v9 = vld [vmem:[%s11370_s11 + $0x890] sm:$0xff]  ;;  %1487 = vst [vmem:[%s11375_s23 + $0x438] sm:$0xff] %v1486_v7 }
  0x61   : > { %1489 = vst [vmem:[%s11375_s23 + $0x440] sm:$0xff] %v1488_v8  ;;  %1491 = vst [vmem:[%s11375_s23 + $0x448] sm:$0xff] %v1490_v9  ;;  %v1492_v10 = vld [vmem:[%s11370_s11 + $0x8a0] sm:$0xff]  ;;  %v1494_v11 = vld [vmem:[%s11370_s11 + $0x8b0] sm:$0xff] }
  0x62   : > { %v1496_v12 = vld [vmem:[%s11370_s11 + $0x8c0] sm:$0xff]  ;;  %1493 = vst [vmem:[%s11375_s23 + $0x450] sm:$0xff] %v1492_v10  ;;  %1495 = vst [vmem:[%s11375_s23 + $0x458] sm:$0xff] %v1494_v11  ;;  %v1498_v13 = vld [vmem:[%s11370_s11 + $0x8d0] sm:$0xff] }
  0x63   : > { %1497 = vst [vmem:[%s11375_s23 + $0x460] sm:$0xff] %v1496_v12  ;;  %v1500_v14 = vld [vmem:[%s11370_s11 + $0x8e0] sm:$0xff]  ;;  %v1502_v15 = vld [vmem:[%s11370_s11 + $0x8f0] sm:$0xff]  ;;  %1499 = vst [vmem:[%s11375_s23 + $0x468] sm:$0xff] %v1498_v13 }
  0x64   : > { %1501 = vst [vmem:[%s11375_s23 + $0x470] sm:$0xff] %v1500_v14  ;;  %1503 = vst [vmem:[%s11375_s23 + $0x478] sm:$0xff] %v1502_v15  ;;  %v1504_v16 = vld [vmem:[%s11370_s11 + $0x900] sm:$0xff]  ;;  %v1506_v17 = vld [vmem:[%s11370_s11 + $0x910] sm:$0xff] }
  0x65   : > { %v1508_v18 = vld [vmem:[%s11370_s11 + $0x920] sm:$0xff]  ;;  %1505 = vst [vmem:[%s11375_s23 + $0x480] sm:$0xff] %v1504_v16  ;;  %1507 = vst [vmem:[%s11375_s23 + $0x488] sm:$0xff] %v1506_v17  ;;  %v1510_v19 = vld [vmem:[%s11370_s11 + $0x930] sm:$0xff] }
  0x66   : > { %1509 = vst [vmem:[%s11375_s23 + $0x490] sm:$0xff] %v1508_v18  ;;  %v1512_v20 = vld [vmem:[%s11370_s11 + $0x940] sm:$0xff]  ;;  %v1514_v21 = vld [vmem:[%s11370_s11 + $0x950] sm:$0xff]  ;;  %1511 = vst [vmem:[%s11375_s23 + $0x498] sm:$0xff] %v1510_v19 }
  0x67   : > { %1513 = vst [vmem:[%s11375_s23 + $0x4a0] sm:$0xff] %v1512_v20  ;;  %1515 = vst [vmem:[%s11375_s23 + $0x4a8] sm:$0xff] %v1514_v21  ;;  %v1516_v22 = vld [vmem:[%s11370_s11 + $0x960] sm:$0xff]  ;;  %v1518_v23 = vld [vmem:[%s11370_s11 + $0x970] sm:$0xff] }
  0x68   : > { %v1520_v24 = vld [vmem:[%s11370_s11 + $0x980] sm:$0xff]  ;;  %1517 = vst [vmem:[%s11375_s23 + $0x4b0] sm:$0xff] %v1516_v22  ;;  %1519 = vst [vmem:[%s11375_s23 + $0x4b8] sm:$0xff] %v1518_v23  ;;  %v1522_v25 = vld [vmem:[%s11370_s11 + $0x990] sm:$0xff] }
  0x69   : > { %1521 = vst [vmem:[%s11375_s23 + $0x4c0] sm:$0xff] %v1520_v24  ;;  %v1524_v26 = vld [vmem:[%s11370_s11 + $0x9a0] sm:$0xff]  ;;  %v1526_v27 = vld [vmem:[%s11370_s11 + $0x9b0] sm:$0xff]  ;;  %1523 = vst [vmem:[%s11375_s23 + $0x4c8] sm:$0xff] %v1522_v25 }
  0x6a   : > { %1525 = vst [vmem:[%s11375_s23 + $0x4d0] sm:$0xff] %v1524_v26  ;;  %1527 = vst [vmem:[%s11375_s23 + $0x4d8] sm:$0xff] %v1526_v27  ;;  %v1528_v28 = vld [vmem:[%s11370_s11 + $0x9c0] sm:$0xff]  ;;  %v1530_v29 = vld [vmem:[%s11370_s11 + $0x9d0] sm:$0xff] }
  0x6b   : > { %v1532_v30 = vld [vmem:[%s11370_s11 + $0x9e0] sm:$0xff]  ;;  %1529 = vst [vmem:[%s11375_s23 + $0x4e0] sm:$0xff] %v1528_v28  ;;  %1531 = vst [vmem:[%s11375_s23 + $0x4e8] sm:$0xff] %v1530_v29  ;;  %v1534_v31 = vld [vmem:[%s11370_s11 + $0x9f0] sm:$0xff] }
  0x6c   : > { %1533 = vst [vmem:[%s11375_s23 + $0x4f0] sm:$0xff] %v1532_v30  ;;  %v1536_v32 = vld [vmem:[%s11370_s11 + $0xa00] sm:$0xff]  ;;  %v1538_v33 = vld [vmem:[%s11370_s11 + $0xa10] sm:$0xff]  ;;  %1535 = vst [vmem:[%s11375_s23 + $0x4f8] sm:$0xff] %v1534_v31 }
  0x6d   : > { %1537 = vst [vmem:[%s11375_s23 + $0x500] sm:$0xff] %v1536_v32  ;;  %1539 = vst [vmem:[%s11375_s23 + $0x508] sm:$0xff] %v1538_v33  ;;  %v1540_v34 = vld [vmem:[%s11370_s11 + $0xa20] sm:$0xff]  ;;  %v1542_v35 = vld [vmem:[%s11370_s11 + $0xa30] sm:$0xff] }
  0x6e   : > { %v1544_v36 = vld [vmem:[%s11370_s11 + $0xa40] sm:$0xff]  ;;  %1541 = vst [vmem:[%s11375_s23 + $0x510] sm:$0xff] %v1540_v34  ;;  %1543 = vst [vmem:[%s11375_s23 + $0x518] sm:$0xff] %v1542_v35  ;;  %v1546_v37 = vld [vmem:[%s11370_s11 + $0xa50] sm:$0xff] }
  0x6f   : > { %1545 = vst [vmem:[%s11375_s23 + $0x520] sm:$0xff] %v1544_v36  ;;  %v1548_v38 = vld [vmem:[%s11370_s11 + $0xa60] sm:$0xff]  ;;  %v1550_v39 = vld [vmem:[%s11370_s11 + $0xa70] sm:$0xff]  ;;  %1547 = vst [vmem:[%s11375_s23 + $0x528] sm:$0xff] %v1546_v37 }
  0x70   : > { %1549 = vst [vmem:[%s11375_s23 + $0x530] sm:$0xff] %v1548_v38  ;;  %1551 = vst [vmem:[%s11375_s23 + $0x538] sm:$0xff] %v1550_v39  ;;  %v1552_v40 = vld [vmem:[%s11370_s11 + $0xa80] sm:$0xff]  ;;  %v1554_v41 = vld [vmem:[%s11370_s11 + $0xa90] sm:$0xff] }
  0x71   : > { %v1556_v42 = vld [vmem:[%s11370_s11 + $0xaa0] sm:$0xff]  ;;  %1553 = vst [vmem:[%s11375_s23 + $0x540] sm:$0xff] %v1552_v40  ;;  %1555 = vst [vmem:[%s11375_s23 + $0x548] sm:$0xff] %v1554_v41  ;;  %v1558_v43 = vld [vmem:[%s11370_s11 + $0xab0] sm:$0xff] }
  0x72   : > { %1557 = vst [vmem:[%s11375_s23 + $0x550] sm:$0xff] %v1556_v42  ;;  %v1560_v44 = vld [vmem:[%s11370_s11 + $0xac0] sm:$0xff]  ;;  %v1562_v45 = vld [vmem:[%s11370_s11 + $0xad0] sm:$0xff]  ;;  %1559 = vst [vmem:[%s11375_s23 + $0x558] sm:$0xff] %v1558_v43 }
  0x73   : > { %1561 = vst [vmem:[%s11375_s23 + $0x560] sm:$0xff] %v1560_v44  ;;  %1563 = vst [vmem:[%s11375_s23 + $0x568] sm:$0xff] %v1562_v45  ;;  %v1564_v46 = vld [vmem:[%s11370_s11 + $0xae0] sm:$0xff]  ;;  %v1566_v47 = vld [vmem:[%s11370_s11 + $0xaf0] sm:$0xff] }
  0x74   : > { %v1568_v48 = vld [vmem:[%s11370_s11 + $0xb00] sm:$0xff]  ;;  %1565 = vst [vmem:[%s11375_s23 + $0x570] sm:$0xff] %v1564_v46  ;;  %1567 = vst [vmem:[%s11375_s23 + $0x578] sm:$0xff] %v1566_v47  ;;  %v1570_v49 = vld [vmem:[%s11370_s11 + $0xb10] sm:$0xff] }
  0x75   : > { %1569 = vst [vmem:[%s11375_s23 + $0x580] sm:$0xff] %v1568_v48  ;;  %v1572_v50 = vld [vmem:[%s11370_s11 + $0xb20] sm:$0xff]  ;;  %v1574_v51 = vld [vmem:[%s11370_s11 + $0xb30] sm:$0xff]  ;;  %1571 = vst [vmem:[%s11375_s23 + $0x588] sm:$0xff] %v1570_v49 }
  0x76   : > { %1573 = vst [vmem:[%s11375_s23 + $0x590] sm:$0xff] %v1572_v50  ;;  %1575 = vst [vmem:[%s11375_s23 + $0x598] sm:$0xff] %v1574_v51  ;;  %v1576_v52 = vld [vmem:[%s11370_s11 + $0xb40] sm:$0xff]  ;;  %v1578_v53 = vld [vmem:[%s11370_s11 + $0xb50] sm:$0xff] }
  0x77   : > { %v1580_v54 = vld [vmem:[%s11370_s11 + $0xb60] sm:$0xff]  ;;  %1577 = vst [vmem:[%s11375_s23 + $0x5a0] sm:$0xff] %v1576_v52  ;;  %1579 = vst [vmem:[%s11375_s23 + $0x5a8] sm:$0xff] %v1578_v53  ;;  %v1582_v55 = vld [vmem:[%s11370_s11 + $0xb70] sm:$0xff] }
  0x78   : > { %1581 = vst [vmem:[%s11375_s23 + $0x5b0] sm:$0xff] %v1580_v54  ;;  %v1584_v56 = vld [vmem:[%s11370_s11 + $0xb80] sm:$0xff]  ;;  %v1586_v57 = vld [vmem:[%s11370_s11 + $0xb90] sm:$0xff]  ;;  %1583 = vst [vmem:[%s11375_s23 + $0x5b8] sm:$0xff] %v1582_v55 }
  0x79   : > { %1585 = vst [vmem:[%s11375_s23 + $0x5c0] sm:$0xff] %v1584_v56  ;;  %1587 = vst [vmem:[%s11375_s23 + $0x5c8] sm:$0xff] %v1586_v57  ;;  %v1588_v58 = vld [vmem:[%s11370_s11 + $0xba0] sm:$0xff]  ;;  %v1590_v59 = vld [vmem:[%s11370_s11 + $0xbb0] sm:$0xff] }
  0x7a   : > { %v1592_v60 = vld [vmem:[%s11370_s11 + $0xbc0] sm:$0xff]  ;;  %1589 = vst [vmem:[%s11375_s23 + $0x5d0] sm:$0xff] %v1588_v58  ;;  %1591 = vst [vmem:[%s11375_s23 + $0x5d8] sm:$0xff] %v1590_v59  ;;  %v1594_v61 = vld [vmem:[%s11370_s11 + $0xbd0] sm:$0xff] }
  0x7b   : > { %1593 = vst [vmem:[%s11375_s23 + $0x5e0] sm:$0xff] %v1592_v60  ;;  %v1596_v62 = vld [vmem:[%s11370_s11 + $0xbe0] sm:$0xff]  ;;  %v1598_v63 = vld [vmem:[%s11370_s11 + $0xbf0] sm:$0xff]  ;;  %1595 = vst [vmem:[%s11375_s23 + $0x5e8] sm:$0xff] %v1594_v61 }
  0x7c   : > { %1597 = vst [vmem:[%s11375_s23 + $0x5f0] sm:$0xff] %v1596_v62  ;;  %1599 = vst [vmem:[%s11375_s23 + $0x5f8] sm:$0xff] %v1598_v63  ;;  %v1600_v0 = vld [vmem:[%s11370_s11 + $0xc00] sm:$0xff]  ;;  %v1602_v1 = vld [vmem:[%s11370_s11 + $0xc10] sm:$0xff] }
  0x7d   : > { %v1604_v2 = vld [vmem:[%s11370_s11 + $0xc20] sm:$0xff]  ;;  %1601 = vst [vmem:[%s11375_s23 + $0x600] sm:$0xff] %v1600_v0  ;;  %1603 = vst [vmem:[%s11375_s23 + $0x608] sm:$0xff] %v1602_v1  ;;  %v1606_v3 = vld [vmem:[%s11370_s11 + $0xc30] sm:$0xff] }
  0x7e   : > { %1605 = vst [vmem:[%s11375_s23 + $0x610] sm:$0xff] %v1604_v2  ;;  %v1608_v4 = vld [vmem:[%s11370_s11 + $0xc40] sm:$0xff]  ;;  %v1610_v5 = vld [vmem:[%s11370_s11 + $0xc50] sm:$0xff]  ;;  %1607 = vst [vmem:[%s11375_s23 + $0x618] sm:$0xff] %v1606_v3 }
  0x7f   : > { %1609 = vst [vmem:[%s11375_s23 + $0x620] sm:$0xff] %v1608_v4  ;;  %1611 = vst [vmem:[%s11375_s23 + $0x628] sm:$0xff] %v1610_v5  ;;  %v1612_v6 = vld [vmem:[%s11370_s11 + $0xc60] sm:$0xff]  ;;  %v1614_v7 = vld [vmem:[%s11370_s11 + $0xc70] sm:$0xff] }
  0x80   : > { %v1616_v8 = vld [vmem:[%s11370_s11 + $0xc80] sm:$0xff]  ;;  %1613 = vst [vmem:[%s11375_s23 + $0x630] sm:$0xff] %v1612_v6  ;;  %1615 = vst [vmem:[%s11375_s23 + $0x638] sm:$0xff] %v1614_v7  ;;  %v1618_v9 = vld [vmem:[%s11370_s11 + $0xc90] sm:$0xff] }
  0x81   : > { %1617 = vst [vmem:[%s11375_s23 + $0x640] sm:$0xff] %v1616_v8  ;;  %v1620_v10 = vld [vmem:[%s11370_s11 + $0xca0] sm:$0xff]  ;;  %v1622_v11 = vld [vmem:[%s11370_s11 + $0xcb0] sm:$0xff]  ;;  %1619 = vst [vmem:[%s11375_s23 + $0x648] sm:$0xff] %v1618_v9 }
  0x82   : > { %1621 = vst [vmem:[%s11375_s23 + $0x650] sm:$0xff] %v1620_v10  ;;  %1623 = vst [vmem:[%s11375_s23 + $0x658] sm:$0xff] %v1622_v11  ;;  %v1624_v12 = vld [vmem:[%s11370_s11 + $0xcc0] sm:$0xff]  ;;  %v1626_v13 = vld [vmem:[%s11370_s11 + $0xcd0] sm:$0xff] }
  0x83   : > { %v1628_v14 = vld [vmem:[%s11370_s11 + $0xce0] sm:$0xff]  ;;  %1625 = vst [vmem:[%s11375_s23 + $0x660] sm:$0xff] %v1624_v12  ;;  %1627 = vst [vmem:[%s11375_s23 + $0x668] sm:$0xff] %v1626_v13  ;;  %v1630_v15 = vld [vmem:[%s11370_s11 + $0xcf0] sm:$0xff] }
  0x84   : > { %1629 = vst [vmem:[%s11375_s23 + $0x670] sm:$0xff] %v1628_v14  ;;  %v1632_v16 = vld [vmem:[%s11370_s11 + $0xd00] sm:$0xff]  ;;  %v1634_v17 = vld [vmem:[%s11370_s11 + $0xd10] sm:$0xff]  ;;  %1631 = vst [vmem:[%s11375_s23 + $0x678] sm:$0xff] %v1630_v15 }
  0x85   : > { %1633 = vst [vmem:[%s11375_s23 + $0x680] sm:$0xff] %v1632_v16  ;;  %1635 = vst [vmem:[%s11375_s23 + $0x688] sm:$0xff] %v1634_v17  ;;  %v1636_v18 = vld [vmem:[%s11370_s11 + $0xd20] sm:$0xff]  ;;  %v1638_v19 = vld [vmem:[%s11370_s11 + $0xd30] sm:$0xff] }
  0x86   : > { %v1640_v20 = vld [vmem:[%s11370_s11 + $0xd40] sm:$0xff]  ;;  %1637 = vst [vmem:[%s11375_s23 + $0x690] sm:$0xff] %v1636_v18  ;;  %1639 = vst [vmem:[%s11375_s23 + $0x698] sm:$0xff] %v1638_v19  ;;  %v1642_v21 = vld [vmem:[%s11370_s11 + $0xd50] sm:$0xff] }
  0x87   : > { %1641 = vst [vmem:[%s11375_s23 + $0x6a0] sm:$0xff] %v1640_v20  ;;  %v1644_v22 = vld [vmem:[%s11370_s11 + $0xd60] sm:$0xff]  ;;  %v1646_v23 = vld [vmem:[%s11370_s11 + $0xd70] sm:$0xff]  ;;  %1643 = vst [vmem:[%s11375_s23 + $0x6a8] sm:$0xff] %v1642_v21 }
  0x88   : > { %1645 = vst [vmem:[%s11375_s23 + $0x6b0] sm:$0xff] %v1644_v22  ;;  %1647 = vst [vmem:[%s11375_s23 + $0x6b8] sm:$0xff] %v1646_v23  ;;  %v1648_v24 = vld [vmem:[%s11370_s11 + $0xd80] sm:$0xff]  ;;  %v1650_v25 = vld [vmem:[%s11370_s11 + $0xd90] sm:$0xff] }
  0x89   : > { %v1652_v26 = vld [vmem:[%s11370_s11 + $0xda0] sm:$0xff]  ;;  %1649 = vst [vmem:[%s11375_s23 + $0x6c0] sm:$0xff] %v1648_v24  ;;  %1651 = vst [vmem:[%s11375_s23 + $0x6c8] sm:$0xff] %v1650_v25  ;;  %v1654_v27 = vld [vmem:[%s11370_s11 + $0xdb0] sm:$0xff] }
  0x8a   : > { %1653 = vst [vmem:[%s11375_s23 + $0x6d0] sm:$0xff] %v1652_v26  ;;  %v1656_v28 = vld [vmem:[%s11370_s11 + $0xdc0] sm:$0xff]  ;;  %v1658_v29 = vld [vmem:[%s11370_s11 + $0xdd0] sm:$0xff]  ;;  %1655 = vst [vmem:[%s11375_s23 + $0x6d8] sm:$0xff] %v1654_v27 }
  0x8b   : > { %1657 = vst [vmem:[%s11375_s23 + $0x6e0] sm:$0xff] %v1656_v28  ;;  %1659 = vst [vmem:[%s11375_s23 + $0x6e8] sm:$0xff] %v1658_v29  ;;  %v1660_v30 = vld [vmem:[%s11370_s11 + $0xde0] sm:$0xff]  ;;  %v1662_v31 = vld [vmem:[%s11370_s11 + $0xdf0] sm:$0xff] }
  0x8c   : > { %v1664_v32 = vld [vmem:[%s11370_s11 + $0xe00] sm:$0xff]  ;;  %1661 = vst [vmem:[%s11375_s23 + $0x6f0] sm:$0xff] %v1660_v30  ;;  %1663 = vst [vmem:[%s11375_s23 + $0x6f8] sm:$0xff] %v1662_v31  ;;  %v1666_v33 = vld [vmem:[%s11370_s11 + $0xe10] sm:$0xff] }
  0x8d   : > { %1665 = vst [vmem:[%s11375_s23 + $0x700] sm:$0xff] %v1664_v32  ;;  %v1668_v34 = vld [vmem:[%s11370_s11 + $0xe20] sm:$0xff]  ;;  %v1670_v35 = vld [vmem:[%s11370_s11 + $0xe30] sm:$0xff]  ;;  %1667 = vst [vmem:[%s11375_s23 + $0x708] sm:$0xff] %v1666_v33 }
  0x8e   : > { %1669 = vst [vmem:[%s11375_s23 + $0x710] sm:$0xff] %v1668_v34  ;;  %1671 = vst [vmem:[%s11375_s23 + $0x718] sm:$0xff] %v1670_v35  ;;  %v1672_v36 = vld [vmem:[%s11370_s11 + $0xe40] sm:$0xff]  ;;  %v1674_v37 = vld [vmem:[%s11370_s11 + $0xe50] sm:$0xff] }
  0x8f   : > { %v1676_v38 = vld [vmem:[%s11370_s11 + $0xe60] sm:$0xff]  ;;  %1673 = vst [vmem:[%s11375_s23 + $0x720] sm:$0xff] %v1672_v36  ;;  %1675 = vst [vmem:[%s11375_s23 + $0x728] sm:$0xff] %v1674_v37  ;;  %v1678_v39 = vld [vmem:[%s11370_s11 + $0xe70] sm:$0xff] }
  0x90   : > { %1677 = vst [vmem:[%s11375_s23 + $0x730] sm:$0xff] %v1676_v38  ;;  %v1680_v40 = vld [vmem:[%s11370_s11 + $0xe80] sm:$0xff]  ;;  %v1682_v41 = vld [vmem:[%s11370_s11 + $0xe90] sm:$0xff]  ;;  %1679 = vst [vmem:[%s11375_s23 + $0x738] sm:$0xff] %v1678_v39 }
  0x91   : > { %1681 = vst [vmem:[%s11375_s23 + $0x740] sm:$0xff] %v1680_v40  ;;  %1683 = vst [vmem:[%s11375_s23 + $0x748] sm:$0xff] %v1682_v41  ;;  %v1684_v42 = vld [vmem:[%s11370_s11 + $0xea0] sm:$0xff]  ;;  %v1686_v43 = vld [vmem:[%s11370_s11 + $0xeb0] sm:$0xff] }
  0x92   : > { %v1688_v44 = vld [vmem:[%s11370_s11 + $0xec0] sm:$0xff]  ;;  %1685 = vst [vmem:[%s11375_s23 + $0x750] sm:$0xff] %v1684_v42  ;;  %1687 = vst [vmem:[%s11375_s23 + $0x758] sm:$0xff] %v1686_v43  ;;  %v1690_v45 = vld [vmem:[%s11370_s11 + $0xed0] sm:$0xff] }
  0x93   : > { %1689 = vst [vmem:[%s11375_s23 + $0x760] sm:$0xff] %v1688_v44  ;;  %v1692_v46 = vld [vmem:[%s11370_s11 + $0xee0] sm:$0xff]  ;;  %v1694_v47 = vld [vmem:[%s11370_s11 + $0xef0] sm:$0xff]  ;;  %1691 = vst [vmem:[%s11375_s23 + $0x768] sm:$0xff] %v1690_v45 }
  0x94   : > { %1693 = vst [vmem:[%s11375_s23 + $0x770] sm:$0xff] %v1692_v46  ;;  %1695 = vst [vmem:[%s11375_s23 + $0x778] sm:$0xff] %v1694_v47  ;;  %v1696_v48 = vld [vmem:[%s11370_s11 + $0xf00] sm:$0xff]  ;;  %v1698_v49 = vld [vmem:[%s11370_s11 + $0xf10] sm:$0xff] }
  0x95   : > { %v1700_v50 = vld [vmem:[%s11370_s11 + $0xf20] sm:$0xff]  ;;  %1697 = vst [vmem:[%s11375_s23 + $0x780] sm:$0xff] %v1696_v48  ;;  %1699 = vst [vmem:[%s11375_s23 + $0x788] sm:$0xff] %v1698_v49  ;;  %v1702_v51 = vld [vmem:[%s11370_s11 + $0xf30] sm:$0xff] }
  0x96   : > { %1701 = vst [vmem:[%s11375_s23 + $0x790] sm:$0xff] %v1700_v50  ;;  %v1704_v52 = vld [vmem:[%s11370_s11 + $0xf40] sm:$0xff]  ;;  %v1706_v53 = vld [vmem:[%s11370_s11 + $0xf50] sm:$0xff]  ;;  %1703 = vst [vmem:[%s11375_s23 + $0x798] sm:$0xff] %v1702_v51 }
  0x97   : > { %1705 = vst [vmem:[%s11375_s23 + $0x7a0] sm:$0xff] %v1704_v52  ;;  %1707 = vst [vmem:[%s11375_s23 + $0x7a8] sm:$0xff] %v1706_v53  ;;  %v1708_v54 = vld [vmem:[%s11370_s11 + $0xf60] sm:$0xff]  ;;  %v1710_v55 = vld [vmem:[%s11370_s11 + $0xf70] sm:$0xff] }
  0x98   : > { %v1712_v56 = vld [vmem:[%s11370_s11 + $0xf80] sm:$0xff]  ;;  %1709 = vst [vmem:[%s11375_s23 + $0x7b0] sm:$0xff] %v1708_v54  ;;  %1711 = vst [vmem:[%s11375_s23 + $0x7b8] sm:$0xff] %v1710_v55  ;;  %v1714_v57 = vld [vmem:[%s11370_s11 + $0xf90] sm:$0xff] }
  0x99   : > { %1713 = vst [vmem:[%s11375_s23 + $0x7c0] sm:$0xff] %v1712_v56  ;;  %v1716_v58 = vld [vmem:[%s11370_s11 + $0xfa0] sm:$0xff]  ;;  %v1718_v59 = vld [vmem:[%s11370_s11 + $0xfb0] sm:$0xff]  ;;  %1715 = vst [vmem:[%s11375_s23 + $0x7c8] sm:$0xff] %v1714_v57 }
  0x9a   : > { %1717 = vst [vmem:[%s11375_s23 + $0x7d0] sm:$0xff] %v1716_v58  ;;  %1719 = vst [vmem:[%s11375_s23 + $0x7d8] sm:$0xff] %v1718_v59  ;;  %v1720_v60 = vld [vmem:[%s11370_s11 + $0xfc0] sm:$0xff]  ;;  %v1722_v61 = vld [vmem:[%s11370_s11 + $0xfd0] sm:$0xff] }
  0x9b   : > { %v1724_v62 = vld [vmem:[%s11370_s11 + $0xfe0] sm:$0xff]  ;;  %1721 = vst [vmem:[%s11375_s23 + $0x7e0] sm:$0xff] %v1720_v60  ;;  %1723 = vst [vmem:[%s11375_s23 + $0x7e8] sm:$0xff] %v1722_v61  ;;  %v1726_v63 = vld [vmem:[%s11370_s11 + $0xff0] sm:$0xff] }
  0x9c   : > { %1725 = vst [vmem:[%s11375_s23 + $0x7f0] sm:$0xff] %v1724_v62  ;;  %v1728_v0 = vld [vmem:[%s11370_s11 + $0x1000] sm:$0xff]  ;;  %v1730_v1 = vld [vmem:[%s11370_s11 + $0x1010] sm:$0xff]  ;;  %1727 = vst [vmem:[%s11375_s23 + $0x7f8] sm:$0xff] %v1726_v63 }
  0x9d   : > { %1729 = vst [vmem:[%s11375_s23 + $0x800] sm:$0xff] %v1728_v0  ;;  %1731 = vst [vmem:[%s11375_s23 + $0x808] sm:$0xff] %v1730_v1  ;;  %v1732_v2 = vld [vmem:[%s11370_s11 + $0x1020] sm:$0xff]  ;;  %v1734_v3 = vld [vmem:[%s11370_s11 + $0x1030] sm:$0xff] }
  0x9e   : > { %v1736_v4 = vld [vmem:[%s11370_s11 + $0x1040] sm:$0xff]  ;;  %1733 = vst [vmem:[%s11375_s23 + $0x810] sm:$0xff] %v1732_v2  ;;  %1735 = vst [vmem:[%s11375_s23 + $0x818] sm:$0xff] %v1734_v3  ;;  %v1738_v5 = vld [vmem:[%s11370_s11 + $0x1050] sm:$0xff] }
  0x9f   : > { %1737 = vst [vmem:[%s11375_s23 + $0x820] sm:$0xff] %v1736_v4  ;;  %v1740_v6 = vld [vmem:[%s11370_s11 + $0x1060] sm:$0xff]  ;;  %v1742_v7 = vld [vmem:[%s11370_s11 + $0x1070] sm:$0xff]  ;;  %1739 = vst [vmem:[%s11375_s23 + $0x828] sm:$0xff] %v1738_v5 }
  0xa0   : > { %1741 = vst [vmem:[%s11375_s23 + $0x830] sm:$0xff] %v1740_v6  ;;  %1743 = vst [vmem:[%s11375_s23 + $0x838] sm:$0xff] %v1742_v7  ;;  %v1744_v8 = vld [vmem:[%s11370_s11 + $0x1080] sm:$0xff]  ;;  %v1746_v9 = vld [vmem:[%s11370_s11 + $0x1090] sm:$0xff] }
  0xa1   : > { %v1748_v10 = vld [vmem:[%s11370_s11 + $0x10a0] sm:$0xff]  ;;  %1745 = vst [vmem:[%s11375_s23 + $0x840] sm:$0xff] %v1744_v8  ;;  %1747 = vst [vmem:[%s11375_s23 + $0x848] sm:$0xff] %v1746_v9  ;;  %v1750_v11 = vld [vmem:[%s11370_s11 + $0x10b0] sm:$0xff] }
  0xa2   : > { %1749 = vst [vmem:[%s11375_s23 + $0x850] sm:$0xff] %v1748_v10  ;;  %v1752_v12 = vld [vmem:[%s11370_s11 + $0x10c0] sm:$0xff]  ;;  %v1754_v13 = vld [vmem:[%s11370_s11 + $0x10d0] sm:$0xff]  ;;  %1751 = vst [vmem:[%s11375_s23 + $0x858] sm:$0xff] %v1750_v11 }
  0xa3   : > { %1753 = vst [vmem:[%s11375_s23 + $0x860] sm:$0xff] %v1752_v12  ;;  %1755 = vst [vmem:[%s11375_s23 + $0x868] sm:$0xff] %v1754_v13  ;;  %v1756_v14 = vld [vmem:[%s11370_s11 + $0x10e0] sm:$0xff]  ;;  %v1758_v15 = vld [vmem:[%s11370_s11 + $0x10f0] sm:$0xff] }
  0xa4   : > { %v1760_v16 = vld [vmem:[%s11370_s11 + $0x1100] sm:$0xff]  ;;  %1757 = vst [vmem:[%s11375_s23 + $0x870] sm:$0xff] %v1756_v14  ;;  %1759 = vst [vmem:[%s11375_s23 + $0x878] sm:$0xff] %v1758_v15  ;;  %v1762_v17 = vld [vmem:[%s11370_s11 + $0x1110] sm:$0xff] }
  0xa5   : > { %1761 = vst [vmem:[%s11375_s23 + $0x880] sm:$0xff] %v1760_v16  ;;  %v1764_v18 = vld [vmem:[%s11370_s11 + $0x1120] sm:$0xff]  ;;  %v1766_v19 = vld [vmem:[%s11370_s11 + $0x1130] sm:$0xff]  ;;  %1763 = vst [vmem:[%s11375_s23 + $0x888] sm:$0xff] %v1762_v17 }
  0xa6   : > { %1765 = vst [vmem:[%s11375_s23 + $0x890] sm:$0xff] %v1764_v18  ;;  %1767 = vst [vmem:[%s11375_s23 + $0x898] sm:$0xff] %v1766_v19  ;;  %v1768_v20 = vld [vmem:[%s11370_s11 + $0x1140] sm:$0xff]  ;;  %v1770_v21 = vld [vmem:[%s11370_s11 + $0x1150] sm:$0xff] }
  0xa7   : > { %v1772_v22 = vld [vmem:[%s11370_s11 + $0x1160] sm:$0xff]  ;;  %1769 = vst [vmem:[%s11375_s23 + $0x8a0] sm:$0xff] %v1768_v20  ;;  %1771 = vst [vmem:[%s11375_s23 + $0x8a8] sm:$0xff] %v1770_v21  ;;  %v1774_v23 = vld [vmem:[%s11370_s11 + $0x1170] sm:$0xff] }
  0xa8   : > { %1773 = vst [vmem:[%s11375_s23 + $0x8b0] sm:$0xff] %v1772_v22  ;;  %v1776_v24 = vld [vmem:[%s11370_s11 + $0x1180] sm:$0xff]  ;;  %v1778_v25 = vld [vmem:[%s11370_s11 + $0x1190] sm:$0xff]  ;;  %1775 = vst [vmem:[%s11375_s23 + $0x8b8] sm:$0xff] %v1774_v23 }
  0xa9   : > { %1777 = vst [vmem:[%s11375_s23 + $0x8c0] sm:$0xff] %v1776_v24  ;;  %1779 = vst [vmem:[%s11375_s23 + $0x8c8] sm:$0xff] %v1778_v25  ;;  %v1780_v26 = vld [vmem:[%s11370_s11 + $0x11a0] sm:$0xff]  ;;  %v1782_v27 = vld [vmem:[%s11370_s11 + $0x11b0] sm:$0xff] }
  0xaa   : > { %v1784_v28 = vld [vmem:[%s11370_s11 + $0x11c0] sm:$0xff]  ;;  %1781 = vst [vmem:[%s11375_s23 + $0x8d0] sm:$0xff] %v1780_v26  ;;  %1783 = vst [vmem:[%s11375_s23 + $0x8d8] sm:$0xff] %v1782_v27  ;;  %v1786_v29 = vld [vmem:[%s11370_s11 + $0x11d0] sm:$0xff] }
  0xab   : > { %1785 = vst [vmem:[%s11375_s23 + $0x8e0] sm:$0xff] %v1784_v28  ;;  %v1788_v30 = vld [vmem:[%s11370_s11 + $0x11e0] sm:$0xff]  ;;  %v1790_v31 = vld [vmem:[%s11370_s11 + $0x11f0] sm:$0xff]  ;;  %1787 = vst [vmem:[%s11375_s23 + $0x8e8] sm:$0xff] %v1786_v29 }
  0xac   : > { %1789 = vst [vmem:[%s11375_s23 + $0x8f0] sm:$0xff] %v1788_v30  ;;  %1791 = vst [vmem:[%s11375_s23 + $0x8f8] sm:$0xff] %v1790_v31  ;;  %v1792_v32 = vld [vmem:[%s11370_s11 + $0x1200] sm:$0xff]  ;;  %v1794_v33 = vld [vmem:[%s11370_s11 + $0x1210] sm:$0xff] }
  0xad   : > { %v1796_v34 = vld [vmem:[%s11370_s11 + $0x1220] sm:$0xff]  ;;  %1793 = vst [vmem:[%s11375_s23 + $0x900] sm:$0xff] %v1792_v32  ;;  %1795 = vst [vmem:[%s11375_s23 + $0x908] sm:$0xff] %v1794_v33  ;;  %v1798_v35 = vld [vmem:[%s11370_s11 + $0x1230] sm:$0xff] }
  0xae   : > { %1797 = vst [vmem:[%s11375_s23 + $0x910] sm:$0xff] %v1796_v34  ;;  %v1800_v36 = vld [vmem:[%s11370_s11 + $0x1240] sm:$0xff]  ;;  %v1802_v37 = vld [vmem:[%s11370_s11 + $0x1250] sm:$0xff]  ;;  %1799 = vst [vmem:[%s11375_s23 + $0x918] sm:$0xff] %v1798_v35 }
  0xaf   : > { %1801 = vst [vmem:[%s11375_s23 + $0x920] sm:$0xff] %v1800_v36  ;;  %1803 = vst [vmem:[%s11375_s23 + $0x928] sm:$0xff] %v1802_v37  ;;  %v1804_v38 = vld [vmem:[%s11370_s11 + $0x1260] sm:$0xff]  ;;  %v1806_v39 = vld [vmem:[%s11370_s11 + $0x1270] sm:$0xff] }
  0xb0   : > { %v1808_v40 = vld [vmem:[%s11370_s11 + $0x1280] sm:$0xff]  ;;  %1805 = vst [vmem:[%s11375_s23 + $0x930] sm:$0xff] %v1804_v38  ;;  %1807 = vst [vmem:[%s11375_s23 + $0x938] sm:$0xff] %v1806_v39  ;;  %v1810_v41 = vld [vmem:[%s11370_s11 + $0x1290] sm:$0xff] }
  0xb1   : > { %1809 = vst [vmem:[%s11375_s23 + $0x940] sm:$0xff] %v1808_v40  ;;  %v1812_v42 = vld [vmem:[%s11370_s11 + $0x12a0] sm:$0xff]  ;;  %v1814_v43 = vld [vmem:[%s11370_s11 + $0x12b0] sm:$0xff]  ;;  %1811 = vst [vmem:[%s11375_s23 + $0x948] sm:$0xff] %v1810_v41 }
  0xb2   : > { %1813 = vst [vmem:[%s11375_s23 + $0x950] sm:$0xff] %v1812_v42  ;;  %1815 = vst [vmem:[%s11375_s23 + $0x958] sm:$0xff] %v1814_v43  ;;  %v1816_v44 = vld [vmem:[%s11370_s11 + $0x12c0] sm:$0xff]  ;;  %v1818_v45 = vld [vmem:[%s11370_s11 + $0x12d0] sm:$0xff] }
  0xb3   : > { %v1820_v46 = vld [vmem:[%s11370_s11 + $0x12e0] sm:$0xff]  ;;  %1817 = vst [vmem:[%s11375_s23 + $0x960] sm:$0xff] %v1816_v44  ;;  %1819 = vst [vmem:[%s11375_s23 + $0x968] sm:$0xff] %v1818_v45  ;;  %v1822_v47 = vld [vmem:[%s11370_s11 + $0x12f0] sm:$0xff] }
  0xb4   : > { %1821 = vst [vmem:[%s11375_s23 + $0x970] sm:$0xff] %v1820_v46  ;;  %v1824_v48 = vld [vmem:[%s11370_s11 + $0x1300] sm:$0xff]  ;;  %v1826_v49 = vld [vmem:[%s11370_s11 + $0x1310] sm:$0xff]  ;;  %1823 = vst [vmem:[%s11375_s23 + $0x978] sm:$0xff] %v1822_v47 }
  0xb5   : > { %1825 = vst [vmem:[%s11375_s23 + $0x980] sm:$0xff] %v1824_v48  ;;  %1827 = vst [vmem:[%s11375_s23 + $0x988] sm:$0xff] %v1826_v49  ;;  %v1828_v50 = vld [vmem:[%s11370_s11 + $0x1320] sm:$0xff]  ;;  %v1830_v51 = vld [vmem:[%s11370_s11 + $0x1330] sm:$0xff] }
  0xb6   : > { %v1832_v52 = vld [vmem:[%s11370_s11 + $0x1340] sm:$0xff]  ;;  %1829 = vst [vmem:[%s11375_s23 + $0x990] sm:$0xff] %v1828_v50  ;;  %1831 = vst [vmem:[%s11375_s23 + $0x998] sm:$0xff] %v1830_v51  ;;  %v1834_v53 = vld [vmem:[%s11370_s11 + $0x1350] sm:$0xff] }
  0xb7   : > { %1833 = vst [vmem:[%s11375_s23 + $0x9a0] sm:$0xff] %v1832_v52  ;;  %v1836_v54 = vld [vmem:[%s11370_s11 + $0x1360] sm:$0xff]  ;;  %v1838_v55 = vld [vmem:[%s11370_s11 + $0x1370] sm:$0xff]  ;;  %1835 = vst [vmem:[%s11375_s23 + $0x9a8] sm:$0xff] %v1834_v53 }
  0xb8   : > { %1837 = vst [vmem:[%s11375_s23 + $0x9b0] sm:$0xff] %v1836_v54  ;;  %1839 = vst [vmem:[%s11375_s23 + $0x9b8] sm:$0xff] %v1838_v55  ;;  %v1840_v56 = vld [vmem:[%s11370_s11 + $0x1380] sm:$0xff]  ;;  %v1842_v57 = vld [vmem:[%s11370_s11 + $0x1390] sm:$0xff] }
  0xb9   : > { %v1844_v58 = vld [vmem:[%s11370_s11 + $0x13a0] sm:$0xff]  ;;  %1841 = vst [vmem:[%s11375_s23 + $0x9c0] sm:$0xff] %v1840_v56  ;;  %1843 = vst [vmem:[%s11375_s23 + $0x9c8] sm:$0xff] %v1842_v57  ;;  %v1846_v59 = vld [vmem:[%s11370_s11 + $0x13b0] sm:$0xff] }
  0xba   : > { %1845 = vst [vmem:[%s11375_s23 + $0x9d0] sm:$0xff] %v1844_v58  ;;  %v1848_v60 = vld [vmem:[%s11370_s11 + $0x13c0] sm:$0xff]  ;;  %v1850_v61 = vld [vmem:[%s11370_s11 + $0x13d0] sm:$0xff]  ;;  %1847 = vst [vmem:[%s11375_s23 + $0x9d8] sm:$0xff] %v1846_v59 }
  0xbb   : > { %1849 = vst [vmem:[%s11375_s23 + $0x9e0] sm:$0xff] %v1848_v60  ;;  %1851 = vst [vmem:[%s11375_s23 + $0x9e8] sm:$0xff] %v1850_v61  ;;  %v1852_v62 = vld [vmem:[%s11370_s11 + $0x13e0] sm:$0xff]  ;;  %v1854_v63 = vld [vmem:[%s11370_s11 + $0x13f0] sm:$0xff] }
  0xbc   : > { %v1856_v0 = vld [vmem:[%s11370_s11 + $0x1400] sm:$0xff]  ;;  %1853 = vst [vmem:[%s11375_s23 + $0x9f0] sm:$0xff] %v1852_v62  ;;  %1855 = vst [vmem:[%s11375_s23 + $0x9f8] sm:$0xff] %v1854_v63  ;;  %v1858_v1 = vld [vmem:[%s11370_s11 + $0x1410] sm:$0xff] }
  0xbd   : > { %1857 = vst [vmem:[%s11375_s23 + $0xa00] sm:$0xff] %v1856_v0  ;;  %v1860_v2 = vld [vmem:[%s11370_s11 + $0x1420] sm:$0xff]  ;;  %v1862_v3 = vld [vmem:[%s11370_s11 + $0x1430] sm:$0xff]  ;;  %1859 = vst [vmem:[%s11375_s23 + $0xa08] sm:$0xff] %v1858_v1 }
  0xbe   : > { %1861 = vst [vmem:[%s11375_s23 + $0xa10] sm:$0xff] %v1860_v2  ;;  %1863 = vst [vmem:[%s11375_s23 + $0xa18] sm:$0xff] %v1862_v3  ;;  %v1864_v4 = vld [vmem:[%s11370_s11 + $0x1440] sm:$0xff]  ;;  %v1866_v5 = vld [vmem:[%s11370_s11 + $0x1450] sm:$0xff] }
  0xbf   : > { %v1868_v6 = vld [vmem:[%s11370_s11 + $0x1460] sm:$0xff]  ;;  %1865 = vst [vmem:[%s11375_s23 + $0xa20] sm:$0xff] %v1864_v4  ;;  %1867 = vst [vmem:[%s11375_s23 + $0xa28] sm:$0xff] %v1866_v5  ;;  %v1870_v7 = vld [vmem:[%s11370_s11 + $0x1470] sm:$0xff] }
  0xc0   : > { %1869 = vst [vmem:[%s11375_s23 + $0xa30] sm:$0xff] %v1868_v6  ;;  %v1872_v8 = vld [vmem:[%s11370_s11 + $0x1480] sm:$0xff]  ;;  %v1874_v9 = vld [vmem:[%s11370_s11 + $0x1490] sm:$0xff]  ;;  %1871 = vst [vmem:[%s11375_s23 + $0xa38] sm:$0xff] %v1870_v7 }
  0xc1   : > { %1873 = vst [vmem:[%s11375_s23 + $0xa40] sm:$0xff] %v1872_v8  ;;  %1875 = vst [vmem:[%s11375_s23 + $0xa48] sm:$0xff] %v1874_v9  ;;  %v1876_v10 = vld [vmem:[%s11370_s11 + $0x14a0] sm:$0xff]  ;;  %v1878_v11 = vld [vmem:[%s11370_s11 + $0x14b0] sm:$0xff] }
  0xc2   : > { %v1880_v12 = vld [vmem:[%s11370_s11 + $0x14c0] sm:$0xff]  ;;  %1877 = vst [vmem:[%s11375_s23 + $0xa50] sm:$0xff] %v1876_v10  ;;  %1879 = vst [vmem:[%s11375_s23 + $0xa58] sm:$0xff] %v1878_v11  ;;  %v1882_v13 = vld [vmem:[%s11370_s11 + $0x14d0] sm:$0xff] }
  0xc3   : > { %1881 = vst [vmem:[%s11375_s23 + $0xa60] sm:$0xff] %v1880_v12  ;;  %v1884_v14 = vld [vmem:[%s11370_s11 + $0x14e0] sm:$0xff]  ;;  %v1886_v15 = vld [vmem:[%s11370_s11 + $0x14f0] sm:$0xff]  ;;  %1883 = vst [vmem:[%s11375_s23 + $0xa68] sm:$0xff] %v1882_v13 }
  0xc4   : > { %1885 = vst [vmem:[%s11375_s23 + $0xa70] sm:$0xff] %v1884_v14  ;;  %1887 = vst [vmem:[%s11375_s23 + $0xa78] sm:$0xff] %v1886_v15  ;;  %v1888_v16 = vld [vmem:[%s11370_s11 + $0x1500] sm:$0xff]  ;;  %v1890_v17 = vld [vmem:[%s11370_s11 + $0x1510] sm:$0xff] }
  0xc5   : > { %v1892_v18 = vld [vmem:[%s11370_s11 + $0x1520] sm:$0xff]  ;;  %1889 = vst [vmem:[%s11375_s23 + $0xa80] sm:$0xff] %v1888_v16  ;;  %1891 = vst [vmem:[%s11375_s23 + $0xa88] sm:$0xff] %v1890_v17  ;;  %v1894_v19 = vld [vmem:[%s11370_s11 + $0x1530] sm:$0xff] }
  0xc6   : > { %1893 = vst [vmem:[%s11375_s23 + $0xa90] sm:$0xff] %v1892_v18  ;;  %v1896_v20 = vld [vmem:[%s11370_s11 + $0x1540] sm:$0xff]  ;;  %v1898_v21 = vld [vmem:[%s11370_s11 + $0x1550] sm:$0xff]  ;;  %1895 = vst [vmem:[%s11375_s23 + $0xa98] sm:$0xff] %v1894_v19 }
  0xc7   : > { %1897 = vst [vmem:[%s11375_s23 + $0xaa0] sm:$0xff] %v1896_v20  ;;  %1899 = vst [vmem:[%s11375_s23 + $0xaa8] sm:$0xff] %v1898_v21  ;;  %v1900_v22 = vld [vmem:[%s11370_s11 + $0x1560] sm:$0xff]  ;;  %v1902_v23 = vld [vmem:[%s11370_s11 + $0x1570] sm:$0xff] }
  0xc8   : > { %v1904_v24 = vld [vmem:[%s11370_s11 + $0x1580] sm:$0xff]  ;;  %1901 = vst [vmem:[%s11375_s23 + $0xab0] sm:$0xff] %v1900_v22  ;;  %1903 = vst [vmem:[%s11375_s23 + $0xab8] sm:$0xff] %v1902_v23  ;;  %v1906_v25 = vld [vmem:[%s11370_s11 + $0x1590] sm:$0xff] }
  0xc9   : > { %1905 = vst [vmem:[%s11375_s23 + $0xac0] sm:$0xff] %v1904_v24  ;;  %v1908_v26 = vld [vmem:[%s11370_s11 + $0x15a0] sm:$0xff]  ;;  %v1910_v27 = vld [vmem:[%s11370_s11 + $0x15b0] sm:$0xff]  ;;  %1907 = vst [vmem:[%s11375_s23 + $0xac8] sm:$0xff] %v1906_v25 }
  0xca   : > { %1909 = vst [vmem:[%s11375_s23 + $0xad0] sm:$0xff] %v1908_v26  ;;  %1911 = vst [vmem:[%s11375_s23 + $0xad8] sm:$0xff] %v1910_v27  ;;  %v1912_v28 = vld [vmem:[%s11370_s11 + $0x15c0] sm:$0xff]  ;;  %v1914_v29 = vld [vmem:[%s11370_s11 + $0x15d0] sm:$0xff] }
  0xcb   : > { %v1916_v30 = vld [vmem:[%s11370_s11 + $0x15e0] sm:$0xff]  ;;  %1913 = vst [vmem:[%s11375_s23 + $0xae0] sm:$0xff] %v1912_v28  ;;  %1915 = vst [vmem:[%s11375_s23 + $0xae8] sm:$0xff] %v1914_v29  ;;  %v1918_v31 = vld [vmem:[%s11370_s11 + $0x15f0] sm:$0xff] }
  0xcc   : > { %1917 = vst [vmem:[%s11375_s23 + $0xaf0] sm:$0xff] %v1916_v30  ;;  %v1920_v32 = vld [vmem:[%s11370_s11 + $0x1600] sm:$0xff]  ;;  %v1922_v33 = vld [vmem:[%s11370_s11 + $0x1610] sm:$0xff]  ;;  %1919 = vst [vmem:[%s11375_s23 + $0xaf8] sm:$0xff] %v1918_v31 }
  0xcd   : > { %1921 = vst [vmem:[%s11375_s23 + $0xb00] sm:$0xff] %v1920_v32  ;;  %1923 = vst [vmem:[%s11375_s23 + $0xb08] sm:$0xff] %v1922_v33  ;;  %v1924_v34 = vld [vmem:[%s11370_s11 + $0x1620] sm:$0xff]  ;;  %v1926_v35 = vld [vmem:[%s11370_s11 + $0x1630] sm:$0xff] }
  0xce   : > { %v1928_v36 = vld [vmem:[%s11370_s11 + $0x1640] sm:$0xff]  ;;  %1925 = vst [vmem:[%s11375_s23 + $0xb10] sm:$0xff] %v1924_v34  ;;  %1927 = vst [vmem:[%s11375_s23 + $0xb18] sm:$0xff] %v1926_v35  ;;  %v1930_v37 = vld [vmem:[%s11370_s11 + $0x1650] sm:$0xff] }
  0xcf   : > { %1929 = vst [vmem:[%s11375_s23 + $0xb20] sm:$0xff] %v1928_v36  ;;  %v1932_v38 = vld [vmem:[%s11370_s11 + $0x1660] sm:$0xff]  ;;  %v1934_v39 = vld [vmem:[%s11370_s11 + $0x1670] sm:$0xff]  ;;  %1931 = vst [vmem:[%s11375_s23 + $0xb28] sm:$0xff] %v1930_v37 }
  0xd0   : > { %1933 = vst [vmem:[%s11375_s23 + $0xb30] sm:$0xff] %v1932_v38  ;;  %1935 = vst [vmem:[%s11375_s23 + $0xb38] sm:$0xff] %v1934_v39  ;;  %v1936_v40 = vld [vmem:[%s11370_s11 + $0x1680] sm:$0xff]  ;;  %v1938_v41 = vld [vmem:[%s11370_s11 + $0x1690] sm:$0xff] }
  0xd1   : > { %v1940_v42 = vld [vmem:[%s11370_s11 + $0x16a0] sm:$0xff]  ;;  %1937 = vst [vmem:[%s11375_s23 + $0xb40] sm:$0xff] %v1936_v40  ;;  %1939 = vst [vmem:[%s11375_s23 + $0xb48] sm:$0xff] %v1938_v41  ;;  %v1942_v43 = vld [vmem:[%s11370_s11 + $0x16b0] sm:$0xff] }
  0xd2   : > { %1941 = vst [vmem:[%s11375_s23 + $0xb50] sm:$0xff] %v1940_v42  ;;  %v1944_v44 = vld [vmem:[%s11370_s11 + $0x16c0] sm:$0xff]  ;;  %v1946_v45 = vld [vmem:[%s11370_s11 + $0x16d0] sm:$0xff]  ;;  %1943 = vst [vmem:[%s11375_s23 + $0xb58] sm:$0xff] %v1942_v43 }
  0xd3   : > { %1945 = vst [vmem:[%s11375_s23 + $0xb60] sm:$0xff] %v1944_v44  ;;  %1947 = vst [vmem:[%s11375_s23 + $0xb68] sm:$0xff] %v1946_v45  ;;  %v1948_v46 = vld [vmem:[%s11370_s11 + $0x16e0] sm:$0xff]  ;;  %v1950_v47 = vld [vmem:[%s11370_s11 + $0x16f0] sm:$0xff] }
  0xd4   : > { %v1952_v48 = vld [vmem:[%s11370_s11 + $0x1700] sm:$0xff]  ;;  %1949 = vst [vmem:[%s11375_s23 + $0xb70] sm:$0xff] %v1948_v46  ;;  %1951 = vst [vmem:[%s11375_s23 + $0xb78] sm:$0xff] %v1950_v47  ;;  %v1954_v49 = vld [vmem:[%s11370_s11 + $0x1710] sm:$0xff] }
  0xd5   : > { %1953 = vst [vmem:[%s11375_s23 + $0xb80] sm:$0xff] %v1952_v48  ;;  %v1956_v50 = vld [vmem:[%s11370_s11 + $0x1720] sm:$0xff]  ;;  %v1958_v51 = vld [vmem:[%s11370_s11 + $0x1730] sm:$0xff]  ;;  %1955 = vst [vmem:[%s11375_s23 + $0xb88] sm:$0xff] %v1954_v49 }
  0xd6   : > { %1957 = vst [vmem:[%s11375_s23 + $0xb90] sm:$0xff] %v1956_v50  ;;  %1959 = vst [vmem:[%s11375_s23 + $0xb98] sm:$0xff] %v1958_v51  ;;  %v1960_v52 = vld [vmem:[%s11370_s11 + $0x1740] sm:$0xff]  ;;  %v1962_v53 = vld [vmem:[%s11370_s11 + $0x1750] sm:$0xff] }
  0xd7   : > { %v1964_v54 = vld [vmem:[%s11370_s11 + $0x1760] sm:$0xff]  ;;  %1961 = vst [vmem:[%s11375_s23 + $0xba0] sm:$0xff] %v1960_v52  ;;  %1963 = vst [vmem:[%s11375_s23 + $0xba8] sm:$0xff] %v1962_v53  ;;  %v1966_v55 = vld [vmem:[%s11370_s11 + $0x1770] sm:$0xff] }
  0xd8   : > { %1965 = vst [vmem:[%s11375_s23 + $0xbb0] sm:$0xff] %v1964_v54  ;;  %v1968_v56 = vld [vmem:[%s11370_s11 + $0x1780] sm:$0xff]  ;;  %v1970_v57 = vld [vmem:[%s11370_s11 + $0x1790] sm:$0xff]  ;;  %1967 = vst [vmem:[%s11375_s23 + $0xbb8] sm:$0xff] %v1966_v55 }
  0xd9   : > { %1969 = vst [vmem:[%s11375_s23 + $0xbc0] sm:$0xff] %v1968_v56  ;;  %1971 = vst [vmem:[%s11375_s23 + $0xbc8] sm:$0xff] %v1970_v57  ;;  %v1972_v58 = vld [vmem:[%s11370_s11 + $0x17a0] sm:$0xff]  ;;  %v1974_v59 = vld [vmem:[%s11370_s11 + $0x17b0] sm:$0xff] }
  0xda   : > { %v1976_v60 = vld [vmem:[%s11370_s11 + $0x17c0] sm:$0xff]  ;;  %1973 = vst [vmem:[%s11375_s23 + $0xbd0] sm:$0xff] %v1972_v58  ;;  %1975 = vst [vmem:[%s11375_s23 + $0xbd8] sm:$0xff] %v1974_v59  ;;  %v1978_v61 = vld [vmem:[%s11370_s11 + $0x17d0] sm:$0xff] }
  0xdb   : > { %1977 = vst [vmem:[%s11375_s23 + $0xbe0] sm:$0xff] %v1976_v60  ;;  %v1980_v62 = vld [vmem:[%s11370_s11 + $0x17e0] sm:$0xff]  ;;  %v1982_v63 = vld [vmem:[%s11370_s11 + $0x17f0] sm:$0xff]  ;;  %1979 = vst [vmem:[%s11375_s23 + $0xbe8] sm:$0xff] %v1978_v61 }
  0xdc   : > { %1981 = vst [vmem:[%s11375_s23 + $0xbf0] sm:$0xff] %v1980_v62  ;;  %1983 = vst [vmem:[%s11375_s23 + $0xbf8] sm:$0xff] %v1982_v63  ;;  %v1984_v0 = vld [vmem:[%s11370_s11 + $0x1800] sm:$0xff]  ;;  %v1986_v1 = vld [vmem:[%s11370_s11 + $0x1810] sm:$0xff] }
  0xdd   : > { %v1988_v2 = vld [vmem:[%s11370_s11 + $0x1820] sm:$0xff]  ;;  %1985 = vst [vmem:[%s11375_s23 + $0xc00] sm:$0xff] %v1984_v0  ;;  %1987 = vst [vmem:[%s11375_s23 + $0xc08] sm:$0xff] %v1986_v1  ;;  %v1990_v3 = vld [vmem:[%s11370_s11 + $0x1830] sm:$0xff] }
  0xde   : > { %1989 = vst [vmem:[%s11375_s23 + $0xc10] sm:$0xff] %v1988_v2  ;;  %v1992_v4 = vld [vmem:[%s11370_s11 + $0x1840] sm:$0xff]  ;;  %v1994_v5 = vld [vmem:[%s11370_s11 + $0x1850] sm:$0xff]  ;;  %1991 = vst [vmem:[%s11375_s23 + $0xc18] sm:$0xff] %v1990_v3 }
  0xdf   : > { %1993 = vst [vmem:[%s11375_s23 + $0xc20] sm:$0xff] %v1992_v4  ;;  %1995 = vst [vmem:[%s11375_s23 + $0xc28] sm:$0xff] %v1994_v5  ;;  %v1996_v6 = vld [vmem:[%s11370_s11 + $0x1860] sm:$0xff]  ;;  %v1998_v7 = vld [vmem:[%s11370_s11 + $0x1870] sm:$0xff] }
  0xe0   : > { %v2000_v8 = vld [vmem:[%s11370_s11 + $0x1880] sm:$0xff]  ;;  %1997 = vst [vmem:[%s11375_s23 + $0xc30] sm:$0xff] %v1996_v6  ;;  %1999 = vst [vmem:[%s11375_s23 + $0xc38] sm:$0xff] %v1998_v7  ;;  %v2002_v9 = vld [vmem:[%s11370_s11 + $0x1890] sm:$0xff] }
  0xe1   : > { %2001 = vst [vmem:[%s11375_s23 + $0xc40] sm:$0xff] %v2000_v8  ;;  %v2004_v10 = vld [vmem:[%s11370_s11 + $0x18a0] sm:$0xff]  ;;  %v2006_v11 = vld [vmem:[%s11370_s11 + $0x18b0] sm:$0xff]  ;;  %2003 = vst [vmem:[%s11375_s23 + $0xc48] sm:$0xff] %v2002_v9 }
  0xe2   : > { %2005 = vst [vmem:[%s11375_s23 + $0xc50] sm:$0xff] %v2004_v10  ;;  %2007 = vst [vmem:[%s11375_s23 + $0xc58] sm:$0xff] %v2006_v11  ;;  %v2008_v12 = vld [vmem:[%s11370_s11 + $0x18c0] sm:$0xff]  ;;  %v2010_v13 = vld [vmem:[%s11370_s11 + $0x18d0] sm:$0xff] }
  0xe3   : > { %v2012_v14 = vld [vmem:[%s11370_s11 + $0x18e0] sm:$0xff]  ;;  %2009 = vst [vmem:[%s11375_s23 + $0xc60] sm:$0xff] %v2008_v12  ;;  %2011 = vst [vmem:[%s11375_s23 + $0xc68] sm:$0xff] %v2010_v13  ;;  %v2014_v15 = vld [vmem:[%s11370_s11 + $0x18f0] sm:$0xff] }
  0xe4   : > { %2013 = vst [vmem:[%s11375_s23 + $0xc70] sm:$0xff] %v2012_v14  ;;  %v2016_v16 = vld [vmem:[%s11370_s11 + $0x1900] sm:$0xff]  ;;  %v2018_v17 = vld [vmem:[%s11370_s11 + $0x1910] sm:$0xff]  ;;  %2015 = vst [vmem:[%s11375_s23 + $0xc78] sm:$0xff] %v2014_v15 }
  0xe5   : > { %2017 = vst [vmem:[%s11375_s23 + $0xc80] sm:$0xff] %v2016_v16  ;;  %2019 = vst [vmem:[%s11375_s23 + $0xc88] sm:$0xff] %v2018_v17  ;;  %v2020_v18 = vld [vmem:[%s11370_s11 + $0x1920] sm:$0xff]  ;;  %v2022_v19 = vld [vmem:[%s11370_s11 + $0x1930] sm:$0xff] }
  0xe6   : > { %v2024_v20 = vld [vmem:[%s11370_s11 + $0x1940] sm:$0xff]  ;;  %2021 = vst [vmem:[%s11375_s23 + $0xc90] sm:$0xff] %v2020_v18  ;;  %2023 = vst [vmem:[%s11375_s23 + $0xc98] sm:$0xff] %v2022_v19  ;;  %v2026_v21 = vld [vmem:[%s11370_s11 + $0x1950] sm:$0xff] }
  0xe7   : > { %2025 = vst [vmem:[%s11375_s23 + $0xca0] sm:$0xff] %v2024_v20  ;;  %v2028_v22 = vld [vmem:[%s11370_s11 + $0x1960] sm:$0xff]  ;;  %v2030_v23 = vld [vmem:[%s11370_s11 + $0x1970] sm:$0xff]  ;;  %2027 = vst [vmem:[%s11375_s23 + $0xca8] sm:$0xff] %v2026_v21 }
  0xe8   : > { %2029 = vst [vmem:[%s11375_s23 + $0xcb0] sm:$0xff] %v2028_v22  ;;  %2031 = vst [vmem:[%s11375_s23 + $0xcb8] sm:$0xff] %v2030_v23  ;;  %v2032_v24 = vld [vmem:[%s11370_s11 + $0x1980] sm:$0xff]  ;;  %v2034_v25 = vld [vmem:[%s11370_s11 + $0x1990] sm:$0xff] }
  0xe9   : > { %v2036_v26 = vld [vmem:[%s11370_s11 + $0x19a0] sm:$0xff]  ;;  %2033 = vst [vmem:[%s11375_s23 + $0xcc0] sm:$0xff] %v2032_v24  ;;  %2035 = vst [vmem:[%s11375_s23 + $0xcc8] sm:$0xff] %v2034_v25  ;;  %v2038_v27 = vld [vmem:[%s11370_s11 + $0x19b0] sm:$0xff] }
  0xea   : > { %2037 = vst [vmem:[%s11375_s23 + $0xcd0] sm:$0xff] %v2036_v26  ;;  %v2040_v28 = vld [vmem:[%s11370_s11 + $0x19c0] sm:$0xff]  ;;  %v2042_v29 = vld [vmem:[%s11370_s11 + $0x19d0] sm:$0xff]  ;;  %2039 = vst [vmem:[%s11375_s23 + $0xcd8] sm:$0xff] %v2038_v27 }
  0xeb   : > { %2041 = vst [vmem:[%s11375_s23 + $0xce0] sm:$0xff] %v2040_v28  ;;  %2043 = vst [vmem:[%s11375_s23 + $0xce8] sm:$0xff] %v2042_v29  ;;  %v2044_v30 = vld [vmem:[%s11370_s11 + $0x19e0] sm:$0xff]  ;;  %v2046_v31 = vld [vmem:[%s11370_s11 + $0x19f0] sm:$0xff] }
  0xec   : > { %v2048_v32 = vld [vmem:[%s11370_s11 + $0x1a00] sm:$0xff]  ;;  %2045 = vst [vmem:[%s11375_s23 + $0xcf0] sm:$0xff] %v2044_v30  ;;  %2047 = vst [vmem:[%s11375_s23 + $0xcf8] sm:$0xff] %v2046_v31  ;;  %v2050_v33 = vld [vmem:[%s11370_s11 + $0x1a10] sm:$0xff] }
  0xed   : > { %2049 = vst [vmem:[%s11375_s23 + $0xd00] sm:$0xff] %v2048_v32  ;;  %v2052_v34 = vld [vmem:[%s11370_s11 + $0x1a20] sm:$0xff]  ;;  %v2054_v35 = vld [vmem:[%s11370_s11 + $0x1a30] sm:$0xff]  ;;  %2051 = vst [vmem:[%s11375_s23 + $0xd08] sm:$0xff] %v2050_v33 }
  0xee   : > { %2053 = vst [vmem:[%s11375_s23 + $0xd10] sm:$0xff] %v2052_v34  ;;  %2055 = vst [vmem:[%s11375_s23 + $0xd18] sm:$0xff] %v2054_v35  ;;  %v2056_v36 = vld [vmem:[%s11370_s11 + $0x1a40] sm:$0xff]  ;;  %v2058_v37 = vld [vmem:[%s11370_s11 + $0x1a50] sm:$0xff] }
  0xef   : > { %v2060_v38 = vld [vmem:[%s11370_s11 + $0x1a60] sm:$0xff]  ;;  %2057 = vst [vmem:[%s11375_s23 + $0xd20] sm:$0xff] %v2056_v36  ;;  %2059 = vst [vmem:[%s11375_s23 + $0xd28] sm:$0xff] %v2058_v37  ;;  %v2062_v39 = vld [vmem:[%s11370_s11 + $0x1a70] sm:$0xff] }
  0xf0   : > { %2061 = vst [vmem:[%s11375_s23 + $0xd30] sm:$0xff] %v2060_v38  ;;  %v2064_v40 = vld [vmem:[%s11370_s11 + $0x1a80] sm:$0xff]  ;;  %v2066_v41 = vld [vmem:[%s11370_s11 + $0x1a90] sm:$0xff]  ;;  %2063 = vst [vmem:[%s11375_s23 + $0xd38] sm:$0xff] %v2062_v39 }
  0xf1   : > { %2065 = vst [vmem:[%s11375_s23 + $0xd40] sm:$0xff] %v2064_v40  ;;  %2067 = vst [vmem:[%s11375_s23 + $0xd48] sm:$0xff] %v2066_v41  ;;  %v2068_v42 = vld [vmem:[%s11370_s11 + $0x1aa0] sm:$0xff]  ;;  %v2070_v43 = vld [vmem:[%s11370_s11 + $0x1ab0] sm:$0xff] }
  0xf2   : > { %v2072_v44 = vld [vmem:[%s11370_s11 + $0x1ac0] sm:$0xff]  ;;  %2069 = vst [vmem:[%s11375_s23 + $0xd50] sm:$0xff] %v2068_v42  ;;  %2071 = vst [vmem:[%s11375_s23 + $0xd58] sm:$0xff] %v2070_v43  ;;  %v2074_v45 = vld [vmem:[%s11370_s11 + $0x1ad0] sm:$0xff] }
  0xf3   : > { %2073 = vst [vmem:[%s11375_s23 + $0xd60] sm:$0xff] %v2072_v44  ;;  %v2076_v46 = vld [vmem:[%s11370_s11 + $0x1ae0] sm:$0xff]  ;;  %v2078_v47 = vld [vmem:[%s11370_s11 + $0x1af0] sm:$0xff]  ;;  %2075 = vst [vmem:[%s11375_s23 + $0xd68] sm:$0xff] %v2074_v45 }
  0xf4   : > { %2077 = vst [vmem:[%s11375_s23 + $0xd70] sm:$0xff] %v2076_v46  ;;  %2079 = vst [vmem:[%s11375_s23 + $0xd78] sm:$0xff] %v2078_v47  ;;  %v2080_v48 = vld [vmem:[%s11370_s11 + $0x1b00] sm:$0xff]  ;;  %v2082_v49 = vld [vmem:[%s11370_s11 + $0x1b10] sm:$0xff] }
  0xf5   : > { %v2084_v50 = vld [vmem:[%s11370_s11 + $0x1b20] sm:$0xff]  ;;  %2081 = vst [vmem:[%s11375_s23 + $0xd80] sm:$0xff] %v2080_v48  ;;  %2083 = vst [vmem:[%s11375_s23 + $0xd88] sm:$0xff] %v2082_v49  ;;  %v2086_v51 = vld [vmem:[%s11370_s11 + $0x1b30] sm:$0xff] }
  0xf6   : > { %2085 = vst [vmem:[%s11375_s23 + $0xd90] sm:$0xff] %v2084_v50  ;;  %v2088_v52 = vld [vmem:[%s11370_s11 + $0x1b40] sm:$0xff]  ;;  %v2090_v53 = vld [vmem:[%s11370_s11 + $0x1b50] sm:$0xff]  ;;  %2087 = vst [vmem:[%s11375_s23 + $0xd98] sm:$0xff] %v2086_v51 }
  0xf7   : > { %2089 = vst [vmem:[%s11375_s23 + $0xda0] sm:$0xff] %v2088_v52  ;;  %2091 = vst [vmem:[%s11375_s23 + $0xda8] sm:$0xff] %v2090_v53  ;;  %v2092_v54 = vld [vmem:[%s11370_s11 + $0x1b60] sm:$0xff]  ;;  %v2094_v55 = vld [vmem:[%s11370_s11 + $0x1b70] sm:$0xff] }
  0xf8   : > { %v2096_v56 = vld [vmem:[%s11370_s11 + $0x1b80] sm:$0xff]  ;;  %2093 = vst [vmem:[%s11375_s23 + $0xdb0] sm:$0xff] %v2092_v54  ;;  %2095 = vst [vmem:[%s11375_s23 + $0xdb8] sm:$0xff] %v2094_v55  ;;  %v2098_v57 = vld [vmem:[%s11370_s11 + $0x1b90] sm:$0xff] }
  0xf9   : > { %2097 = vst [vmem:[%s11375_s23 + $0xdc0] sm:$0xff] %v2096_v56  ;;  %v2100_v58 = vld [vmem:[%s11370_s11 + $0x1ba0] sm:$0xff]  ;;  %v2102_v59 = vld [vmem:[%s11370_s11 + $0x1bb0] sm:$0xff]  ;;  %2099 = vst [vmem:[%s11375_s23 + $0xdc8] sm:$0xff] %v2098_v57 }
  0xfa   : > { %2101 = vst [vmem:[%s11375_s23 + $0xdd0] sm:$0xff] %v2100_v58  ;;  %2103 = vst [vmem:[%s11375_s23 + $0xdd8] sm:$0xff] %v2102_v59  ;;  %v2104_v60 = vld [vmem:[%s11370_s11 + $0x1bc0] sm:$0xff]  ;;  %v2106_v61 = vld [vmem:[%s11370_s11 + $0x1bd0] sm:$0xff] }
  0xfb   : > { %v2108_v62 = vld [vmem:[%s11370_s11 + $0x1be0] sm:$0xff]  ;;  %2105 = vst [vmem:[%s11375_s23 + $0xde0] sm:$0xff] %v2104_v60  ;;  %2107 = vst [vmem:[%s11375_s23 + $0xde8] sm:$0xff] %v2106_v61  ;;  %v2110_v63 = vld [vmem:[%s11370_s11 + $0x1bf0] sm:$0xff] }
  0xfc   : > { %2109 = vst [vmem:[%s11375_s23 + $0xdf0] sm:$0xff] %v2108_v62  ;;  %v2112_v0 = vld [vmem:[%s11370_s11 + $0x1c00] sm:$0xff]  ;;  %v2114_v1 = vld [vmem:[%s11370_s11 + $0x1c10] sm:$0xff]  ;;  %2111 = vst [vmem:[%s11375_s23 + $0xdf8] sm:$0xff] %v2110_v63 }
  0xfd   : > { %2113 = vst [vmem:[%s11375_s23 + $0xe00] sm:$0xff] %v2112_v0  ;;  %2115 = vst [vmem:[%s11375_s23 + $0xe08] sm:$0xff] %v2114_v1  ;;  %v2116_v2 = vld [vmem:[%s11370_s11 + $0x1c20] sm:$0xff]  ;;  %v2118_v3 = vld [vmem:[%s11370_s11 + $0x1c30] sm:$0xff] }
  0xfe   : > { %v2120_v4 = vld [vmem:[%s11370_s11 + $0x1c40] sm:$0xff]  ;;  %2117 = vst [vmem:[%s11375_s23 + $0xe10] sm:$0xff] %v2116_v2  ;;  %2119 = vst [vmem:[%s11375_s23 + $0xe18] sm:$0xff] %v2118_v3  ;;  %v2122_v5 = vld [vmem:[%s11370_s11 + $0x1c50] sm:$0xff] }
  0xff   : > { %2121 = vst [vmem:[%s11375_s23 + $0xe20] sm:$0xff] %v2120_v4  ;;  %v2124_v6 = vld [vmem:[%s11370_s11 + $0x1c60] sm:$0xff]  ;;  %v2126_v7 = vld [vmem:[%s11370_s11 + $0x1c70] sm:$0xff]  ;;  %2123 = vst [vmem:[%s11375_s23 + $0xe28] sm:$0xff] %v2122_v5 }
 0x100   : > { %2125 = vst [vmem:[%s11375_s23 + $0xe30] sm:$0xff] %v2124_v6  ;;  %2127 = vst [vmem:[%s11375_s23 + $0xe38] sm:$0xff] %v2126_v7  ;;  %v2128_v8 = vld [vmem:[%s11370_s11 + $0x1c80] sm:$0xff]  ;;  %v2130_v9 = vld [vmem:[%s11370_s11 + $0x1c90] sm:$0xff] }
 0x101   : > { %v2132_v10 = vld [vmem:[%s11370_s11 + $0x1ca0] sm:$0xff]  ;;  %2129 = vst [vmem:[%s11375_s23 + $0xe40] sm:$0xff] %v2128_v8  ;;  %2131 = vst [vmem:[%s11375_s23 + $0xe48] sm:$0xff] %v2130_v9  ;;  %v2134_v11 = vld [vmem:[%s11370_s11 + $0x1cb0] sm:$0xff] }
 0x102   : > { %2133 = vst [vmem:[%s11375_s23 + $0xe50] sm:$0xff] %v2132_v10  ;;  %v2136_v12 = vld [vmem:[%s11370_s11 + $0x1cc0] sm:$0xff]  ;;  %v2138_v13 = vld [vmem:[%s11370_s11 + $0x1cd0] sm:$0xff]  ;;  %2135 = vst [vmem:[%s11375_s23 + $0xe58] sm:$0xff] %v2134_v11 }
 0x103   : > { %2137 = vst [vmem:[%s11375_s23 + $0xe60] sm:$0xff] %v2136_v12  ;;  %2139 = vst [vmem:[%s11375_s23 + $0xe68] sm:$0xff] %v2138_v13  ;;  %v2140_v14 = vld [vmem:[%s11370_s11 + $0x1ce0] sm:$0xff]  ;;  %v2142_v15 = vld [vmem:[%s11370_s11 + $0x1cf0] sm:$0xff] }
 0x104   : > { %v2144_v16 = vld [vmem:[%s11370_s11 + $0x1d00] sm:$0xff]  ;;  %2141 = vst [vmem:[%s11375_s23 + $0xe70] sm:$0xff] %v2140_v14  ;;  %2143 = vst [vmem:[%s11375_s23 + $0xe78] sm:$0xff] %v2142_v15  ;;  %v2146_v17 = vld [vmem:[%s11370_s11 + $0x1d10] sm:$0xff] }
 0x105   : > { %2145 = vst [vmem:[%s11375_s23 + $0xe80] sm:$0xff] %v2144_v16  ;;  %v2148_v18 = vld [vmem:[%s11370_s11 + $0x1d20] sm:$0xff]  ;;  %v2150_v19 = vld [vmem:[%s11370_s11 + $0x1d30] sm:$0xff]  ;;  %2147 = vst [vmem:[%s11375_s23 + $0xe88] sm:$0xff] %v2146_v17 }
 0x106   : > { %2149 = vst [vmem:[%s11375_s23 + $0xe90] sm:$0xff] %v2148_v18  ;;  %2151 = vst [vmem:[%s11375_s23 + $0xe98] sm:$0xff] %v2150_v19  ;;  %v2152_v20 = vld [vmem:[%s11370_s11 + $0x1d40] sm:$0xff]  ;;  %v2154_v21 = vld [vmem:[%s11370_s11 + $0x1d50] sm:$0xff] }
 0x107   : > { %v2156_v22 = vld [vmem:[%s11370_s11 + $0x1d60] sm:$0xff]  ;;  %2153 = vst [vmem:[%s11375_s23 + $0xea0] sm:$0xff] %v2152_v20  ;;  %2155 = vst [vmem:[%s11375_s23 + $0xea8] sm:$0xff] %v2154_v21  ;;  %v2158_v23 = vld [vmem:[%s11370_s11 + $0x1d70] sm:$0xff] }
 0x108   : > { %2157 = vst [vmem:[%s11375_s23 + $0xeb0] sm:$0xff] %v2156_v22  ;;  %v2160_v24 = vld [vmem:[%s11370_s11 + $0x1d80] sm:$0xff]  ;;  %v2162_v25 = vld [vmem:[%s11370_s11 + $0x1d90] sm:$0xff]  ;;  %2159 = vst [vmem:[%s11375_s23 + $0xeb8] sm:$0xff] %v2158_v23 }
 0x109   : > { %2161 = vst [vmem:[%s11375_s23 + $0xec0] sm:$0xff] %v2160_v24  ;;  %2163 = vst [vmem:[%s11375_s23 + $0xec8] sm:$0xff] %v2162_v25  ;;  %v2164_v26 = vld [vmem:[%s11370_s11 + $0x1da0] sm:$0xff]  ;;  %v2166_v27 = vld [vmem:[%s11370_s11 + $0x1db0] sm:$0xff] }
 0x10a   : > { %v2168_v28 = vld [vmem:[%s11370_s11 + $0x1dc0] sm:$0xff]  ;;  %2165 = vst [vmem:[%s11375_s23 + $0xed0] sm:$0xff] %v2164_v26  ;;  %2167 = vst [vmem:[%s11375_s23 + $0xed8] sm:$0xff] %v2166_v27  ;;  %v2170_v29 = vld [vmem:[%s11370_s11 + $0x1dd0] sm:$0xff] }
 0x10b   : > { %2169 = vst [vmem:[%s11375_s23 + $0xee0] sm:$0xff] %v2168_v28  ;;  %v2172_v30 = vld [vmem:[%s11370_s11 + $0x1de0] sm:$0xff]  ;;  %v2174_v31 = vld [vmem:[%s11370_s11 + $0x1df0] sm:$0xff]  ;;  %2171 = vst [vmem:[%s11375_s23 + $0xee8] sm:$0xff] %v2170_v29 }
 0x10c   : > { %2173 = vst [vmem:[%s11375_s23 + $0xef0] sm:$0xff] %v2172_v30  ;;  %2175 = vst [vmem:[%s11375_s23 + $0xef8] sm:$0xff] %v2174_v31  ;;  %v2176_v32 = vld [vmem:[%s11370_s11 + $0x1e00] sm:$0xff]  ;;  %v2178_v33 = vld [vmem:[%s11370_s11 + $0x1e10] sm:$0xff] }
 0x10d   : > { %v2180_v34 = vld [vmem:[%s11370_s11 + $0x1e20] sm:$0xff]  ;;  %2177 = vst [vmem:[%s11375_s23 + $0xf00] sm:$0xff] %v2176_v32  ;;  %2179 = vst [vmem:[%s11375_s23 + $0xf08] sm:$0xff] %v2178_v33  ;;  %v2182_v35 = vld [vmem:[%s11370_s11 + $0x1e30] sm:$0xff] }
 0x10e   : > { %2181 = vst [vmem:[%s11375_s23 + $0xf10] sm:$0xff] %v2180_v34  ;;  %v2184_v36 = vld [vmem:[%s11370_s11 + $0x1e40] sm:$0xff]  ;;  %v2186_v37 = vld [vmem:[%s11370_s11 + $0x1e50] sm:$0xff]  ;;  %2183 = vst [vmem:[%s11375_s23 + $0xf18] sm:$0xff] %v2182_v35 }
 0x10f   : > { %2185 = vst [vmem:[%s11375_s23 + $0xf20] sm:$0xff] %v2184_v36  ;;  %2187 = vst [vmem:[%s11375_s23 + $0xf28] sm:$0xff] %v2186_v37  ;;  %v2188_v38 = vld [vmem:[%s11370_s11 + $0x1e60] sm:$0xff]  ;;  %v2190_v39 = vld [vmem:[%s11370_s11 + $0x1e70] sm:$0xff] }
 0x110   : > { %v2192_v40 = vld [vmem:[%s11370_s11 + $0x1e80] sm:$0xff]  ;;  %2189 = vst [vmem:[%s11375_s23 + $0xf30] sm:$0xff] %v2188_v38  ;;  %2191 = vst [vmem:[%s11375_s23 + $0xf38] sm:$0xff] %v2190_v39  ;;  %v2194_v41 = vld [vmem:[%s11370_s11 + $0x1e90] sm:$0xff] }
 0x111   : > { %2193 = vst [vmem:[%s11375_s23 + $0xf40] sm:$0xff] %v2192_v40  ;;  %v2196_v42 = vld [vmem:[%s11370_s11 + $0x1ea0] sm:$0xff]  ;;  %v2198_v43 = vld [vmem:[%s11370_s11 + $0x1eb0] sm:$0xff]  ;;  %2195 = vst [vmem:[%s11375_s23 + $0xf48] sm:$0xff] %v2194_v41 }
 0x112   : > { %2197 = vst [vmem:[%s11375_s23 + $0xf50] sm:$0xff] %v2196_v42  ;;  %2199 = vst [vmem:[%s11375_s23 + $0xf58] sm:$0xff] %v2198_v43  ;;  %v2200_v44 = vld [vmem:[%s11370_s11 + $0x1ec0] sm:$0xff]  ;;  %v2202_v45 = vld [vmem:[%s11370_s11 + $0x1ed0] sm:$0xff] }
 0x113   : > { %v2204_v46 = vld [vmem:[%s11370_s11 + $0x1ee0] sm:$0xff]  ;;  %2201 = vst [vmem:[%s11375_s23 + $0xf60] sm:$0xff] %v2200_v44  ;;  %2203 = vst [vmem:[%s11375_s23 + $0xf68] sm:$0xff] %v2202_v45  ;;  %v2206_v47 = vld [vmem:[%s11370_s11 + $0x1ef0] sm:$0xff] }
 0x114   : > { %2205 = vst [vmem:[%s11375_s23 + $0xf70] sm:$0xff] %v2204_v46  ;;  %v2208_v48 = vld [vmem:[%s11370_s11 + $0x1f00] sm:$0xff]  ;;  %v2210_v49 = vld [vmem:[%s11370_s11 + $0x1f10] sm:$0xff]  ;;  %2207 = vst [vmem:[%s11375_s23 + $0xf78] sm:$0xff] %v2206_v47 }
 0x115   : > { %2209 = vst [vmem:[%s11375_s23 + $0xf80] sm:$0xff] %v2208_v48  ;;  %2211 = vst [vmem:[%s11375_s23 + $0xf88] sm:$0xff] %v2210_v49  ;;  %v2212_v50 = vld [vmem:[%s11370_s11 + $0x1f20] sm:$0xff]  ;;  %v2214_v51 = vld [vmem:[%s11370_s11 + $0x1f30] sm:$0xff] }
 0x116   : > { %v2216_v52 = vld [vmem:[%s11370_s11 + $0x1f40] sm:$0xff]  ;;  %2213 = vst [vmem:[%s11375_s23 + $0xf90] sm:$0xff] %v2212_v50  ;;  %2215 = vst [vmem:[%s11375_s23 + $0xf98] sm:$0xff] %v2214_v51  ;;  %v2218_v53 = vld [vmem:[%s11370_s11 + $0x1f50] sm:$0xff] }
 0x117   : > { %2217 = vst [vmem:[%s11375_s23 + $0xfa0] sm:$0xff] %v2216_v52  ;;  %v2220_v54 = vld [vmem:[%s11370_s11 + $0x1f60] sm:$0xff]  ;;  %v2222_v55 = vld [vmem:[%s11370_s11 + $0x1f70] sm:$0xff]  ;;  %2219 = vst [vmem:[%s11375_s23 + $0xfa8] sm:$0xff] %v2218_v53 }
 0x118   : > { %2221 = vst [vmem:[%s11375_s23 + $0xfb0] sm:$0xff] %v2220_v54  ;;  %2223 = vst [vmem:[%s11375_s23 + $0xfb8] sm:$0xff] %v2222_v55  ;;  %v2224_v56 = vld [vmem:[%s11370_s11 + $0x1f80] sm:$0xff]  ;;  %v2226_v57 = vld [vmem:[%s11370_s11 + $0x1f90] sm:$0xff] }
 0x119   : > { %v2228_v58 = vld [vmem:[%s11370_s11 + $0x1fa0] sm:$0xff]  ;;  %2225 = vst [vmem:[%s11375_s23 + $0xfc0] sm:$0xff] %v2224_v56  ;;  %2227 = vst [vmem:[%s11375_s23 + $0xfc8] sm:$0xff] %v2226_v57  ;;  %v2230_v59 = vld [vmem:[%s11370_s11 + $0x1fb0] sm:$0xff] }
 0x11a   : > { %2229 = vst [vmem:[%s11375_s23 + $0xfd0] sm:$0xff] %v2228_v58  ;;  %v2232_v60 = vld [vmem:[%s11370_s11 + $0x1fc0] sm:$0xff]  ;;  %v2234_v61 = vld [vmem:[%s11370_s11 + $0x1fd0] sm:$0xff]  ;;  %2231 = vst [vmem:[%s11375_s23 + $0xfd8] sm:$0xff] %v2230_v59 }
 0x11b   : > { %2233 = vst [vmem:[%s11375_s23 + $0xfe0] sm:$0xff] %v2232_v60  ;;  %2235 = vst [vmem:[%s11375_s23 + $0xfe8] sm:$0xff] %v2234_v61  ;;  %v2236_v62 = vld [vmem:[%s11370_s11 + $0x1fe0] sm:$0xff]  ;;  %v2238_v63 = vld [vmem:[%s11370_s11 + $0x1ff0] sm:$0xff] }
 0x11c   : > { %2237 = vst [vmem:[%s11375_s23 + $0xff0] sm:$0xff] %v2236_v62  ;;  %2239 = vst [vmem:[%s11375_s23 + $0xff8] sm:$0xff] %v2238_v63 }
 0x11d PF: > { %p9119_p11 = scmp.ge.s32.totalorder %s11262_s20, 1  ;;  %p4336_p12 = scmp.lt.s32.totalorder %s11262_s20, 5 }
 0x11f   : > { %p4337_p13 = pnand %p9119_p11, %p4336_p12 }
 0x120   : > { %s4343_s24 = sand.u32 (!%p4337_p13), 1, %s11238_s14   ;;  %p4374_p0 = scmp.lt.s32.totalorder (!%p4337_p13), %s11246_s16, 1  ;;  %vm6695_vm0 = vcmask (!%p4337_p13), 1045504   ;;  %vm4706_vm1 = vsmask.f32 (!%p4337_p13), 7424  ;;  %vm4997_vm3 = vcmask (!%p4337_p13), 1046528  }
 0x121   : > { %4340 = sbr.rel (%p4337_p13) target bundleno = 1043 (0x413), region = 80  ;;  %s9120_s25 = sshll.u32 (!%p4337_p13), %s4343_s24, 12  ;;  %vm6962_vm2 = vsmask.f32 (!%p4337_p13), 5376  ;;  %vm5565_vm4 = vcmask (!%p4337_p13), 1044480  }
 0x122   : > { %s12401_s26 = scalar_lea.vmem (!%p4337_p13), [#allocation2], %s9120_s25  ;;  %vm5264_vm5 = vsmask.f32 (!%p4337_p13), 6400  ;;  %vm5846_vm6 = vsmask.f32 (!%p4337_p13), 4352  ;;  %s13256_s7 = sshll.u32 (!%p4337_p13), %s11250_s17, 1 }
 0x123   : > { %v10371_v0 = vld [vmem:[%s12401_s26 + $0x4] ss:$8 sps:$4 sm:$0xff] (!%p4337_p13)   ;;  %v10375_v2 = vld [vmem:[%s12401_s26] ss:$8 sps:$4 sm:$0xff] (!%p4337_p13)   ;;  %v10377_v4 = vld [vmem:[%s12401_s26 + $0x14] ss:$8 sps:$4 sm:$0xff] (!%p4337_p13)  }
 0x124   : > { %v10373_v1 = vld [vmem:[%s12401_s26 + $0x804] ss:$8 sps:$4 sm:$0xff] (!%p4337_p13)   ;;  %4610 = vmatprep.subr.bf16.mxu1 (!%p4337_p13), %v10371_v0  ;;  %v10376_v3 = vld [vmem:[%s12401_s26 + $0x800] ss:$8 sps:$4 sm:$0xff] (!%p4337_p13)   ;;  %v10379_v5 = vld [vmem:[%s12401_s26 + $0x814] ss:$8 sps:$4 sm:$0xff] (!%p4337_p13)  }
 0x125   : > { %6866 = vmatprep.subr.bf16.mxu0 (!%p4337_p13), %v10373_v1  ;;  %4611 = vmatpush1.bf16.msra.mxu1 (!%p4337_p13), %v10375_v2  ;;  %v10381_v6 = vld [vmem:[%s12401_s26 + $0x10] ss:$8 sps:$4 sm:$0xff] (!%p4337_p13)   ;;  %v10383_v8 = vld [vmem:[%s12401_s26 + $0x24] ss:$8 sps:$4 sm:$0xff] (!%p4337_p13)   ;;  %v10387_v10 = vld [vmem:[%s12401_s26 + $0x20] ss:$8 sps:$4 sm:$0xff] (!%p4337_p13)  }
 0x126   : > { %6867 = vmatpush1.bf16.msra.mxu0 (!%p4337_p13), %v10376_v3  ;;  %4612 = vmatprep.subr.bf16.mxu1 (!%p4337_p13), %v10377_v4  ;;  %v10382_v7 = vld [vmem:[%s12401_s26 + $0x810] ss:$8 sps:$4 sm:$0xff] (!%p4337_p13)   ;;  %v10385_v9 = vld [vmem:[%s12401_s26 + $0x824] ss:$8 sps:$4 sm:$0xff] (!%p4337_p13)   ;;  %v10388_v11 = vld [vmem:[%s12401_s26 + $0x820] ss:$8 sps:$4 sm:$0xff] (!%p4337_p13)  }
 0x127   : > { %6868 = vmatprep.subr.bf16.mxu0 (!%p4337_p13), %v10379_v5  ;;  %v10389_v12 = vld [vmem:[%s12401_s26 + $0x34] ss:$8 sps:$4 sm:$0xff] (!%p4337_p13)   ;;  %v10393_v14 = vld [vmem:[%s12401_s26 + $0x30] ss:$8 sps:$4 sm:$0xff] (!%p4337_p13)   ;;  %v10395_v16 = vld [vmem:[%s12401_s26 + $0x44] ss:$8 sps:$4 sm:$0xff] (!%p4337_p13)  }
 0x128   : > { %v10391_v13 = vld [vmem:[%s12401_s26 + $0x834] ss:$8 sps:$4 sm:$0xff]   ;;  %v10394_v15 = vld [vmem:[%s12401_s26 + $0x830] ss:$8 sps:$4 sm:$0xff]   ;;  %v10397_v17 = vld [vmem:[%s12401_s26 + $0x844] ss:$8 sps:$4 sm:$0xff]  }
 0x129   : > { %4613 = vmatpush1.bf16.msra.mxu1 %v10381_v6  ;;  %v10399_v18 = vld [vmem:[%s12401_s26 + $0x40] ss:$8 sps:$4 sm:$0xff]   ;;  %v10401_v20 = vld [vmem:[%s12401_s26 + $0x54] ss:$8 sps:$4 sm:$0xff]   ;;  %v10405_v22 = vld [vmem:[%s12401_s26 + $0x50] ss:$8 sps:$4 sm:$0xff]  }
 0x12a   : > { %6869 = vmatpush1.bf16.msra.mxu0 %v10382_v7  ;;  %4614 = vmatprep.subr.bf16.mxu1 %v10383_v8  ;;  %v10400_v19 = vld [vmem:[%s12401_s26 + $0x840] ss:$8 sps:$4 sm:$0xff]   ;;  %v10403_v21 = vld [vmem:[%s12401_s26 + $0x854] ss:$8 sps:$4 sm:$0xff]   ;;  %v10406_v23 = vld [vmem:[%s12401_s26 + $0x850] ss:$8 sps:$4 sm:$0xff]  }
 0x12b   : > { %6870 = vmatprep.subr.bf16.mxu0 %v10385_v9  ;;  %v10407_v24 = vld [vmem:[%s12401_s26 + $0x64] ss:$8 sps:$4 sm:$0xff]   ;;  %v10411_v26 = vld [vmem:[%s12401_s26 + $0x60] ss:$8 sps:$4 sm:$0xff]   ;;  %v10413_v28 = vld [vmem:[%s12401_s26 + $0x74] ss:$8 sps:$4 sm:$0xff]  }
 0x12c   : > { %v10409_v25 = vld [vmem:[%s12401_s26 + $0x864] ss:$8 sps:$4 sm:$0xff]   ;;  %v10412_v27 = vld [vmem:[%s12401_s26 + $0x860] ss:$8 sps:$4 sm:$0xff]   ;;  %v10415_v29 = vld [vmem:[%s12401_s26 + $0x874] ss:$8 sps:$4 sm:$0xff]  }
 0x12d   : > { %4615 = vmatpush1.bf16.msra.mxu1 %v10387_v10  ;;  %v10417_v30 = vld [vmem:[%s12401_s26 + $0x70] ss:$8 sps:$4 sm:$0xff]   ;;  %v10419_v32 = vld [vmem:[%s12401_s26 + $0x84] ss:$8 sps:$4 sm:$0xff]   ;;  %v10423_v34 = vld [vmem:[%s12401_s26 + $0x80] ss:$8 sps:$4 sm:$0xff]  }
 0x12e   : > { %6871 = vmatpush1.bf16.msra.mxu0 %v10388_v11  ;;  %4616 = vmatprep.subr.bf16.mxu1 %v10389_v12  ;;  %v10418_v31 = vld [vmem:[%s12401_s26 + $0x870] ss:$8 sps:$4 sm:$0xff]   ;;  %v10421_v33 = vld [vmem:[%s12401_s26 + $0x884] ss:$8 sps:$4 sm:$0xff]   ;;  %v10424_v35 = vld [vmem:[%s12401_s26 + $0x880] ss:$8 sps:$4 sm:$0xff]  }
 0x12f   : > { %6872 = vmatprep.subr.bf16.mxu0 %v10391_v13  ;;  %v10425_v36 = vld [vmem:[%s12401_s26 + $0x94] ss:$8 sps:$4 sm:$0xff]   ;;  %s4375_s14 = scalar_select %p4374_p0, %s11246_s16, 1  ;;  %v10429_v38 = vld [vmem:[%s12401_s26 + $0x90] ss:$8 sps:$4 sm:$0xff]  }
 0x130   : > { %v10427_v37 = vld [vmem:[%s12401_s26 + $0x894] ss:$8 sps:$4 sm:$0xff]   ;;  %v10430_v39 = vld [vmem:[%s12401_s26 + $0x890] ss:$8 sps:$4 sm:$0xff]   ;;  %v10431_v40 = vld [vmem:[%s12401_s26 + $0xa4] ss:$8 sps:$4 sm:$0xff]  }
 0x131   : > { %4617 = vmatpush1.bf16.msra.mxu1 %v10393_v14  ;;  %v10433_v41 = vld [vmem:[%s12401_s26 + $0x8a4] ss:$8 sps:$4 sm:$0xff]   ;;  %s10297_s27 = smul.u32 40, %s4375_s14  ;;  %v10435_v42 = vld [vmem:[%s12401_s26 + $0xa0] ss:$8 sps:$4 sm:$0xff]   ;;  %p4381_p1 = scmp.lt.s32.totalorder %s13256_s7, 3 }
 0x132   : > { %6873 = vmatpush1.bf16.msra.mxu0 %v10394_v15  ;;  %4618 = vmatprep.subr.bf16.mxu1 %v10395_v16  ;;  %v10436_v43 = vld [vmem:[%s12401_s26 + $0x8a0] ss:$8 sps:$4 sm:$0xff]   ;;  %v10437_v44 = vld [vmem:[%s12401_s26 + $0xb4] ss:$8 sps:$4 sm:$0xff]   ;;  %v10441_v46 = vld [vmem:[%s12401_s26 + $0xb0] ss:$8 sps:$4 sm:$0xff]  }
 0x133   : > { %6874 = vmatprep.subr.bf16.mxu0 %v10397_v17  ;;  %v10439_v45 = vld [vmem:[%s12401_s26 + $0x8b4] ss:$8 sps:$4 sm:$0xff]   ;;  %s12454_s6 = scalar_lea.vmem %s13298_s0, %s10297_s27  ;;  %v10442_v47 = vld [vmem:[%s12401_s26 + $0x8b0] ss:$8 sps:$4 sm:$0xff]   ;;  %v10443_v50 = vld [vmem:[%s12401_s26 + $0xc4] ss:$8 sps:$4 sm:$0xff]  }
 0x134   : > { %v4398_v48 = vld [vmem:[%s12454_s6] sm:$0xff]  ;;  %v12460_v49 = vld [vmem:[%s12454_s6 + $0x8] sm:$0xff]  ;;  %v12468_v53 = vld [vmem:[%s12454_s6 + $0x10] sm:$0xff]  ;;  %s4382_s8 = scalar_select %p4381_p1, %s13256_s7, 3 }
 0x135   : > { %4619 = vmatpush1.bf16.msra.mxu1 %v10399_v18  ;;  %v10445_v51 = vld [vmem:[%s12401_s26 + $0x8c4] ss:$8 sps:$4 sm:$0xff]   ;;  %v12465_v52 = vcombine.high %v4398_v48, %v12460_v49  ;;  %v6651_v55 = vld [vmem:[%s12454_s6 + $0x18] sm:$0x77]  ;;  %v10447_v56 = vld [vmem:[%s12401_s26 + $0xc0] ss:$8 sps:$4 sm:$0xff]   ;;  %v12499_v17 = vcombine.low %v4398_v48, %v12460_v49 }
 0x136   : > { %6875 = vmatpush1.bf16.msra.mxu0 %v10400_v19  ;;  %4620 = vmatprep.subr.bf16.mxu1 %v10401_v20  ;;  %v6650_v54 = vld [vmem:[%s12454_s6 + $0x8] sm:$0xcc]  ;;  %v9662_v58 = vcombine.high %v6651_v55, %v6651_v55  ;;  %v10449_v60 = vld [vmem:[%s12401_s26 + $0xd4] ss:$8 sps:$4 sm:$0xff]   ;;  %v10453_v1 = vld [vmem:[%s12401_s26 + $0xd0] ss:$8 sps:$4 sm:$0xff]   ;;  %v9661_v8 = vcombine.low %v6651_v55, %v6651_v55  ;;  %s4383_s11 = scalar_lea.vmem %s13300_s2, %s4382_s8 }
 0x137   : > { %6876 = vmatprep.subr.bf16.mxu0 %v10403_v21  ;;  %4642 = vmatprep.mubr.bf16.mxu1 %v12465_v52  ;;  %v12475_v57 = vcombine.high %v6650_v54, %v12468_v53  ;;  %v10448_v59 = vld [vmem:[%s12401_s26 + $0x8c0] ss:$8 sps:$4 sm:$0xff]   ;;  %v10451_v63 = vld [vmem:[%s12401_s26 + $0x8d4] ss:$8 sps:$4 sm:$0xff]   ;;  %v10454_v2 = vld [vmem:[%s12401_s26 + $0x8d0] ss:$8 sps:$4 sm:$0xff]   ;;  %v12489_v7 = vcombine.low %v6650_v54, %v12468_v53 }
 0x138   : > { %v6700_v62 = vrot.slane %v9662_v58, 2  ;;  %v10455_v3 = vld [vmem:[%s12401_s26 + $0xe4] ss:$8 sps:$4 sm:$0xff]   ;;  %v10459_v5 = vld [vmem:[%s12401_s26 + $0xe0] ss:$8 sps:$4 sm:$0xff]   ;;  %v6697_v14 = vrot.slane %v9661_v8, 2 }
 0x139   : > { %4621 = vmatpush1.bf16.msra.mxu1 %v10405_v22  ;;  %v6699_v61 = vrot.slane %v12475_v57, 2  ;;  %v10457_v4 = vld [vmem:[%s12401_s26 + $0x8e4] ss:$8 sps:$4 sm:$0xff]   ;;  %v10460_v6 = vld [vmem:[%s12401_s26 + $0x8e0] ss:$8 sps:$4 sm:$0xff]   ;;  %v6696_v13 = vrot.slane %v12489_v7, 2 }
 0x13a   : > { %6877 = vmatpush1.bf16.msra.mxu0 %v10406_v23  ;;  %4622 = vmatprep.subr.bf16.mxu1 %v10407_v24  ;;  %v10461_v9 = vld [vmem:[%s12401_s26 + $0xf4] ss:$8 sps:$4 sm:$0xff]   ;;  %v10465_v11 = vld [vmem:[%s12401_s26 + $0xf0] ss:$8 sps:$4 sm:$0xff]   ;;  %v10470_v15 = vld [vmem:[%s12401_s26 + $0x104] ss:$8 sps:$4 sm:$0xff]  }
 0x13b   : > { %6878 = vmatprep.subr.bf16.mxu0 %v10409_v25  ;;  %v6701_v0 = vsel %vm6695_vm0, %v6699_v61, %v6700_v62  ;;  %v10463_v10 = vld [vmem:[%s12401_s26 + $0x8f4] ss:$8 sps:$4 sm:$0xff]   ;;  %v10466_v12 = vld [vmem:[%s12401_s26 + $0x8f0] ss:$8 sps:$4 sm:$0xff]   ;;  %v10475_v16 = vld [vmem:[%s12401_s26 + $0x904] ss:$8 sps:$4 sm:$0xff]   ;;  %v6698_v20 = vsel %vm6695_vm0, %v6696_v13, %v6697_v14 }
 0x13c   : > { %6898 = vmatprep.mubr.bf16.mxu0 %v6701_v0  ;;  %v10468_v18 = vld [vmem:[%s12401_s26 + $0x100] ss:$8 sps:$4 sm:$0xff]   ;;  %v10481_v21 = vld [vmem:[%s12401_s26 + $0x114] ss:$8 sps:$4 sm:$0xff]   ;;  %v10479_v23 = vld [vmem:[%s12401_s26 + $0x110] ss:$8 sps:$4 sm:$0xff]  }
 0x13d   : > { %4623 = vmatpush1.bf16.msra.mxu1 %v10411_v26  ;;  %v10473_v19 = vld [vmem:[%s12401_s26 + $0x900] ss:$8 sps:$4 sm:$0xff]   ;;  %v10484_v22 = vld [vmem:[%s12401_s26 + $0x914] ss:$8 sps:$4 sm:$0xff]   ;;  %v10482_v24 = vld [vmem:[%s12401_s26 + $0x910] ss:$8 sps:$4 sm:$0xff]  }
 0x13e   : > { %6879 = vmatpush1.bf16.msra.mxu0 %v10412_v27  ;;  %4624 = vmatprep.subr.bf16.mxu1 %v10413_v28  ;;  %v10487_v25 = vld [vmem:[%s12401_s26 + $0x124] ss:$8 sps:$4 sm:$0xff]   ;;  %v10485_v27 = vld [vmem:[%s12401_s26 + $0x120] ss:$8 sps:$4 sm:$0xff]   ;;  %v10517_v58 = vld [vmem:[%s12401_s26 + $0x174] ss:$8 sps:$4 sm:$0xff]  }
 0x13f   : > { %6880 = vmatprep.subr.bf16.mxu0 %v10415_v29  ;;  %v10490_v26 = vld [vmem:[%s12401_s26 + $0x924] ss:$8 sps:$4 sm:$0xff]   ;;  %v10488_v28 = vld [vmem:[%s12401_s26 + $0x920] ss:$8 sps:$4 sm:$0xff]   ;;  %v10493_v29 = vld [vmem:[%s12401_s26 + $0x134] ss:$8 sps:$4 sm:$0xff]  }
 0x140   : > { %v10509_v54 = vld [vmem:[%s12401_s26 + $0x160] ss:$8 sps:$4 sm:$0xff]   ;;  %v12544_v61 = vld [vmem:[%s12454_s6 + $0x18] sm:$0xff]  ;;  %v10526_v8 = vld [vmem:[%s12401_s26 + $0x984] ss:$8 sps:$4 sm:$0xff]   ;;  %s4371_s17 = sand.u32 1, %s11230_s12  }
 0x141   : > { %4625 = vmatpush1.bf16.msra.mxu1 %v10417_v30  ;;  %v10496_v30 = vld [vmem:[%s12401_s26 + $0x934] ss:$8 sps:$4 sm:$0xff]   ;;  %v10512_v55 = vld [vmem:[%s12401_s26 + $0x960] ss:$8 sps:$4 sm:$0xff]   ;;  %s10296_s23 = smul.u32 24, %s4371_s17 }
 0x142   : > { %6881 = vmatpush1.bf16.msra.mxu0 %v10418_v31  ;;  %4626 = vmatprep.subr.bf16.mxu1 %v10419_v32  ;;  %v10491_v31 = vld [vmem:[%s12401_s26 + $0x130] ss:$8 sps:$4 sm:$0xff]   ;;  %v10521_v13 = vld [vmem:[%s12401_s26 + $0x180] ss:$8 sps:$4 sm:$0xff]   ;;  %s10298_s24 = smul.u32 (%p11352_p9), 12, %s11246_s16 }
 0x143   : > { %6882 = vmatprep.subr.bf16.mxu0 %v10421_v33  ;;  %v10494_v32 = vld [vmem:[%s12401_s26 + $0x930] ss:$8 sps:$4 sm:$0xff]   ;;  %v10499_v33 = vld [vmem:[%s12401_s26 + $0x144] ss:$8 sps:$4 sm:$0xff]   ;;  %s4373_s12 = scalar_lea.vmem [#allocation3], %s10296_s23 }
 0x144   : > { %s8968_s25 = sadd.s32 (%p11352_p9), %s10298_s24, %s13256_s7 }
 0x145   : > { %4627 = vmatpush1.bf16.msra.mxu1 %v10423_v34  ;;  %v10502_v34 = vld [vmem:[%s12401_s26 + $0x944] ss:$8 sps:$4 sm:$0xff]  }
 0x146   : > { %6883 = vmatpush1.bf16.msra.mxu0 %v10424_v35  ;;  %4628 = vmatprep.subr.bf16.mxu1 %v10425_v36  ;;  %v10497_v35 = vld [vmem:[%s12401_s26 + $0x140] ss:$8 sps:$4 sm:$0xff]  }
 0x147   : > { %6884 = vmatprep.subr.bf16.mxu0 %v10427_v37  ;;  %v10500_v36 = vld [vmem:[%s12401_s26 + $0x940] ss:$8 sps:$4 sm:$0xff]   ;;  %v4722_v37 = vshll.u32 %v12465_v52, 16 }
 0x149   : > { %4629 = vmatpush1.bf16.msra.mxu1 %v10429_v38  ;;  %v10505_v38 = vld [vmem:[%s12401_s26 + $0x154] ss:$8 sps:$4 sm:$0xff]   ;;  %v4724_v48 = vrot.slane %v4722_v37, 1  ;;  %v4710_v37 = vshll.u32 %v12499_v17, 16 }
 0x14a   : > { %6885 = vmatpush1.bf16.msra.mxu0 %v10430_v39  ;;  %4630 = vmatprep.subr.bf16.mxu1 %v10431_v40  ;;  %v10508_v39 = vld [vmem:[%s12401_s26 + $0x954] ss:$8 sps:$4 sm:$0xff]  }
 0x14b   : > { %6886 = vmatprep.subr.bf16.mxu0 %v10433_v41  ;;  %v4400_v40 = vld [vmem:[%s12454_s6 + $0x10] sm:$0x11] }
 0x14c   : > { %v10503_v41 = vld [vmem:[%s12401_s26 + $0x150] ss:$8 sps:$4 sm:$0xff]  }
 0x14d   : > { %4631 = vmatpush1.bf16.msra.mxu1 %v10435_v42  ;;  %v9126_v42 = vcombine.high %v4400_v40, %v4400_v40 }
 0x14e   : > { %6887 = vmatpush1.bf16.msra.mxu0 %v10436_v43  ;;  %4632 = vmatprep.subr.bf16.mxu1 %v10437_v44  ;;  %v9125_v43 = vcombine.low %v4400_v40, %v4400_v40  ;;  %v10506_v44 = vld [vmem:[%s12401_s26 + $0x950] ss:$8 sps:$4 sm:$0xff]  }
 0x14f   : > { %6888 = vmatprep.subr.bf16.mxu0 %v10439_v45  ;;  %v10511_v45 = vld [vmem:[%s12401_s26 + $0x164] ss:$8 sps:$4 sm:$0xff]   ;;  %v10554_v40 = vld [vmem:[%s12401_s26 + $0x9d0] ss:$8 sps:$4 sm:$0xff]  }
 0x151   : > { %4633 = vmatpush1.bf16.msra.mxu1 %v10441_v46  ;;  %v10514_v46 = vld [vmem:[%s12401_s26 + $0x964] ss:$8 sps:$4 sm:$0xff]  }
 0x152   : > { %6889 = vmatpush1.bf16.msra.mxu0 %v10442_v47  ;;  %4634 = vmatprep.subr.bf16.mxu1 %v10443_v50  ;;  %v4720_v47 = vshrl.u32 %v12465_v52, 16  ;;  %v6981_v50 = vshrl.u32 %v12475_v57, 16 }
 0x153   : > { %6890 = vmatprep.subr.bf16.mxu0 %v10445_v51  ;;  %v6984_v51 = vshll.u32 %v12475_v57, 16  ;;  %v10515_v57 = vld [vmem:[%s12401_s26 + $0x170] ss:$8 sps:$4 sm:$0xff]  }
 0x154   : > { %v6983_v0 = vrot.slane %v6981_v50, 2  ;;  %v10561_v50 = vld [vmem:[%s12401_s26 + $0x9e0] ss:$8 sps:$4 sm:$0xff]  }
 0x155   : > { %4635 = vmatpush1.bf16.msra.mxu1 %v10447_v56  ;;  %v12535_v56 = vld [vmem:[%s12454_s6 + $0x10] sm:$0x33] }
 0x156   : > { %6891 = vmatpush1.bf16.msra.mxu0 %v10448_v59  ;;  %4636 = vmatprep.subr.bf16.mxu1 %v10449_v60  ;;  %v12540_v52 = vcombine.high %v12535_v56, %v12535_v56  ;;  %v10520_v59 = vld [vmem:[%s12401_s26 + $0x974] ss:$8 sps:$4 sm:$0xff]   ;;  %v4725_v60 = vor.u32 %v4724_v48, %v4720_v47  ;;  %v4708_v47 = vshrl.u32 %v12499_v17, 16  ;;  %v10558_v48 = vld [vmem:[%s12401_s26 + $0x1e0] ss:$8 sps:$4 sm:$0xff]  }
 0x157   : > { %6892 = vmatprep.subr.bf16.mxu0 %v10451_v63  ;;  %v12550_v63 = vcombine.high %v12544_v61, %v12544_v61 }
 0x159   : > { %4637 = vmatpush1.bf16.msra.mxu1 %v10453_v1  ;;  %v6986_v1 = vrot.slane %v6984_v51, 3  ;;  %v10567_v51 = vld [vmem:[%s12401_s26 + $0x1f4] ss:$8 sps:$4 sm:$0xff]  }
 0x15a   : > { %6893 = vmatpush1.bf16.msra.mxu0 %v10454_v2  ;;  %4638 = vmatprep.subr.bf16.mxu1 %v10455_v3  ;;  %v10518_v2 = vld [vmem:[%s12401_s26 + $0x970] ss:$8 sps:$4 sm:$0xff]   ;;  %v10523_v3 = vld [vmem:[%s12401_s26 + $0x184] ss:$8 sps:$4 sm:$0xff]  }
 0x15b   : > { %6894 = vmatprep.subr.bf16.mxu0 %v10457_v4 }
 0x15d   : > { %4639 = vmatpush1.bf16.msra.mxu1 %v10459_v5  ;;  %v6989_v5 = vshrl.u32 %v12550_v63, 16 }
 0x15e   : > { %6895 = vmatpush1.bf16.msra.mxu0 %v10460_v6  ;;  %4640 = vmatprep.subr.bf16.mxu1 %v10461_v9  ;;  %v6992_v6 = vshll.u32 %v12550_v63, 16 }
 0x15f   : > { %6896 = vmatprep.subr.bf16.mxu0 %v10463_v10  ;;  %v6987_v10 = vor.u32 %v6986_v1, %v6983_v0 }
 0x161   : > { %4641 = vmatpush1.bf16.msra.mxu1 %v10465_v11  ;;  %v6991_v11 = vrot.slane %v6989_v5, 2  ;;  %v10580_v5 = vld [vmem:[%s12401_s26 + $0xa04] ss:$8 sps:$4 sm:$0xff]  }
 0x162   : > { %6897 = vmatpush1.bf16.msra.mxu0 %v10466_v12  ;;  %4901 = vmatprep.subr.bf16.mxu1 %v10470_v15  ;;  %v6994_v12 = vrot.slane %v6992_v6, 3  ;;  %v10529_v15 = vld [vmem:[%s12401_s26 + $0x194] ss:$8 sps:$4 sm:$0xff]   ;;  %v4734_v6 = vshrl.u32 %v12540_v52, 16 }
 0x163   : > { %7161 = vmatprep.subr.bf16.mxu0 %v10475_v16 }
 0x164   : > { %4643 = vmatmul.mubr.bf16.vlgmr.msra.gmra.mrb[0].mxu1 %v12499_v17  ;;  %v12564_v16 = vor.u32 %v6994_v12, %v6991_v11  ;;  %v10570_v17 = vld [vmem:[%s12401_s26 + $0x9f4] ss:$8 sps:$4 sm:$0xff]  }
 0x165   : > { %6899 = vmatmul.mubr.bf16.vlgmr.msra.gmra.mrb[0].mxu0 %v6698_v20  ;;  %4902 = vmatpush1.bf16.msra.mxu1 %v10468_v18  ;;  %v10532_v18 = vld [vmem:[%s12401_s26 + $0x994] ss:$8 sps:$4 sm:$0xff]   ;;  %v10527_v20 = vld [vmem:[%s12401_s26 + $0x190] ss:$8 sps:$4 sm:$0xff]  }
 0x166   : > { %7162 = vmatpush1.bf16.msra.mxu0 %v10473_v19  ;;  %4903 = vmatprep.subr.bf16.mxu1 %v10481_v21  ;;  %v6996_v19 = vsel %vm6962_vm2, %v6987_v10, %v12564_v16  ;;  %v10530_v21 = vld [vmem:[%s12401_s26 + $0x990] ss:$8 sps:$4 sm:$0xff]   ;;  %v10583_v12 = vld [vmem:[%s12401_s26 + $0x214] ss:$8 sps:$4 sm:$0xff]  }
 0x167   : > { %7163 = vmatprep.subr.bf16.mxu0 %v10484_v22  ;;  %6908 = vmatprep.mubr.bf16.mxu0 %v6700_v62  ;;  %v4727_v62 = vshll.u32 %v12540_v52, 16  ;;  %v10535_v22 = vld [vmem:[%s12401_s26 + $0x1a4] ss:$8 sps:$4 sm:$0xff]  }
 0x168   : > { %4652 = vmatprep.mubr.bf16.mxu1 %v9126_v42  ;;  %v10560_v42 = vld [vmem:[%s12401_s26 + $0x1e4] ss:$8 sps:$4 sm:$0xff]  }
 0x169   : > { %4904 = vmatpush1.bf16.msra.mxu1 %v10479_v23  ;;  %v12554_v4 = vrot.slane %v4727_v62, 1  ;;  %v10538_v23 = vld [vmem:[%s12401_s26 + $0x9a4] ss:$8 sps:$4 sm:$0xff]  }
 0x16a   : > { %7164 = vmatpush1.bf16.msra.mxu0 %v10482_v24  ;;  %4905 = vmatprep.subr.bf16.mxu1 %v10487_v25  ;;  %v10533_v24 = vld [vmem:[%s12401_s26 + $0x1a0] ss:$8 sps:$4 sm:$0xff]   ;;  %v10575_v62 = vld [vmem:[%s12401_s26 + $0x204] ss:$8 sps:$4 sm:$0xff]  }
 0x16b   : > { %7165 = vmatprep.subr.bf16.mxu0 %v10490_v26  ;;  %v4730_v9 = vsel %vm4706_vm1, %v4725_v60, %v12554_v4  ;;  %v10536_v25 = vld [vmem:[%s12401_s26 + $0x9a0] ss:$8 sps:$4 sm:$0xff]   ;;  %v10541_v26 = vld [vmem:[%s12401_s26 + $0x1b4] ss:$8 sps:$4 sm:$0xff]   ;;  %v10565_v60 = vld [vmem:[%s12401_s26 + $0x1f0] ss:$8 sps:$4 sm:$0xff]  }
 0x16c   : > { %4653 = vmatmul.mubr.bf16.gmra.mrb[4].mxu1 %v9125_v43  ;;  %v12597_v43 = vcombine.low %v12535_v56, %v12535_v56 }
 0x16d   : > { %6909 = vmatmul.mubr.bf16.gmra.mrb[4].mxu0 %v6697_v14  ;;  %4906 = vmatpush1.bf16.msra.mxu1 %v10485_v27  ;;  %v10524_v14 = vld [vmem:[%s12401_s26 + $0x980] ss:$8 sps:$4 sm:$0xff]   ;;  %v10544_v27 = vld [vmem:[%s12401_s26 + $0x9b4] ss:$8 sps:$4 sm:$0xff]  }
 0x16e   : > { %7166 = vmatpush1.bf16.msra.mxu0 %v10488_v28  ;;  %4907 = vmatprep.subr.bf16.mxu1 %v10493_v29  ;;  %v10539_v28 = vld [vmem:[%s12401_s26 + $0x1b0] ss:$8 sps:$4 sm:$0xff]  }
 0x16f   : > { %7167 = vmatprep.subr.bf16.mxu0 %v10496_v30  ;;  %4933 = vmatprep.mubr.bf16.mxu1 %v4730_v9  ;;  %v10542_v29 = vld [vmem:[%s12401_s26 + $0x9b0] ss:$8 sps:$4 sm:$0xff]   ;;  %v10547_v30 = vld [vmem:[%s12401_s26 + $0x1c4] ss:$8 sps:$4 sm:$0xff]   ;;  %v10578_v9 = vld [vmem:[%s12401_s26 + $0xa00] ss:$8 sps:$4 sm:$0xff]  }
 0x170   : > { %7193 = vmatprep.mubr.bf16.mxu0 %v6996_v19  ;;  %v4731_v19 = vshrl.u32 %v12597_v43, 16 }
 0x171   : > { %4908 = vmatpush1.bf16.msra.mxu1 %v10491_v31  ;;  %v10550_v31 = vld [vmem:[%s12401_s26 + $0x9c4] ss:$8 sps:$4 sm:$0xff]  }
 0x172   : > { %7168 = vmatpush1.bf16.msra.mxu0 %v10494_v32  ;;  %4909 = vmatprep.subr.bf16.mxu1 %v10499_v33  ;;  %v10545_v32 = vld [vmem:[%s12401_s26 + $0x1c0] ss:$8 sps:$4 sm:$0xff]  }
 0x173   : > { %7169 = vmatprep.subr.bf16.mxu0 %v10502_v34  ;;  %v10548_v33 = vld [vmem:[%s12401_s26 + $0x9c0] ss:$8 sps:$4 sm:$0xff]   ;;  %v10553_v34 = vld [vmem:[%s12401_s26 + $0x1d4] ss:$8 sps:$4 sm:$0xff]  }
 0x175   : > { %4910 = vmatpush1.bf16.msra.mxu1 %v10497_v35  ;;  %v12586_v35 = vcombine.low %v12544_v61, %v12544_v61 }
 0x176   : > { %7170 = vmatpush1.bf16.msra.mxu0 %v10500_v36  ;;  %4911 = vmatprep.subr.bf16.mxu1 %v10505_v38  ;;  %v10556_v36 = vld [vmem:[%s12401_s26 + $0x9d4] ss:$8 sps:$4 sm:$0xff]   ;;  %v6964_v38 = vshrl.u32 %v12489_v7, 16 }
 0x177   : > { %7171 = vmatprep.subr.bf16.mxu0 %v10508_v39  ;;  %v10551_v39 = vld [vmem:[%s12401_s26 + $0x1d0] ss:$8 sps:$4 sm:$0xff]  }
 0x179   : > { %4912 = vmatpush1.bf16.msra.mxu1 %v10503_v41  ;;  %v6967_v41 = vshll.u32 %v12489_v7, 16  ;;  %v4712_v7 = vrot.slane %v4710_v37, 1  ;;  %v10604_v37 = vld [vmem:[%s12401_s26 + $0xa44] ss:$8 sps:$4 sm:$0xff]  }
 0x17a   : > { %7172 = vmatpush1.bf16.msra.mxu0 %v10506_v44  ;;  %4913 = vmatprep.subr.bf16.mxu1 %v10511_v45  ;;  %v6972_v44 = vshrl.u32 %v12586_v35, 16  ;;  %v6975_v45 = vshll.u32 %v12586_v35, 16 }
 0x17b   : > { %7173 = vmatprep.subr.bf16.mxu0 %v10514_v46  ;;  %v10563_v46 = vld [vmem:[%s12401_s26 + $0x9e4] ss:$8 sps:$4 sm:$0xff]   ;;  %v6969_v56 = vrot.slane %v6967_v41, 3  ;;  %v4713_v0 = vor.u32 %v4712_v7, %v4708_v47  ;;  %v10610_v41 = vld [vmem:[%s12401_s26 + $0xa54] ss:$8 sps:$4 sm:$0xff]  }
 0x17c   : > { %v10611_v47 = vld [vmem:[%s12401_s26 + $0x260] ss:$8 sps:$4 sm:$0xff]  }
 0x17d   : > { %4914 = vmatpush1.bf16.msra.mxu1 %v10509_v54  ;;  %v6966_v54 = vrot.slane %v6964_v38, 2  ;;  %v10599_v38 = vld [vmem:[%s12401_s26 + $0x240] ss:$8 sps:$4 sm:$0xff]  }
 0x17e   : > { %7174 = vmatpush1.bf16.msra.mxu0 %v10512_v55  ;;  %4915 = vmatprep.subr.bf16.mxu1 %v10517_v58  ;;  %v4715_v55 = vshll.u32 %v12597_v43, 16  ;;  %v6974_v58 = vrot.slane %v6972_v44, 2  ;;  %v10608_v44 = vld [vmem:[%s12401_s26 + $0xa50] ss:$8 sps:$4 sm:$0xff]   ;;  %v10614_v7 = vld [vmem:[%s12401_s26 + $0xa60] ss:$8 sps:$4 sm:$0xff]  }
 0x17f   : > { %7175 = vmatprep.subr.bf16.mxu0 %v10520_v59  ;;  %v6977_v59 = vrot.slane %v6975_v45, 3  ;;  %v10613_v45 = vld [vmem:[%s12401_s26 + $0x264] ss:$8 sps:$4 sm:$0xff]  }
 0x180   : > { %v4717_v1 = vrot.slane %v4715_v55, 1  ;;  %v10625_v55 = vld [vmem:[%s12401_s26 + $0x284] ss:$8 sps:$4 sm:$0xff]  }
 0x181   : > { %4916 = vmatpush1.bf16.msra.mxu1 %v10515_v57  ;;  %v10568_v57 = vld [vmem:[%s12401_s26 + $0x9f0] ss:$8 sps:$4 sm:$0xff]  }
 0x182   : > { %7176 = vmatpush1.bf16.msra.mxu0 %v10518_v2  ;;  %4917 = vmatprep.subr.bf16.mxu1 %v10523_v3  ;;  %v6970_v2 = vor.u32 %v6969_v56, %v6966_v54  ;;  %v6978_v3 = vor.u32 %v6977_v59, %v6974_v58  ;;  %v4718_v10 = vsel %vm4706_vm1, %v4713_v0, %v4717_v1  ;;  %v10620_v54 = vld [vmem:[%s12401_s26 + $0xa70] ss:$8 sps:$4 sm:$0xff]   ;;  %v10628_v56 = vld [vmem:[%s12401_s26 + $0xa84] ss:$8 sps:$4 sm:$0xff]   ;;  %v10623_v58 = vld [vmem:[%s12401_s26 + $0x280] ss:$8 sps:$4 sm:$0xff]  }
 0x183   : > { %7177 = vmatprep.subr.bf16.mxu0 %v10526_v8  ;;  %v10573_v8 = vld [vmem:[%s12401_s26 + $0x200] ss:$8 sps:$4 sm:$0xff]   ;;  %v10637_v0 = vld [vmem:[%s12401_s26 + $0x2a4] ss:$8 sps:$4 sm:$0xff]  }
 0x184   : > { %v6979_v11 = vsel %vm6962_vm2, %v6970_v2, %v6978_v3  ;;  %v10626_v59 = vld [vmem:[%s12401_s26 + $0xa80] ss:$8 sps:$4 sm:$0xff]  }
 0x185   : > { %4918 = vmatpush1.bf16.msra.mxu1 %v10521_v13  ;;  %v10586_v13 = vld [vmem:[%s12401_s26 + $0xa14] ss:$8 sps:$4 sm:$0xff]   ;;  %v10635_v2 = vld [vmem:[%s12401_s26 + $0x2a0] ss:$8 sps:$4 sm:$0xff]  }
 0x186   : > { %7178 = vmatpush1.bf16.msra.mxu0 %v10524_v14  ;;  %4919 = vmatprep.subr.bf16.mxu1 %v10529_v15  ;;  %v4736_v14 = vor.u32 %v4734_v6, %v12554_v4  ;;  %v10581_v15 = vld [vmem:[%s12401_s26 + $0x210] ss:$8 sps:$4 sm:$0xff]   ;;  %v12633_v4 = vld [vmem:[%s12454_s6 + $0x8] sm:$0x88]  ;;  %v10646_v6 = vld [vmem:[%s12401_s26 + $0xab4] ss:$8 sps:$4 sm:$0xff]  }
 0x187   : > { %7179 = vmatprep.subr.bf16.mxu0 %v10532_v18  ;;  %v10584_v18 = vld [vmem:[%s12401_s26 + $0xa10] ss:$8 sps:$4 sm:$0xff]  }
 0x189   : > { %4920 = vmatpush1.bf16.msra.mxu1 %v10527_v20  ;;  %v12624_v20 = vld [vmem:[%s12454_s6] sm:$0xee] }
 0x18a   : > { %7180 = vmatpush1.bf16.msra.mxu0 %v10530_v21  ;;  %4921 = vmatprep.subr.bf16.mxu1 %v10535_v22  ;;  %v10589_v21 = vld [vmem:[%s12401_s26 + $0x224] ss:$8 sps:$4 sm:$0xff]  }
 0x18b   : > { %7181 = vmatprep.subr.bf16.mxu0 %v10538_v23  ;;  %v10592_v22 = vld [vmem:[%s12401_s26 + $0xa24] ss:$8 sps:$4 sm:$0xff]   ;;  %v12630_v23 = vcombine.high %v12624_v20, %v12460_v49  ;;  %v7261_v49 = vrot.slane %v12550_v63, 3  ;;  %v10695_v63 = vld [vmem:[%s12401_s26 + $0x334] ss:$8 sps:$4 sm:$0xff]  }
 0x18d   : > { %4922 = vmatpush1.bf16.msra.mxu1 %v10533_v24  ;;  %v10587_v24 = vld [vmem:[%s12401_s26 + $0x220] ss:$8 sps:$4 sm:$0xff]  }
 0x18e   : > { %7182 = vmatpush1.bf16.msra.mxu0 %v10536_v25  ;;  %4923 = vmatprep.subr.bf16.mxu1 %v10541_v26  ;;  %v9794_v25 = vcombine.high %v12633_v4, %v12468_v53  ;;  %v4733_v26 = vor.u32 %v4731_v19, %v4717_v1  ;;  %v10598_v53 = vld [vmem:[%s12401_s26 + $0xa34] ss:$8 sps:$4 sm:$0xff]   ;;  %v10640_v1 = vld [vmem:[%s12401_s26 + $0xaa4] ss:$8 sps:$4 sm:$0xff]   ;;  %v10656_v19 = vld [vmem:[%s12401_s26 + $0xad0] ss:$8 sps:$4 sm:$0xff]  }
 0x18f   : > { %7183 = vmatprep.subr.bf16.mxu0 %v10544_v27  ;;  %v5001_v27 = vrot.slane %v12630_v23, 1 }
 0x191   : > { %4924 = vmatpush1.bf16.msra.mxu1 %v10539_v28  ;;  %v5002_v28 = vrot.slane %v12540_v52, 1  ;;  %v10690_v52 = vld [vmem:[%s12401_s26 + $0xb20] ss:$8 sps:$4 sm:$0xff]  }
 0x192   : > { %7184 = vmatpush1.bf16.msra.mxu0 %v10542_v29  ;;  %4925 = vmatprep.subr.bf16.mxu1 %v10547_v30  ;;  %v10590_v29 = vld [vmem:[%s12401_s26 + $0xa20] ss:$8 sps:$4 sm:$0xff]   ;;  %v10595_v30 = vld [vmem:[%s12401_s26 + $0x234] ss:$8 sps:$4 sm:$0xff]  }
 0x193   : > { %7185 = vmatprep.subr.bf16.mxu0 %v10550_v31  ;;  %v10593_v31 = vld [vmem:[%s12401_s26 + $0x230] ss:$8 sps:$4 sm:$0xff]  }
 0x195   : > { %4926 = vmatpush1.bf16.msra.mxu1 %v10545_v32  ;;  %v5003_v32 = vsel %vm4997_vm3, %v5001_v27, %v5002_v28  ;;  %v12701_v27 = vld [vmem:[%s12454_s6 + $0x8] sm:$0x88] }
 0x196   : > { %7186 = vmatpush1.bf16.msra.mxu0 %v10548_v33  ;;  %4927 = vmatprep.subr.bf16.mxu1 %v10553_v34  ;;  %v10596_v34 = vld [vmem:[%s12401_s26 + $0xa30] ss:$8 sps:$4 sm:$0xff]  }
 0x197   : > { %7187 = vmatprep.subr.bf16.mxu0 %v10556_v36  ;;  %v10601_v36 = vld [vmem:[%s12401_s26 + $0x244] ss:$8 sps:$4 sm:$0xff]  }
 0x199   : > { %4928 = vmatpush1.bf16.msra.mxu1 %v10551_v39  ;;  %v10602_v39 = vld [vmem:[%s12401_s26 + $0xa40] ss:$8 sps:$4 sm:$0xff]  }
 0x19a   : > { %7188 = vmatpush1.bf16.msra.mxu0 %v10554_v40  ;;  %4929 = vmatprep.subr.bf16.mxu1 %v10560_v42  ;;  %v10607_v40 = vld [vmem:[%s12401_s26 + $0x254] ss:$8 sps:$4 sm:$0xff]   ;;  %v10605_v42 = vld [vmem:[%s12401_s26 + $0x250] ss:$8 sps:$4 sm:$0xff]  }
 0x19b   : > { %7189 = vmatprep.subr.bf16.mxu0 %v10563_v46  ;;  %v10616_v46 = vld [vmem:[%s12401_s26 + $0xa64] ss:$8 sps:$4 sm:$0xff]  }
 0x19d   : > { %4930 = vmatpush1.bf16.msra.mxu1 %v10558_v48  ;;  %v10619_v48 = vld [vmem:[%s12401_s26 + $0x274] ss:$8 sps:$4 sm:$0xff]  }
 0x19e   : > { %7190 = vmatpush1.bf16.msra.mxu0 %v10561_v50  ;;  %4931 = vmatprep.subr.bf16.mxu1 %v10567_v51  ;;  %v10622_v50 = vld [vmem:[%s12401_s26 + $0xa74] ss:$8 sps:$4 sm:$0xff]   ;;  %v10617_v51 = vld [vmem:[%s12401_s26 + $0x270] ss:$8 sps:$4 sm:$0xff]  }
 0x19f   : > { %7191 = vmatprep.subr.bf16.mxu0 %v10570_v17  ;;  %v10631_v17 = vld [vmem:[%s12401_s26 + $0x294] ss:$8 sps:$4 sm:$0xff]  }
 0x1a1   : > { %4932 = vmatpush1.bf16.msra.mxu1 %v10565_v60  ;;  %v10634_v60 = vld [vmem:[%s12401_s26 + $0xa94] ss:$8 sps:$4 sm:$0xff]  }
 0x1a2   : > { %7192 = vmatpush1.bf16.msra.mxu0 %v10568_v57  ;;  %5168 = vmatprep.subr.bf16.mxu1 %v10575_v62  ;;  %v10629_v57 = vld [vmem:[%s12401_s26 + $0x290] ss:$8 sps:$4 sm:$0xff]  }
 0x1a3   : > { %7427 = vmatprep.subr.bf16.mxu0 %v10580_v5  ;;  %v10632_v62 = vld [vmem:[%s12401_s26 + $0xa90] ss:$8 sps:$4 sm:$0xff]   ;;  %v10643_v5 = vld [vmem:[%s12401_s26 + $0x2b4] ss:$8 sps:$4 sm:$0xff]  }
 0x1a4   : > { %4934 = vmatmul.mubr.bf16.vlgmr.msra.gmra.mrb[0].mxu1 %v4718_v10  ;;  %v10649_v10 = vld [vmem:[%s12401_s26 + $0x2c4] ss:$8 sps:$4 sm:$0xff]  }
 0x1a5   : > { %7194 = vmatmul.mubr.bf16.vlgmr.msra.gmra.mrb[0].mxu0 %v6979_v11  ;;  %5169 = vmatpush1.bf16.msra.mxu1 %v10573_v8  ;;  %v10641_v8 = vld [vmem:[%s12401_s26 + $0x2b0] ss:$8 sps:$4 sm:$0xff]   ;;  %v10652_v11 = vld [vmem:[%s12401_s26 + $0xac4] ss:$8 sps:$4 sm:$0xff]  }
 0x1a6   : > { %7428 = vmatpush1.bf16.msra.mxu0 %v10578_v9  ;;  %5170 = vmatprep.subr.bf16.mxu1 %v10583_v12  ;;  %v10644_v9 = vld [vmem:[%s12401_s26 + $0xab0] ss:$8 sps:$4 sm:$0xff]   ;;  %v10647_v12 = vld [vmem:[%s12401_s26 + $0x2c0] ss:$8 sps:$4 sm:$0xff]  }
 0x1a7   : > { %7429 = vmatprep.subr.bf16.mxu0 %v10586_v13  ;;  %4943 = vmatprep.mubr.bf16.mxu1 %v4736_v14  ;;  %v10650_v13 = vld [vmem:[%s12401_s26 + $0xac0] ss:$8 sps:$4 sm:$0xff]   ;;  %v10655_v14 = vld [vmem:[%s12401_s26 + $0x2d4] ss:$8 sps:$4 sm:$0xff]  }
 0x1a8   : > { %7203 = vmatprep.mubr.bf16.mxu0 %v12564_v16  ;;  %v7260_v16 = vrot.slane %v9794_v25, 3  ;;  %v10662_v25 = vld [vmem:[%s12401_s26 + $0xae0] ss:$8 sps:$4 sm:$0xff]  }
 0x1a9   : > { %5171 = vmatpush1.bf16.msra.mxu1 %v10581_v15  ;;  %v10658_v15 = vld [vmem:[%s12401_s26 + $0xad4] ss:$8 sps:$4 sm:$0xff]  }
 0x1aa   : > { %7430 = vmatpush1.bf16.msra.mxu0 %v10584_v18  ;;  %5172 = vmatprep.subr.bf16.mxu1 %v10589_v21  ;;  %v7262_v33 = vsel %vm5565_vm4, %v7260_v16, %v7261_v49  ;;  %v10653_v18 = vld [vmem:[%s12401_s26 + $0x2d0] ss:$8 sps:$4 sm:$0xff]   ;;  %v10661_v21 = vld [vmem:[%s12401_s26 + $0x2e4] ss:$8 sps:$4 sm:$0xff]  }
 0x1ab   : > { %7431 = vmatprep.subr.bf16.mxu0 %v10592_v22  ;;  %v10664_v22 = vld [vmem:[%s12401_s26 + $0xae4] ss:$8 sps:$4 sm:$0xff]  }
 0x1ac   : > { %4944 = vmatmul.mubr.bf16.gmra.mrb[4].mxu1 %v4733_v26  ;;  %v12698_v26 = vld [vmem:[%s12454_s6 + $0x10] sm:$0x77] }
 0x1ad   : > { %7204 = vmatmul.mubr.bf16.gmra.mrb[4].mxu0 %v6978_v3  ;;  %5173 = vmatpush1.bf16.msra.mxu1 %v10587_v24  ;;  %v10638_v3 = vld [vmem:[%s12401_s26 + $0xaa0] ss:$8 sps:$4 sm:$0xff]  }
 0x1ae   : > { %7432 = vmatpush1.bf16.msra.mxu0 %v10590_v29  ;;  %5174 = vmatprep.subr.bf16.mxu1 %v10595_v30  ;;  %v10659_v24 = vld [vmem:[%s12401_s26 + $0x2e0] ss:$8 sps:$4 sm:$0xff]   ;;  %v12704_v29 = vld [vmem:[%s12454_s6 + $0x10] sm:$0xff] }
 0x1af   : > { %7433 = vmatprep.subr.bf16.mxu0 %v10598_v53  ;;  %5200 = vmatprep.mubr.bf16.mxu1 %v5003_v32  ;;  %v12707_v30 = vld [vmem:[%s12454_s6 + $0x8] sm:$0xff]  ;;  %v11186_v53 = vld [vmem:[%s12454_s6 + $0x10] sm:$0xff]  ;;  %v12716_v32 = vld [vmem:[%s12454_s6 + $0x20] sm:$0x11] }
 0x1b0   : > { %7459 = vmatprep.mubr.bf16.mxu0 %v7262_v33  ;;  %v12711_v16 = vcombine.low %v12624_v20, %v12707_v30  ;;  %v10667_v33 = vld [vmem:[%s12401_s26 + $0x2f4] ss:$8 sps:$4 sm:$0xff]   ;;  %v9860_v20 = vcombine.high %v12701_v27, %v12704_v29 }
 0x1b1   : > { %5175 = vmatpush1.bf16.msra.mxu1 %v10593_v31  ;;  %v9793_v31 = vcombine.low %v12633_v4, %v11186_v53  ;;  %v9862_v4 = vcombine.high %v12544_v61, %v12716_v32  ;;  %v10710_v53 = vld [vmem:[%s12401_s26 + $0xb54] ss:$8 sps:$4 sm:$0xff]  }
 0x1b2   : > { %7434 = vmatpush1.bf16.msra.mxu0 %v10596_v34  ;;  %5176 = vmatprep.subr.bf16.mxu1 %v10601_v36  ;;  %v10670_v34 = vld [vmem:[%s12401_s26 + $0xaf4] ss:$8 sps:$4 sm:$0xff]   ;;  %v9324_v36 = vcombine.high %v12698_v26, %v12698_v26 }
 0x1b3   : > { %7435 = vmatprep.subr.bf16.mxu0 %v10604_v37  ;;  %v10665_v37 = vld [vmem:[%s12401_s26 + $0x2f0] ss:$8 sps:$4 sm:$0xff]  }
 0x1b4   : > { %v5291_v61 = vshrl.u32 %v9324_v36, 16 }
 0x1b5   : > { %5177 = vmatpush1.bf16.msra.mxu1 %v10599_v38  ;;  %v4999_v38 = vrot.slane %v12597_v43, 1  ;;  %v10701_v43 = vld [vmem:[%s12401_s26 + $0x344] ss:$8 sps:$4 sm:$0xff]  }
 0x1b6   : > { %7436 = vmatpush1.bf16.msra.mxu0 %v10602_v39  ;;  %5178 = vmatprep.subr.bf16.mxu1 %v10607_v40  ;;  %v10668_v39 = vld [vmem:[%s12401_s26 + $0xaf0] ss:$8 sps:$4 sm:$0xff]   ;;  %v7257_v40 = vrot.slane %v9793_v31, 3 }
 0x1b7   : > { %7437 = vmatprep.subr.bf16.mxu0 %v10610_v41  ;;  %v4998_v41 = vrot.slane %v12711_v16, 1  ;;  %v10705_v31 = vld [vmem:[%s12401_s26 + $0x350] ss:$8 sps:$4 sm:$0xff]  }
 0x1b9   : > { %5179 = vmatpush1.bf16.msra.mxu1 %v10605_v42  ;;  %v7258_v42 = vrot.slane %v12586_v35, 3  ;;  %v10673_v35 = vld [vmem:[%s12401_s26 + $0x300] ss:$8 sps:$4 sm:$0xff]  }
 0x1ba   : > { %7438 = vmatpush1.bf16.msra.mxu0 %v10608_v44  ;;  %5180 = vmatprep.subr.bf16.mxu1 %v10613_v45  ;;  %v10675_v44 = vld [vmem:[%s12401_s26 + $0x304] ss:$8 sps:$4 sm:$0xff]  }
 0x1bb   : > { %7439 = vmatprep.subr.bf16.mxu0 %v10616_v46  ;;  %v10680_v45 = vld [vmem:[%s12401_s26 + $0xb04] ss:$8 sps:$4 sm:$0xff]   ;;  %v5283_v46 = vshrl.u32 %v12630_v23, 16 }
 0x1bd   : > { %5181 = vmatpush1.bf16.msra.mxu1 %v10611_v47  ;;  %v5286_v47 = vshll.u32 %v12630_v23, 16  ;;  %v10683_v23 = vld [vmem:[%s12401_s26 + $0x314] ss:$8 sps:$4 sm:$0xff]  }
 0x1be   : > { %7440 = vmatpush1.bf16.msra.mxu0 %v10614_v7  ;;  %5182 = vmatprep.subr.bf16.mxu1 %v10619_v48  ;;  %v5294_v7 = vshll.u32 %v9324_v36, 16  ;;  %v7555_v48 = vshrl.u32 %v9860_v20, 16  ;;  %v10716_v36 = vld [vmem:[%s12401_s26 + $0xb64] ss:$8 sps:$4 sm:$0xff]  }
 0x1bf   : > { %7441 = vmatprep.subr.bf16.mxu0 %v10622_v50  ;;  %v7558_v50 = vshll.u32 %v9860_v20, 16  ;;  %v10719_v20 = vld [vmem:[%s12401_s26 + $0x374] ss:$8 sps:$4 sm:$0xff]  }
 0x1c1   : > { %5183 = vmatpush1.bf16.msra.mxu1 %v10617_v51  ;;  %v7563_v51 = vshrl.u32 %v9862_v4, 16 }
 0x1c2   : > { %7442 = vmatpush1.bf16.msra.mxu0 %v10620_v54  ;;  %5184 = vmatprep.subr.bf16.mxu1 %v10625_v55  ;;  %v7566_v54 = vshll.u32 %v9862_v4, 16  ;;  %v10678_v55 = vld [vmem:[%s12401_s26 + $0xb00] ss:$8 sps:$4 sm:$0xff]   ;;  %v10722_v4 = vld [vmem:[%s12401_s26 + $0xb74] ss:$8 sps:$4 sm:$0xff]  }
 0x1c3   : > { %7443 = vmatprep.subr.bf16.mxu0 %v10628_v56  ;;  %v5000_v56 = vsel %vm4997_vm3, %v4998_v41, %v4999_v38  ;;  %v10725_v41 = vld [vmem:[%s12401_s26 + $0x384] ss:$8 sps:$4 sm:$0xff]  }
 0x1c5   : > { %5185 = vmatpush1.bf16.msra.mxu1 %v10623_v58  ;;  %v7259_v58 = vsel %vm5565_vm4, %v7257_v40, %v7258_v42  ;;  %v10720_v40 = vld [vmem:[%s12401_s26 + $0xb70] ss:$8 sps:$4 sm:$0xff]  }
 0x1c6   : > { %7444 = vmatpush1.bf16.msra.mxu0 %v10626_v59  ;;  %5186 = vmatprep.subr.bf16.mxu1 %v10631_v17  ;;  %v10686_v59 = vld [vmem:[%s12401_s26 + $0xb14] ss:$8 sps:$4 sm:$0xff]   ;;  %v5285_v17 = vrot.slane %v5283_v46, 1 }
 0x1c7   : > { %7445 = vmatprep.subr.bf16.mxu0 %v10634_v60  ;;  %v5288_v60 = vrot.slane %v5286_v47, 2  ;;  %v10731_v46 = vld [vmem:[%s12401_s26 + $0x394] ss:$8 sps:$4 sm:$0xff]  }
 0x1c8   : > { %v10734_v47 = vld [vmem:[%s12401_s26 + $0xb94] ss:$8 sps:$4 sm:$0xff]  }
 0x1c9   : > { %5187 = vmatpush1.bf16.msra.mxu1 %v10629_v57  ;;  %v5293_v57 = vrot.slane %v5291_v61, 1  ;;  %v10729_v61 = vld [vmem:[%s12401_s26 + $0x390] ss:$8 sps:$4 sm:$0xff]  }
 0x1ca   : > { %7446 = vmatpush1.bf16.msra.mxu0 %v10632_v62  ;;  %5188 = vmatprep.subr.bf16.mxu1 %v10637_v0  ;;  %v5296_v62 = vrot.slane %v5294_v7, 2  ;;  %v7557_v0 = vrot.slane %v7555_v48, 3  ;;  %v10732_v7 = vld [vmem:[%s12401_s26 + $0xb90] ss:$8 sps:$4 sm:$0xff]   ;;  %v10737_v48 = vld [vmem:[%s12401_s26 + $0x3a4] ss:$8 sps:$4 sm:$0xff]  }
 0x1cb   : > { %7447 = vmatprep.subr.bf16.mxu0 %v10640_v1  ;;  %v7560_v1 = vrot.slane %v7558_v50, 4  ;;  %v10740_v50 = vld [vmem:[%s12401_s26 + $0xba4] ss:$8 sps:$4 sm:$0xff]  }
 0x1cd   : > { %5189 = vmatpush1.bf16.msra.mxu1 %v10635_v2  ;;  %v7565_v2 = vrot.slane %v7563_v51, 3  ;;  %v10735_v51 = vld [vmem:[%s12401_s26 + $0x3a0] ss:$8 sps:$4 sm:$0xff]  }
 0x1ce   : > { %7448 = vmatpush1.bf16.msra.mxu0 %v10638_v3  ;;  %5190 = vmatprep.subr.bf16.mxu1 %v10643_v5  ;;  %v7568_v3 = vrot.slane %v7566_v54, 4  ;;  %v10681_v5 = vld [vmem:[%s12401_s26 + $0x310] ss:$8 sps:$4 sm:$0xff]   ;;  %v10738_v54 = vld [vmem:[%s12401_s26 + $0xba0] ss:$8 sps:$4 sm:$0xff]  }
 0x1cf   : > { %7449 = vmatprep.subr.bf16.mxu0 %v10646_v6  ;;  %v10684_v6 = vld [vmem:[%s12401_s26 + $0xb10] ss:$8 sps:$4 sm:$0xff]  }
 0x1d1   : > { %5191 = vmatpush1.bf16.msra.mxu1 %v10641_v8  ;;  %v10689_v8 = vld [vmem:[%s12401_s26 + $0x324] ss:$8 sps:$4 sm:$0xff]  }
 0x1d2   : > { %7450 = vmatpush1.bf16.msra.mxu0 %v10644_v9  ;;  %5192 = vmatprep.subr.bf16.mxu1 %v10649_v10  ;;  %v10692_v9 = vld [vmem:[%s12401_s26 + $0xb24] ss:$8 sps:$4 sm:$0xff]   ;;  %v5289_v10 = vor.u32 %v5288_v60, %v5285_v17  ;;  %v9323_v17 = vcombine.low %v12698_v26, %v12698_v26  ;;  %v10747_v60 = vld [vmem:[%s12401_s26 + $0x3c0] ss:$8 sps:$4 sm:$0xff]   ;;  %v5266_v26 = vshrl.u32 %v12711_v16, 16 }
 0x1d3   : > { %7451 = vmatprep.subr.bf16.mxu0 %v10652_v11  ;;  %v12751_v11 = vor.u32 %v5296_v62, %v5293_v57  ;;  %v10750_v57 = vld [vmem:[%s12401_s26 + $0xbc0] ss:$8 sps:$4 sm:$0xff]   ;;  %v9859_v62 = vcombine.low %v12701_v27, %v12704_v29 }
 0x1d4   : > { %v5274_v27 = vshrl.u32 %v9323_v17, 16 }
 0x1d5   : > { %5193 = vmatpush1.bf16.msra.mxu1 %v10647_v12  ;;  %v7561_v12 = vor.u32 %v7560_v1, %v7557_v0  ;;  %v12808_v0 = vld [vmem:[%s12454_s6 + $0x18] sm:$0xff] }
 0x1d6   : > { %7452 = vmatpush1.bf16.msra.mxu0 %v10650_v13  ;;  %5194 = vmatprep.subr.bf16.mxu1 %v10655_v14  ;;  %v12753_v13 = vor.u32 %v7568_v3, %v7565_v2  ;;  %v10687_v14 = vld [vmem:[%s12401_s26 + $0x320] ss:$8 sps:$4 sm:$0xff]   ;;  %v9861_v1 = vcombine.low %v12808_v0, %v12716_v32  ;;  %v10755_v2 = vld [vmem:[%s12401_s26 + $0x3d4] ss:$8 sps:$4 sm:$0xff]   ;;  %v7541_v32 = vshll.u32 %v9859_v62, 16 }
 0x1d7   : > { %7453 = vmatprep.subr.bf16.mxu0 %v10658_v15  ;;  %v10758_v3 = vld [vmem:[%s12401_s26 + $0xbd4] ss:$8 sps:$4 sm:$0xff]  }
 0x1d8   : > { %v7570_v15 = vsel %vm5846_vm6, %v7561_v12, %v12753_v13  ;;  %v7546_v12 = vshrl.u32 %v9861_v1, 16 }
 0x1d9   : > { %5195 = vmatpush1.bf16.msra.mxu1 %v10653_v18  ;;  %v10693_v18 = vld [vmem:[%s12401_s26 + $0x330] ss:$8 sps:$4 sm:$0xff]  }
 0x1da   : > { %7454 = vmatpush1.bf16.msra.mxu0 %v10656_v19  ;;  %5196 = vmatprep.subr.bf16.mxu1 %v10661_v21  ;;  %v10696_v19 = vld [vmem:[%s12401_s26 + $0xb30] ss:$8 sps:$4 sm:$0xff]   ;;  %v10704_v21 = vld [vmem:[%s12401_s26 + $0xb44] ss:$8 sps:$4 sm:$0xff]  }
 0x1db   : > { %7455 = vmatprep.subr.bf16.mxu0 %v10664_v22  ;;  %v10699_v22 = vld [vmem:[%s12401_s26 + $0x340] ss:$8 sps:$4 sm:$0xff]  }
 0x1dd   : > { %5197 = vmatpush1.bf16.msra.mxu1 %v10659_v24  ;;  %v10702_v24 = vld [vmem:[%s12401_s26 + $0xb40] ss:$8 sps:$4 sm:$0xff]  }
 0x1de   : > { %7456 = vmatpush1.bf16.msra.mxu0 %v10662_v25  ;;  %5198 = vmatprep.subr.bf16.mxu1 %v10667_v33  ;;  %v10707_v25 = vld [vmem:[%s12401_s26 + $0x354] ss:$8 sps:$4 sm:$0xff]   ;;  %v10708_v33 = vld [vmem:[%s12401_s26 + $0xb50] ss:$8 sps:$4 sm:$0xff]  }
 0x1df   : > { %7457 = vmatprep.subr.bf16.mxu0 %v10670_v34  ;;  %v10713_v34 = vld [vmem:[%s12401_s26 + $0x364] ss:$8 sps:$4 sm:$0xff]  }
 0x1e1   : > { %5199 = vmatpush1.bf16.msra.mxu1 %v10665_v37  ;;  %v10711_v37 = vld [vmem:[%s12401_s26 + $0x360] ss:$8 sps:$4 sm:$0xff]  }
 0x1e2   : > { %7458 = vmatpush1.bf16.msra.mxu0 %v10668_v39  ;;  %5463 = vmatprep.subr.bf16.mxu1 %v10675_v44  ;;  %v10717_v39 = vld [vmem:[%s12401_s26 + $0x370] ss:$8 sps:$4 sm:$0xff]   ;;  %v10723_v44 = vld [vmem:[%s12401_s26 + $0x380] ss:$8 sps:$4 sm:$0xff]  }
 0x1e3   : > { %7735 = vmatprep.subr.bf16.mxu0 %v10680_v45  ;;  %v10726_v45 = vld [vmem:[%s12401_s26 + $0xb80] ss:$8 sps:$4 sm:$0xff]  }
 0x1e4   : > { %5201 = vmatmul.mubr.bf16.vlgmr.msra.gmra.mrb[0].mxu1 %v5000_v56  ;;  %v10741_v56 = vld [vmem:[%s12401_s26 + $0x3b0] ss:$8 sps:$4 sm:$0xff]  }
 0x1e5   : > { %7460 = vmatmul.mubr.bf16.vlgmr.msra.gmra.mrb[0].mxu0 %v7259_v58  ;;  %5464 = vmatpush1.bf16.msra.mxu1 %v10673_v35  ;;  %v10743_v35 = vld [vmem:[%s12401_s26 + $0x3b4] ss:$8 sps:$4 sm:$0xff]   ;;  %v10744_v58 = vld [vmem:[%s12401_s26 + $0xbb0] ss:$8 sps:$4 sm:$0xff]  }
 0x1e6   : > { %7736 = vmatpush1.bf16.msra.mxu0 %v10678_v55  ;;  %5465 = vmatprep.subr.bf16.mxu1 %v10683_v23  ;;  %v10746_v55 = vld [vmem:[%s12401_s26 + $0xbb4] ss:$8 sps:$4 sm:$0xff]   ;;  %v10749_v23 = vld [vmem:[%s12401_s26 + $0x3c4] ss:$8 sps:$4 sm:$0xff]  }
 0x1e7   : > { %7737 = vmatprep.subr.bf16.mxu0 %v10686_v59  ;;  %5210 = vmatprep.mubr.bf16.mxu1 %v5002_v28  ;;  %v10698_v28 = vld [vmem:[%s12401_s26 + $0xb34] ss:$8 sps:$4 sm:$0xff]   ;;  %v10752_v59 = vld [vmem:[%s12401_s26 + $0xbc4] ss:$8 sps:$4 sm:$0xff]  }
 0x1e8   : > { %7469 = vmatprep.mubr.bf16.mxu0 %v7261_v49  ;;  %v5298_v49 = vsel %vm5264_vm5, %v5289_v10, %v12751_v11  ;;  %v7538_v10 = vshrl.u32 %v9859_v62, 16 }
 0x1e9   : > { %5466 = vmatpush1.bf16.msra.mxu1 %v10681_v5  ;;  %v10753_v5 = vld [vmem:[%s12401_s26 + $0x3d0] ss:$8 sps:$4 sm:$0xff]  }
 0x1ea   : > { %7738 = vmatpush1.bf16.msra.mxu0 %v10684_v6  ;;  %5467 = vmatprep.subr.bf16.mxu1 %v10689_v8  ;;  %v5269_v6 = vshll.u32 %v12711_v16, 16  ;;  %v10756_v8 = vld [vmem:[%s12401_s26 + $0xbd0] ss:$8 sps:$4 sm:$0xff]   ;;  %v10762_v16 = vld [vmem:[%s12401_s26 + $0xbe0] ss:$8 sps:$4 sm:$0xff]  }
 0x1eb   : > { %7739 = vmatprep.subr.bf16.mxu0 %v10692_v9  ;;  %v5277_v9 = vshll.u32 %v9323_v17, 16  ;;  %v10792_v17 = vld [vmem:[%s12401_s26 + $0xc20] ss:$8 sps:$4 sm:$0xff]  }
 0x1ec   : > { %5211 = vmatmul.mubr.bf16.gmra.mrb[4].mxu1 %v4999_v38  ;;  %v10714_v38 = vld [vmem:[%s12401_s26 + $0xb60] ss:$8 sps:$4 sm:$0xff]  }
 0x1ed   : > { %7470 = vmatmul.mubr.bf16.gmra.mrb[4].mxu0 %v7258_v42  ;;  %5468 = vmatpush1.bf16.msra.mxu1 %v10687_v14  ;;  %v10728_v42 = vld [vmem:[%s12401_s26 + $0xb84] ss:$8 sps:$4 sm:$0xff]   ;;  %v7549_v14 = vshll.u32 %v9861_v1, 16  ;;  %v10798_v1 = vld [vmem:[%s12401_s26 + $0xc30] ss:$8 sps:$4 sm:$0xff]  }
 0x1ee   : > { %7740 = vmatpush1.bf16.msra.mxu0 %v10690_v52  ;;  %5469 = vmatprep.subr.bf16.mxu1 %v10695_v63  ;;  %v10761_v52 = vld [vmem:[%s12401_s26 + $0x3e4] ss:$8 sps:$4 sm:$0xff]  }
 0x1ef   : > { %7741 = vmatprep.subr.bf16.mxu0 %v10698_v28  ;;  %5495 = vmatprep.mubr.bf16.mxu1 %v5298_v49  ;;  %v10764_v63 = vld [vmem:[%s12401_s26 + $0xbe4] ss:$8 sps:$4 sm:$0xff]   ;;  %v10759_v28 = vld [vmem:[%s12401_s26 + $0x3e0] ss:$8 sps:$4 sm:$0xff]   ;;  %v5268_v49 = vrot.slane %v5266_v26, 1 }
 0x1f0   : > { %7767 = vmatprep.mubr.bf16.mxu0 %v7570_v15  ;;  %v5271_v15 = vrot.slane %v5269_v6, 2  ;;  %v10804_v26 = vld [vmem:[%s12401_s26 + $0xc40] ss:$8 sps:$4 sm:$0xff]   ;;  %v10809_v6 = vld [vmem:[%s12401_s26 + $0x454] ss:$8 sps:$4 sm:$0xff]  }
 0x1f1   : > { %5470 = vmatpush1.bf16.msra.mxu1 %v10693_v18  ;;  %v5276_v18 = vrot.slane %v5274_v27, 1  ;;  %v10807_v27 = vld [vmem:[%s12401_s26 + $0x450] ss:$8 sps:$4 sm:$0xff]  }
 0x1f2   : > { %7742 = vmatpush1.bf16.msra.mxu0 %v10696_v19  ;;  %5471 = vmatprep.subr.bf16.mxu1 %v10701_v43  ;;  %v5279_v19 = vrot.slane %v5277_v9, 2  ;;  %v7540_v43 = vrot.slane %v7538_v10, 3  ;;  %v10810_v9 = vld [vmem:[%s12401_s26 + $0xc50] ss:$8 sps:$4 sm:$0xff]   ;;  %v10815_v10 = vld [vmem:[%s12401_s26 + $0x464] ss:$8 sps:$4 sm:$0xff]  }
 0x1f3   : > { %7743 = vmatprep.subr.bf16.mxu0 %v10704_v21  ;;  %v7543_v21 = vrot.slane %v7541_v32, 4  ;;  %v10818_v32 = vld [vmem:[%s12401_s26 + $0xc64] ss:$8 sps:$4 sm:$0xff]  }
 0x1f5   : > { %5472 = vmatpush1.bf16.msra.mxu1 %v10699_v22  ;;  %v7548_v22 = vrot.slane %v7546_v12, 3  ;;  %v10813_v12 = vld [vmem:[%s12401_s26 + $0x460] ss:$8 sps:$4 sm:$0xff]  }
 0x1f6   : > { %7744 = vmatpush1.bf16.msra.mxu0 %v10702_v24  ;;  %5473 = vmatprep.subr.bf16.mxu1 %v10707_v25  ;;  %v7551_v24 = vrot.slane %v7549_v14, 4  ;;  %v10767_v25 = vld [vmem:[%s12401_s26 + $0x3f4] ss:$8 sps:$4 sm:$0xff]   ;;  %v10816_v14 = vld [vmem:[%s12401_s26 + $0xc60] ss:$8 sps:$4 sm:$0xff]  }
 0x1f7   : > { %7745 = vmatprep.subr.bf16.mxu0 %v10710_v53  ;;  %v10770_v53 = vld [vmem:[%s12401_s26 + $0xbf4] ss:$8 sps:$4 sm:$0xff]  }
 0x1f9   : > { %5474 = vmatpush1.bf16.msra.mxu1 %v10705_v31  ;;  %v5272_v31 = vor.u32 %v5271_v15, %v5268_v49  ;;  %v10822_v49 = vld [vmem:[%s12401_s26 + $0xc70] ss:$8 sps:$4 sm:$0xff]   ;;  %v10827_v15 = vld [vmem:[%s12401_s26 + $0x484] ss:$8 sps:$4 sm:$0xff]  }
 0x1fa   : > { %7746 = vmatpush1.bf16.msra.mxu0 %v10708_v33  ;;  %5475 = vmatprep.subr.bf16.mxu1 %v10713_v34  ;;  %v10765_v33 = vld [vmem:[%s12401_s26 + $0x3f0] ss:$8 sps:$4 sm:$0xff]  }
 0x1fb   : > { %7747 = vmatprep.subr.bf16.mxu0 %v10716_v36  ;;  %v10768_v34 = vld [vmem:[%s12401_s26 + $0xbf0] ss:$8 sps:$4 sm:$0xff]   ;;  %v5280_v36 = vor.u32 %v5279_v19, %v5276_v18  ;;  %v10825_v18 = vld [vmem:[%s12401_s26 + $0x480] ss:$8 sps:$4 sm:$0xff]  }
 0x1fc   : > { %v10828_v19 = vld [vmem:[%s12401_s26 + $0xc80] ss:$8 sps:$4 sm:$0xff]  }
 0x1fd   : > { %5476 = vmatpush1.bf16.msra.mxu1 %v10711_v37  ;;  %v7544_v37 = vor.u32 %v7543_v21, %v7540_v43  ;;  %v10833_v43 = vld [vmem:[%s12401_s26 + $0x494] ss:$8 sps:$4 sm:$0xff]  }
 0x1fe   : > { %7748 = vmatpush1.bf16.msra.mxu0 %v10714_v38  ;;  %5477 = vmatprep.subr.bf16.mxu1 %v10719_v20  ;;  %v7552_v38 = vor.u32 %v7551_v24, %v7548_v22  ;;  %v10775_v20 = vld [vmem:[%s12401_s26 + $0x404] ss:$8 sps:$4 sm:$0xff]   ;;  %v10836_v21 = vld [vmem:[%s12401_s26 + $0xc94] ss:$8 sps:$4 sm:$0xff]   ;;  %v10831_v22 = vld [vmem:[%s12401_s26 + $0x490] ss:$8 sps:$4 sm:$0xff]  }
 0x1ff   : > { %7749 = vmatprep.subr.bf16.mxu0 %v10722_v4  ;;  %v10782_v4 = vld [vmem:[%s12401_s26 + $0xc04] ss:$8 sps:$4 sm:$0xff]   ;;  %v10834_v24 = vld [vmem:[%s12401_s26 + $0xc90] ss:$8 sps:$4 sm:$0xff]  }
 0x201   : > { %5478 = vmatpush1.bf16.msra.mxu1 %v10717_v39  ;;  %v10773_v39 = vld [vmem:[%s12401_s26 + $0x400] ss:$8 sps:$4 sm:$0xff]  }
 0x202   : > { %7750 = vmatpush1.bf16.msra.mxu0 %v10720_v40  ;;  %5479 = vmatprep.subr.bf16.mxu1 %v10725_v41  ;;  %v10780_v40 = vld [vmem:[%s12401_s26 + $0xc00] ss:$8 sps:$4 sm:$0xff]  }
 0x203   : > { %7751 = vmatprep.subr.bf16.mxu0 %v10728_v42  ;;  %v12831_v41 = vld [vmem:[%s12454_s6] sm:$0x88]  ;;  %v5281_v42 = vsel %vm5264_vm5, %v5272_v31, %v5280_v36 }
 0x204   : > { %v10837_v31 = vld [vmem:[%s12401_s26 + $0x4a0] ss:$8 sps:$4 sm:$0xff]  }
 0x205   : > { %5480 = vmatpush1.bf16.msra.mxu1 %v10723_v44  ;;  %v7553_v44 = vsel %vm5846_vm6, %v7544_v37, %v7552_v38  ;;  %v10843_v37 = vld [vmem:[%s12401_s26 + $0x4b0] ss:$8 sps:$4 sm:$0xff]  }
 0x206   : > { %7752 = vmatpush1.bf16.msra.mxu0 %v10726_v45  ;;  %5481 = vmatprep.subr.bf16.mxu1 %v10731_v46  ;;  %v12836_v45 = vld [vmem:[%s12454_s6 + $0x10] sm:$0xee]  ;;  %v12839_v46 = vld [vmem:[%s12454_s6 + $0x20] sm:$0x33] }
 0x207   : > { %7753 = vmatprep.subr.bf16.mxu0 %v10734_v47  ;;  %v10785_v47 = vld [vmem:[%s12401_s26 + $0x414] ss:$8 sps:$4 sm:$0xff]  }
 0x209   : > { %5482 = vmatpush1.bf16.msra.mxu1 %v10729_v61  ;;  %v10788_v61 = vld [vmem:[%s12401_s26 + $0xc14] ss:$8 sps:$4 sm:$0xff]  }
 0x20a   : > { %7754 = vmatpush1.bf16.msra.mxu0 %v10732_v7  ;;  %5483 = vmatprep.subr.bf16.mxu1 %v10737_v48  ;;  %v9392_v7 = vcombine.high %v12704_v29, %v12704_v29  ;;  %v9390_v48 = vcombine.high %v12831_v41, %v12707_v30  ;;  %v10791_v29 = vld [vmem:[%s12401_s26 + $0x424] ss:$8 sps:$4 sm:$0xff]  }
 0x20b   : > { %7755 = vmatprep.subr.bf16.mxu0 %v10740_v50  ;;  %v12849_v50 = vcombine.high %v12836_v45, %v12808_v0  ;;  %v10794_v30 = vld [vmem:[%s12401_s26 + $0xc24] ss:$8 sps:$4 sm:$0xff]  }
 0x20d   : > { %5484 = vmatpush1.bf16.msra.mxu1 %v10735_v51  ;;  %v9930_v51 = vcombine.high %v12839_v46, %v12839_v46 }
 0x20e   : > { %7756 = vmatpush1.bf16.msra.mxu0 %v10738_v54  ;;  %5485 = vmatprep.subr.bf16.mxu1 %v10743_v35  ;;  %v10783_v54 = vld [vmem:[%s12401_s26 + $0x410] ss:$8 sps:$4 sm:$0xff]  }
 0x20f   : > { %7757 = vmatprep.subr.bf16.mxu0 %v10746_v55  ;;  %v10786_v35 = vld [vmem:[%s12401_s26 + $0xc10] ss:$8 sps:$4 sm:$0xff]   ;;  %v5569_v55 = vrot.slane %v9390_v48, 3  ;;  %v10866_v48 = vld [vmem:[%s12401_s26 + $0xce4] ss:$8 sps:$4 sm:$0xff]  }
 0x211   : > { %5486 = vmatpush1.bf16.msra.mxu1 %v10741_v56  ;;  %v12859_v56 = vrot.slane %v9392_v7, 3  ;;  %v10863_v7 = vld [vmem:[%s12401_s26 + $0x4e4] ss:$8 sps:$4 sm:$0xff]  }
 0x212   : > { %7758 = vmatpush1.bf16.msra.mxu0 %v10744_v58  ;;  %5487 = vmatprep.subr.bf16.mxu1 %v10749_v23  ;;  %v7840_v58 = vrot.slane %v12849_v50, 1  ;;  %v12862_v23 = vrot.slane %v9930_v51, 1  ;;  %v12917_v51 = vld [vmem:[%s12454_s6] sm:$0x88] }
 0x213   : > { %7759 = vmatprep.subr.bf16.mxu0 %v10752_v59  ;;  %v10789_v59 = vld [vmem:[%s12401_s26 + $0x420] ss:$8 sps:$4 sm:$0xff]  }
 0x214   : > { %v7842_v62 = vsel %vm4997_vm3, %v7840_v58, %v12862_v23  ;;  %v10864_v58 = vld [vmem:[%s12401_s26 + $0xce0] ss:$8 sps:$4 sm:$0xff]  }
 0x215   : > { %5488 = vmatpush1.bf16.msra.mxu1 %v10747_v60  ;;  %v10797_v60 = vld [vmem:[%s12401_s26 + $0x434] ss:$8 sps:$4 sm:$0xff]  }
 0x216   : > { %7760 = vmatpush1.bf16.msra.mxu0 %v10750_v57  ;;  %5489 = vmatprep.subr.bf16.mxu1 %v10755_v2  ;;  %v10795_v57 = vld [vmem:[%s12401_s26 + $0x430] ss:$8 sps:$4 sm:$0xff]   ;;  %v10803_v2 = vld [vmem:[%s12401_s26 + $0x444] ss:$8 sps:$4 sm:$0xff]  }
 0x217   : > { %7761 = vmatprep.subr.bf16.mxu0 %v10758_v3  ;;  %v10806_v3 = vld [vmem:[%s12401_s26 + $0xc44] ss:$8 sps:$4 sm:$0xff]  }
 0x219   : > { %5490 = vmatpush1.bf16.msra.mxu1 %v10753_v5  ;;  %v10801_v5 = vld [vmem:[%s12401_s26 + $0x440] ss:$8 sps:$4 sm:$0xff]  }
 0x21a   : > { %7762 = vmatpush1.bf16.msra.mxu0 %v10756_v8  ;;  %5491 = vmatprep.subr.bf16.mxu1 %v10761_v52  ;;  %v10812_v8 = vld [vmem:[%s12401_s26 + $0xc54] ss:$8 sps:$4 sm:$0xff]  }
 0x21b   : > { %7763 = vmatprep.subr.bf16.mxu0 %v10764_v63  ;;  %v10821_v52 = vld [vmem:[%s12401_s26 + $0x474] ss:$8 sps:$4 sm:$0xff]  }
 0x21c   : > { %v10824_v63 = vld [vmem:[%s12401_s26 + $0xc74] ss:$8 sps:$4 sm:$0xff]  }
 0x21d   : > { %5492 = vmatpush1.bf16.msra.mxu1 %v10759_v28  ;;  %v10819_v28 = vld [vmem:[%s12401_s26 + $0x470] ss:$8 sps:$4 sm:$0xff]  }
 0x21e   : > { %7764 = vmatpush1.bf16.msra.mxu0 %v10762_v16  ;;  %5493 = vmatprep.subr.bf16.mxu1 %v10767_v25  ;;  %v10830_v16 = vld [vmem:[%s12401_s26 + $0xc84] ss:$8 sps:$4 sm:$0xff]  }
 0x21f   : > { %7765 = vmatprep.subr.bf16.mxu0 %v10770_v53  ;;  %v10839_v25 = vld [vmem:[%s12401_s26 + $0x4a4] ss:$8 sps:$4 sm:$0xff]  }
 0x220   : > { %v10842_v53 = vld [vmem:[%s12401_s26 + $0xca4] ss:$8 sps:$4 sm:$0xff]  }
 0x221   : > { %5494 = vmatpush1.bf16.msra.mxu1 %v10765_v33  ;;  %v10840_v33 = vld [vmem:[%s12401_s26 + $0xca0] ss:$8 sps:$4 sm:$0xff]  }
 0x222   : > { %7766 = vmatpush1.bf16.msra.mxu0 %v10768_v34  ;;  %5736 = vmatprep.subr.bf16.mxu1 %v10775_v20  ;;  %v10845_v34 = vld [vmem:[%s12401_s26 + $0x4b4] ss:$8 sps:$4 sm:$0xff]   ;;  %v10851_v20 = vld [vmem:[%s12401_s26 + $0x4c4] ss:$8 sps:$4 sm:$0xff]  }
 0x223   : > { %8007 = vmatprep.subr.bf16.mxu0 %v10782_v4  ;;  %v10854_v4 = vld [vmem:[%s12401_s26 + $0xcc4] ss:$8 sps:$4 sm:$0xff]  }
 0x224   : > { %5496 = vmatmul.mubr.bf16.vlgmr.msra.gmra.mrb[0].mxu1 %v5281_v42  ;;  %v10857_v42 = vld [vmem:[%s12401_s26 + $0x4d4] ss:$8 sps:$4 sm:$0xff]  }
 0x225   : > { %7768 = vmatmul.mubr.bf16.vlgmr.msra.gmra.mrb[0].mxu0 %v7553_v44  ;;  %5737 = vmatpush1.bf16.msra.mxu1 %v10773_v39  ;;  %v10849_v39 = vld [vmem:[%s12401_s26 + $0x4c0] ss:$8 sps:$4 sm:$0xff]   ;;  %v10860_v44 = vld [vmem:[%s12401_s26 + $0xcd4] ss:$8 sps:$4 sm:$0xff]  }
 0x226   : > { %8008 = vmatpush1.bf16.msra.mxu0 %v10780_v40  ;;  %5738 = vmatprep.subr.bf16.mxu1 %v10785_v47  ;;  %v10852_v40 = vld [vmem:[%s12401_s26 + $0xcc0] ss:$8 sps:$4 sm:$0xff]   ;;  %v10855_v47 = vld [vmem:[%s12401_s26 + $0x4d0] ss:$8 sps:$4 sm:$0xff]  }
 0x227   : > { %8009 = vmatprep.subr.bf16.mxu0 %v10788_v61  ;;  %5505 = vmatprep.mubr.bf16.mxu1 %v12751_v11  ;;  %v10800_v11 = vld [vmem:[%s12401_s26 + $0xc34] ss:$8 sps:$4 sm:$0xff]   ;;  %v10858_v61 = vld [vmem:[%s12401_s26 + $0xcd0] ss:$8 sps:$4 sm:$0xff]  }
 0x228   : > { %7777 = vmatprep.mubr.bf16.mxu0 %v12753_v13  ;;  %v5571_v13 = vsel %vm5565_vm4, %v5569_v55, %v12859_v56 }
 0x229   : > { %5739 = vmatpush1.bf16.msra.mxu1 %v10783_v54  ;;  %v12920_v54 = vld [vmem:[%s12454_s6 + $0x8] sm:$0xff] }
 0x22a   : > { %8010 = vmatpush1.bf16.msra.mxu0 %v10786_v35  ;;  %5740 = vmatprep.subr.bf16.mxu1 %v10791_v29  ;;  %v12923_v35 = vld [vmem:[%s12454_s6 + $0x18] sm:$0x11]  ;;  %v10861_v29 = vld [vmem:[%s12401_s26 + $0x4e0] ss:$8 sps:$4 sm:$0xff]  }
 0x22b   : > { %8011 = vmatprep.subr.bf16.mxu0 %v10794_v30  ;;  %v11188_v30 = vld [vmem:[%s12454_s6 + $0x10] sm:$0xff] }
 0x22c   : > { %5506 = vmatmul.mubr.bf16.gmra.mrb[4].mxu1 %v5280_v36  ;;  %v10848_v36 = vld [vmem:[%s12401_s26 + $0xcb4] ss:$8 sps:$4 sm:$0xff]   ;;  %v9391_v55 = vcombine.low %v11188_v30, %v11188_v30  ;;  %v10910_v30 = vld [vmem:[%s12401_s26 + $0xd44] ss:$8 sps:$4 sm:$0xff]  }
 0x22d   : > { %7778 = vmatmul.mubr.bf16.gmra.mrb[4].mxu0 %v7552_v38  ;;  %5741 = vmatpush1.bf16.msra.mxu1 %v10789_v59  ;;  %v10846_v38 = vld [vmem:[%s12401_s26 + $0xcb0] ss:$8 sps:$4 sm:$0xff]   ;;  %v11189_v59 = vld [vmem:[%s12454_s6 + $0x8] sm:$0xff] }
 0x22e   : > { %8012 = vmatpush1.bf16.msra.mxu0 %v10792_v17  ;;  %5742 = vmatprep.subr.bf16.mxu1 %v10797_v60  ;;  %v9389_v17 = vcombine.low %v12831_v41, %v11189_v59  ;;  %v12932_v60 = vcombine.low %v12836_v45, %v12808_v0  ;;  %v9458_v41 = vcombine.high %v12917_v51, %v12920_v54  ;;  %v5567_v45 = vrot.slane %v9391_v55, 3  ;;  %v10905_v55 = vld [vmem:[%s12401_s26 + $0x540] ss:$8 sps:$4 sm:$0xff]   ;;  %v10913_v59 = vld [vmem:[%s12401_s26 + $0x554] ss:$8 sps:$4 sm:$0xff]  }
 0x22f   : > { %8013 = vmatprep.subr.bf16.mxu0 %v10800_v11  ;;  %5768 = vmatprep.mubr.bf16.mxu1 %v5571_v13  ;;  %v9929_v11 = vcombine.low %v12839_v46, %v12839_v46  ;;  %v10869_v13 = vld [vmem:[%s12401_s26 + $0x4f4] ss:$8 sps:$4 sm:$0xff]  }
 0x230   : > { %8039 = vmatprep.mubr.bf16.mxu0 %v7842_v62  ;;  %v10872_v62 = vld [vmem:[%s12401_s26 + $0xcf4] ss:$8 sps:$4 sm:$0xff]  }
 0x231   : > { %5743 = vmatpush1.bf16.msra.mxu1 %v10795_v57  ;;  %v12937_v57 = vld [vmem:[%s12454_s6 + $0x20] sm:$0x77] }
 0x232   : > { %8014 = vmatpush1.bf16.msra.mxu0 %v10798_v1  ;;  %5744 = vmatprep.subr.bf16.mxu1 %v10803_v2  ;;  %v10867_v1 = vld [vmem:[%s12401_s26 + $0x4f0] ss:$8 sps:$4 sm:$0xff]   ;;  %v12951_v46 = vcombine.high %v12937_v57, %v12937_v57 }
 0x233   : > { %8015 = vmatprep.subr.bf16.mxu0 %v10806_v3  ;;  %v12945_v2 = vld [vmem:[%s12454_s6 + $0x10] sm:$0xff] }
 0x234   : > { %v9460_v0 = vcombine.high %v12945_v2, %v12923_v35  ;;  %v10870_v3 = vld [vmem:[%s12401_s26 + $0xcf0] ss:$8 sps:$4 sm:$0xff]  }
 0x235   : > { %5745 = vmatpush1.bf16.msra.mxu1 %v10801_v5  ;;  %v5566_v5 = vrot.slane %v9389_v17, 3  ;;  %v10916_v17 = vld [vmem:[%s12401_s26 + $0xd54] ss:$8 sps:$4 sm:$0xff]  }
 0x236   : > { %8016 = vmatpush1.bf16.msra.mxu0 %v10804_v26  ;;  %5746 = vmatprep.subr.bf16.mxu1 %v10809_v6  ;;  %v7838_v26 = vrot.slane %v9929_v11, 1  ;;  %v7837_v6 = vrot.slane %v12932_v60, 1  ;;  %v10911_v11 = vld [vmem:[%s12401_s26 + $0x550] ss:$8 sps:$4 sm:$0xff]  }
 0x237   : > { %8017 = vmatprep.subr.bf16.mxu0 %v10812_v8  ;;  %v10879_v8 = vld [vmem:[%s12401_s26 + $0x504] ss:$8 sps:$4 sm:$0xff]  }
 0x239   : > { %5747 = vmatpush1.bf16.msra.mxu1 %v10807_v27  ;;  %v10886_v27 = vld [vmem:[%s12401_s26 + $0xd04] ss:$8 sps:$4 sm:$0xff]  }
 0x23a   : > { %8018 = vmatpush1.bf16.msra.mxu0 %v10810_v9  ;;  %5748 = vmatprep.subr.bf16.mxu1 %v10815_v10  ;;  %v8121_v9 = vshrl.u32 %v12849_v50, 16  ;;  %v8124_v10 = vshll.u32 %v12849_v50, 16  ;;  %v10889_v50 = vld [vmem:[%s12401_s26 + $0x514] ss:$8 sps:$4 sm:$0xff]  }
 0x23b   : > { %8019 = vmatprep.subr.bf16.mxu0 %v10818_v32  ;;  %v5865_v32 = vshrl.u32 %v9458_v41, 16 }
 0x23d   : > { %5749 = vmatpush1.bf16.msra.mxu1 %v10813_v12  ;;  %v5868_v12 = vshll.u32 %v9458_v41, 16  ;;  %v10917_v41 = vld [vmem:[%s12401_s26 + $0x560] ss:$8 sps:$4 sm:$0xff]  }
 0x23e   : > { %8020 = vmatpush1.bf16.msra.mxu0 %v10816_v14  ;;  %5750 = vmatprep.subr.bf16.mxu1 %v10821_v52  ;;  %v5873_v14 = vshrl.u32 %v9460_v0, 16  ;;  %v5876_v52 = vshll.u32 %v9460_v0, 16  ;;  %v10920_v0 = vld [vmem:[%s12401_s26 + $0xd60] ss:$8 sps:$4 sm:$0xff]  }
 0x23f   : > { %8021 = vmatprep.subr.bf16.mxu0 %v10824_v63  ;;  %v8129_v63 = vshrl.u32 %v12951_v46, 16 }
 0x241   : > { %5751 = vmatpush1.bf16.msra.mxu1 %v10819_v28  ;;  %v8132_v28 = vshll.u32 %v12951_v46, 16 }
 0x242   : > { %8022 = vmatpush1.bf16.msra.mxu0 %v10822_v49  ;;  %5752 = vmatprep.subr.bf16.mxu1 %v10827_v15  ;;  %v10877_v49 = vld [vmem:[%s12401_s26 + $0x500] ss:$8 sps:$4 sm:$0xff]  }
 0x243   : > { %8023 = vmatprep.subr.bf16.mxu0 %v10830_v16  ;;  %v10884_v15 = vld [vmem:[%s12401_s26 + $0xd00] ss:$8 sps:$4 sm:$0xff]   ;;  %v5568_v16 = vsel %vm5565_vm4, %v5566_v5, %v5567_v45  ;;  %v10923_v5 = vld [vmem:[%s12401_s26 + $0x570] ss:$8 sps:$4 sm:$0xff]  }
 0x245   : > { %5753 = vmatpush1.bf16.msra.mxu1 %v10825_v18  ;;  %v7839_v18 = vsel %vm4997_vm3, %v7837_v6, %v7838_v26  ;;  %v10931_v6 = vld [vmem:[%s12401_s26 + $0x584] ss:$8 sps:$4 sm:$0xff]  }
 0x246   : > { %8024 = vmatpush1.bf16.msra.mxu0 %v10828_v19  ;;  %5754 = vmatprep.subr.bf16.mxu1 %v10833_v43  ;;  %v10892_v19 = vld [vmem:[%s12401_s26 + $0xd14] ss:$8 sps:$4 sm:$0xff]   ;;  %v8123_v43 = vrot.slane %v8121_v9, 1  ;;  %v10932_v9 = vld [vmem:[%s12401_s26 + $0xd80] ss:$8 sps:$4 sm:$0xff]  }
 0x247   : > { %8025 = vmatprep.subr.bf16.mxu0 %v10836_v21  ;;  %v8126_v21 = vrot.slane %v8124_v10, 2  ;;  %v10937_v10 = vld [vmem:[%s12401_s26 + $0x594] ss:$8 sps:$4 sm:$0xff]  }
 0x249   : > { %5755 = vmatpush1.bf16.msra.mxu1 %v10831_v22  ;;  %v5867_v22 = vrot.slane %v5865_v32, 3  ;;  %v10940_v32 = vld [vmem:[%s12401_s26 + $0xd94] ss:$8 sps:$4 sm:$0xff]  }
 0x24a   : > { %8026 = vmatpush1.bf16.msra.mxu0 %v10834_v24  ;;  %5756 = vmatprep.subr.bf16.mxu1 %v10839_v25  ;;  %v5870_v24 = vrot.slane %v5868_v12, 4  ;;  %v5875_v25 = vrot.slane %v5873_v14, 3  ;;  %v10935_v12 = vld [vmem:[%s12401_s26 + $0x590] ss:$8 sps:$4 sm:$0xff]  }
 0x24b   : > { %8027 = vmatprep.subr.bf16.mxu0 %v10842_v53  ;;  %v5878_v53 = vrot.slane %v5876_v52, 4  ;;  %v10938_v14 = vld [vmem:[%s12401_s26 + $0xd90] ss:$8 sps:$4 sm:$0xff]   ;;  %v10943_v52 = vld [vmem:[%s12401_s26 + $0x5a4] ss:$8 sps:$4 sm:$0xff]  }
 0x24d   : > { %5757 = vmatpush1.bf16.msra.mxu1 %v10837_v31  ;;  %v8131_v31 = vrot.slane %v8129_v63, 1  ;;  %v10946_v63 = vld [vmem:[%s12401_s26 + $0xda4] ss:$8 sps:$4 sm:$0xff]  }
 0x24e   : > { %8028 = vmatpush1.bf16.msra.mxu0 %v10840_v33  ;;  %5758 = vmatprep.subr.bf16.mxu1 %v10845_v34  ;;  %v8134_v33 = vrot.slane %v8132_v28, 2  ;;  %v10887_v34 = vld [vmem:[%s12401_s26 + $0x510] ss:$8 sps:$4 sm:$0xff]   ;;  %v10941_v28 = vld [vmem:[%s12401_s26 + $0x5a0] ss:$8 sps:$4 sm:$0xff]  }
 0x24f   : > { %8029 = vmatprep.subr.bf16.mxu0 %v10848_v36  ;;  %v10890_v36 = vld [vmem:[%s12401_s26 + $0xd10] ss:$8 sps:$4 sm:$0xff]  }
 0x251   : > { %5759 = vmatpush1.bf16.msra.mxu1 %v10843_v37  ;;  %v10895_v37 = vld [vmem:[%s12401_s26 + $0x524] ss:$8 sps:$4 sm:$0xff]  }
 0x252   : > { %8030 = vmatpush1.bf16.msra.mxu0 %v10846_v38  ;;  %5760 = vmatprep.subr.bf16.mxu1 %v10851_v20  ;;  %v10898_v38 = vld [vmem:[%s12401_s26 + $0xd24] ss:$8 sps:$4 sm:$0xff]   ;;  %v5871_v20 = vor.u32 %v5870_v24, %v5867_v22  ;;  %v10953_v22 = vld [vmem:[%s12401_s26 + $0x5c0] ss:$8 sps:$4 sm:$0xff]  }
 0x253   : > { %8031 = vmatprep.subr.bf16.mxu0 %v10854_v4  ;;  %v12973_v4 = vor.u32 %v5878_v53, %v5875_v25  ;;  %v10956_v24 = vld [vmem:[%s12401_s26 + $0xdc0] ss:$8 sps:$4 sm:$0xff]   ;;  %v13027_v25 = vcombine.low %v12937_v57, %v12937_v57  ;;  %v9459_v53 = vcombine.low %v12945_v2, %v12923_v35  ;;  %v10962_v57 = vld [vmem:[%s12401_s26 + $0xdd0] ss:$8 sps:$4 sm:$0xff]  }
 0x255   : > { %5761 = vmatpush1.bf16.msra.mxu1 %v10849_v39  ;;  %v8127_v39 = vor.u32 %v8126_v21, %v8123_v43  ;;  %v10958_v43 = vld [vmem:[%s12401_s26 + $0xdc4] ss:$8 sps:$4 sm:$0xff]   ;;  %v9457_v21 = vcombine.low %v12917_v51, %v12920_v54 }
 0x256   : > { %8032 = vmatpush1.bf16.msra.mxu0 %v10852_v40  ;;  %5762 = vmatprep.subr.bf16.mxu1 %v10857_v42  ;;  %v12975_v40 = vor.u32 %v8134_v33, %v8131_v31  ;;  %v10893_v42 = vld [vmem:[%s12401_s26 + $0x520] ss:$8 sps:$4 sm:$0xff]   ;;  %v10961_v31 = vld [vmem:[%s12401_s26 + $0x5d4] ss:$8 sps:$4 sm:$0xff]  }
 0x257   : > { %8033 = vmatprep.subr.bf16.mxu0 %v10860_v44  ;;  %v10896_v44 = vld [vmem:[%s12401_s26 + $0xd20] ss:$8 sps:$4 sm:$0xff]   ;;  %v10964_v33 = vld [vmem:[%s12401_s26 + $0xdd4] ss:$8 sps:$4 sm:$0xff]   ;;  %v5848_v51 = vshrl.u32 %v9457_v21, 16 }
 0x259   : > { %5763 = vmatpush1.bf16.msra.mxu1 %v10855_v47  ;;  %v10901_v47 = vld [vmem:[%s12401_s26 + $0x534] ss:$8 sps:$4 sm:$0xff]  }
 0x25a   : > { %8034 = vmatpush1.bf16.msra.mxu0 %v10858_v61  ;;  %5764 = vmatprep.subr.bf16.mxu1 %v10863_v7  ;;  %v8136_v61 = vsel %vm5264_vm5, %v8127_v39, %v12975_v40  ;;  %v10899_v7 = vld [vmem:[%s12401_s26 + $0x530] ss:$8 sps:$4 sm:$0xff]   ;;  %v5859_v39 = vshll.u32 %v9459_v53, 16 }
 0x25b   : > { %8035 = vmatprep.subr.bf16.mxu0 %v10866_v48  ;;  %v10902_v48 = vld [vmem:[%s12401_s26 + $0xd30] ss:$8 sps:$4 sm:$0xff]  }
 0x25d   : > { %5765 = vmatpush1.bf16.msra.mxu1 %v10861_v29  ;;  %v10907_v29 = vld [vmem:[%s12401_s26 + $0x544] ss:$8 sps:$4 sm:$0xff]  }
 0x25e   : > { %8036 = vmatpush1.bf16.msra.mxu0 %v10864_v58  ;;  %5766 = vmatprep.subr.bf16.mxu1 %v10869_v13  ;;  %v10908_v58 = vld [vmem:[%s12401_s26 + $0xd40] ss:$8 sps:$4 sm:$0xff]   ;;  %v10914_v13 = vld [vmem:[%s12401_s26 + $0xd50] ss:$8 sps:$4 sm:$0xff]  }
 0x25f   : > { %8037 = vmatprep.subr.bf16.mxu0 %v10872_v62  ;;  %v10919_v62 = vld [vmem:[%s12401_s26 + $0x564] ss:$8 sps:$4 sm:$0xff]  }
 0x261   : > { %5767 = vmatpush1.bf16.msra.mxu1 %v10867_v1  ;;  %v10922_v1 = vld [vmem:[%s12401_s26 + $0xd64] ss:$8 sps:$4 sm:$0xff]  }
 0x262   : > { %8038 = vmatpush1.bf16.msra.mxu0 %v10870_v3  ;;  %6045 = vmatprep.subr.bf16.mxu1 %v10879_v8  ;;  %v10928_v3 = vld [vmem:[%s12401_s26 + $0xd74] ss:$8 sps:$4 sm:$0xff]   ;;  %v10934_v8 = vld [vmem:[%s12401_s26 + $0xd84] ss:$8 sps:$4 sm:$0xff]  }
 0x263   : > { %8301 = vmatprep.subr.bf16.mxu0 %v10886_v27  ;;  %v10929_v27 = vld [vmem:[%s12401_s26 + $0x580] ss:$8 sps:$4 sm:$0xff]  }
 0x264   : > { %5769 = vmatmul.mubr.bf16.vlgmr.msra.gmra.mrb[0].mxu1 %v5568_v16  ;;  %v10952_v16 = vld [vmem:[%s12401_s26 + $0xdb4] ss:$8 sps:$4 sm:$0xff]  }
 0x265   : > { %8040 = vmatmul.mubr.bf16.vlgmr.msra.gmra.mrb[0].mxu0 %v7839_v18  ;;  %6046 = vmatpush1.bf16.msra.mxu1 %v10877_v49  ;;  %v10944_v49 = vld [vmem:[%s12401_s26 + $0xda0] ss:$8 sps:$4 sm:$0xff]   ;;  %v10947_v18 = vld [vmem:[%s12401_s26 + $0x5b0] ss:$8 sps:$4 sm:$0xff]  }
 0x266   : > { %8302 = vmatpush1.bf16.msra.mxu0 %v10884_v15  ;;  %6047 = vmatprep.subr.bf16.mxu1 %v10889_v50  ;;  %v10949_v15 = vld [vmem:[%s12401_s26 + $0x5b4] ss:$8 sps:$4 sm:$0xff]   ;;  %v10950_v50 = vld [vmem:[%s12401_s26 + $0xdb0] ss:$8 sps:$4 sm:$0xff]  }
 0x267   : > { %8303 = vmatprep.subr.bf16.mxu0 %v10892_v19  ;;  %5778 = vmatprep.mubr.bf16.mxu1 %v12859_v56  ;;  %v10904_v56 = vld [vmem:[%s12401_s26 + $0xd34] ss:$8 sps:$4 sm:$0xff]   ;;  %v10955_v19 = vld [vmem:[%s12401_s26 + $0x5c4] ss:$8 sps:$4 sm:$0xff]  }
 0x268   : > { %8049 = vmatprep.mubr.bf16.mxu0 %v12862_v23  ;;  %v5880_v23 = vsel %vm5846_vm6, %v5871_v20, %v12973_v4  ;;  %v5856_v20 = vshrl.u32 %v9459_v53, 16  ;;  %v11012_v53 = vld [vmem:[%s12401_s26 + $0xe44] ss:$8 sps:$4 sm:$0xff]  }
 0x269   : > { %6048 = vmatpush1.bf16.msra.mxu1 %v10887_v34  ;;  %v10959_v34 = vld [vmem:[%s12401_s26 + $0x5d0] ss:$8 sps:$4 sm:$0xff]  }
 0x26a   : > { %8304 = vmatpush1.bf16.msra.mxu0 %v10890_v36  ;;  %6049 = vmatprep.subr.bf16.mxu1 %v10895_v37  ;;  %v5851_v36 = vshll.u32 %v9457_v21, 16  ;;  %v8104_v37 = vshrl.u32 %v12932_v60, 16  ;;  %v11001_v21 = vld [vmem:[%s12401_s26 + $0x630] ss:$8 sps:$4 sm:$0xff]  }
 0x26b   : > { %8305 = vmatprep.subr.bf16.mxu0 %v10898_v38  ;;  %v8107_v38 = vshll.u32 %v12932_v60, 16 }
 0x26c   : > { %5779 = vmatmul.mubr.bf16.gmra.mrb[4].mxu1 %v5567_v45  ;;  %v10925_v45 = vld [vmem:[%s12401_s26 + $0x574] ss:$8 sps:$4 sm:$0xff]   ;;  %v8106_v60 = vrot.slane %v8104_v37, 1  ;;  %v11016_v37 = vld [vmem:[%s12401_s26 + $0xe50] ss:$8 sps:$4 sm:$0xff]  }
 0x26d   : > { %8050 = vmatmul.mubr.bf16.gmra.mrb[4].mxu0 %v7838_v26  ;;  %6050 = vmatpush1.bf16.msra.mxu1 %v10893_v42  ;;  %v10926_v26 = vld [vmem:[%s12401_s26 + $0xd70] ss:$8 sps:$4 sm:$0xff]   ;;  %v8112_v42 = vshrl.u32 %v13027_v25, 16 }
 0x26e   : > { %8306 = vmatpush1.bf16.msra.mxu0 %v10896_v44  ;;  %6051 = vmatprep.subr.bf16.mxu1 %v10901_v47  ;;  %v8115_v44 = vshll.u32 %v13027_v25, 16  ;;  %v10967_v47 = vld [vmem:[%s12401_s26 + $0x5e4] ss:$8 sps:$4 sm:$0xff]  }
 0x26f   : > { %8307 = vmatprep.subr.bf16.mxu0 %v10904_v56  ;;  %6077 = vmatprep.mubr.bf16.mxu1 %v5880_v23  ;;  %v10970_v56 = vld [vmem:[%s12401_s26 + $0xde4] ss:$8 sps:$4 sm:$0xff]   ;;  %v10965_v23 = vld [vmem:[%s12401_s26 + $0x5e0] ss:$8 sps:$4 sm:$0xff]  }
 0x270   : > { %8333 = vmatprep.mubr.bf16.mxu0 %v8136_v61  ;;  %v5850_v61 = vrot.slane %v5848_v51, 3  ;;  %v11018_v51 = vld [vmem:[%s12401_s26 + $0xe54] ss:$8 sps:$4 sm:$0xff]  }
 0x271   : > { %6052 = vmatpush1.bf16.msra.mxu1 %v10899_v7  ;;  %v5853_v7 = vrot.slane %v5851_v36, 4  ;;  %v11013_v36 = vld [vmem:[%s12401_s26 + $0x650] ss:$8 sps:$4 sm:$0xff]  }
 0x272   : > { %8308 = vmatpush1.bf16.msra.mxu0 %v10902_v48  ;;  %6053 = vmatprep.subr.bf16.mxu1 %v10907_v29  ;;  %v8109_v48 = vrot.slane %v8107_v38, 2  ;;  %v10968_v29 = vld [vmem:[%s12401_s26 + $0xde0] ss:$8 sps:$4 sm:$0xff]   ;;  %v11021_v38 = vld [vmem:[%s12401_s26 + $0x664] ss:$8 sps:$4 sm:$0xff]  }
 0x273   : > { %8309 = vmatprep.subr.bf16.mxu0 %v10910_v30  ;;  %v5858_v30 = vrot.slane %v5856_v20, 3  ;;  %v11019_v20 = vld [vmem:[%s12401_s26 + $0x660] ss:$8 sps:$4 sm:$0xff]  }
 0x275   : > { %6054 = vmatpush1.bf16.msra.mxu1 %v10905_v55  ;;  %v5861_v55 = vrot.slane %v5859_v39, 4  ;;  %v11022_v39 = vld [vmem:[%s12401_s26 + $0xe60] ss:$8 sps:$4 sm:$0xff]  }
 0x276   : > { %8310 = vmatpush1.bf16.msra.mxu0 %v10908_v58  ;;  %6055 = vmatprep.subr.bf16.mxu1 %v10913_v59  ;;  %v8114_v58 = vrot.slane %v8112_v42, 1  ;;  %v8117_v59 = vrot.slane %v8115_v44, 2  ;;  %v11027_v42 = vld [vmem:[%s12401_s26 + $0x674] ss:$8 sps:$4 sm:$0xff]  }
 0x277   : > { %8311 = vmatprep.subr.bf16.mxu0 %v10916_v17  ;;  %v10973_v17 = vld [vmem:[%s12401_s26 + $0x5f4] ss:$8 sps:$4 sm:$0xff]  }
 0x278   : > { %v11030_v44 = vld [vmem:[%s12401_s26 + $0xe74] ss:$8 sps:$4 sm:$0xff]  }
 0x279   : > { %6056 = vmatpush1.bf16.msra.mxu1 %v10911_v11  ;;  %v10976_v11 = vld [vmem:[%s12401_s26 + $0xdf4] ss:$8 sps:$4 sm:$0xff]  }
 0x27a   : > { %8312 = vmatpush1.bf16.msra.mxu0 %v10914_v13  ;;  %6057 = vmatprep.subr.bf16.mxu1 %v10919_v62  ;;  %v8110_v13 = vor.u32 %v8109_v48, %v8106_v60  ;;  %v10971_v62 = vld [vmem:[%s12401_s26 + $0x5f0] ss:$8 sps:$4 sm:$0xff]   ;;  %v11034_v60 = vld [vmem:[%s12401_s26 + $0xe80] ss:$8 sps:$4 sm:$0xff]   ;;  %v11039_v48 = vld [vmem:[%s12401_s26 + $0x694] ss:$8 sps:$4 sm:$0xff]  }
 0x27b   : > { %8313 = vmatprep.subr.bf16.mxu0 %v10922_v1  ;;  %v10974_v1 = vld [vmem:[%s12401_s26 + $0xdf0] ss:$8 sps:$4 sm:$0xff]  }
 0x27d   : > { %6058 = vmatpush1.bf16.msra.mxu1 %v10917_v41  ;;  %v5854_v41 = vor.u32 %v5853_v7, %v5850_v61  ;;  %v11036_v61 = vld [vmem:[%s12401_s26 + $0xe84] ss:$8 sps:$4 sm:$0xff]   ;;  %v11031_v7 = vld [vmem:[%s12401_s26 + $0x680] ss:$8 sps:$4 sm:$0xff]  }
 0x27e   : > { %8314 = vmatpush1.bf16.msra.mxu0 %v10920_v0  ;;  %6059 = vmatprep.subr.bf16.mxu1 %v10925_v45  ;;  %v5862_v0 = vor.u32 %v5861_v55, %v5858_v30  ;;  %v8118_v45 = vor.u32 %v8117_v59, %v8114_v58  ;;  %v11037_v30 = vld [vmem:[%s12401_s26 + $0x690] ss:$8 sps:$4 sm:$0xff]   ;;  %v11045_v58 = vld [vmem:[%s12401_s26 + $0x6a4] ss:$8 sps:$4 sm:$0xff]  }
 0x27f   : > { %8315 = vmatprep.subr.bf16.mxu0 %v10928_v3  ;;  %v10982_v3 = vld [vmem:[%s12401_s26 + $0x604] ss:$8 sps:$4 sm:$0xff]   ;;  %v11040_v55 = vld [vmem:[%s12401_s26 + $0xe90] ss:$8 sps:$4 sm:$0xff]  }
 0x280   : > { %v11048_v59 = vld [vmem:[%s12401_s26 + $0xea4] ss:$8 sps:$4 sm:$0xff]  }
 0x281   : > { %6060 = vmatpush1.bf16.msra.mxu1 %v10923_v5  ;;  %v10987_v5 = vld [vmem:[%s12401_s26 + $0xe04] ss:$8 sps:$4 sm:$0xff]  }
 0x282   : > { %8316 = vmatpush1.bf16.msra.mxu0 %v10926_v26  ;;  %6061 = vmatprep.subr.bf16.mxu1 %v10931_v6  ;;  %v10980_v26 = vld [vmem:[%s12401_s26 + $0x600] ss:$8 sps:$4 sm:$0xff]  }
 0x283   : > { %8317 = vmatprep.subr.bf16.mxu0 %v10934_v8  ;;  %v10985_v6 = vld [vmem:[%s12401_s26 + $0xe00] ss:$8 sps:$4 sm:$0xff]   ;;  %v5863_v8 = vsel %vm5846_vm6, %v5854_v41, %v5862_v0  ;;  %v11052_v41 = vld [vmem:[%s12401_s26 + $0xeb0] ss:$8 sps:$4 sm:$0xff]  }
 0x285   : > { %6062 = vmatpush1.bf16.msra.mxu1 %v10929_v27  ;;  %v8119_v27 = vsel %vm5264_vm5, %v8110_v13, %v8118_v45  ;;  %v11051_v13 = vld [vmem:[%s12401_s26 + $0x6b4] ss:$8 sps:$4 sm:$0xff]  }
 0x286   : > { %8318 = vmatpush1.bf16.msra.mxu0 %v10932_v9  ;;  %6063 = vmatprep.subr.bf16.mxu1 %v10937_v10  ;;  %v13054_v9 = vld [vmem:[%s12454_s6 + $0x10] sm:$0xcc] }
 0x287   : > { %8319 = vmatprep.subr.bf16.mxu0 %v10940_v32  ;;  %v10991_v10 = vld [vmem:[%s12401_s26 + $0x614] ss:$8 sps:$4 sm:$0xff]  }
 0x288   : > { %v10994_v32 = vld [vmem:[%s12401_s26 + $0xe14] ss:$8 sps:$4 sm:$0xff]  }
 0x289   : > { %6064 = vmatpush1.bf16.msra.mxu1 %v10935_v12  ;;  %v13059_v12 = vld [vmem:[%s12454_s6 + $0x18] sm:$0xff] }
 0x28a   : > { %8320 = vmatpush1.bf16.msra.mxu0 %v10938_v14  ;;  %6065 = vmatprep.subr.bf16.mxu1 %v10943_v52  ;;  %v13063_v14 = vcombine.high %v13054_v9, %v13059_v12  ;;  %v10989_v52 = vld [vmem:[%s12401_s26 + $0x610] ss:$8 sps:$4 sm:$0xff]  }
 0x28b   : > { %8321 = vmatprep.subr.bf16.mxu0 %v10946_v63  ;;  %v10992_v63 = vld [vmem:[%s12401_s26 + $0xe10] ss:$8 sps:$4 sm:$0xff]  }
 0x28d   : > { %6066 = vmatpush1.bf16.msra.mxu1 %v10941_v28  ;;  %v10997_v28 = vld [vmem:[%s12401_s26 + $0x624] ss:$8 sps:$4 sm:$0xff]  }
 0x28e   : > { %8322 = vmatpush1.bf16.msra.mxu0 %v10944_v49  ;;  %6067 = vmatprep.subr.bf16.mxu1 %v10949_v15  ;;  %v11000_v49 = vld [vmem:[%s12401_s26 + $0xe24] ss:$8 sps:$4 sm:$0xff]   ;;  %v8400_v15 = vrot.slane %v13063_v14, 2 }
 0x28f   : > { %8323 = vmatprep.subr.bf16.mxu0 %v10952_v16  ;;  %v8401_v16 = vrot.slane %v12951_v46, 2  ;;  %v11103_v46 = vld [vmem:[%s12401_s26 + $0x734] ss:$8 sps:$4 sm:$0xff]  }
 0x291   : > { %6068 = vmatpush1.bf16.msra.mxu1 %v10947_v18  ;;  %v10995_v18 = vld [vmem:[%s12401_s26 + $0x620] ss:$8 sps:$4 sm:$0xff]  }
 0x292   : > { %8324 = vmatpush1.bf16.msra.mxu0 %v10950_v50  ;;  %6069 = vmatprep.subr.bf16.mxu1 %v10955_v19  ;;  %v10998_v50 = vld [vmem:[%s12401_s26 + $0xe20] ss:$8 sps:$4 sm:$0xff]   ;;  %v11003_v19 = vld [vmem:[%s12401_s26 + $0x634] ss:$8 sps:$4 sm:$0xff]  }
 0x293   : > { %8325 = vmatprep.subr.bf16.mxu0 %v10958_v43  ;;  %v11006_v43 = vld [vmem:[%s12401_s26 + $0xe34] ss:$8 sps:$4 sm:$0xff]  }
 0x295   : > { %6070 = vmatpush1.bf16.msra.mxu1 %v10953_v22  ;;  %v11004_v22 = vld [vmem:[%s12401_s26 + $0xe30] ss:$8 sps:$4 sm:$0xff]  }
 0x296   : > { %8326 = vmatpush1.bf16.msra.mxu0 %v10956_v24  ;;  %6071 = vmatprep.subr.bf16.mxu1 %v10961_v31  ;;  %v11009_v24 = vld [vmem:[%s12401_s26 + $0x644] ss:$8 sps:$4 sm:$0xff]   ;;  %v11007_v31 = vld [vmem:[%s12401_s26 + $0x640] ss:$8 sps:$4 sm:$0xff]  }
 0x297   : > { %8327 = vmatprep.subr.bf16.mxu0 %v10964_v33  ;;  %v11010_v33 = vld [vmem:[%s12401_s26 + $0xe40] ss:$8 sps:$4 sm:$0xff]  }
 0x299   : > { %6072 = vmatpush1.bf16.msra.mxu1 %v10959_v34  ;;  %v11015_v34 = vld [vmem:[%s12401_s26 + $0x654] ss:$8 sps:$4 sm:$0xff]  }
 0x29a   : > { %8328 = vmatpush1.bf16.msra.mxu0 %v10962_v57  ;;  %6073 = vmatprep.subr.bf16.mxu1 %v10967_v47  ;;  %v11024_v57 = vld [vmem:[%s12401_s26 + $0xe64] ss:$8 sps:$4 sm:$0xff]   ;;  %v11025_v47 = vld [vmem:[%s12401_s26 + $0x670] ss:$8 sps:$4 sm:$0xff]  }
 0x29b   : > { %8329 = vmatprep.subr.bf16.mxu0 %v10970_v56  ;;  %v11028_v56 = vld [vmem:[%s12401_s26 + $0xe70] ss:$8 sps:$4 sm:$0xff]  }
 0x29d   : > { %6074 = vmatpush1.bf16.msra.mxu1 %v10965_v23  ;;  %v11033_v23 = vld [vmem:[%s12401_s26 + $0x684] ss:$8 sps:$4 sm:$0xff]  }
 0x29e   : > { %8330 = vmatpush1.bf16.msra.mxu0 %v10968_v29  ;;  %6075 = vmatprep.subr.bf16.mxu1 %v10973_v17  ;;  %v11042_v29 = vld [vmem:[%s12401_s26 + $0xe94] ss:$8 sps:$4 sm:$0xff]   ;;  %v11043_v17 = vld [vmem:[%s12401_s26 + $0x6a0] ss:$8 sps:$4 sm:$0xff]  }
 0x29f   : > { %8331 = vmatprep.subr.bf16.mxu0 %v10976_v11  ;;  %v11046_v11 = vld [vmem:[%s12401_s26 + $0xea0] ss:$8 sps:$4 sm:$0xff]  }
 0x2a1   : > { %6076 = vmatpush1.bf16.msra.mxu1 %v10971_v62  ;;  %v11054_v62 = vld [vmem:[%s12401_s26 + $0xeb4] ss:$8 sps:$4 sm:$0xff]  }
 0x2a2   : > { %8332 = vmatpush1.bf16.msra.mxu0 %v10974_v1  ;;  %6303 = vmatprep.subr.bf16.mxu1 %v10982_v3  ;;  %v11049_v1 = vld [vmem:[%s12401_s26 + $0x6b0] ss:$8 sps:$4 sm:$0xff]   ;;  %v11055_v3 = vld [vmem:[%s12401_s26 + $0x6c0] ss:$8 sps:$4 sm:$0xff]  }
 0x2a3   : > { %8567 = vmatprep.subr.bf16.mxu0 %v10987_v5  ;;  %v11058_v5 = vld [vmem:[%s12401_s26 + $0xec0] ss:$8 sps:$4 sm:$0xff]  }
 0x2a4   : > { %6078 = vmatmul.mubr.bf16.vlgmr.msra.gmra.mrb[0].mxu1 %v5863_v8  ;;  %v11061_v8 = vld [vmem:[%s12401_s26 + $0x6d0] ss:$8 sps:$4 sm:$0xff]  }
 0x2a5   : > { %8334 = vmatmul.mubr.bf16.vlgmr.msra.gmra.mrb[0].mxu0 %v8119_v27  ;;  %6304 = vmatpush1.bf16.msra.mxu1 %v10980_v26  ;;  %v11063_v26 = vld [vmem:[%s12401_s26 + $0x6d4] ss:$8 sps:$4 sm:$0xff]   ;;  %v11064_v27 = vld [vmem:[%s12401_s26 + $0xed0] ss:$8 sps:$4 sm:$0xff]  }
 0x2a6   : > { %8568 = vmatpush1.bf16.msra.mxu0 %v10985_v6  ;;  %6305 = vmatprep.subr.bf16.mxu1 %v10991_v10  ;;  %v11066_v6 = vld [vmem:[%s12401_s26 + $0xed4] ss:$8 sps:$4 sm:$0xff]   ;;  %v11069_v10 = vld [vmem:[%s12401_s26 + $0x6e4] ss:$8 sps:$4 sm:$0xff]  }
 0x2a7   : > { %8569 = vmatprep.subr.bf16.mxu0 %v10994_v32  ;;  %6087 = vmatprep.mubr.bf16.mxu1 %v12973_v4  ;;  %v13079_v4 = vcombine.high %v12920_v54, %v12945_v2  ;;  %v11072_v32 = vld [vmem:[%s12401_s26 + $0xee4] ss:$8 sps:$4 sm:$0xff]  }
 0x2a8   : > { %8343 = vmatprep.mubr.bf16.mxu0 %v12975_v40  ;;  %v8402_v40 = vsel %vm6695_vm0, %v8400_v15, %v8401_v16  ;;  %v11075_v15 = vld [vmem:[%s12401_s26 + $0x6f4] ss:$8 sps:$4 sm:$0xff]  }
 0x2a9   : > { %6306 = vmatpush1.bf16.msra.mxu1 %v10989_v52  ;;  %v11067_v52 = vld [vmem:[%s12401_s26 + $0x6e0] ss:$8 sps:$4 sm:$0xff]  }
 0x2aa   : > { %8570 = vmatpush1.bf16.msra.mxu0 %v10992_v63  ;;  %6307 = vmatprep.subr.bf16.mxu1 %v10997_v28  ;;  %v11070_v63 = vld [vmem:[%s12401_s26 + $0xee0] ss:$8 sps:$4 sm:$0xff]   ;;  %v13133_v28 = vcombine.low %v13054_v9, %v13059_v12  ;;  %v8398_v12 = vrot.slane %v13027_v25, 2  ;;  %v8684_v25 = vshll.u32 %v13063_v14, 16 }
 0x2ab   : > { %8571 = vmatprep.subr.bf16.mxu0 %v11000_v49  ;;  %v13136_v49 = vld [vmem:[%s12454_s6 + $0x20] sm:$0xff] }
 0x2ac   : > { %6088 = vmatmul.mubr.bf16.gmra.mrb[4].mxu1 %v5862_v0  ;;  %v11057_v0 = vld [vmem:[%s12401_s26 + $0x6c4] ss:$8 sps:$4 sm:$0xff]   ;;  %v8397_v9 = vrot.slane %v13133_v28, 2 }
 0x2ad   : > { %8344 = vmatmul.mubr.bf16.gmra.mrb[4].mxu0 %v8118_v45  ;;  %6308 = vmatpush1.bf16.msra.mxu1 %v10995_v18  ;;  %v11060_v45 = vld [vmem:[%s12401_s26 + $0xec4] ss:$8 sps:$4 sm:$0xff]   ;;  %v11078_v18 = vld [vmem:[%s12401_s26 + $0xef4] ss:$8 sps:$4 sm:$0xff]  }
 0x2ae   : > { %8572 = vmatpush1.bf16.msra.mxu0 %v10998_v50  ;;  %6309 = vmatprep.subr.bf16.mxu1 %v11003_v19  ;;  %v13141_v50 = vld [vmem:[%s12454_s6 + $0x18] sm:$0x33]  ;;  %v10128_v19 = vcombine.high %v13136_v49, %v13136_v49 }
 0x2af   : > { %8573 = vmatprep.subr.bf16.mxu0 %v11006_v43  ;;  %6335 = vmatprep.mubr.bf16.mxu1 %v13079_v4  ;;  %v11073_v43 = vld [vmem:[%s12401_s26 + $0x6f0] ss:$8 sps:$4 sm:$0xff]  }
 0x2b0   : > { %8599 = vmatprep.mubr.bf16.mxu0 %v8402_v40  ;;  %v11076_v40 = vld [vmem:[%s12401_s26 + $0xef0] ss:$8 sps:$4 sm:$0xff]  }
 0x2b1   : > { %6310 = vmatpush1.bf16.msra.mxu1 %v11001_v21  ;;  %v11082_v21 = vld [vmem:[%s12401_s26 + $0x704] ss:$8 sps:$4 sm:$0xff]  }
 0x2b2   : > { %8574 = vmatpush1.bf16.msra.mxu0 %v11004_v22  ;;  %6311 = vmatprep.subr.bf16.mxu1 %v11009_v24  ;;  %v11087_v22 = vld [vmem:[%s12401_s26 + $0xf04] ss:$8 sps:$4 sm:$0xff]   ;;  %v6414_v24 = vshll.u32 %v13079_v4, 16 }
 0x2b3   : > { %8575 = vmatprep.subr.bf16.mxu0 %v11012_v53  ;;  %v13154_v53 = vcombine.low %v12920_v54, %v12945_v2  ;;  %v11091_v54 = vld [vmem:[%s12401_s26 + $0x714] ss:$8 sps:$4 sm:$0xff]  }
 0x2b4   : > { %v11094_v2 = vld [vmem:[%s12401_s26 + $0xf14] ss:$8 sps:$4 sm:$0xff]  }
 0x2b5   : > { %6312 = vmatpush1.bf16.msra.mxu1 %v11007_v31  ;;  %v13158_v31 = vcombine.high %v13141_v50, %v13141_v50 }
 0x2b6   : > { %8576 = vmatpush1.bf16.msra.mxu0 %v11010_v33  ;;  %6313 = vmatprep.subr.bf16.mxu1 %v11015_v34  ;;  %v8681_v33 = vshrl.u32 %v13063_v14, 16  ;;  %v8689_v34 = vshrl.u32 %v10128_v19, 16  ;;  %v6412_v14 = vshrl.u32 %v13079_v4, 16  ;;  %v11097_v4 = vld [vmem:[%s12401_s26 + $0x724] ss:$8 sps:$4 sm:$0xff]  }
 0x2b7   : > { %8577 = vmatprep.subr.bf16.mxu0 %v11018_v51  ;;  %v8692_v51 = vshll.u32 %v10128_v19, 16  ;;  %v11136_v19 = vld [vmem:[%s12401_s26 + $0xf84] ss:$8 sps:$4 sm:$0xff]  }
 0x2b9   : > { %6314 = vmatpush1.bf16.msra.mxu1 %v11013_v36  ;;  %v11080_v36 = vld [vmem:[%s12401_s26 + $0x700] ss:$8 sps:$4 sm:$0xff]  }
 0x2ba   : > { %8578 = vmatpush1.bf16.msra.mxu0 %v11016_v37  ;;  %6315 = vmatprep.subr.bf16.mxu1 %v11021_v38  ;;  %v11085_v37 = vld [vmem:[%s12401_s26 + $0xf00] ss:$8 sps:$4 sm:$0xff]   ;;  %v8399_v38 = vsel %vm6695_vm0, %v8397_v9, %v8398_v12  ;;  %v11139_v9 = vld [vmem:[%s12401_s26 + $0x794] ss:$8 sps:$4 sm:$0xff]  }
 0x2bb   : > { %8579 = vmatprep.subr.bf16.mxu0 %v11024_v57  ;;  %v9528_v57 = vcombine.high %v12923_v35, %v12923_v35 }
 0x2bd   : > { %6316 = vmatpush1.bf16.msra.mxu1 %v11019_v20  ;;  %v6416_v20 = vrot.slane %v6414_v24, 1  ;;  %v11145_v24 = vld [vmem:[%s12401_s26 + $0x7a4] ss:$8 sps:$4 sm:$0xff]  }
 0x2be   : > { %8580 = vmatpush1.bf16.msra.mxu0 %v11022_v39  ;;  %6317 = vmatprep.subr.bf16.mxu1 %v11027_v42  ;;  %v6419_v39 = vshll.u32 %v13158_v31, 16  ;;  %v8683_v42 = vrot.slane %v8681_v33, 2  ;;  %v11148_v33 = vld [vmem:[%s12401_s26 + $0xfa4] ss:$8 sps:$4 sm:$0xff]  }
 0x2bf   : > { %8581 = vmatprep.subr.bf16.mxu0 %v11030_v44  ;;  %v8686_v44 = vrot.slane %v8684_v25, 3  ;;  %v11143_v25 = vld [vmem:[%s12401_s26 + $0x7a0] ss:$8 sps:$4 sm:$0xff]  }
 0x2c1   : > { %6318 = vmatpush1.bf16.msra.mxu1 %v11025_v47  ;;  %v8691_v47 = vrot.slane %v8689_v34, 2  ;;  %v11146_v34 = vld [vmem:[%s12401_s26 + $0xfa0] ss:$8 sps:$4 sm:$0xff]  }
 0x2c2   : > { %8582 = vmatpush1.bf16.msra.mxu0 %v11028_v56  ;;  %6319 = vmatprep.subr.bf16.mxu1 %v11033_v23  ;;  %v8694_v56 = vrot.slane %v8692_v51, 3  ;;  %v11089_v23 = vld [vmem:[%s12401_s26 + $0x710] ss:$8 sps:$4 sm:$0xff]   ;;  %v11151_v51 = vld [vmem:[%s12401_s26 + $0x7b4] ss:$8 sps:$4 sm:$0xff]  }
 0x2c3   : > { %8583 = vmatprep.subr.bf16.mxu0 %v11036_v61  ;;  %v11092_v61 = vld [vmem:[%s12401_s26 + $0xf10] ss:$8 sps:$4 sm:$0xff]  }
 0x2c5   : > { %6320 = vmatpush1.bf16.msra.mxu1 %v11031_v7  ;;  %v11100_v7 = vld [vmem:[%s12401_s26 + $0xf24] ss:$8 sps:$4 sm:$0xff]  }
 0x2c6   : > { %8584 = vmatpush1.bf16.msra.mxu0 %v11034_v60  ;;  %6321 = vmatprep.subr.bf16.mxu1 %v11039_v48  ;;  %v9527_v60 = vcombine.low %v12923_v35, %v12923_v35  ;;  %v6417_v48 = vor.u32 %v6416_v20, %v6412_v14  ;;  %v11158_v14 = vld [vmem:[%s12401_s26 + $0xfc0] ss:$8 sps:$4 sm:$0xff]   ;;  %v10127_v20 = vcombine.low %v13136_v49, %v13136_v49  ;;  %v8667_v49 = vshll.u32 %v13133_v28, 16 }
 0x2c7   : > { %8585 = vmatprep.subr.bf16.mxu0 %v11042_v29  ;;  %v13180_v29 = vrot.slane %v6419_v39, 1  ;;  %v11163_v39 = vld [vmem:[%s12401_s26 + $0x7d4] ss:$8 sps:$4 sm:$0xff]  }
 0x2c9   : > { %6322 = vmatpush1.bf16.msra.mxu1 %v11037_v30  ;;  %v8687_v30 = vor.u32 %v8686_v44, %v8683_v42  ;;  %v6422_v35 = vsel %vm4706_vm1, %v6417_v48, %v13180_v29  ;;  %v11166_v42 = vld [vmem:[%s12401_s26 + $0xfd4] ss:$8 sps:$4 sm:$0xff]   ;;  %v11161_v44 = vld [vmem:[%s12401_s26 + $0x7d0] ss:$8 sps:$4 sm:$0xff]   ;;  %v11174_v48 = vld [vmem:[%s12401_s26 + $0xfe4] ss:$8 sps:$4 sm:$0xff]  }
 0x2ca   : > { %8586 = vmatpush1.bf16.msra.mxu0 %v11040_v55  ;;  %6323 = vmatprep.subr.bf16.mxu1 %v11045_v58  ;;  %v13182_v55 = vor.u32 %v8694_v56, %v8691_v47  ;;  %v11095_v58 = vld [vmem:[%s12401_s26 + $0x720] ss:$8 sps:$4 sm:$0xff]   ;;  %v9593_v47 = vcombine.low %v13141_v50, %v13141_v50  ;;  %v6402_v56 = vshll.u32 %v13154_v53, 16  ;;  %v6400_v50 = vshrl.u32 %v13154_v53, 16 }
 0x2cb   : > { %8587 = vmatprep.subr.bf16.mxu0 %v11048_v59  ;;  %v11098_v59 = vld [vmem:[%s12401_s26 + $0xf20] ss:$8 sps:$4 sm:$0xff]  }
 0x2cd   : > { %6324 = vmatpush1.bf16.msra.mxu1 %v11043_v17  ;;  %v8696_v17 = vsel %vm6962_vm2, %v8687_v30, %v13182_v55  ;;  %v11169_v30 = vld [vmem:[%s12401_s26 + $0x7e0] ss:$8 sps:$4 sm:$0xff]  }
 0x2ce   : > { %8588 = vmatpush1.bf16.msra.mxu0 %v11046_v11  ;;  %6325 = vmatprep.subr.bf16.mxu1 %v11051_v13  ;;  %v11101_v11 = vld [vmem:[%s12401_s26 + $0x730] ss:$8 sps:$4 sm:$0xff]  }
 0x2cf   : > { %8589 = vmatprep.subr.bf16.mxu0 %v11054_v62  ;;  %v11104_v13 = vld [vmem:[%s12401_s26 + $0xf30] ss:$8 sps:$4 sm:$0xff]   ;;  %v11109_v62 = vld [vmem:[%s12401_s26 + $0x744] ss:$8 sps:$4 sm:$0xff]  }
 0x2d1   : > { %6326 = vmatpush1.bf16.msra.mxu1 %v11049_v1  ;;  %v11112_v1 = vld [vmem:[%s12401_s26 + $0xf44] ss:$8 sps:$4 sm:$0xff]  }
 0x2d2   : > { %8590 = vmatpush1.bf16.msra.mxu0 %v11052_v41  ;;  %6327 = vmatprep.subr.bf16.mxu1 %v11057_v0  ;;  %v11107_v41 = vld [vmem:[%s12401_s26 + $0x740] ss:$8 sps:$4 sm:$0xff]  }
 0x2d3   : > { %8591 = vmatprep.subr.bf16.mxu0 %v11060_v45  ;;  %v11110_v0 = vld [vmem:[%s12401_s26 + $0xf40] ss:$8 sps:$4 sm:$0xff]   ;;  %v11115_v45 = vld [vmem:[%s12401_s26 + $0x754] ss:$8 sps:$4 sm:$0xff]  }
 0x2d5   : > { %6328 = vmatpush1.bf16.msra.mxu1 %v11055_v3  ;;  %v11118_v3 = vld [vmem:[%s12401_s26 + $0xf54] ss:$8 sps:$4 sm:$0xff]  }
 0x2d6   : > { %8592 = vmatpush1.bf16.msra.mxu0 %v11058_v5  ;;  %6329 = vmatprep.subr.bf16.mxu1 %v11063_v26  ;;  %v11113_v5 = vld [vmem:[%s12401_s26 + $0x750] ss:$8 sps:$4 sm:$0xff]  }
 0x2d7   : > { %8593 = vmatprep.subr.bf16.mxu0 %v11066_v6  ;;  %v11116_v26 = vld [vmem:[%s12401_s26 + $0xf50] ss:$8 sps:$4 sm:$0xff]   ;;  %v11121_v6 = vld [vmem:[%s12401_s26 + $0x764] ss:$8 sps:$4 sm:$0xff]  }
 0x2d9   : > { %6330 = vmatpush1.bf16.msra.mxu1 %v11061_v8  ;;  %v11124_v8 = vld [vmem:[%s12401_s26 + $0xf64] ss:$8 sps:$4 sm:$0xff]  }
 0x2da   : > { %8594 = vmatpush1.bf16.msra.mxu0 %v11064_v27  ;;  %6331 = vmatprep.subr.bf16.mxu1 %v11069_v10  ;;  %v11119_v27 = vld [vmem:[%s12401_s26 + $0x760] ss:$8 sps:$4 sm:$0xff]  }
 0x2db   : > { %8595 = vmatprep.subr.bf16.mxu0 %v11072_v32  ;;  %v11122_v10 = vld [vmem:[%s12401_s26 + $0xf60] ss:$8 sps:$4 sm:$0xff]   ;;  %v11127_v32 = vld [vmem:[%s12401_s26 + $0x774] ss:$8 sps:$4 sm:$0xff]  }
 0x2dd   : > { %6332 = vmatpush1.bf16.msra.mxu1 %v11067_v52  ;;  %v11130_v52 = vld [vmem:[%s12401_s26 + $0xf74] ss:$8 sps:$4 sm:$0xff]  }
 0x2de   : > { %8596 = vmatpush1.bf16.msra.mxu0 %v11070_v63  ;;  %6333 = vmatprep.subr.bf16.mxu1 %v11075_v15  ;;  %v11125_v63 = vld [vmem:[%s12401_s26 + $0x770] ss:$8 sps:$4 sm:$0xff]  }
 0x2df   : > { %8597 = vmatprep.subr.bf16.mxu0 %v11078_v18  ;;  %v11128_v15 = vld [vmem:[%s12401_s26 + $0xf70] ss:$8 sps:$4 sm:$0xff]   ;;  %v11133_v18 = vld [vmem:[%s12401_s26 + $0x784] ss:$8 sps:$4 sm:$0xff]  }
 0x2e1   : > { %6334 = vmatpush1.bf16.msra.mxu1 %v11073_v43  ;;  %v11131_v43 = vld [vmem:[%s12401_s26 + $0x780] ss:$8 sps:$4 sm:$0xff]  }
 0x2e2   : > { %8598 = vmatpush1.bf16.msra.mxu0 %v11076_v40  ;;  %6593 = vmatprep.subr.bf16.mxu1 %v11082_v21  ;;  %v11134_v40 = vld [vmem:[%s12401_s26 + $0xf80] ss:$8 sps:$4 sm:$0xff]   ;;  %v11137_v21 = vld [vmem:[%s12401_s26 + $0x790] ss:$8 sps:$4 sm:$0xff]  }
 0x2e3   : > { %8861 = vmatprep.subr.bf16.mxu0 %v11087_v22  ;;  %v11140_v22 = vld [vmem:[%s12401_s26 + $0xf90] ss:$8 sps:$4 sm:$0xff]  }
 0x2e4   : > { %6336 = vmatmul.mubr.bf16.vlgmr.msra.gmra.mrb[0].mxu1 %v13154_v53  ;;  %v11178_v53 = vld [vmem:[%s12401_s26 + $0xff0] ss:$8 sps:$4 sm:$0xff]  }
 0x2e5   : > { %8600 = vmatmul.mubr.bf16.vlgmr.msra.gmra.mrb[0].mxu0 %v8399_v38  ;;  %6594 = vmatpush1.bf16.msra.mxu1 %v11080_v36  ;;  %v11154_v36 = vld [vmem:[%s12401_s26 + $0xfb4] ss:$8 sps:$4 sm:$0xff]   ;;  %v11152_v38 = vld [vmem:[%s12401_s26 + $0xfb0] ss:$8 sps:$4 sm:$0xff]  }
 0x2e6   : > { %8862 = vmatpush1.bf16.msra.mxu0 %v11085_v37  ;;  %6595 = vmatprep.subr.bf16.mxu1 %v11091_v54  ;;  %v11149_v37 = vld [vmem:[%s12401_s26 + $0x7b0] ss:$8 sps:$4 sm:$0xff]   ;;  %v11157_v54 = vld [vmem:[%s12401_s26 + $0x7c4] ss:$8 sps:$4 sm:$0xff]  }
 0x2e7   : > { %8863 = vmatprep.subr.bf16.mxu0 %v11094_v2  ;;  %6345 = vmatprep.mubr.bf16.mxu1 %v9528_v57  ;;  %v11160_v2 = vld [vmem:[%s12401_s26 + $0xfc4] ss:$8 sps:$4 sm:$0xff]   ;;  %v11155_v57 = vld [vmem:[%s12401_s26 + $0x7c0] ss:$8 sps:$4 sm:$0xff]  }
 0x2e8   : > { %8609 = vmatprep.mubr.bf16.mxu0 %v8401_v16  ;;  %v11106_v16 = vld [vmem:[%s12401_s26 + $0xf34] ss:$8 sps:$4 sm:$0xff]  }
 0x2e9   : > { %6596 = vmatpush1.bf16.msra.mxu1 %v11089_v23  ;;  %v11164_v23 = vld [vmem:[%s12401_s26 + $0xfd0] ss:$8 sps:$4 sm:$0xff]  }
 0x2ea   : > { %8864 = vmatpush1.bf16.msra.mxu0 %v11092_v61  ;;  %6597 = vmatprep.subr.bf16.mxu1 %v11097_v4  ;;  %v8664_v61 = vshrl.u32 %v13133_v28, 16  ;;  %v8672_v4 = vshrl.u32 %v10127_v20, 16  ;;  %v8669_v28 = vrot.slane %v8667_v49, 3 }
 0x2eb   : > { %8865 = vmatprep.subr.bf16.mxu0 %v11100_v7  ;;  %v8675_v7 = vshll.u32 %v10127_v20, 16 }
 0x2ec   : > { %6346 = vmatmul.mubr.bf16.gmra.mrb[4].mxu1 %v9527_v60  ;;  %v11171_v60 = vld [vmem:[%s12401_s26 + $0x7e4] ss:$8 sps:$4 sm:$0xff]  }
 0x2ed   : > { %8610 = vmatmul.mubr.bf16.gmra.mrb[4].mxu0 %v8398_v12  ;;  %6598 = vmatpush1.bf16.msra.mxu1 %v11095_v58  ;;  %v11142_v12 = vld [vmem:[%s12401_s26 + $0xf94] ss:$8 sps:$4 sm:$0xff]   ;;  %v6404_v58 = vrot.slane %v6402_v56, 1 }
 0x2ee   : > { %8866 = vmatpush1.bf16.msra.mxu0 %v11098_v59  ;;  %6599 = vmatprep.subr.bf16.mxu1 %v11103_v46  ;;  %v6407_v59 = vshll.u32 %v9593_v47, 16  ;;  %v11172_v46 = vld [vmem:[%s12401_s26 + $0xfe0] ss:$8 sps:$4 sm:$0xff]  }
 0x2ef   : > { %8867 = vmatprep.subr.bf16.mxu0 %v11106_v16  ;;  %6625 = vmatprep.mubr.bf16.mxu1 %v6422_v35  ;;  %v8666_v16 = vrot.slane %v8664_v61, 2  ;;  %v8674_v35 = vrot.slane %v8672_v4, 2 }
 0x2f0   : > { %8893 = vmatprep.mubr.bf16.mxu0 %v8696_v17  ;;  %v8677_v17 = vrot.slane %v8675_v7, 3 }
 0x2f1   : > { %6600 = vmatpush1.bf16.msra.mxu1 %v11101_v11  ;;  %v11177_v11 = vld [vmem:[%s12401_s26 + $0x7f4] ss:$8 sps:$4 sm:$0xff]  }
 0x2f2   : > { %8868 = vmatpush1.bf16.msra.mxu0 %v11104_v13  ;;  %6601 = vmatprep.subr.bf16.mxu1 %v11109_v62  ;;  %v11180_v13 = vld [vmem:[%s12401_s26 + $0xff4] ss:$8 sps:$4 sm:$0xff]   ;;  %v6405_v62 = vor.u32 %v6404_v58, %v6400_v50 }
 0x2f3   : > { %8869 = vmatprep.subr.bf16.mxu0 %v11112_v1  ;;  %v11175_v1 = vld [vmem:[%s12401_s26 + $0x7f0] ss:$8 sps:$4 sm:$0xff]   ;;  %s10165_s26 = sshll.u32 (%p11352_p9), %s8968_s25, 2 }
 0x2f4   : > { %s8970_s28 = scalar_lea.vmem (%p11352_p9), %s13301_s3, %s10165_s26 }
 0x2f5   : > { %6602 = vmatpush1.bf16.msra.mxu1 %v11107_v41  ;;  %v6409_v41 = vrot.slane %v6407_v59, 1 }
 0x2f6   : > { %8870 = vmatpush1.bf16.msra.mxu0 %v11110_v0  ;;  %6603 = vmatprep.subr.bf16.mxu1 %v11115_v45  ;;  %v8670_v0 = vor.u32 %v8669_v28, %v8666_v16  ;;  %v8678_v45 = vor.u32 %v8677_v17, %v8674_v35 }
 0x2f7   : > { %8871 = vmatprep.subr.bf16.mxu0 %v11118_v3  ;;  %v6426_v3 = vshrl.u32 %v13158_v31, 16  ;;  %v4388_v31 = vlaneseq }
 0x2f9   : > { %6604 = vmatpush1.bf16.msra.mxu1 %v11113_v5  ;;  %v6410_v5 = vsel %vm4706_vm1, %v6405_v62, %v6409_v41 }
 0x2fa   : > { %8872 = vmatpush1.bf16.msra.mxu0 %v11116_v26  ;;  %6605 = vmatprep.subr.bf16.mxu1 %v11121_v6  ;;  %v8679_v26 = vsel %vm6962_vm2, %v8670_v0, %v8678_v45  ;;  %v6428_v6 = vor.u32 %v6426_v3, %v13180_v29 }
 0x2fb   : > { %8873 = vmatprep.subr.bf16.mxu0 %v11124_v8  ;;  %v6423_v8 = vshrl.u32 %v9593_v47, 16 }
 0x2fd   : > { %6606 = vmatpush1.bf16.msra.mxu1 %v11119_v27  ;;  %v6425_v27 = vor.u32 %v6423_v8, %v6409_v41 }
 0x2fe   : > { %8874 = vmatpush1.bf16.msra.mxu0 %v11122_v10  ;;  %6607 = vmatprep.subr.bf16.mxu1 %v11127_v32  ;;  %v4389_v10 = vshrl.u32 %v4388_v31, 7  ;;  %v4386_v32 = vld [vmem:[%s4383_s11] sm:$0x3] }
 0x2ff   : > { %8875 = vmatprep.subr.bf16.mxu0 %v11130_v52 }
 0x300   : > { %v4390_v29 = vsub.s32 0, %v4389_v10  ;;  %v4394_v52 = vsub.s32 1, %v4389_v10 }
 0x301   : > { %6608 = vmatpush1.bf16.msra.mxu1 %v11125_v63 }
 0x302   : > { %8876 = vmatpush1.bf16.msra.mxu0 %v11128_v15  ;;  %6609 = vmatprep.subr.bf16.mxu1 %v11133_v18  ;;  %v4395_v63 = vrot.slane %v4386_v32, %v4394_v52 }
 0x303   : > { %8877 = vmatprep.subr.bf16.mxu0 %v11136_v19 }
 0x305   : > { %6610 = vmatpush1.bf16.msra.mxu1 %v11131_v43 }
 0x306   : > { %8878 = vmatpush1.bf16.msra.mxu0 %v11134_v40  ;;  %6611 = vmatprep.subr.bf16.mxu1 %v11139_v9 }
 0x307   : > { %8879 = vmatprep.subr.bf16.mxu0 %v11142_v12 }
 0x309   : > { %6612 = vmatpush1.bf16.msra.mxu1 %v11137_v21 }
 0x30a   : > { %8880 = vmatpush1.bf16.msra.mxu0 %v11140_v22  ;;  %6613 = vmatprep.subr.bf16.mxu1 %v11145_v24 }
 0x30b   : > { %8881 = vmatprep.subr.bf16.mxu0 %v11148_v33 }
 0x30d   : > { %6614 = vmatpush1.bf16.msra.mxu1 %v11143_v25 }
 0x30e   : > { %8882 = vmatpush1.bf16.msra.mxu0 %v11146_v34  ;;  %6615 = vmatprep.subr.bf16.mxu1 %v11151_v51 }
 0x30f   : > { %8883 = vmatprep.subr.bf16.mxu0 %v11154_v36 }
 0x311   : > { %6616 = vmatpush1.bf16.msra.mxu1 %v11149_v37 }
 0x312   : > { %8884 = vmatpush1.bf16.msra.mxu0 %v11152_v38  ;;  %6617 = vmatprep.subr.bf16.mxu1 %v11157_v54 }
 0x313   : > { %8885 = vmatprep.subr.bf16.mxu0 %v11160_v2 }
 0x315   : > { %6618 = vmatpush1.bf16.msra.mxu1 %v11155_v57 }
 0x316   : > { %8886 = vmatpush1.bf16.msra.mxu0 %v11158_v14  ;;  %6619 = vmatprep.subr.bf16.mxu1 %v11163_v39 }
 0x317   : > { %8887 = vmatprep.subr.bf16.mxu0 %v11166_v42 }
 0x319   : > { %6620 = vmatpush1.bf16.msra.mxu1 %v11161_v44 }
 0x31a   : > { %8888 = vmatpush1.bf16.msra.mxu0 %v11164_v23  ;;  %6621 = vmatprep.subr.bf16.mxu1 %v11171_v60 }
 0x31b   : > { %8889 = vmatprep.subr.bf16.mxu0 %v11174_v48 }
 0x31d   : > { %6622 = vmatpush1.bf16.msra.mxu1 %v11169_v30 }
 0x31e   : > { %8890 = vmatpush1.bf16.msra.mxu0 %v11172_v46  ;;  %6623 = vmatprep.subr.bf16.mxu1 %v11177_v11 }
 0x31f   : > { %8891 = vmatprep.subr.bf16.mxu0 %v11180_v13 }
 0x321   : > { %6624 = vmatpush1.bf16.msra.mxu1 %v11175_v1 }
 0x322   : > { %8892 = vmatpush1.bf16.msra.mxu0 %v11178_v53 }
 0x324   : > { %6626 = vmatmul.mubr.bf16.vlgmr.msra.gmra.mrb[0].mxu1 %v6410_v5 }
 0x325   : > { %8894 = vmatmul.mubr.bf16.vlgmr.msra.gmra.mrb[0].mxu0 %v8679_v26  ;;  %6635 = vmatprep.mubr.bf16.mxu1 %v6428_v6 }
 0x326   : > { %8903 = vmatprep.mubr.bf16.mxu0 %v13182_v55  ;;  %v4391_v55 = vrot.slane %v4386_v32, %v4390_v29 }
 0x32c   : > { %6636 = vmatmul.mubr.bf16.gmra.mrb[4].mxu1 %v6425_v27 }
 0x32d   : > { %8904 = vmatmul.mubr.bf16.gmra.mrb[4].mxu0 %v8678_v45 }
 0x3f7   : > { %v6627_v15 = vpop.f32.mrb[0].mxu1 }
 0x3f8   : > { %v8895_v18 = vpop.f32.mrb[0].mxu0  ;;  %v10172_v19 = vadd.f32 %v6627_v15, %v4391_v55  ;;  %v6629_v43 = vpop.f32.mrb[1].mxu1 }
 0x3f9   : > { %v8897_v40 = vpop.f32.mrb[1].mxu0  ;;  %v10174_v9 = vadd.f32 %v6629_v43, %v4395_v63  ;;  %v6631_v12 = vpop.f32.mrb[2].mxu1 }
 0x3fa   : > { %v8899_v21 = vpop.f32.mrb[2].mxu0  ;;  %v10173_v22 = vadd.f32 %v10172_v19, %v8895_v18  ;;  %v10176_v24 = vadd.f32 %v6631_v12, %v4391_v55  ;;  %v6633_v33 = vpop.f32.mrb[3].mxu1 }
 0x3fb   : > { %v8901_v25 = vpop.f32.mrb[3].mxu0  ;;  %v10175_v34 = vadd.f32 %v10174_v9, %v8897_v40  ;;  %v10178_v51 = vadd.f32 %v6633_v33, %v4395_v63 }
 0x3fc   : > { %vm8918_vm7 = vcmp.ge.f32.partialorder %v10173_v22, 0.0  ;;  %v8924_v36 = vmul.f32 0.2, %v10173_v22  ;;  %v10177_v37 = vadd.f32 %v10176_v24, %v8899_v21 }
 0x3fd   : > { %vm8919_vm8 = vcmp.ge.f32.partialorder %v10175_v34, 0.0  ;;  %v8925_v38 = vmul.f32 0.2, %v10175_v34  ;;  %v10179_v54 = vadd.f32 %v10178_v51, %v8901_v25 }
 0x3fe   : > { %v8930_v2 = vsel %vm8918_vm7, %v10173_v22, %v8924_v36  ;;  %vm8920_vm9 = vcmp.ge.f32.partialorder %v10177_v37, 0.0  ;;  %v8926_v57 = vmul.f32 0.2, %v10177_v37 }
 0x3ff   : > { %v8931_v14 = vsel %vm8919_vm8, %v10175_v34, %v8925_v38  ;;  %vm8921_vm10 = vcmp.ge.f32.partialorder %v10179_v54, 0.0  ;;  %v8927_v20 = vmul.f32 0.2, %v10179_v54  ;;  %v6637_v39 = vpop.f32.mrb[4].mxu1 }
 0x400   : > { %v8905_v42 = vpop.f32.mrb[4].mxu0  ;;  %v10169_v44 = vpack.c.bf16 %v8931_v14, %v8930_v2  ;;  %v8932_v47 = vsel %vm8920_vm9, %v10177_v37, %v8926_v57  ;;  %v10180_v56 = vadd.f32 %v6637_v39, %v4391_v55  ;;  %v6639_v23 = vpop.f32.mrb[5].mxu1 }
 0x401   : > { %v8907_v61 = vpop.f32.mrb[5].mxu0  ;;  %v8933_v49 = vsel %vm8921_vm10, %v10179_v54, %v8927_v20  ;;  %v10182_v4 = vadd.f32 %v6639_v23, %v4395_v63  ;;  %v6641_v7 = vpop.f32.mrb[6].mxu1 }
 0x402   : > { %v8909_v60 = vpop.f32.mrb[6].mxu0  ;;  %8956 = vst [vmem:[%s4373_s12] sm:$0xff] %v10169_v44  ;;  %v10170_v48 = vpack.c.bf16 %v8933_v49, %v8932_v47  ;;  %v10181_v30 = vadd.f32 %v10180_v56, %v8905_v42  ;;  %v6642_v50 = vpop.f32.mrb[7].mxu1 }
 0x403   : > { %v8910_v58 = vpop.f32.mrb[7].mxu0  ;;  %v10183_v59 = vadd.f32 %v10182_v4, %v8907_v61 }
 0x404   : > { %8957 = vst [vmem:[%s4373_s12 + $0x8] sm:$0xff] %v10170_v48  ;;  %vm8922_vm11 = vcmp.ge.f32.partialorder %v10181_v30, 0.0  ;;  %v8928_v46 = vmul.f32 0.2, %v10181_v30  ;;  %8965 = sbr.rel (!%p11352_p9) target bundleno = 1043 (0x413), region = 88 }
 0x405   : > { %vm8923_vm12 = vcmp.ge.f32.partialorder %v10183_v59, 0.0  ;;  %v8929_v16 = vmul.f32 0.2, %v10183_v59 }
 0x406   : > { %v8934_v28 = vsel %vm8922_vm11, %v10181_v30, %v8928_v46 }
 0x407   : > { %v8935_v35 = vsel %vm8923_vm12, %v10183_v59, %v8929_v16 }
 0x408   : > { %v10171_v17 = vpack.c.bf16 %v8935_v35, %v8934_v28 }
 0x409   : > { %v9002_v11 = vld [vmem:[%s4373_s12] sm:$0xff] (%p11352_p9) }
 0x40a   : > { %8958 = vst [vmem:[%s4373_s12 + $0x10] sm:$0x11] %v10171_v17  ;;  %9003 = vst [vmem:[%s8970_s28] sm:$0xff] (%p11352_p9), %v9002_v11 }
 0x40b   : > { %v9004_v13 = vld [vmem:[%s4373_s12 + $0x8] sm:$0xff] }
 0x40c   : > { %9005 = vst [vmem:[%s8970_s28 + $0x10] sm:$0xff] %v9004_v13 }
 0x411   : > { %v9006_v62 = vld [vmem:[%s4373_s12 + $0x10] sm:$0xff] }
 0x412   : > { %9007 = vst [vmem:[%s8970_s28 + $0x20] sm:$0xff] %v9006_v62 }
 0x413 PF: > { %s13_s20 = sadd.s32 1, %s11262_s20   ;;  %s13304_s12 = smov %s11234_s13 }
 0x414   : > { %p10_p2 = scmp.ge.s32.totalorder %s13_s20, 6   ;;  %s13305_s13 = smov %s11360_s5 }
 0x415   : > { %s13306_s14 = smov %s11242_s15  ;;  %s13307_s15 = smov %s11357_s4 }
 0x416   : > { %s13308_s16 = smov %s11254_s18  ;;  %s13309_s17 = smov %s11258_s19 }
 0x417   : > { %s13310_s18 = smov %s13313_s21  ;;  %s13311_s19 = smov %s13317_s22 }
 0x418   :  { %12 = sbr.rel (!%p10_p2) target bundleno = 5 (0x5), region = 184 }

</bundles_post_ra>
